<compile_context>
chip_gen: v5e
topology: v5e:2x2
jax: 0.10.0
libtpu: 0.0.40
codegen_flags: <defaults>
</compile_context>

<pallas_src>
import math
from functools import partial

import jax
import jax.numpy as jnp
from jax.experimental import pallas as pl
from jax.experimental.pallas import tpu as pltpu


# ------------------------------ fused kernel ------------------------------- #

def make_fused_kernel(S, T_out, B_pad, H, D, V, L, enc_layers, batch_div,
                      ignore_id, smoothing):
    H2, H4, H6, H8, D4 = 2 * H, 4 * H, 6 * H, 8 * H, 4 * D
    N = T_out * B_pad
    conf = 1.0 - smoothing
    low = smoothing / (V - 1)
    log_conf = math.log(conf)
    log_low = math.log(low)
    inv_batch = 1.0 / batch_div
    n_enc = 2 * enc_layers
    f32 = jnp.float32
    enc_unroll = True if S <= 32 else 4          # guard against unroll blow-up
    dec_unroll = True if T_out <= 32 else 4

    def kernel(*refs):
        (enc_x_ref, dec_x_ref, enc_cmask_ref, dec_mask_ref,
         attn_mask_ref, tgt_ref) = refs[0:6]
        enc_w = refs[6:6 + n_enc]
        (walpha_ref, balpha_ref, wpv_ref, bpv_ref,
         dwih_ref, dwhh_ref, db_ref, wt_ref, bt_ref) = refs[6 + n_enc:15 + n_enc]
        loss_ref, acc_ref = refs[15 + n_enc:17 + n_enc]
        yf_ref, yb_ref, g_ref, gxd_ref, ydec_ref = refs[17 + n_enc:]

        # static fwd/bwd column mask over the gate-grouped
        # [i_f|i_b|f_f|f_b|g_f|g_b|o_f|o_b] layout (hoisted)
        lane8 = jax.lax.broadcasted_iota(jnp.int32, (B_pad, H8), 1)
        fwd_cols = (lane8 % H2) < H

        # ---------------- encoder: fused bidirectional LSTM stack ----------------
        # layer-0 hoisted input projection: one MXU pass over all timesteps
        g_ref[...] = jnp.dot(enc_x_ref[...], enc_w[0][...],
                             preferred_element_type=f32).reshape(S, B_pad, H8)

        yf_flat = None
        yb_flat = None
        for l in range(enc_layers):
            # hoisted fwd(t)/bwd(S-1-t) gate combine, in place, off the recurrence
            for p in range(S // 2):
                tb = S - 1 - p
                ga = g_ref[p]
                gb = g_ref[tb]
                g_ref[p] = jnp.where(fwd_cols, ga, gb)
                g_ref[tb] = jnp.where(fwd_cols, gb, ga)

            whh_bd = enc_w[2 * l + 1][...]                          # [2H, 8H] block-diag

            def enc_step(t, carry, whh_bd=whh_bd):
                h_cat, c_cat = carry                                # [B_pad, 2H]
                gates = g_ref[t] + jnp.dot(h_cat, whh_bd,
                                           preferred_element_type=f32)
                i_g = jax.nn.sigmoid(gates[:, 0:H2])
                f_g = jax.nn.sigmoid(gates[:, H2:H4])
                g_g = jnp.tanh(gates[:, H4:H6])
                o_g = jax.nn.sigmoid(gates[:, H6:H8])
                c_new = f_g * c_cat + i_g * g_g
                h_new = o_g * jnp.tanh(c_new)
                m = enc_cmask_ref[t] > 0.5                          # [B_pad, 2H] bool
                h_out = jnp.where(m, h_new, 0.0)                    # packed-seq zeroing
                yf_ref[t] = h_out[:, 0:H]
                yb_ref[S - 1 - t] = h_out[:, H:H2]
                return (jnp.where(m, h_new, h_cat),
                        jnp.where(m, c_new, c_cat))

            zeros2 = jnp.zeros((B_pad, H2), f32)
            jax.lax.fori_loop(0, S, enc_step, (zeros2, zeros2), unroll=enc_unroll)

            yf_flat = yf_ref[...].reshape(S * B_pad, H)
            yb_flat = yb_ref[...].reshape(S * B_pad, H)
            if l + 1 < enc_layers:
                w_next = enc_w[2 * (l + 1)][...]                    # [2H, 8H]
                g_ref[...] = (jnp.dot(yf_flat, w_next[0:H, :],
                                      preferred_element_type=f32)
                              + jnp.dot(yb_flat, w_next[H:H2, :],
                                        preferred_element_type=f32)
                              ).reshape(S, B_pad, H8)

        # ---- attention (src_proj folded into key/value/query at pack time) ----
        alpha = (jnp.dot(yf_flat, walpha_ref[0:H, :], preferred_element_type=f32)
                 + jnp.dot(yb_flat, walpha_ref[H:H2, :], preferred_element_type=f32)
                 + balpha_ref[...])                                 # [S*B_pad, L]
        val = (jnp.dot(yf_flat, wpv_ref[0:H, :], preferred_element_type=f32)
               + jnp.dot(yb_flat, wpv_ref[H:H2, :], preferred_element_type=f32)
               + bpv_ref[...])                                      # [S*B_pad, D]
        alpha3 = alpha.reshape(S, B_pad, L)
        val3 = val.reshape(S, B_pad, D)
        am = attn_mask_ref[...] > 0.5                               # [S, B_pad, 1]
        alpha3 = jnp.where(am, alpha3, -1e9)                        # finite mask (no NaN)
        alpha3 = alpha3 - jnp.max(alpha3, axis=0, keepdims=True)
        e = jnp.exp(alpha3)
        p_att = e / jnp.sum(e, axis=0, keepdims=True)               # softmax over S
        h_dec = jnp.sum(p_att[:, :, 0:1] * val3, axis=0)            # [B_pad, D]
        c_dec = jnp.sum(p_att[:, :, 1:2] * val3, axis=0)

        # ------------------- decoder: LSTMCell recurrence ------------------------
        gxd_ref[...] = (jnp.dot(dec_x_ref[...], dwih_ref[...],
                                preferred_element_type=f32)
                        + db_ref[...]).reshape(T_out, B_pad, D4)
        dwhh = dwhh_ref[...]

        def dec_step(t, carry):
            h, c = carry
            gates = gxd_ref[t] + jnp.dot(h, dwhh, preferred_element_type=f32)
            i_g = jax.nn.sigmoid(gates[:, 0:D])
            f_g = jax.nn.sigmoid(gates[:, D:2 * D])
            g_g = jnp.tanh(gates[:, 2 * D:3 * D])
            o_g = jax.nn.sigmoid(gates[:, 3 * D:D4])
            c_new = f_g * c + i_g * g_g
            h_new = o_g * jnp.tanh(c_new)
            m = dec_mask_ref[t] > 0.5                               # [B_pad, D] bool
            ydec_ref[t] = jnp.where(m, h_new, 0.0)
            return (jnp.where(m, h_new, h), jnp.where(m, c_new, c))

        jax.lax.fori_loop(0, T_out, dec_step, (h_dec, c_dec), unroll=dec_unroll)

        # --------- vocab projection + label-smoothing KL loss + accuracy ---------
        logits = (jnp.dot(ydec_ref[...].reshape(N, D), wt_ref[...],
                          preferred_element_type=f32)
                  + bt_ref[...])                                    # [N, V]
        tgt = tgt_ref[...]                                          # [N, 1] int32
        valid = tgt != ignore_id
        mx = jnp.max(logits, axis=-1, keepdims=True)
        z = logits - mx
        lse = jnp.log(jnp.sum(jnp.exp(z), axis=-1, keepdims=True))
        logp = z - lse
        iota = jax.lax.broadcasted_iota(jnp.int32, (N, V), 1)
        onehot = iota == jnp.where(valid, tgt, 0)
        kl = jnp.where(onehot, conf * (log_conf - logp), low * (log_low - logp))
        row = jnp.where(valid, jnp.sum(kl, axis=-1, keepdims=True), 0.0)
        loss_ref[...] = jnp.sum(row, axis=0, keepdims=True) * inv_batch

        # accuracy: first-index argmax == target (V < 2^24, so f32 compare exact)
        pred = jnp.min(jnp.where(logits == mx, iota.astype(f32), float(V)),
                       axis=-1, keepdims=True)
        correct = jnp.logical_and(pred == tgt.astype(f32), valid).astype(f32)
        num = jnp.sum(correct, axis=0, keepdims=True)
        den = jnp.maximum(jnp.sum(valid.astype(f32), axis=0, keepdims=True), 1.0)
        acc_ref[...] = num / den

    return kernel


def _full_block(shape):
    rank = len(shape)
    return pl.BlockSpec(shape, lambda i, _r=rank: (0,) * _r)


def g2p_fused(enc_x, dec_x, enc_cmask, dec_mask, attn_mask, targets, packed, *,
              S, T_out, B_pad, H, D, V, L, enc_layers, batch_div, ignore_id,
              smoothing):
    kernel = make_fused_kernel(S, T_out, B_pad, H, D, V, L, enc_layers,
                               batch_div, ignore_id, smoothing)
    inputs = [enc_x, dec_x, enc_cmask, dec_mask, attn_mask, targets]
    for l in range(enc_layers):
        inputs.append(packed['enc_wih'][l])
        inputs.append(packed['enc_whh'][l])
    inputs += [packed['walpha'], packed['balpha'], packed['wpv'], packed['bpv'],
               packed['dwih'], packed['dwhh'], packed['db'], packed['wt'],
               packed['bt']]
    in_specs = [_full_block(tuple(x.shape)) for x in inputs]
    out_shape = (jax.ShapeDtypeStruct((1, 1), jnp.float32),
                 jax.ShapeDtypeStruct((1, 1), jnp.float32))
    out_specs = (_full_block((1, 1)), _full_block((1, 1)))
    scratch = [pltpu.VMEM((S, B_pad, H), jnp.float32),           # fwd outputs
               pltpu.VMEM((S, B_pad, H), jnp.float32),           # bwd outputs
               pltpu.VMEM((S, B_pad, 8 * H), jnp.float32),       # hoisted/combined gates
               pltpu.VMEM((T_out, B_pad, 4 * D), jnp.float32),   # hoisted decoder gates
               pltpu.VMEM((T_out, B_pad, D), jnp.float32)]       # decoder outputs
    loss, acc = pl.pallas_call(
        kernel,
        out_shape=out_shape,
        grid=(1,),
        in_specs=in_specs,
        out_specs=out_specs,
        scratch_shapes=scratch,
        compiler_params=pltpu.CompilerParams(dimension_semantics=("arbitrary",)),
    )(*inputs)
    return loss[0, 0], acc[0, 0]


# ------------------------------- model glue --------------------------------- #

def sinusoidal_pe(max_len, dim):
    position = jnp.arange(max_len, dtype=jnp.float32)[:, None]
    div_term = jnp.exp(jnp.arange(0, dim, 2, dtype=jnp.float32)
                       * (-math.log(10000.0) / dim))
    pe = jnp.zeros((max_len, dim), jnp.float32)
    pe = pe.at[:, 0::2].set(jnp.sin(position * div_term))
    pe = pe.at[:, 1::2].set(jnp.cos(position * div_term))
    return pe


def init_params(key, src_vocab, tgt_vocab, enc_hidden, enc_layers,
                dec_hidden, dec_layers):
    keys = iter(jax.random.split(key, 64))

    def nrm(shape, scale=0.1):
        return scale * jax.random.normal(next(keys), shape, dtype=jnp.float32)

    params = {
        'src_emb': nrm((src_vocab, enc_hidden)),
        'tgt_emb': nrm((tgt_vocab, dec_hidden)),
        'enc': [],
        'src_proj_w': nrm((enc_hidden, 2 * enc_hidden)),
        'src_proj_b': nrm((enc_hidden,)),
        'dec_w_ih': nrm((4 * dec_hidden, dec_hidden)),
        'dec_w_hh': nrm((4 * dec_hidden, dec_hidden)),
        'dec_b_ih': nrm((4 * dec_hidden,)),
        'dec_b_hh': nrm((4 * dec_hidden,)),
        'tgt_proj_w': nrm((tgt_vocab, dec_hidden)),
        'tgt_proj_b': nrm((tgt_vocab,)),
        'h0': nrm((dec_layers, dec_hidden), 1.0),
        'c0': nrm((dec_layers, dec_hidden), 1.0),   # unused in forward (matches PyTorch)
        'key_w': nrm((dec_hidden, enc_hidden)),
        'value_w': nrm((dec_hidden, enc_hidden)),
        'query_w': nrm((dec_hidden, dec_hidden)),
    }
    for l in range(enc_layers):
        in_size = enc_hidden if l == 0 else 2 * enc_hidden
        params['enc'].append({
            'fwd': (nrm((4 * enc_hidden, in_size)), nrm((4 * enc_hidden, enc_hidden))),
            'bwd': (nrm((4 * enc_hidden, in_size)), nrm((4 * enc_hidden, enc_hidden))),
        })
    return params


def pack_params(params, enc_hidden, dec_hidden, tgt_vocab):
    """One-time packing of torch-layout params into kernel-friendly layouts:
    pre-transposed weights, gate-grouped fwd|bwd W_ih, block-diagonal W_hh,
    and src_proj folded into the attention key/value/query projections."""
    H, D = enc_hidden, dec_hidden
    packed = {'src_emb': params['src_emb'], 'tgt_emb': params['tgt_emb']}
    enc_wih, enc_whh = [], []
    for layer in params['enc']:
        wif, whf = layer['fwd']              # [4H, in], [4H, H]
        wib, whb = layer['bwd']
        wifT, wibT = wif.T, wib.T            # [in, 4H]
        whfT, whbT = whf.T, whb.T            # [H, 4H]
        cols = []
        for g in range(4):                   # gate-grouped columns: [g_fwd | g_bwd]
            cols.append(wifT[:, g * H:(g + 1) * H])
            cols.append(wibT[:, g * H:(g + 1) * H])
        enc_wih.append(jnp.concatenate(cols, axis=1))            # [in, 8H]
        bd = jnp.zeros((2 * H, 8 * H), jnp.float32)
        for g in range(4):
            bd = bd.at[0:H, g * 2 * H:g * 2 * H + H].set(whfT[:, g * H:(g + 1) * H])
            bd = bd.at[H:2 * H, g * 2 * H + H:(g + 1) * 2 * H].set(
                whbT[:, g * H:(g + 1) * H])
        enc_whh.append(bd)                                       # [2H, 8H] block-diag
    packed['enc_wih'] = enc_wih
    packed['enc_whh'] = enc_whh

    # fold src_projection ∘ {key,value,query} (review item: drop mem/key passes)
    wp = params['src_proj_w'].T                                  # [2H, H]
    bp = params['src_proj_b'].reshape(1, H)                      # [1, H]
    wkT = params['key_w'].T                                      # [H, D]
    wvT = params['value_w'].T                                    # [H, D]
    qT = params['query_w'] @ params['h0'].T                      # [D, L]  (Wq @ h0^T)
    wkq = wkT @ qT                                               # [H, L]
    packed['walpha'] = wp @ wkq                                  # [2H, L]
    packed['balpha'] = bp @ wkq                                  # [1, L]
    packed['wpv'] = wp @ wvT                                     # [2H, D]
    packed['bpv'] = bp @ wvT                                     # [1, D]

    packed['dwih'] = params['dec_w_ih'].T                        # [D, 4D]
    packed['dwhh'] = params['dec_w_hh'].T
    packed['db'] = (params['dec_b_ih'] + params['dec_b_hh']).reshape(1, 4 * D)
    packed['wt'] = params['tgt_proj_w'].T                        # [D, V]
    packed['bt'] = params['tgt_proj_b'].reshape(1, tgt_vocab)
    return packed


def model_forward(packed, src_ids, src_lengths, tgt_ids, tgt_lengths, *,
                  tgt_vocab, enc_hidden, enc_layers, dec_hidden, ignore_id=-1):
    B, S = src_ids.shape
    _, T_in = tgt_ids.shape
    T_out = T_in + 1
    B_pad = max(8, ((B + 7) // 8) * 8)        # sublane-aligned batch padding
    sos = eos = tgt_vocab - 1
    x_scale = math.sqrt(enc_hidden)
    pe = sinusoidal_pe(max(S, T_out) + 1, enc_hidden)

    # --- add_sos_eos (tgt_ids rows end-padded with ignore_id) ---
    pos_in = jnp.arange(T_in)
    valid_t = pos_in[None, :] < tgt_lengths[:, None]
    ys_in = jnp.concatenate(
        [jnp.full((B, 1), sos, dtype=jnp.int32),
         jnp.where(valid_t, tgt_ids, eos).astype(jnp.int32)], axis=1)      # [B, T_out]
    pos_out = jnp.arange(T_out)
    tgt_ext = jnp.concatenate([tgt_ids, jnp.zeros((B, 1), tgt_ids.dtype)], axis=1)
    ys_out = jnp.where(pos_out[None, :] < tgt_lengths[:, None], tgt_ext,
                       jnp.where(pos_out[None, :] == tgt_lengths[:, None], eos,
                                 ignore_id)).astype(jnp.int32)             # [B, T_out]
    ys_in_lens = tgt_lengths + 1

    # --- embeddings + positional encoding (gathers stay in XLA) ---
    src_embed = jnp.take(packed['src_emb'], src_ids, axis=0)               # [B, S, H]
    enc_in = src_embed * x_scale + pe[None, :S, :]
    tgt_embed = jnp.take(packed['tgt_emb'], ys_in, axis=0)                 # [B, T_out, D]
    dec_in = tgt_embed * x_scale + pe[None, :T_out, :]

    # --- pad batch to B_pad (padded rows fully masked / ignored) ---
    pb = B_pad - B
    enc_in_p = jnp.pad(enc_in, ((0, pb), (0, 0), (0, 0)))
    dec_in_p = jnp.pad(dec_in, ((0, pb), (0, 0), (0, 0)))
    src_len_p = jnp.pad(src_lengths, (0, pb))
    dec_len_p = jnp.pad(ys_in_lens, (0, pb))
    ys_out_p = jnp.pad(ys_out, ((0, pb), (0, 0)), constant_values=ignore_id)

    # s-major / t-major flattened, batch-padded layouts (row = t*B_pad + b)
    enc_x = jnp.transpose(enc_in_p, (1, 0, 2)).reshape(S * B_pad, enc_hidden)
    dec_x = jnp.transpose(dec_in_p, (1, 0, 2)).reshape(T_out * B_pad, dec_hidden)

    # --- length masks (packed-sequence semantics), full-width for 1-select blends ---
    fm = (jnp.arange(S)[:, None] < src_len_p[None, :]).astype(jnp.float32)  # [S, B_pad]
    enc_cmask = jnp.concatenate(
        [jnp.broadcast_to(fm[:, :, None], (S, B_pad, enc_hidden)),
         jnp.broadcast_to(fm[::-1, :, None], (S, B_pad, enc_hidden))], axis=-1)
    dm = (jnp.arange(T_out)[:, None] < dec_len_p[None, :]).astype(jnp.float32)
    dec_mask = jnp.broadcast_to(dm[:, :, None], (T_out, B_pad, dec_hidden))
    attn_mask = fm[:, :, None]                                              # [S, B_pad, 1]

    targets = jnp.transpose(ys_out_p, (1, 0)).reshape(T_out * B_pad, 1)     # t-major

    L = packed['walpha'].shape[1]
    loss, acc = g2p_fused(enc_x, dec_x, enc_cmask, dec_mask, attn_mask, targets,
                          packed,
                          S=S, T_out=T_out, B_pad=B_pad, H=enc_hidden,
                          D=dec_hidden, V=tgt_vocab, L=L, enc_layers=enc_layers,
                          batch_div=float(B), ignore_id=ignore_id, smoothing=0.1)
    return {'loss': loss, 'loss_att': loss, 'acc_att': acc}


# ---------------------------------- main ------------------------------------ #

if __name__ == "__main__":
    SRC_VOCAB, TGT_VOCAB = 16, 12
    H = D = 32
    ENC_LAYERS, DEC_LAYERS = 2, 2
    B, S, T_IN = 2, 8, 6

    key = jax.random.PRNGKey(0)
    pkey, dkey1, dkey2 = jax.random.split(key, 3)
    params = init_params(pkey, SRC_VOCAB, TGT_VOCAB, H, ENC_LAYERS, D, DEC_LAYERS)
    packed = pack_params(params, H, D, TGT_VOCAB)   # one-time weight packing (outside jit)

    # max lengths equal the padded dims so pad_packed_sequence shapes match exactly
    src_lengths = jnp.array([S, 5], dtype=jnp.int32)
    tgt_lengths = jnp.array([T_IN, 4], dtype=jnp.int32)
    src_ids = jax.random.randint(dkey1, (B, S), 0, SRC_VOCAB, dtype=jnp.int32)
    tgt_raw = jax.random.randint(dkey2, (B, T_IN), 0, TGT_VOCAB - 1, dtype=jnp.int32)
    tgt_ids = jnp.where(jnp.arange(T_IN)[None, :] < tgt_lengths[:, None], tgt_raw, -1)

    fwd = jax.jit(partial(model_forward,
                          tgt_vocab=TGT_VOCAB, enc_hidden=H, enc_layers=ENC_LAYERS,
                          dec_hidden=D))
    out = fwd(packed, src_ids, src_lengths, tgt_ids, tgt_lengths)
    out = jax.block_until_ready(out)
    assert out['loss'].shape == () and out['acc_att'].shape == ()
    print("KERNEL_OK")
</pallas_src>

<mosaic_0001>
module attributes {stable_mosaic.version = 11 : i64} {
  func.func @kernel(%arg0: i32, %arg1: memref<64x32xf32, #tpu.memory_space<vmem>>, %arg2: memref<56x32xf32, #tpu.memory_space<vmem>>, %arg3: memref<8x8x64xf32, #tpu.memory_space<vmem>>, %arg4: memref<7x8x32xf32, #tpu.memory_space<vmem>>, %arg5: memref<8x8x1xf32, #tpu.memory_space<vmem>>, %arg6: memref<56x1xi32, #tpu.memory_space<vmem>>, %arg7: memref<32x256xf32, #tpu.memory_space<vmem>>, %arg8: memref<64x256xf32, #tpu.memory_space<vmem>>, %arg9: memref<64x256xf32, #tpu.memory_space<vmem>>, %arg10: memref<64x256xf32, #tpu.memory_space<vmem>>, %arg11: memref<64x2xf32, #tpu.memory_space<vmem>>, %arg12: memref<1x2xf32, #tpu.memory_space<vmem>>, %arg13: memref<64x32xf32, #tpu.memory_space<vmem>>, %arg14: memref<1x32xf32, #tpu.memory_space<vmem>>, %arg15: memref<32x128xf32, #tpu.memory_space<vmem>>, %arg16: memref<32x128xf32, #tpu.memory_space<vmem>>, %arg17: memref<1x128xf32, #tpu.memory_space<vmem>>, %arg18: memref<32x12xf32, #tpu.memory_space<vmem>>, %arg19: memref<1x12xf32, #tpu.memory_space<vmem>>, %arg20: memref<1x1xf32, #tpu.memory_space<vmem>>, %arg21: memref<1x1xf32, #tpu.memory_space<vmem>>, %arg22: memref<8x8x32xf32, #tpu.memory_space<vmem>>, %arg23: memref<8x8x32xf32, #tpu.memory_space<vmem>>, %arg24: memref<8x8x256xf32, #tpu.memory_space<vmem>>, %arg25: memref<7x8x128xf32, #tpu.memory_space<vmem>>, %arg26: memref<7x8x32xf32, #tpu.memory_space<vmem>>) attributes {dimension_semantics = [#tpu.dimension_semantics<arbitrary>], iteration_bounds = array<i64: 1>, scalar_prefetch = 0 : i64, scratch_operands = 5 : i64, tpu.core_type = #tpu.core_type<tc>, window_params = [{pipeline_mode = #tpu.pipeline_mode<synchronous>, transform_indices = @transform_0, window_bounds = array<i64: 64, 32>}, {pipeline_mode = #tpu.pipeline_mode<synchronous>, transform_indices = @transform_1, window_bounds = array<i64: 56, 32>}, {pipeline_mode = #tpu.pipeline_mode<synchronous>, transform_indices = @transform_2, window_bounds = array<i64: 8, 8, 64>}, {pipeline_mode = #tpu.pipeline_mode<synchronous>, transform_indices = @transform_3, window_bounds = array<i64: 7, 8, 32>}, {pipeline_mode = #tpu.pipeline_mode<synchronous>, transform_indices = @transform_4, window_bounds = array<i64: 8, 8, 1>}, {pipeline_mode = #tpu.pipeline_mode<synchronous>, transform_indices = @transform_5, window_bounds = array<i64: 56, 1>}, {pipeline_mode = #tpu.pipeline_mode<synchronous>, transform_indices = @transform_6, window_bounds = array<i64: 32, 256>}, {pipeline_mode = #tpu.pipeline_mode<synchronous>, transform_indices = @transform_7, window_bounds = array<i64: 64, 256>}, {pipeline_mode = #tpu.pipeline_mode<synchronous>, transform_indices = @transform_8, window_bounds = array<i64: 64, 256>}, {pipeline_mode = #tpu.pipeline_mode<synchronous>, transform_indices = @transform_9, window_bounds = array<i64: 64, 256>}, {pipeline_mode = #tpu.pipeline_mode<synchronous>, transform_indices = @transform_10, window_bounds = array<i64: 64, 2>}, {pipeline_mode = #tpu.pipeline_mode<synchronous>, transform_indices = @transform_11, window_bounds = array<i64: 1, 2>}, {pipeline_mode = #tpu.pipeline_mode<synchronous>, transform_indices = @transform_12, window_bounds = array<i64: 64, 32>}, {pipeline_mode = #tpu.pipeline_mode<synchronous>, transform_indices = @transform_13, window_bounds = array<i64: 1, 32>}, {pipeline_mode = #tpu.pipeline_mode<synchronous>, transform_indices = @transform_14, window_bounds = array<i64: 32, 128>}, {pipeline_mode = #tpu.pipeline_mode<synchronous>, transform_indices = @transform_15, window_bounds = array<i64: 32, 128>}, {pipeline_mode = #tpu.pipeline_mode<synchronous>, transform_indices = @transform_16, window_bounds = array<i64: 1, 128>}, {pipeline_mode = #tpu.pipeline_mode<synchronous>, transform_indices = @transform_17, window_bounds = array<i64: 32, 12>}, {pipeline_mode = #tpu.pipeline_mode<synchronous>, transform_indices = @transform_18, window_bounds = array<i64: 1, 12>}, {pipeline_mode = #tpu.pipeline_mode<synchronous>, transform_indices = @transform_19, window_bounds = array<i64: 1, 1>}, {pipeline_mode = #tpu.pipeline_mode<synchronous>, transform_indices = @transform_20, window_bounds = array<i64: 1, 1>}]} {
    %0 = tpu.iota {dimensions = array<i32: 1>} : vector<8x256xi32>
    %c64_i32 = arith.constant 64 : i32
    %c0_i32 = arith.constant 0 : i32
    %1 = arith.cmpi eq, %c64_i32, %c0_i32 : i32
    %c1_i32 = arith.constant 1 : i32
    %2 = arith.select %1, %c1_i32, %c64_i32 : i32
    %3 = vector.broadcast %2 : i32 to vector<8x256xi32>
    %4 = arith.remsi %0, %3 : vector<8x256xi32>
    %c0_i32_0 = arith.constant 0 : i32
    %5 = vector.broadcast %c0_i32_0 : i32 to vector<8x256xi32>
    %6 = arith.cmpi ne, %4, %5 : vector<8x256xi32>
    %c0_i32_1 = arith.constant 0 : i32
    %7 = vector.broadcast %c0_i32_1 : i32 to vector<8x256xi32>
    %8 = arith.cmpi slt, %4, %7 : vector<8x256xi32>
    %c0_i32_2 = arith.constant 0 : i32
    %9 = arith.cmpi slt, %2, %c0_i32_2 : i32
    %10 = vector.broadcast %9 : i1 to vector<8x256xi1>
    %11 = vector.broadcast %10 : vector<8x256xi1> to vector<8x256xi1>
    %12 = arith.xori %8, %11 : vector<8x256xi1>
    %13 = arith.andi %12, %6 : vector<8x256xi1>
    %14 = vector.broadcast %2 : i32 to vector<8x256xi32>
    %15 = arith.addi %4, %14 : vector<8x256xi32>
    %16 = arith.select %13, %15, %4 : vector<8x256xi1>, vector<8x256xi32>
    %c32_i32 = arith.constant 32 : i32
    %17 = vector.broadcast %c32_i32 : i32 to vector<8x256xi32>
    %18 = arith.cmpi slt, %16, %17 : vector<8x256xi32>
    %c0 = arith.constant 0 : index
    %c0_3 = arith.constant 0 : index
    %19 = vector.load %arg1[%c0, %c0_3] : memref<64x32xf32, #tpu.memory_space<vmem>>, vector<64x32xf32>
    %c0_4 = arith.constant 0 : index
    %c0_5 = arith.constant 0 : index
    %20 = vector.load %arg7[%c0_4, %c0_5] : memref<32x256xf32, #tpu.memory_space<vmem>>, vector<32x256xf32>
    %cst = arith.constant dense<0.000000e+00> : vector<64x256xf32>
    %21 = tpu.matmul %19, %20, %cst {dimension_numbers = #tpu.dot_dimension_numbers<[1], [0], [0], [1], [0, 0, 1, 1], [], []>} : vector<64x32xf32>, vector<32x256xf32>, vector<64x256xf32> -> vector<64x256xf32>
    %22 = vector.shape_cast %21 : vector<64x256xf32> to vector<8x8x256xf32>
    %c0_6 = arith.constant 0 : index
    %c0_7 = arith.constant 0 : index
    %c0_8 = arith.constant 0 : index
    %23 = vector.load %arg24[%c0_6, %c0_7, %c0_8] : memref<8x8x256xf32, #tpu.memory_space<vmem>>, vector<8x8x256xf32>
    tpu.vector_store %arg24[%c0_6, %c0_7, %c0_8], %22 {strides = array<i32>} : memref<8x8x256xf32, #tpu.memory_space<vmem>>, vector<8x8x256xf32>,
    %c0_9 = arith.constant 0 : index
    %c0_10 = arith.constant 0 : index
    %c0_11 = arith.constant 0 : index
    %24 = vector.load %arg24[%c0_9, %c0_10, %c0_11] : memref<8x8x256xf32, #tpu.memory_space<vmem>>, vector<1x8x256xf32>
    %25 = vector.shape_cast %24 : vector<1x8x256xf32> to vector<8x256xf32>
    %c7 = arith.constant 7 : index
    %c0_12 = arith.constant 0 : index
    %c0_13 = arith.constant 0 : index
    %26 = vector.load %arg24[%c7, %c0_12, %c0_13] : memref<8x8x256xf32, #tpu.memory_space<vmem>>, vector<1x8x256xf32>
    %27 = vector.shape_cast %26 : vector<1x8x256xf32> to vector<8x256xf32>
    %28 = arith.select %18, %25, %27 : vector<8x256xi1>, vector<8x256xf32>
    %c0_14 = arith.constant 0 : index
    %c0_15 = arith.constant 0 : index
    %c0_16 = arith.constant 0 : index
    %29 = vector.load %arg24[%c0_14, %c0_15, %c0_16] : memref<8x8x256xf32, #tpu.memory_space<vmem>>, vector<1x8x256xf32>
    %30 = vector.shape_cast %29 : vector<1x8x256xf32> to vector<8x256xf32>
    %31 = vector.shape_cast %28 : vector<8x256xf32> to vector<1x8x256xf32>
    tpu.vector_store %arg24[%c0_14, %c0_15, %c0_16], %31 {strides = array<i32>} : memref<8x8x256xf32, #tpu.memory_space<vmem>>, vector<1x8x256xf32>,
    %32 = arith.select %18, %27, %25 : vector<8x256xi1>, vector<8x256xf32>
    %c7_17 = arith.constant 7 : index
    %c0_18 = arith.constant 0 : index
    %c0_19 = arith.constant 0 : index
    %33 = vector.load %arg24[%c7_17, %c0_18, %c0_19] : memref<8x8x256xf32, #tpu.memory_space<vmem>>, vector<1x8x256xf32>
    %34 = vector.shape_cast %33 : vector<1x8x256xf32> to vector<8x256xf32>
    %35 = vector.shape_cast %32 : vector<8x256xf32> to vector<1x8x256xf32>
    tpu.vector_store %arg24[%c7_17, %c0_18, %c0_19], %35 {strides = array<i32>} : memref<8x8x256xf32, #tpu.memory_space<vmem>>, vector<1x8x256xf32>,
    %c1 = arith.constant 1 : index
    %c0_20 = arith.constant 0 : index
    %c0_21 = arith.constant 0 : index
    %36 = vector.load %arg24[%c1, %c0_20, %c0_21] : memref<8x8x256xf32, #tpu.memory_space<vmem>>, vector<1x8x256xf32>
    %37 = vector.shape_cast %36 : vector<1x8x256xf32> to vector<8x256xf32>
    %c6 = arith.constant 6 : index
    %c0_22 = arith.constant 0 : index
    %c0_23 = arith.constant 0 : index
    %38 = vector.load %arg24[%c6, %c0_22, %c0_23] : memref<8x8x256xf32, #tpu.memory_space<vmem>>, vector<1x8x256xf32>
    %39 = vector.shape_cast %38 : vector<1x8x256xf32> to vector<8x256xf32>
    %40 = arith.select %18, %37, %39 : vector<8x256xi1>, vector<8x256xf32>
    %c1_24 = arith.constant 1 : index
    %c0_25 = arith.constant 0 : index
    %c0_26 = arith.constant 0 : index
    %41 = vector.load %arg24[%c1_24, %c0_25, %c0_26] : memref<8x8x256xf32, #tpu.memory_space<vmem>>, vector<1x8x256xf32>
    %42 = vector.shape_cast %41 : vector<1x8x256xf32> to vector<8x256xf32>
    %43 = vector.shape_cast %40 : vector<8x256xf32> to vector<1x8x256xf32>
    tpu.vector_store %arg24[%c1_24, %c0_25, %c0_26], %43 {strides = array<i32>} : memref<8x8x256xf32, #tpu.memory_space<vmem>>, vector<1x8x256xf32>,
    %44 = arith.select %18, %39, %37 : vector<8x256xi1>, vector<8x256xf32>
    %c6_27 = arith.constant 6 : index
    %c0_28 = arith.constant 0 : index
    %c0_29 = arith.constant 0 : index
    %45 = vector.load %arg24[%c6_27, %c0_28, %c0_29] : memref<8x8x256xf32, #tpu.memory_space<vmem>>, vector<1x8x256xf32>
    %46 = vector.shape_cast %45 : vector<1x8x256xf32> to vector<8x256xf32>
    %47 = vector.shape_cast %44 : vector<8x256xf32> to vector<1x8x256xf32>
    tpu.vector_store %arg24[%c6_27, %c0_28, %c0_29], %47 {strides = array<i32>} : memref<8x8x256xf32, #tpu.memory_space<vmem>>, vector<1x8x256xf32>,
    %c2 = arith.constant 2 : index
    %c0_30 = arith.constant 0 : index
    %c0_31 = arith.constant 0 : index
    %48 = vector.load %arg24[%c2, %c0_30, %c0_31] : memref<8x8x256xf32, #tpu.memory_space<vmem>>, vector<1x8x256xf32>
    %49 = vector.shape_cast %48 : vector<1x8x256xf32> to vector<8x256xf32>
    %c5 = arith.constant 5 : index
    %c0_32 = arith.constant 0 : index
    %c0_33 = arith.constant 0 : index
    %50 = vector.load %arg24[%c5, %c0_32, %c0_33] : memref<8x8x256xf32, #tpu.memory_space<vmem>>, vector<1x8x256xf32>
    %51 = vector.shape_cast %50 : vector<1x8x256xf32> to vector<8x256xf32>
    %52 = arith.select %18, %49, %51 : vector<8x256xi1>, vector<8x256xf32>
    %c2_34 = arith.constant 2 : index
    %c0_35 = arith.constant 0 : index
    %c0_36 = arith.constant 0 : index
    %53 = vector.load %arg24[%c2_34, %c0_35, %c0_36] : memref<8x8x256xf32, #tpu.memory_space<vmem>>, vector<1x8x256xf32>
    %54 = vector.shape_cast %53 : vector<1x8x256xf32> to vector<8x256xf32>
    %55 = vector.shape_cast %52 : vector<8x256xf32> to vector<1x8x256xf32>
    tpu.vector_store %arg24[%c2_34, %c0_35, %c0_36], %55 {strides = array<i32>} : memref<8x8x256xf32, #tpu.memory_space<vmem>>, vector<1x8x256xf32>,
    %56 = arith.select %18, %51, %49 : vector<8x256xi1>, vector<8x256xf32>
    %c5_37 = arith.constant 5 : index
    %c0_38 = arith.constant 0 : index
    %c0_39 = arith.constant 0 : index
    %57 = vector.load %arg24[%c5_37, %c0_38, %c0_39] : memref<8x8x256xf32, #tpu.memory_space<vmem>>, vector<1x8x256xf32>
    %58 = vector.shape_cast %57 : vector<1x8x256xf32> to vector<8x256xf32>
    %59 = vector.shape_cast %56 : vector<8x256xf32> to vector<1x8x256xf32>
    tpu.vector_store %arg24[%c5_37, %c0_38, %c0_39], %59 {strides = array<i32>} : memref<8x8x256xf32, #tpu.memory_space<vmem>>, vector<1x8x256xf32>,
    %c3 = arith.constant 3 : index
    %c0_40 = arith.constant 0 : index
    %c0_41 = arith.constant 0 : index
    %60 = vector.load %arg24[%c3, %c0_40, %c0_41] : memref<8x8x256xf32, #tpu.memory_space<vmem>>, vector<1x8x256xf32>
    %61 = vector.shape_cast %60 : vector<1x8x256xf32> to vector<8x256xf32>
    %c4 = arith.constant 4 : index
    %c0_42 = arith.constant 0 : index
    %c0_43 = arith.constant 0 : index
    %62 = vector.load %arg24[%c4, %c0_42, %c0_43] : memref<8x8x256xf32, #tpu.memory_space<vmem>>, vector<1x8x256xf32>
    %63 = vector.shape_cast %62 : vector<1x8x256xf32> to vector<8x256xf32>
    %64 = arith.select %18, %61, %63 : vector<8x256xi1>, vector<8x256xf32>
    %c3_44 = arith.constant 3 : index
    %c0_45 = arith.constant 0 : index
    %c0_46 = arith.constant 0 : index
    %65 = vector.load %arg24[%c3_44, %c0_45, %c0_46] : memref<8x8x256xf32, #tpu.memory_space<vmem>>, vector<1x8x256xf32>
    %66 = vector.shape_cast %65 : vector<1x8x256xf32> to vector<8x256xf32>
    %67 = vector.shape_cast %64 : vector<8x256xf32> to vector<1x8x256xf32>
    tpu.vector_store %arg24[%c3_44, %c0_45, %c0_46], %67 {strides = array<i32>} : memref<8x8x256xf32, #tpu.memory_space<vmem>>, vector<1x8x256xf32>,
    %68 = arith.select %18, %63, %61 : vector<8x256xi1>, vector<8x256xf32>
    %c4_47 = arith.constant 4 : index
    %c0_48 = arith.constant 0 : index
    %c0_49 = arith.constant 0 : index
    %69 = vector.load %arg24[%c4_47, %c0_48, %c0_49] : memref<8x8x256xf32, #tpu.memory_space<vmem>>, vector<1x8x256xf32>
    %70 = vector.shape_cast %69 : vector<1x8x256xf32> to vector<8x256xf32>
    %71 = vector.shape_cast %68 : vector<8x256xf32> to vector<1x8x256xf32>
    tpu.vector_store %arg24[%c4_47, %c0_48, %c0_49], %71 {strides = array<i32>} : memref<8x8x256xf32, #tpu.memory_space<vmem>>, vector<1x8x256xf32>,
    %c0_50 = arith.constant 0 : index
    %c0_51 = arith.constant 0 : index
    %72 = vector.load %arg8[%c0_50, %c0_51] : memref<64x256xf32, #tpu.memory_space<vmem>>, vector<64x256xf32>
    %cst_52 = arith.constant 0.000000e+00 : f32
    %73 = vector.broadcast %cst_52 : f32 to vector<8x64xf32>
    %c0_i32_53 = arith.constant 0 : i32
    %74 = arith.index_cast %c0_i32_53 : i32 to index
    %c0_54 = arith.constant 0 : index
    %c0_55 = arith.constant 0 : index
    %75 = vector.load %arg24[%74, %c0_54, %c0_55] : memref<8x8x256xf32, #tpu.memory_space<vmem>>, vector<1x8x256xf32>
    %76 = vector.shape_cast %75 : vector<1x8x256xf32> to vector<8x256xf32>
    %cst_56 = arith.constant dense<0.000000e+00> : vector<8x256xf32>
    %77 = tpu.matmul %73, %72, %cst_56 {dimension_numbers = #tpu.dot_dimension_numbers<[1], [0], [0], [1], [0, 0, 1, 1], [], []>} : vector<8x64xf32>, vector<64x256xf32>, vector<8x256xf32> -> vector<8x256xf32>
    %78 = arith.addf %76, %77 : vector<8x256xf32>
    %79 = vector.extract_strided_slice %78 {offsets = [0, 0], sizes = [8, 64], strides = [1, 1]} : vector<8x256xf32> to vector<8x64xf32>
    %80 = arith.negf %79 : vector<8x64xf32>
    %81 = math.exp %80 : vector<8x64xf32>
    %cst_57 = arith.constant 1.000000e+00 : f32
    %82 = vector.broadcast %cst_57 : f32 to vector<8x64xf32>
    %83 = arith.addf %82, %81 : vector<8x64xf32>
    %84 = arith.divf %82, %83 : vector<8x64xf32>
    %85 = vector.extract_strided_slice %78 {offsets = [0, 64], sizes = [8, 64], strides = [1, 1]} : vector<8x256xf32> to vector<8x64xf32>
    %86 = arith.negf %85 : vector<8x64xf32>
    %87 = math.exp %86 : vector<8x64xf32>
    %cst_58 = arith.constant 1.000000e+00 : f32
    %88 = vector.broadcast %cst_58 : f32 to vector<8x64xf32>
    %89 = arith.addf %88, %87 : vector<8x64xf32>
    %90 = arith.divf %88, %89 : vector<8x64xf32>
    %91 = vector.extract_strided_slice %78 {offsets = [0, 128], sizes = [8, 64], strides = [1, 1]} : vector<8x256xf32> to vector<8x64xf32>
    %92 = math.tanh %91 : vector<8x64xf32>
    %93 = vector.extract_strided_slice %78 {offsets = [0, 192], sizes = [8, 64], strides = [1, 1]} : vector<8x256xf32> to vector<8x64xf32>
    %94 = arith.negf %93 : vector<8x64xf32>
    %95 = math.exp %94 : vector<8x64xf32>
    %cst_59 = arith.constant 1.000000e+00 : f32
    %96 = vector.broadcast %cst_59 : f32 to vector<8x64xf32>
    %97 = arith.addf %96, %95 : vector<8x64xf32>
    %98 = arith.divf %96, %97 : vector<8x64xf32>
    %99 = arith.mulf %90, %73 : vector<8x64xf32>
    %100 = arith.mulf %84, %92 : vector<8x64xf32>
    %101 = arith.addf %99, %100 : vector<8x64xf32>
    %102 = math.tanh %101 : vector<8x64xf32>
    %103 = arith.mulf %98, %102 : vector<8x64xf32>
    %104 = arith.index_cast %c0_i32_53 : i32 to index
    %c0_60 = arith.constant 0 : index
    %c0_61 = arith.constant 0 : index
    %105 = vector.load %arg3[%104, %c0_60, %c0_61] : memref<8x8x64xf32, #tpu.memory_space<vmem>>, vector<1x8x64xf32>
    %106 = vector.shape_cast %105 : vector<1x8x64xf32> to vector<8x64xf32>
    %cst_62 = arith.constant 5.000000e-01 : f32
    %107 = vector.broadcast %cst_62 : f32 to vector<8x64xf32>
    %108 = arith.cmpf ogt, %106, %107 : vector<8x64xf32>
    %cst_63 = arith.constant 0.000000e+00 : f32
    %109 = vector.broadcast %cst_63 : f32 to vector<8x64xf32>
    %110 = arith.select %108, %103, %109 : vector<8x64xi1>, vector<8x64xf32>
    %111 = vector.extract_strided_slice %110 {offsets = [0, 0], sizes = [8, 32], strides = [1, 1]} : vector<8x64xf32> to vector<8x32xf32>
    %112 = arith.index_cast %c0_i32_53 : i32 to index
    %c0_64 = arith.constant 0 : index
    %c0_65 = arith.constant 0 : index
    %113 = vector.load %arg22[%112, %c0_64, %c0_65] : memref<8x8x32xf32, #tpu.memory_space<vmem>>, vector<1x8x32xf32>
    %114 = vector.shape_cast %113 : vector<1x8x32xf32> to vector<8x32xf32>
    %115 = vector.shape_cast %111 : vector<8x32xf32> to vector<1x8x32xf32>
    tpu.vector_store %arg22[%112, %c0_64, %c0_65], %115 {strides = array<i32>} : memref<8x8x32xf32, #tpu.memory_space<vmem>>, vector<1x8x32xf32>,
    %116 = vector.extract_strided_slice %110 {offsets = [0, 32], sizes = [8, 32], strides = [1, 1]} : vector<8x64xf32> to vector<8x32xf32>
    %c7_i32 = arith.constant 7 : i32
    %117 = arith.subi %c7_i32, %c0_i32_53 : i32
    %118 = arith.index_cast %117 : i32 to index
    %c0_66 = arith.constant 0 : index
    %c0_67 = arith.constant 0 : index
    %119 = vector.load %arg23[%118, %c0_66, %c0_67] : memref<8x8x32xf32, #tpu.memory_space<vmem>>, vector<1x8x32xf32>
    %120 = vector.shape_cast %119 : vector<1x8x32xf32> to vector<8x32xf32>
    %121 = vector.shape_cast %116 : vector<8x32xf32> to vector<1x8x32xf32>
    tpu.vector_store %arg23[%118, %c0_66, %c0_67], %121 {strides = array<i32>} : memref<8x8x32xf32, #tpu.memory_space<vmem>>, vector<1x8x32xf32>,
    %122 = arith.select %108, %103, %73 : vector<8x64xi1>, vector<8x64xf32>
    %123 = arith.select %108, %101, %73 : vector<8x64xi1>, vector<8x64xf32>
    %c1_i32_68 = arith.constant 1 : i32
    %124 = arith.index_cast %c1_i32_68 : i32 to index
    %c0_69 = arith.constant 0 : index
    %c0_70 = arith.constant 0 : index
    %125 = vector.load %arg24[%124, %c0_69, %c0_70] : memref<8x8x256xf32, #tpu.memory_space<vmem>>, vector<1x8x256xf32>
    %126 = vector.shape_cast %125 : vector<1x8x256xf32> to vector<8x256xf32>
    %cst_71 = arith.constant dense<0.000000e+00> : vector<8x256xf32>
    %127 = tpu.matmul %122, %72, %cst_71 {dimension_numbers = #tpu.dot_dimension_numbers<[1], [0], [0], [1], [0, 0, 1, 1], [], []>} : vector<8x64xf32>, vector<64x256xf32>, vector<8x256xf32> -> vector<8x256xf32>
    %128 = arith.addf %126, %127 : vector<8x256xf32>
    %129 = vector.extract_strided_slice %128 {offsets = [0, 0], sizes = [8, 64], strides = [1, 1]} : vector<8x256xf32> to vector<8x64xf32>
    %130 = arith.negf %129 : vector<8x64xf32>
    %131 = math.exp %130 : vector<8x64xf32>
    %cst_72 = arith.constant 1.000000e+00 : f32
    %132 = vector.broadcast %cst_72 : f32 to vector<8x64xf32>
    %133 = arith.addf %132, %131 : vector<8x64xf32>
    %134 = arith.divf %132, %133 : vector<8x64xf32>
    %135 = vector.extract_strided_slice %128 {offsets = [0, 64], sizes = [8, 64], strides = [1, 1]} : vector<8x256xf32> to vector<8x64xf32>
    %136 = arith.negf %135 : vector<8x64xf32>
    %137 = math.exp %136 : vector<8x64xf32>
    %cst_73 = arith.constant 1.000000e+00 : f32
    %138 = vector.broadcast %cst_73 : f32 to vector<8x64xf32>
    %139 = arith.addf %138, %137 : vector<8x64xf32>
    %140 = arith.divf %138, %139 : vector<8x64xf32>
    %141 = vector.extract_strided_slice %128 {offsets = [0, 128], sizes = [8, 64], strides = [1, 1]} : vector<8x256xf32> to vector<8x64xf32>
    %142 = math.tanh %141 : vector<8x64xf32>
    %143 = vector.extract_strided_slice %128 {offsets = [0, 192], sizes = [8, 64], strides = [1, 1]} : vector<8x256xf32> to vector<8x64xf32>
    %144 = arith.negf %143 : vector<8x64xf32>
    %145 = math.exp %144 : vector<8x64xf32>
    %cst_74 = arith.constant 1.000000e+00 : f32
    %146 = vector.broadcast %cst_74 : f32 to vector<8x64xf32>
    %147 = arith.addf %146, %145 : vector<8x64xf32>
    %148 = arith.divf %146, %147 : vector<8x64xf32>
    %149 = arith.mulf %140, %123 : vector<8x64xf32>
    %150 = arith.mulf %134, %142 : vector<8x64xf32>
    %151 = arith.addf %149, %150 : vector<8x64xf32>
    %152 = math.tanh %151 : vector<8x64xf32>
    %153 = arith.mulf %148, %152 : vector<8x64xf32>
    %154 = arith.index_cast %c1_i32_68 : i32 to index
    %c0_75 = arith.constant 0 : index
    %c0_76 = arith.constant 0 : index
    %155 = vector.load %arg3[%154, %c0_75, %c0_76] : memref<8x8x64xf32, #tpu.memory_space<vmem>>, vector<1x8x64xf32>
    %156 = vector.shape_cast %155 : vector<1x8x64xf32> to vector<8x64xf32>
    %cst_77 = arith.constant 5.000000e-01 : f32
    %157 = vector.broadcast %cst_77 : f32 to vector<8x64xf32>
    %158 = arith.cmpf ogt, %156, %157 : vector<8x64xf32>
    %cst_78 = arith.constant 0.000000e+00 : f32
    %159 = vector.broadcast %cst_78 : f32 to vector<8x64xf32>
    %160 = arith.select %158, %153, %159 : vector<8x64xi1>, vector<8x64xf32>
    %161 = vector.extract_strided_slice %160 {offsets = [0, 0], sizes = [8, 32], strides = [1, 1]} : vector<8x64xf32> to vector<8x32xf32>
    %162 = arith.index_cast %c1_i32_68 : i32 to index
    %c0_79 = arith.constant 0 : index
    %c0_80 = arith.constant 0 : index
    %163 = vector.load %arg22[%162, %c0_79, %c0_80] : memref<8x8x32xf32, #tpu.memory_space<vmem>>, vector<1x8x32xf32>
    %164 = vector.shape_cast %163 : vector<1x8x32xf32> to vector<8x32xf32>
    %165 = vector.shape_cast %161 : vector<8x32xf32> to vector<1x8x32xf32>
    tpu.vector_store %arg22[%162, %c0_79, %c0_80], %165 {strides = array<i32>} : memref<8x8x32xf32, #tpu.memory_space<vmem>>, vector<1x8x32xf32>,
    %166 = vector.extract_strided_slice %160 {offsets = [0, 32], sizes = [8, 32], strides = [1, 1]} : vector<8x64xf32> to vector<8x32xf32>
    %c7_i32_81 = arith.constant 7 : i32
    %167 = arith.subi %c7_i32_81, %c1_i32_68 : i32
    %168 = arith.index_cast %167 : i32 to index
    %c0_82 = arith.constant 0 : index
    %c0_83 = arith.constant 0 : index
    %169 = vector.load %arg23[%168, %c0_82, %c0_83] : memref<8x8x32xf32, #tpu.memory_space<vmem>>, vector<1x8x32xf32>
    %170 = vector.shape_cast %169 : vector<1x8x32xf32> to vector<8x32xf32>
    %171 = vector.shape_cast %166 : vector<8x32xf32> to vector<1x8x32xf32>
    tpu.vector_store %arg23[%168, %c0_82, %c0_83], %171 {strides = array<i32>} : memref<8x8x32xf32, #tpu.memory_space<vmem>>, vector<1x8x32xf32>,
    %172 = arith.select %158, %153, %122 : vector<8x64xi1>, vector<8x64xf32>
    %173 = arith.select %158, %151, %123 : vector<8x64xi1>, vector<8x64xf32>
    %c2_i32 = arith.constant 2 : i32
    %174 = arith.index_cast %c2_i32 : i32 to index
    %c0_84 = arith.constant 0 : index
    %c0_85 = arith.constant 0 : index
    %175 = vector.load %arg24[%174, %c0_84, %c0_85] : memref<8x8x256xf32, #tpu.memory_space<vmem>>, vector<1x8x256xf32>
    %176 = vector.shape_cast %175 : vector<1x8x256xf32> to vector<8x256xf32>
    %cst_86 = arith.constant dense<0.000000e+00> : vector<8x256xf32>
    %177 = tpu.matmul %172, %72, %cst_86 {dimension_numbers = #tpu.dot_dimension_numbers<[1], [0], [0], [1], [0, 0, 1, 1], [], []>} : vector<8x64xf32>, vector<64x256xf32>, vector<8x256xf32> -> vector<8x256xf32>
    %178 = arith.addf %176, %177 : vector<8x256xf32>
    %179 = vector.extract_strided_slice %178 {offsets = [0, 0], sizes = [8, 64], strides = [1, 1]} : vector<8x256xf32> to vector<8x64xf32>
    %180 = arith.negf %179 : vector<8x64xf32>
    %181 = math.exp %180 : vector<8x64xf32>
    %cst_87 = arith.constant 1.000000e+00 : f32
    %182 = vector.broadcast %cst_87 : f32 to vector<8x64xf32>
    %183 = arith.addf %182, %181 : vector<8x64xf32>
    %184 = arith.divf %182, %183 : vector<8x64xf32>
    %185 = vector.extract_strided_slice %178 {offsets = [0, 64], sizes = [8, 64], strides = [1, 1]} : vector<8x256xf32> to vector<8x64xf32>
    %186 = arith.negf %185 : vector<8x64xf32>
    %187 = math.exp %186 : vector<8x64xf32>
    %cst_88 = arith.constant 1.000000e+00 : f32
    %188 = vector.broadcast %cst_88 : f32 to vector<8x64xf32>
    %189 = arith.addf %188, %187 : vector<8x64xf32>
    %190 = arith.divf %188, %189 : vector<8x64xf32>
    %191 = vector.extract_strided_slice %178 {offsets = [0, 128], sizes = [8, 64], strides = [1, 1]} : vector<8x256xf32> to vector<8x64xf32>
    %192 = math.tanh %191 : vector<8x64xf32>
    %193 = vector.extract_strided_slice %178 {offsets = [0, 192], sizes = [8, 64], strides = [1, 1]} : vector<8x256xf32> to vector<8x64xf32>
    %194 = arith.negf %193 : vector<8x64xf32>
    %195 = math.exp %194 : vector<8x64xf32>
    %cst_89 = arith.constant 1.000000e+00 : f32
    %196 = vector.broadcast %cst_89 : f32 to vector<8x64xf32>
    %197 = arith.addf %196, %195 : vector<8x64xf32>
    %198 = arith.divf %196, %197 : vector<8x64xf32>
    %199 = arith.mulf %190, %173 : vector<8x64xf32>
    %200 = arith.mulf %184, %192 : vector<8x64xf32>
    %201 = arith.addf %199, %200 : vector<8x64xf32>
    %202 = math.tanh %201 : vector<8x64xf32>
    %203 = arith.mulf %198, %202 : vector<8x64xf32>
    %204 = arith.index_cast %c2_i32 : i32 to index
    %c0_90 = arith.constant 0 : index
    %c0_91 = arith.constant 0 : index
    %205 = vector.load %arg3[%204, %c0_90, %c0_91] : memref<8x8x64xf32, #tpu.memory_space<vmem>>, vector<1x8x64xf32>
    %206 = vector.shape_cast %205 : vector<1x8x64xf32> to vector<8x64xf32>
    %cst_92 = arith.constant 5.000000e-01 : f32
    %207 = vector.broadcast %cst_92 : f32 to vector<8x64xf32>
    %208 = arith.cmpf ogt, %206, %207 : vector<8x64xf32>
    %cst_93 = arith.constant 0.000000e+00 : f32
    %209 = vector.broadcast %cst_93 : f32 to vector<8x64xf32>
    %210 = arith.select %208, %203, %209 : vector<8x64xi1>, vector<8x64xf32>
    %211 = vector.extract_strided_slice %210 {offsets = [0, 0], sizes = [8, 32], strides = [1, 1]} : vector<8x64xf32> to vector<8x32xf32>
    %212 = arith.index_cast %c2_i32 : i32 to index
    %c0_94 = arith.constant 0 : index
    %c0_95 = arith.constant 0 : index
    %213 = vector.load %arg22[%212, %c0_94, %c0_95] : memref<8x8x32xf32, #tpu.memory_space<vmem>>, vector<1x8x32xf32>
    %214 = vector.shape_cast %213 : vector<1x8x32xf32> to vector<8x32xf32>
    %215 = vector.shape_cast %211 : vector<8x32xf32> to vector<1x8x32xf32>
    tpu.vector_store %arg22[%212, %c0_94, %c0_95], %215 {strides = array<i32>} : memref<8x8x32xf32, #tpu.memory_space<vmem>>, vector<1x8x32xf32>,
    %216 = vector.extract_strided_slice %210 {offsets = [0, 32], sizes = [8, 32], strides = [1, 1]} : vector<8x64xf32> to vector<8x32xf32>
    %c7_i32_96 = arith.constant 7 : i32
    %217 = arith.subi %c7_i32_96, %c2_i32 : i32
    %218 = arith.index_cast %217 : i32 to index
    %c0_97 = arith.constant 0 : index
    %c0_98 = arith.constant 0 : index
    %219 = vector.load %arg23[%218, %c0_97, %c0_98] : memref<8x8x32xf32, #tpu.memory_space<vmem>>, vector<1x8x32xf32>
    %220 = vector.shape_cast %219 : vector<1x8x32xf32> to vector<8x32xf32>
    %221 = vector.shape_cast %216 : vector<8x32xf32> to vector<1x8x32xf32>
    tpu.vector_store %arg23[%218, %c0_97, %c0_98], %221 {strides = array<i32>} : memref<8x8x32xf32, #tpu.memory_space<vmem>>, vector<1x8x32xf32>,
    %222 = arith.select %208, %203, %172 : vector<8x64xi1>, vector<8x64xf32>
    %223 = arith.select %208, %201, %173 : vector<8x64xi1>, vector<8x64xf32>
    %c3_i32 = arith.constant 3 : i32
    %224 = arith.index_cast %c3_i32 : i32 to index
    %c0_99 = arith.constant 0 : index
    %c0_100 = arith.constant 0 : index
    %225 = vector.load %arg24[%224, %c0_99, %c0_100] : memref<8x8x256xf32, #tpu.memory_space<vmem>>, vector<1x8x256xf32>
    %226 = vector.shape_cast %225 : vector<1x8x256xf32> to vector<8x256xf32>
    %cst_101 = arith.constant dense<0.000000e+00> : vector<8x256xf32>
    %227 = tpu.matmul %222, %72, %cst_101 {dimension_numbers = #tpu.dot_dimension_numbers<[1], [0], [0], [1], [0, 0, 1, 1], [], []>} : vector<8x64xf32>, vector<64x256xf32>, vector<8x256xf32> -> vector<8x256xf32>
    %228 = arith.addf %226, %227 : vector<8x256xf32>
    %229 = vector.extract_strided_slice %228 {offsets = [0, 0], sizes = [8, 64], strides = [1, 1]} : vector<8x256xf32> to vector<8x64xf32>
    %230 = arith.negf %229 : vector<8x64xf32>
    %231 = math.exp %230 : vector<8x64xf32>
    %cst_102 = arith.constant 1.000000e+00 : f32
    %232 = vector.broadcast %cst_102 : f32 to vector<8x64xf32>
    %233 = arith.addf %232, %231 : vector<8x64xf32>
    %234 = arith.divf %232, %233 : vector<8x64xf32>
    %235 = vector.extract_strided_slice %228 {offsets = [0, 64], sizes = [8, 64], strides = [1, 1]} : vector<8x256xf32> to vector<8x64xf32>
    %236 = arith.negf %235 : vector<8x64xf32>
    %237 = math.exp %236 : vector<8x64xf32>
    %cst_103 = arith.constant 1.000000e+00 : f32
    %238 = vector.broadcast %cst_103 : f32 to vector<8x64xf32>
    %239 = arith.addf %238, %237 : vector<8x64xf32>
    %240 = arith.divf %238, %239 : vector<8x64xf32>
    %241 = vector.extract_strided_slice %228 {offsets = [0, 128], sizes = [8, 64], strides = [1, 1]} : vector<8x256xf32> to vector<8x64xf32>
    %242 = math.tanh %241 : vector<8x64xf32>
    %243 = vector.extract_strided_slice %228 {offsets = [0, 192], sizes = [8, 64], strides = [1, 1]} : vector<8x256xf32> to vector<8x64xf32>
    %244 = arith.negf %243 : vector<8x64xf32>
    %245 = math.exp %244 : vector<8x64xf32>
    %cst_104 = arith.constant 1.000000e+00 : f32
    %246 = vector.broadcast %cst_104 : f32 to vector<8x64xf32>
    %247 = arith.addf %246, %245 : vector<8x64xf32>
    %248 = arith.divf %246, %247 : vector<8x64xf32>
    %249 = arith.mulf %240, %223 : vector<8x64xf32>
    %250 = arith.mulf %234, %242 : vector<8x64xf32>
    %251 = arith.addf %249, %250 : vector<8x64xf32>
    %252 = math.tanh %251 : vector<8x64xf32>
    %253 = arith.mulf %248, %252 : vector<8x64xf32>
    %254 = arith.index_cast %c3_i32 : i32 to index
    %c0_105 = arith.constant 0 : index
    %c0_106 = arith.constant 0 : index
    %255 = vector.load %arg3[%254, %c0_105, %c0_106] : memref<8x8x64xf32, #tpu.memory_space<vmem>>, vector<1x8x64xf32>
    %256 = vector.shape_cast %255 : vector<1x8x64xf32> to vector<8x64xf32>
    %cst_107 = arith.constant 5.000000e-01 : f32
    %257 = vector.broadcast %cst_107 : f32 to vector<8x64xf32>
    %258 = arith.cmpf ogt, %256, %257 : vector<8x64xf32>
    %cst_108 = arith.constant 0.000000e+00 : f32
    %259 = vector.broadcast %cst_108 : f32 to vector<8x64xf32>
    %260 = arith.select %258, %253, %259 : vector<8x64xi1>, vector<8x64xf32>
    %261 = vector.extract_strided_slice %260 {offsets = [0, 0], sizes = [8, 32], strides = [1, 1]} : vector<8x64xf32> to vector<8x32xf32>
    %262 = arith.index_cast %c3_i32 : i32 to index
    %c0_109 = arith.constant 0 : index
    %c0_110 = arith.constant 0 : index
    %263 = vector.load %arg22[%262, %c0_109, %c0_110] : memref<8x8x32xf32, #tpu.memory_space<vmem>>, vector<1x8x32xf32>
    %264 = vector.shape_cast %263 : vector<1x8x32xf32> to vector<8x32xf32>
    %265 = vector.shape_cast %261 : vector<8x32xf32> to vector<1x8x32xf32>
    tpu.vector_store %arg22[%262, %c0_109, %c0_110], %265 {strides = array<i32>} : memref<8x8x32xf32, #tpu.memory_space<vmem>>, vector<1x8x32xf32>,
    %266 = vector.extract_strided_slice %260 {offsets = [0, 32], sizes = [8, 32], strides = [1, 1]} : vector<8x64xf32> to vector<8x32xf32>
    %c7_i32_111 = arith.constant 7 : i32
    %267 = arith.subi %c7_i32_111, %c3_i32 : i32
    %268 = arith.index_cast %267 : i32 to index
    %c0_112 = arith.constant 0 : index
    %c0_113 = arith.constant 0 : index
    %269 = vector.load %arg23[%268, %c0_112, %c0_113] : memref<8x8x32xf32, #tpu.memory_space<vmem>>, vector<1x8x32xf32>
    %270 = vector.shape_cast %269 : vector<1x8x32xf32> to vector<8x32xf32>
    %271 = vector.shape_cast %266 : vector<8x32xf32> to vector<1x8x32xf32>
    tpu.vector_store %arg23[%268, %c0_112, %c0_113], %271 {strides = array<i32>} : memref<8x8x32xf32, #tpu.memory_space<vmem>>, vector<1x8x32xf32>,
    %272 = arith.select %258, %253, %222 : vector<8x64xi1>, vector<8x64xf32>
    %273 = arith.select %258, %251, %223 : vector<8x64xi1>, vector<8x64xf32>
    %c4_i32 = arith.constant 4 : i32
    %274 = arith.index_cast %c4_i32 : i32 to index
    %c0_114 = arith.constant 0 : index
    %c0_115 = arith.constant 0 : index
    %275 = vector.load %arg24[%274, %c0_114, %c0_115] : memref<8x8x256xf32, #tpu.memory_space<vmem>>, vector<1x8x256xf32>
    %276 = vector.shape_cast %275 : vector<1x8x256xf32> to vector<8x256xf32>
    %cst_116 = arith.constant dense<0.000000e+00> : vector<8x256xf32>
    %277 = tpu.matmul %272, %72, %cst_116 {dimension_numbers = #tpu.dot_dimension_numbers<[1], [0], [0], [1], [0, 0, 1, 1], [], []>} : vector<8x64xf32>, vector<64x256xf32>, vector<8x256xf32> -> vector<8x256xf32>
    %278 = arith.addf %276, %277 : vector<8x256xf32>
    %279 = vector.extract_strided_slice %278 {offsets = [0, 0], sizes = [8, 64], strides = [1, 1]} : vector<8x256xf32> to vector<8x64xf32>
    %280 = arith.negf %279 : vector<8x64xf32>
    %281 = math.exp %280 : vector<8x64xf32>
    %cst_117 = arith.constant 1.000000e+00 : f32
    %282 = vector.broadcast %cst_117 : f32 to vector<8x64xf32>
    %283 = arith.addf %282, %281 : vector<8x64xf32>
    %284 = arith.divf %282, %283 : vector<8x64xf32>
    %285 = vector.extract_strided_slice %278 {offsets = [0, 64], sizes = [8, 64], strides = [1, 1]} : vector<8x256xf32> to vector<8x64xf32>
    %286 = arith.negf %285 : vector<8x64xf32>
    %287 = math.exp %286 : vector<8x64xf32>
    %cst_118 = arith.constant 1.000000e+00 : f32
    %288 = vector.broadcast %cst_118 : f32 to vector<8x64xf32>
    %289 = arith.addf %288, %287 : vector<8x64xf32>
    %290 = arith.divf %288, %289 : vector<8x64xf32>
    %291 = vector.extract_strided_slice %278 {offsets = [0, 128], sizes = [8, 64], strides = [1, 1]} : vector<8x256xf32> to vector<8x64xf32>
    %292 = math.tanh %291 : vector<8x64xf32>
    %293 = vector.extract_strided_slice %278 {offsets = [0, 192], sizes = [8, 64], strides = [1, 1]} : vector<8x256xf32> to vector<8x64xf32>
    %294 = arith.negf %293 : vector<8x64xf32>
    %295 = math.exp %294 : vector<8x64xf32>
    %cst_119 = arith.constant 1.000000e+00 : f32
    %296 = vector.broadcast %cst_119 : f32 to vector<8x64xf32>
    %297 = arith.addf %296, %295 : vector<8x64xf32>
    %298 = arith.divf %296, %297 : vector<8x64xf32>
    %299 = arith.mulf %290, %273 : vector<8x64xf32>
    %300 = arith.mulf %284, %292 : vector<8x64xf32>
    %301 = arith.addf %299, %300 : vector<8x64xf32>
    %302 = math.tanh %301 : vector<8x64xf32>
    %303 = arith.mulf %298, %302 : vector<8x64xf32>
    %304 = arith.index_cast %c4_i32 : i32 to index
    %c0_120 = arith.constant 0 : index
    %c0_121 = arith.constant 0 : index
    %305 = vector.load %arg3[%304, %c0_120, %c0_121] : memref<8x8x64xf32, #tpu.memory_space<vmem>>, vector<1x8x64xf32>
    %306 = vector.shape_cast %305 : vector<1x8x64xf32> to vector<8x64xf32>
    %cst_122 = arith.constant 5.000000e-01 : f32
    %307 = vector.broadcast %cst_122 : f32 to vector<8x64xf32>
    %308 = arith.cmpf ogt, %306, %307 : vector<8x64xf32>
    %cst_123 = arith.constant 0.000000e+00 : f32
    %309 = vector.broadcast %cst_123 : f32 to vector<8x64xf32>
    %310 = arith.select %308, %303, %309 : vector<8x64xi1>, vector<8x64xf32>
    %311 = vector.extract_strided_slice %310 {offsets = [0, 0], sizes = [8, 32], strides = [1, 1]} : vector<8x64xf32> to vector<8x32xf32>
    %312 = arith.index_cast %c4_i32 : i32 to index
    %c0_124 = arith.constant 0 : index
    %c0_125 = arith.constant 0 : index
    %313 = vector.load %arg22[%312, %c0_124, %c0_125] : memref<8x8x32xf32, #tpu.memory_space<vmem>>, vector<1x8x32xf32>
    %314 = vector.shape_cast %313 : vector<1x8x32xf32> to vector<8x32xf32>
    %315 = vector.shape_cast %311 : vector<8x32xf32> to vector<1x8x32xf32>
    tpu.vector_store %arg22[%312, %c0_124, %c0_125], %315 {strides = array<i32>} : memref<8x8x32xf32, #tpu.memory_space<vmem>>, vector<1x8x32xf32>,
    %316 = vector.extract_strided_slice %310 {offsets = [0, 32], sizes = [8, 32], strides = [1, 1]} : vector<8x64xf32> to vector<8x32xf32>
    %c7_i32_126 = arith.constant 7 : i32
    %317 = arith.subi %c7_i32_126, %c4_i32 : i32
    %318 = arith.index_cast %317 : i32 to index
    %c0_127 = arith.constant 0 : index
    %c0_128 = arith.constant 0 : index
    %319 = vector.load %arg23[%318, %c0_127, %c0_128] : memref<8x8x32xf32, #tpu.memory_space<vmem>>, vector<1x8x32xf32>
    %320 = vector.shape_cast %319 : vector<1x8x32xf32> to vector<8x32xf32>
    %321 = vector.shape_cast %316 : vector<8x32xf32> to vector<1x8x32xf32>
    tpu.vector_store %arg23[%318, %c0_127, %c0_128], %321 {strides = array<i32>} : memref<8x8x32xf32, #tpu.memory_space<vmem>>, vector<1x8x32xf32>,
    %322 = arith.select %308, %303, %272 : vector<8x64xi1>, vector<8x64xf32>
    %323 = arith.select %308, %301, %273 : vector<8x64xi1>, vector<8x64xf32>
    %c5_i32 = arith.constant 5 : i32
    %324 = arith.index_cast %c5_i32 : i32 to index
    %c0_129 = arith.constant 0 : index
    %c0_130 = arith.constant 0 : index
    %325 = vector.load %arg24[%324, %c0_129, %c0_130] : memref<8x8x256xf32, #tpu.memory_space<vmem>>, vector<1x8x256xf32>
    %326 = vector.shape_cast %325 : vector<1x8x256xf32> to vector<8x256xf32>
    %cst_131 = arith.constant dense<0.000000e+00> : vector<8x256xf32>
    %327 = tpu.matmul %322, %72, %cst_131 {dimension_numbers = #tpu.dot_dimension_numbers<[1], [0], [0], [1], [0, 0, 1, 1], [], []>} : vector<8x64xf32>, vector<64x256xf32>, vector<8x256xf32> -> vector<8x256xf32>
    %328 = arith.addf %326, %327 : vector<8x256xf32>
    %329 = vector.extract_strided_slice %328 {offsets = [0, 0], sizes = [8, 64], strides = [1, 1]} : vector<8x256xf32> to vector<8x64xf32>
    %330 = arith.negf %329 : vector<8x64xf32>
    %331 = math.exp %330 : vector<8x64xf32>
    %cst_132 = arith.constant 1.000000e+00 : f32
    %332 = vector.broadcast %cst_132 : f32 to vector<8x64xf32>
    %333 = arith.addf %332, %331 : vector<8x64xf32>
    %334 = arith.divf %332, %333 : vector<8x64xf32>
    %335 = vector.extract_strided_slice %328 {offsets = [0, 64], sizes = [8, 64], strides = [1, 1]} : vector<8x256xf32> to vector<8x64xf32>
    %336 = arith.negf %335 : vector<8x64xf32>
    %337 = math.exp %336 : vector<8x64xf32>
    %cst_133 = arith.constant 1.000000e+00 : f32
    %338 = vector.broadcast %cst_133 : f32 to vector<8x64xf32>
    %339 = arith.addf %338, %337 : vector<8x64xf32>
    %340 = arith.divf %338, %339 : vector<8x64xf32>
    %341 = vector.extract_strided_slice %328 {offsets = [0, 128], sizes = [8, 64], strides = [1, 1]} : vector<8x256xf32> to vector<8x64xf32>
    %342 = math.tanh %341 : vector<8x64xf32>
    %343 = vector.extract_strided_slice %328 {offsets = [0, 192], sizes = [8, 64], strides = [1, 1]} : vector<8x256xf32> to vector<8x64xf32>
    %344 = arith.negf %343 : vector<8x64xf32>
    %345 = math.exp %344 : vector<8x64xf32>
    %cst_134 = arith.constant 1.000000e+00 : f32
    %346 = vector.broadcast %cst_134 : f32 to vector<8x64xf32>
    %347 = arith.addf %346, %345 : vector<8x64xf32>
    %348 = arith.divf %346, %347 : vector<8x64xf32>
    %349 = arith.mulf %340, %323 : vector<8x64xf32>
    %350 = arith.mulf %334, %342 : vector<8x64xf32>
    %351 = arith.addf %349, %350 : vector<8x64xf32>
    %352 = math.tanh %351 : vector<8x64xf32>
    %353 = arith.mulf %348, %352 : vector<8x64xf32>
    %354 = arith.index_cast %c5_i32 : i32 to index
    %c0_135 = arith.constant 0 : index
    %c0_136 = arith.constant 0 : index
    %355 = vector.load %arg3[%354, %c0_135, %c0_136] : memref<8x8x64xf32, #tpu.memory_space<vmem>>, vector<1x8x64xf32>
    %356 = vector.shape_cast %355 : vector<1x8x64xf32> to vector<8x64xf32>
    %cst_137 = arith.constant 5.000000e-01 : f32
    %357 = vector.broadcast %cst_137 : f32 to vector<8x64xf32>
    %358 = arith.cmpf ogt, %356, %357 : vector<8x64xf32>
    %cst_138 = arith.constant 0.000000e+00 : f32
    %359 = vector.broadcast %cst_138 : f32 to vector<8x64xf32>
    %360 = arith.select %358, %353, %359 : vector<8x64xi1>, vector<8x64xf32>
    %361 = vector.extract_strided_slice %360 {offsets = [0, 0], sizes = [8, 32], strides = [1, 1]} : vector<8x64xf32> to vector<8x32xf32>
    %362 = arith.index_cast %c5_i32 : i32 to index
    %c0_139 = arith.constant 0 : index
    %c0_140 = arith.constant 0 : index
    %363 = vector.load %arg22[%362, %c0_139, %c0_140] : memref<8x8x32xf32, #tpu.memory_space<vmem>>, vector<1x8x32xf32>
    %364 = vector.shape_cast %363 : vector<1x8x32xf32> to vector<8x32xf32>
    %365 = vector.shape_cast %361 : vector<8x32xf32> to vector<1x8x32xf32>
    tpu.vector_store %arg22[%362, %c0_139, %c0_140], %365 {strides = array<i32>} : memref<8x8x32xf32, #tpu.memory_space<vmem>>, vector<1x8x32xf32>,
    %366 = vector.extract_strided_slice %360 {offsets = [0, 32], sizes = [8, 32], strides = [1, 1]} : vector<8x64xf32> to vector<8x32xf32>
    %c7_i32_141 = arith.constant 7 : i32
    %367 = arith.subi %c7_i32_141, %c5_i32 : i32
    %368 = arith.index_cast %367 : i32 to index
    %c0_142 = arith.constant 0 : index
    %c0_143 = arith.constant 0 : index
    %369 = vector.load %arg23[%368, %c0_142, %c0_143] : memref<8x8x32xf32, #tpu.memory_space<vmem>>, vector<1x8x32xf32>
    %370 = vector.shape_cast %369 : vector<1x8x32xf32> to vector<8x32xf32>
    %371 = vector.shape_cast %366 : vector<8x32xf32> to vector<1x8x32xf32>
    tpu.vector_store %arg23[%368, %c0_142, %c0_143], %371 {strides = array<i32>} : memref<8x8x32xf32, #tpu.memory_space<vmem>>, vector<1x8x32xf32>,
    %372 = arith.select %358, %353, %322 : vector<8x64xi1>, vector<8x64xf32>
    %373 = arith.select %358, %351, %323 : vector<8x64xi1>, vector<8x64xf32>
    %c6_i32 = arith.constant 6 : i32
    %374 = arith.index_cast %c6_i32 : i32 to index
    %c0_144 = arith.constant 0 : index
    %c0_145 = arith.constant 0 : index
    %375 = vector.load %arg24[%374, %c0_144, %c0_145] : memref<8x8x256xf32, #tpu.memory_space<vmem>>, vector<1x8x256xf32>
    %376 = vector.shape_cast %375 : vector<1x8x256xf32> to vector<8x256xf32>
    %cst_146 = arith.constant dense<0.000000e+00> : vector<8x256xf32>
    %377 = tpu.matmul %372, %72, %cst_146 {dimension_numbers = #tpu.dot_dimension_numbers<[1], [0], [0], [1], [0, 0, 1, 1], [], []>} : vector<8x64xf32>, vector<64x256xf32>, vector<8x256xf32> -> vector<8x256xf32>
    %378 = arith.addf %376, %377 : vector<8x256xf32>
    %379 = vector.extract_strided_slice %378 {offsets = [0, 0], sizes = [8, 64], strides = [1, 1]} : vector<8x256xf32> to vector<8x64xf32>
    %380 = arith.negf %379 : vector<8x64xf32>
    %381 = math.exp %380 : vector<8x64xf32>
    %cst_147 = arith.constant 1.000000e+00 : f32
    %382 = vector.broadcast %cst_147 : f32 to vector<8x64xf32>
    %383 = arith.addf %382, %381 : vector<8x64xf32>
    %384 = arith.divf %382, %383 : vector<8x64xf32>
    %385 = vector.extract_strided_slice %378 {offsets = [0, 64], sizes = [8, 64], strides = [1, 1]} : vector<8x256xf32> to vector<8x64xf32>
    %386 = arith.negf %385 : vector<8x64xf32>
    %387 = math.exp %386 : vector<8x64xf32>
    %cst_148 = arith.constant 1.000000e+00 : f32
    %388 = vector.broadcast %cst_148 : f32 to vector<8x64xf32>
    %389 = arith.addf %388, %387 : vector<8x64xf32>
    %390 = arith.divf %388, %389 : vector<8x64xf32>
    %391 = vector.extract_strided_slice %378 {offsets = [0, 128], sizes = [8, 64], strides = [1, 1]} : vector<8x256xf32> to vector<8x64xf32>
    %392 = math.tanh %391 : vector<8x64xf32>
    %393 = vector.extract_strided_slice %378 {offsets = [0, 192], sizes = [8, 64], strides = [1, 1]} : vector<8x256xf32> to vector<8x64xf32>
    %394 = arith.negf %393 : vector<8x64xf32>
    %395 = math.exp %394 : vector<8x64xf32>
    %cst_149 = arith.constant 1.000000e+00 : f32
    %396 = vector.broadcast %cst_149 : f32 to vector<8x64xf32>
    %397 = arith.addf %396, %395 : vector<8x64xf32>
    %398 = arith.divf %396, %397 : vector<8x64xf32>
    %399 = arith.mulf %390, %373 : vector<8x64xf32>
    %400 = arith.mulf %384, %392 : vector<8x64xf32>
    %401 = arith.addf %399, %400 : vector<8x64xf32>
    %402 = math.tanh %401 : vector<8x64xf32>
    %403 = arith.mulf %398, %402 : vector<8x64xf32>
    %404 = arith.index_cast %c6_i32 : i32 to index
    %c0_150 = arith.constant 0 : index
    %c0_151 = arith.constant 0 : index
    %405 = vector.load %arg3[%404, %c0_150, %c0_151] : memref<8x8x64xf32, #tpu.memory_space<vmem>>, vector<1x8x64xf32>
    %406 = vector.shape_cast %405 : vector<1x8x64xf32> to vector<8x64xf32>
    %cst_152 = arith.constant 5.000000e-01 : f32
    %407 = vector.broadcast %cst_152 : f32 to vector<8x64xf32>
    %408 = arith.cmpf ogt, %406, %407 : vector<8x64xf32>
    %cst_153 = arith.constant 0.000000e+00 : f32
    %409 = vector.broadcast %cst_153 : f32 to vector<8x64xf32>
    %410 = arith.select %408, %403, %409 : vector<8x64xi1>, vector<8x64xf32>
    %411 = vector.extract_strided_slice %410 {offsets = [0, 0], sizes = [8, 32], strides = [1, 1]} : vector<8x64xf32> to vector<8x32xf32>
    %412 = arith.index_cast %c6_i32 : i32 to index
    %c0_154 = arith.constant 0 : index
    %c0_155 = arith.constant 0 : index
    %413 = vector.load %arg22[%412, %c0_154, %c0_155] : memref<8x8x32xf32, #tpu.memory_space<vmem>>, vector<1x8x32xf32>
    %414 = vector.shape_cast %413 : vector<1x8x32xf32> to vector<8x32xf32>
    %415 = vector.shape_cast %411 : vector<8x32xf32> to vector<1x8x32xf32>
    tpu.vector_store %arg22[%412, %c0_154, %c0_155], %415 {strides = array<i32>} : memref<8x8x32xf32, #tpu.memory_space<vmem>>, vector<1x8x32xf32>,
    %416 = vector.extract_strided_slice %410 {offsets = [0, 32], sizes = [8, 32], strides = [1, 1]} : vector<8x64xf32> to vector<8x32xf32>
    %c7_i32_156 = arith.constant 7 : i32
    %417 = arith.subi %c7_i32_156, %c6_i32 : i32
    %418 = arith.index_cast %417 : i32 to index
    %c0_157 = arith.constant 0 : index
    %c0_158 = arith.constant 0 : index
    %419 = vector.load %arg23[%418, %c0_157, %c0_158] : memref<8x8x32xf32, #tpu.memory_space<vmem>>, vector<1x8x32xf32>
    %420 = vector.shape_cast %419 : vector<1x8x32xf32> to vector<8x32xf32>
    %421 = vector.shape_cast %416 : vector<8x32xf32> to vector<1x8x32xf32>
    tpu.vector_store %arg23[%418, %c0_157, %c0_158], %421 {strides = array<i32>} : memref<8x8x32xf32, #tpu.memory_space<vmem>>, vector<1x8x32xf32>,
    %422 = arith.select %408, %403, %372 : vector<8x64xi1>, vector<8x64xf32>
    %423 = arith.select %408, %401, %373 : vector<8x64xi1>, vector<8x64xf32>
    %c7_i32_159 = arith.constant 7 : i32
    %424 = arith.index_cast %c7_i32_159 : i32 to index
    %c0_160 = arith.constant 0 : index
    %c0_161 = arith.constant 0 : index
    %425 = vector.load %arg24[%424, %c0_160, %c0_161] : memref<8x8x256xf32, #tpu.memory_space<vmem>>, vector<1x8x256xf32>
    %426 = vector.shape_cast %425 : vector<1x8x256xf32> to vector<8x256xf32>
    %cst_162 = arith.constant dense<0.000000e+00> : vector<8x256xf32>
    %427 = tpu.matmul %422, %72, %cst_162 {dimension_numbers = #tpu.dot_dimension_numbers<[1], [0], [0], [1], [0, 0, 1, 1], [], []>} : vector<8x64xf32>, vector<64x256xf32>, vector<8x256xf32> -> vector<8x256xf32>
    %428 = arith.addf %426, %427 : vector<8x256xf32>
    %429 = vector.extract_strided_slice %428 {offsets = [0, 0], sizes = [8, 64], strides = [1, 1]} : vector<8x256xf32> to vector<8x64xf32>
    %430 = arith.negf %429 : vector<8x64xf32>
    %431 = math.exp %430 : vector<8x64xf32>
    %cst_163 = arith.constant 1.000000e+00 : f32
    %432 = vector.broadcast %cst_163 : f32 to vector<8x64xf32>
    %433 = arith.addf %432, %431 : vector<8x64xf32>
    %434 = arith.divf %432, %433 : vector<8x64xf32>
    %435 = vector.extract_strided_slice %428 {offsets = [0, 64], sizes = [8, 64], strides = [1, 1]} : vector<8x256xf32> to vector<8x64xf32>
    %436 = arith.negf %435 : vector<8x64xf32>
    %437 = math.exp %436 : vector<8x64xf32>
    %cst_164 = arith.constant 1.000000e+00 : f32
    %438 = vector.broadcast %cst_164 : f32 to vector<8x64xf32>
    %439 = arith.addf %438, %437 : vector<8x64xf32>
    %440 = arith.divf %438, %439 : vector<8x64xf32>
    %441 = vector.extract_strided_slice %428 {offsets = [0, 128], sizes = [8, 64], strides = [1, 1]} : vector<8x256xf32> to vector<8x64xf32>
    %442 = math.tanh %441 : vector<8x64xf32>
    %443 = vector.extract_strided_slice %428 {offsets = [0, 192], sizes = [8, 64], strides = [1, 1]} : vector<8x256xf32> to vector<8x64xf32>
    %444 = arith.negf %443 : vector<8x64xf32>
    %445 = math.exp %444 : vector<8x64xf32>
    %cst_165 = arith.constant 1.000000e+00 : f32
    %446 = vector.broadcast %cst_165 : f32 to vector<8x64xf32>
    %447 = arith.addf %446, %445 : vector<8x64xf32>
    %448 = arith.divf %446, %447 : vector<8x64xf32>
    %449 = arith.mulf %440, %423 : vector<8x64xf32>
    %450 = arith.mulf %434, %442 : vector<8x64xf32>
    %451 = arith.addf %449, %450 : vector<8x64xf32>
    %452 = math.tanh %451 : vector<8x64xf32>
    %453 = arith.mulf %448, %452 : vector<8x64xf32>
    %454 = arith.index_cast %c7_i32_159 : i32 to index
    %c0_166 = arith.constant 0 : index
    %c0_167 = arith.constant 0 : index
    %455 = vector.load %arg3[%454, %c0_166, %c0_167] : memref<8x8x64xf32, #tpu.memory_space<vmem>>, vector<1x8x64xf32>
    %456 = vector.shape_cast %455 : vector<1x8x64xf32> to vector<8x64xf32>
    %cst_168 = arith.constant 5.000000e-01 : f32
    %457 = vector.broadcast %cst_168 : f32 to vector<8x64xf32>
    %458 = arith.cmpf ogt, %456, %457 : vector<8x64xf32>
    %cst_169 = arith.constant 0.000000e+00 : f32
    %459 = vector.broadcast %cst_169 : f32 to vector<8x64xf32>
    %460 = arith.select %458, %453, %459 : vector<8x64xi1>, vector<8x64xf32>
    %461 = vector.extract_strided_slice %460 {offsets = [0, 0], sizes = [8, 32], strides = [1, 1]} : vector<8x64xf32> to vector<8x32xf32>
    %462 = arith.index_cast %c7_i32_159 : i32 to index
    %c0_170 = arith.constant 0 : index
    %c0_171 = arith.constant 0 : index
    %463 = vector.load %arg22[%462, %c0_170, %c0_171] : memref<8x8x32xf32, #tpu.memory_space<vmem>>, vector<1x8x32xf32>
    %464 = vector.shape_cast %463 : vector<1x8x32xf32> to vector<8x32xf32>
    %465 = vector.shape_cast %461 : vector<8x32xf32> to vector<1x8x32xf32>
    tpu.vector_store %arg22[%462, %c0_170, %c0_171], %465 {strides = array<i32>} : memref<8x8x32xf32, #tpu.memory_space<vmem>>, vector<1x8x32xf32>,
    %466 = vector.extract_strided_slice %460 {offsets = [0, 32], sizes = [8, 32], strides = [1, 1]} : vector<8x64xf32> to vector<8x32xf32>
    %c7_i32_172 = arith.constant 7 : i32
    %467 = arith.subi %c7_i32_172, %c7_i32_159 : i32
    %468 = arith.index_cast %467 : i32 to index
    %c0_173 = arith.constant 0 : index
    %c0_174 = arith.constant 0 : index
    %469 = vector.load %arg23[%468, %c0_173, %c0_174] : memref<8x8x32xf32, #tpu.memory_space<vmem>>, vector<1x8x32xf32>
    %470 = vector.shape_cast %469 : vector<1x8x32xf32> to vector<8x32xf32>
    %471 = vector.shape_cast %466 : vector<8x32xf32> to vector<1x8x32xf32>
    tpu.vector_store %arg23[%468, %c0_173, %c0_174], %471 {strides = array<i32>} : memref<8x8x32xf32, #tpu.memory_space<vmem>>, vector<1x8x32xf32>,
    %472 = arith.select %458, %453, %422 : vector<8x64xi1>, vector<8x64xf32>
    %473 = arith.select %458, %451, %423 : vector<8x64xi1>, vector<8x64xf32>
    %c8_i32 = arith.constant 8 : i32
    %c0_175 = arith.constant 0 : index
    %c0_176 = arith.constant 0 : index
    %c0_177 = arith.constant 0 : index
    %474 = vector.load %arg22[%c0_175, %c0_176, %c0_177] : memref<8x8x32xf32, #tpu.memory_space<vmem>>, vector<8x8x32xf32>
    %475 = vector.shape_cast %474 : vector<8x8x32xf32> to vector<64x32xf32>
    %c0_178 = arith.constant 0 : index
    %c0_179 = arith.constant 0 : index
    %c0_180 = arith.constant 0 : index
    %476 = vector.load %arg23[%c0_178, %c0_179, %c0_180] : memref<8x8x32xf32, #tpu.memory_space<vmem>>, vector<8x8x32xf32>
    %477 = vector.shape_cast %476 : vector<8x8x32xf32> to vector<64x32xf32>
    %c0_181 = arith.constant 0 : index
    %c0_182 = arith.constant 0 : index
    %478 = vector.load %arg9[%c0_181, %c0_182] : memref<64x256xf32, #tpu.memory_space<vmem>>, vector<64x256xf32>
    %479 = vector.extract_strided_slice %478 {offsets = [0, 0], sizes = [32, 256], strides = [1, 1]} : vector<64x256xf32> to vector<32x256xf32>
    %cst_183 = arith.constant dense<0.000000e+00> : vector<64x256xf32>
    %480 = tpu.matmul %475, %479, %cst_183 {dimension_numbers = #tpu.dot_dimension_numbers<[1], [0], [0], [1], [0, 0, 1, 1], [], []>} : vector<64x32xf32>, vector<32x256xf32>, vector<64x256xf32> -> vector<64x256xf32>
    %481 = vector.extract_strided_slice %478 {offsets = [32, 0], sizes = [32, 256], strides = [1, 1]} : vector<64x256xf32> to vector<32x256xf32>
    %cst_184 = arith.constant dense<0.000000e+00> : vector<64x256xf32>
    %482 = tpu.matmul %477, %481, %cst_184 {dimension_numbers = #tpu.dot_dimension_numbers<[1], [0], [0], [1], [0, 0, 1, 1], [], []>} : vector<64x32xf32>, vector<32x256xf32>, vector<64x256xf32> -> vector<64x256xf32>
    %483 = arith.addf %480, %482 : vector<64x256xf32>
    %484 = vector.shape_cast %483 : vector<64x256xf32> to vector<8x8x256xf32>
    %c0_185 = arith.constant 0 : index
    %c0_186 = arith.constant 0 : index
    %c0_187 = arith.constant 0 : index
    %485 = vector.load %arg24[%c0_185, %c0_186, %c0_187] : memref<8x8x256xf32, #tpu.memory_space<vmem>>, vector<8x8x256xf32>
    tpu.vector_store %arg24[%c0_185, %c0_186, %c0_187], %484 {strides = array<i32>} : memref<8x8x256xf32, #tpu.memory_space<vmem>>, vector<8x8x256xf32>,
    %c0_188 = arith.constant 0 : index
    %c0_189 = arith.constant 0 : index
    %c0_190 = arith.constant 0 : index
    %486 = vector.load %arg24[%c0_188, %c0_189, %c0_190] : memref<8x8x256xf32, #tpu.memory_space<vmem>>, vector<1x8x256xf32>
    %487 = vector.shape_cast %486 : vector<1x8x256xf32> to vector<8x256xf32>
    %c7_191 = arith.constant 7 : index
    %c0_192 = arith.constant 0 : index
    %c0_193 = arith.constant 0 : index
    %488 = vector.load %arg24[%c7_191, %c0_192, %c0_193] : memref<8x8x256xf32, #tpu.memory_space<vmem>>, vector<1x8x256xf32>
    %489 = vector.shape_cast %488 : vector<1x8x256xf32> to vector<8x256xf32>
    %490 = arith.select %18, %487, %489 : vector<8x256xi1>, vector<8x256xf32>
    %c0_194 = arith.constant 0 : index
    %c0_195 = arith.constant 0 : index
    %c0_196 = arith.constant 0 : index
    %491 = vector.load %arg24[%c0_194, %c0_195, %c0_196] : memref<8x8x256xf32, #tpu.memory_space<vmem>>, vector<1x8x256xf32>
    %492 = vector.shape_cast %491 : vector<1x8x256xf32> to vector<8x256xf32>
    %493 = vector.shape_cast %490 : vector<8x256xf32> to vector<1x8x256xf32>
    tpu.vector_store %arg24[%c0_194, %c0_195, %c0_196], %493 {strides = array<i32>} : memref<8x8x256xf32, #tpu.memory_space<vmem>>, vector<1x8x256xf32>,
    %494 = arith.select %18, %489, %487 : vector<8x256xi1>, vector<8x256xf32>
    %c7_197 = arith.constant 7 : index
    %c0_198 = arith.constant 0 : index
    %c0_199 = arith.constant 0 : index
    %495 = vector.load %arg24[%c7_197, %c0_198, %c0_199] : memref<8x8x256xf32, #tpu.memory_space<vmem>>, vector<1x8x256xf32>
    %496 = vector.shape_cast %495 : vector<1x8x256xf32> to vector<8x256xf32>
    %497 = vector.shape_cast %494 : vector<8x256xf32> to vector<1x8x256xf32>
    tpu.vector_store %arg24[%c7_197, %c0_198, %c0_199], %497 {strides = array<i32>} : memref<8x8x256xf32, #tpu.memory_space<vmem>>, vector<1x8x256xf32>,
    %c1_200 = arith.constant 1 : index
    %c0_201 = arith.constant 0 : index
    %c0_202 = arith.constant 0 : index
    %498 = vector.load %arg24[%c1_200, %c0_201, %c0_202] : memref<8x8x256xf32, #tpu.memory_space<vmem>>, vector<1x8x256xf32>
    %499 = vector.shape_cast %498 : vector<1x8x256xf32> to vector<8x256xf32>
    %c6_203 = arith.constant 6 : index
    %c0_204 = arith.constant 0 : index
    %c0_205 = arith.constant 0 : index
    %500 = vector.load %arg24[%c6_203, %c0_204, %c0_205] : memref<8x8x256xf32, #tpu.memory_space<vmem>>, vector<1x8x256xf32>
    %501 = vector.shape_cast %500 : vector<1x8x256xf32> to vector<8x256xf32>
    %502 = arith.select %18, %499, %501 : vector<8x256xi1>, vector<8x256xf32>
    %c1_206 = arith.constant 1 : index
    %c0_207 = arith.constant 0 : index
    %c0_208 = arith.constant 0 : index
    %503 = vector.load %arg24[%c1_206, %c0_207, %c0_208] : memref<8x8x256xf32, #tpu.memory_space<vmem>>, vector<1x8x256xf32>
    %504 = vector.shape_cast %503 : vector<1x8x256xf32> to vector<8x256xf32>
    %505 = vector.shape_cast %502 : vector<8x256xf32> to vector<1x8x256xf32>
    tpu.vector_store %arg24[%c1_206, %c0_207, %c0_208], %505 {strides = array<i32>} : memref<8x8x256xf32, #tpu.memory_space<vmem>>, vector<1x8x256xf32>,
    %506 = arith.select %18, %501, %499 : vector<8x256xi1>, vector<8x256xf32>
    %c6_209 = arith.constant 6 : index
    %c0_210 = arith.constant 0 : index
    %c0_211 = arith.constant 0 : index
    %507 = vector.load %arg24[%c6_209, %c0_210, %c0_211] : memref<8x8x256xf32, #tpu.memory_space<vmem>>, vector<1x8x256xf32>
    %508 = vector.shape_cast %507 : vector<1x8x256xf32> to vector<8x256xf32>
    %509 = vector.shape_cast %506 : vector<8x256xf32> to vector<1x8x256xf32>
    tpu.vector_store %arg24[%c6_209, %c0_210, %c0_211], %509 {strides = array<i32>} : memref<8x8x256xf32, #tpu.memory_space<vmem>>, vector<1x8x256xf32>,
    %c2_212 = arith.constant 2 : index
    %c0_213 = arith.constant 0 : index
    %c0_214 = arith.constant 0 : index
    %510 = vector.load %arg24[%c2_212, %c0_213, %c0_214] : memref<8x8x256xf32, #tpu.memory_space<vmem>>, vector<1x8x256xf32>
    %511 = vector.shape_cast %510 : vector<1x8x256xf32> to vector<8x256xf32>
    %c5_215 = arith.constant 5 : index
    %c0_216 = arith.constant 0 : index
    %c0_217 = arith.constant 0 : index
    %512 = vector.load %arg24[%c5_215, %c0_216, %c0_217] : memref<8x8x256xf32, #tpu.memory_space<vmem>>, vector<1x8x256xf32>
    %513 = vector.shape_cast %512 : vector<1x8x256xf32> to vector<8x256xf32>
    %514 = arith.select %18, %511, %513 : vector<8x256xi1>, vector<8x256xf32>
    %c2_218 = arith.constant 2 : index
    %c0_219 = arith.constant 0 : index
    %c0_220 = arith.constant 0 : index
    %515 = vector.load %arg24[%c2_218, %c0_219, %c0_220] : memref<8x8x256xf32, #tpu.memory_space<vmem>>, vector<1x8x256xf32>
    %516 = vector.shape_cast %515 : vector<1x8x256xf32> to vector<8x256xf32>
    %517 = vector.shape_cast %514 : vector<8x256xf32> to vector<1x8x256xf32>
    tpu.vector_store %arg24[%c2_218, %c0_219, %c0_220], %517 {strides = array<i32>} : memref<8x8x256xf32, #tpu.memory_space<vmem>>, vector<1x8x256xf32>,
    %518 = arith.select %18, %513, %511 : vector<8x256xi1>, vector<8x256xf32>
    %c5_221 = arith.constant 5 : index
    %c0_222 = arith.constant 0 : index
    %c0_223 = arith.constant 0 : index
    %519 = vector.load %arg24[%c5_221, %c0_222, %c0_223] : memref<8x8x256xf32, #tpu.memory_space<vmem>>, vector<1x8x256xf32>
    %520 = vector.shape_cast %519 : vector<1x8x256xf32> to vector<8x256xf32>
    %521 = vector.shape_cast %518 : vector<8x256xf32> to vector<1x8x256xf32>
    tpu.vector_store %arg24[%c5_221, %c0_222, %c0_223], %521 {strides = array<i32>} : memref<8x8x256xf32, #tpu.memory_space<vmem>>, vector<1x8x256xf32>,
    %c3_224 = arith.constant 3 : index
    %c0_225 = arith.constant 0 : index
    %c0_226 = arith.constant 0 : index
    %522 = vector.load %arg24[%c3_224, %c0_225, %c0_226] : memref<8x8x256xf32, #tpu.memory_space<vmem>>, vector<1x8x256xf32>
    %523 = vector.shape_cast %522 : vector<1x8x256xf32> to vector<8x256xf32>
    %c4_227 = arith.constant 4 : index
    %c0_228 = arith.constant 0 : index
    %c0_229 = arith.constant 0 : index
    %524 = vector.load %arg24[%c4_227, %c0_228, %c0_229] : memref<8x8x256xf32, #tpu.memory_space<vmem>>, vector<1x8x256xf32>
    %525 = vector.shape_cast %524 : vector<1x8x256xf32> to vector<8x256xf32>
    %526 = arith.select %18, %523, %525 : vector<8x256xi1>, vector<8x256xf32>
    %c3_230 = arith.constant 3 : index
    %c0_231 = arith.constant 0 : index
    %c0_232 = arith.constant 0 : index
    %527 = vector.load %arg24[%c3_230, %c0_231, %c0_232] : memref<8x8x256xf32, #tpu.memory_space<vmem>>, vector<1x8x256xf32>
    %528 = vector.shape_cast %527 : vector<1x8x256xf32> to vector<8x256xf32>
    %529 = vector.shape_cast %526 : vector<8x256xf32> to vector<1x8x256xf32>
    tpu.vector_store %arg24[%c3_230, %c0_231, %c0_232], %529 {strides = array<i32>} : memref<8x8x256xf32, #tpu.memory_space<vmem>>, vector<1x8x256xf32>,
    %530 = arith.select %18, %525, %523 : vector<8x256xi1>, vector<8x256xf32>
    %c4_233 = arith.constant 4 : index
    %c0_234 = arith.constant 0 : index
    %c0_235 = arith.constant 0 : index
    %531 = vector.load %arg24[%c4_233, %c0_234, %c0_235] : memref<8x8x256xf32, #tpu.memory_space<vmem>>, vector<1x8x256xf32>
    %532 = vector.shape_cast %531 : vector<1x8x256xf32> to vector<8x256xf32>
    %533 = vector.shape_cast %530 : vector<8x256xf32> to vector<1x8x256xf32>
    tpu.vector_store %arg24[%c4_233, %c0_234, %c0_235], %533 {strides = array<i32>} : memref<8x8x256xf32, #tpu.memory_space<vmem>>, vector<1x8x256xf32>,
    %c0_236 = arith.constant 0 : index
    %c0_237 = arith.constant 0 : index
    %534 = vector.load %arg10[%c0_236, %c0_237] : memref<64x256xf32, #tpu.memory_space<vmem>>, vector<64x256xf32>
    %cst_238 = arith.constant 0.000000e+00 : f32
    %535 = vector.broadcast %cst_238 : f32 to vector<8x64xf32>
    %c0_i32_239 = arith.constant 0 : i32
    %536 = arith.index_cast %c0_i32_239 : i32 to index
    %c0_240 = arith.constant 0 : index
    %c0_241 = arith.constant 0 : index
    %537 = vector.load %arg24[%536, %c0_240, %c0_241] : memref<8x8x256xf32, #tpu.memory_space<vmem>>, vector<1x8x256xf32>
    %538 = vector.shape_cast %537 : vector<1x8x256xf32> to vector<8x256xf32>
    %cst_242 = arith.constant dense<0.000000e+00> : vector<8x256xf32>
    %539 = tpu.matmul %535, %534, %cst_242 {dimension_numbers = #tpu.dot_dimension_numbers<[1], [0], [0], [1], [0, 0, 1, 1], [], []>} : vector<8x64xf32>, vector<64x256xf32>, vector<8x256xf32> -> vector<8x256xf32>
    %540 = arith.addf %538, %539 : vector<8x256xf32>
    %541 = vector.extract_strided_slice %540 {offsets = [0, 0], sizes = [8, 64], strides = [1, 1]} : vector<8x256xf32> to vector<8x64xf32>
    %542 = arith.negf %541 : vector<8x64xf32>
    %543 = math.exp %542 : vector<8x64xf32>
    %cst_243 = arith.constant 1.000000e+00 : f32
    %544 = vector.broadcast %cst_243 : f32 to vector<8x64xf32>
    %545 = arith.addf %544, %543 : vector<8x64xf32>
    %546 = arith.divf %544, %545 : vector<8x64xf32>
    %547 = vector.extract_strided_slice %540 {offsets = [0, 64], sizes = [8, 64], strides = [1, 1]} : vector<8x256xf32> to vector<8x64xf32>
    %548 = arith.negf %547 : vector<8x64xf32>
    %549 = math.exp %548 : vector<8x64xf32>
    %cst_244 = arith.constant 1.000000e+00 : f32
    %550 = vector.broadcast %cst_244 : f32 to vector<8x64xf32>
    %551 = arith.addf %550, %549 : vector<8x64xf32>
    %552 = arith.divf %550, %551 : vector<8x64xf32>
    %553 = vector.extract_strided_slice %540 {offsets = [0, 128], sizes = [8, 64], strides = [1, 1]} : vector<8x256xf32> to vector<8x64xf32>
    %554 = math.tanh %553 : vector<8x64xf32>
    %555 = vector.extract_strided_slice %540 {offsets = [0, 192], sizes = [8, 64], strides = [1, 1]} : vector<8x256xf32> to vector<8x64xf32>
    %556 = arith.negf %555 : vector<8x64xf32>
    %557 = math.exp %556 : vector<8x64xf32>
    %cst_245 = arith.constant 1.000000e+00 : f32
    %558 = vector.broadcast %cst_245 : f32 to vector<8x64xf32>
    %559 = arith.addf %558, %557 : vector<8x64xf32>
    %560 = arith.divf %558, %559 : vector<8x64xf32>
    %561 = arith.mulf %552, %535 : vector<8x64xf32>
    %562 = arith.mulf %546, %554 : vector<8x64xf32>
    %563 = arith.addf %561, %562 : vector<8x64xf32>
    %564 = math.tanh %563 : vector<8x64xf32>
    %565 = arith.mulf %560, %564 : vector<8x64xf32>
    %566 = arith.index_cast %c0_i32_239 : i32 to index
    %c0_246 = arith.constant 0 : index
    %c0_247 = arith.constant 0 : index
    %567 = vector.load %arg3[%566, %c0_246, %c0_247] : memref<8x8x64xf32, #tpu.memory_space<vmem>>, vector<1x8x64xf32>
    %568 = vector.shape_cast %567 : vector<1x8x64xf32> to vector<8x64xf32>
    %cst_248 = arith.constant 5.000000e-01 : f32
    %569 = vector.broadcast %cst_248 : f32 to vector<8x64xf32>
    %570 = arith.cmpf ogt, %568, %569 : vector<8x64xf32>
    %cst_249 = arith.constant 0.000000e+00 : f32
    %571 = vector.broadcast %cst_249 : f32 to vector<8x64xf32>
    %572 = arith.select %570, %565, %571 : vector<8x64xi1>, vector<8x64xf32>
    %573 = vector.extract_strided_slice %572 {offsets = [0, 0], sizes = [8, 32], strides = [1, 1]} : vector<8x64xf32> to vector<8x32xf32>
    %574 = arith.index_cast %c0_i32_239 : i32 to index
    %c0_250 = arith.constant 0 : index
    %c0_251 = arith.constant 0 : index
    %575 = vector.load %arg22[%574, %c0_250, %c0_251] : memref<8x8x32xf32, #tpu.memory_space<vmem>>, vector<1x8x32xf32>
    %576 = vector.shape_cast %575 : vector<1x8x32xf32> to vector<8x32xf32>
    %577 = vector.shape_cast %573 : vector<8x32xf32> to vector<1x8x32xf32>
    tpu.vector_store %arg22[%574, %c0_250, %c0_251], %577 {strides = array<i32>} : memref<8x8x32xf32, #tpu.memory_space<vmem>>, vector<1x8x32xf32>,
    %578 = vector.extract_strided_slice %572 {offsets = [0, 32], sizes = [8, 32], strides = [1, 1]} : vector<8x64xf32> to vector<8x32xf32>
    %c7_i32_252 = arith.constant 7 : i32
    %579 = arith.subi %c7_i32_252, %c0_i32_239 : i32
    %580 = arith.index_cast %579 : i32 to index
    %c0_253 = arith.constant 0 : index
    %c0_254 = arith.constant 0 : index
    %581 = vector.load %arg23[%580, %c0_253, %c0_254] : memref<8x8x32xf32, #tpu.memory_space<vmem>>, vector<1x8x32xf32>
    %582 = vector.shape_cast %581 : vector<1x8x32xf32> to vector<8x32xf32>
    %583 = vector.shape_cast %578 : vector<8x32xf32> to vector<1x8x32xf32>
    tpu.vector_store %arg23[%580, %c0_253, %c0_254], %583 {strides = array<i32>} : memref<8x8x32xf32, #tpu.memory_space<vmem>>, vector<1x8x32xf32>,
    %584 = arith.select %570, %565, %535 : vector<8x64xi1>, vector<8x64xf32>
    %585 = arith.select %570, %563, %535 : vector<8x64xi1>, vector<8x64xf32>
    %c1_i32_255 = arith.constant 1 : i32
    %586 = arith.index_cast %c1_i32_255 : i32 to index
    %c0_256 = arith.constant 0 : index
    %c0_257 = arith.constant 0 : index
    %587 = vector.load %arg24[%586, %c0_256, %c0_257] : memref<8x8x256xf32, #tpu.memory_space<vmem>>, vector<1x8x256xf32>
    %588 = vector.shape_cast %587 : vector<1x8x256xf32> to vector<8x256xf32>
    %cst_258 = arith.constant dense<0.000000e+00> : vector<8x256xf32>
    %589 = tpu.matmul %584, %534, %cst_258 {dimension_numbers = #tpu.dot_dimension_numbers<[1], [0], [0], [1], [0, 0, 1, 1], [], []>} : vector<8x64xf32>, vector<64x256xf32>, vector<8x256xf32> -> vector<8x256xf32>
    %590 = arith.addf %588, %589 : vector<8x256xf32>
    %591 = vector.extract_strided_slice %590 {offsets = [0, 0], sizes = [8, 64], strides = [1, 1]} : vector<8x256xf32> to vector<8x64xf32>
    %592 = arith.negf %591 : vector<8x64xf32>
    %593 = math.exp %592 : vector<8x64xf32>
    %cst_259 = arith.constant 1.000000e+00 : f32
    %594 = vector.broadcast %cst_259 : f32 to vector<8x64xf32>
    %595 = arith.addf %594, %593 : vector<8x64xf32>
    %596 = arith.divf %594, %595 : vector<8x64xf32>
    %597 = vector.extract_strided_slice %590 {offsets = [0, 64], sizes = [8, 64], strides = [1, 1]} : vector<8x256xf32> to vector<8x64xf32>
    %598 = arith.negf %597 : vector<8x64xf32>
    %599 = math.exp %598 : vector<8x64xf32>
    %cst_260 = arith.constant 1.000000e+00 : f32
    %600 = vector.broadcast %cst_260 : f32 to vector<8x64xf32>
    %601 = arith.addf %600, %599 : vector<8x64xf32>
    %602 = arith.divf %600, %601 : vector<8x64xf32>
    %603 = vector.extract_strided_slice %590 {offsets = [0, 128], sizes = [8, 64], strides = [1, 1]} : vector<8x256xf32> to vector<8x64xf32>
    %604 = math.tanh %603 : vector<8x64xf32>
    %605 = vector.extract_strided_slice %590 {offsets = [0, 192], sizes = [8, 64], strides = [1, 1]} : vector<8x256xf32> to vector<8x64xf32>
    %606 = arith.negf %605 : vector<8x64xf32>
    %607 = math.exp %606 : vector<8x64xf32>
    %cst_261 = arith.constant 1.000000e+00 : f32
    %608 = vector.broadcast %cst_261 : f32 to vector<8x64xf32>
    %609 = arith.addf %608, %607 : vector<8x64xf32>
    %610 = arith.divf %608, %609 : vector<8x64xf32>
    %611 = arith.mulf %602, %585 : vector<8x64xf32>
    %612 = arith.mulf %596, %604 : vector<8x64xf32>
    %613 = arith.addf %611, %612 : vector<8x64xf32>
    %614 = math.tanh %613 : vector<8x64xf32>
    %615 = arith.mulf %610, %614 : vector<8x64xf32>
    %616 = arith.index_cast %c1_i32_255 : i32 to index
    %c0_262 = arith.constant 0 : index
    %c0_263 = arith.constant 0 : index
    %617 = vector.load %arg3[%616, %c0_262, %c0_263] : memref<8x8x64xf32, #tpu.memory_space<vmem>>, vector<1x8x64xf32>
    %618 = vector.shape_cast %617 : vector<1x8x64xf32> to vector<8x64xf32>
    %cst_264 = arith.constant 5.000000e-01 : f32
    %619 = vector.broadcast %cst_264 : f32 to vector<8x64xf32>
    %620 = arith.cmpf ogt, %618, %619 : vector<8x64xf32>
    %cst_265 = arith.constant 0.000000e+00 : f32
    %621 = vector.broadcast %cst_265 : f32 to vector<8x64xf32>
    %622 = arith.select %620, %615, %621 : vector<8x64xi1>, vector<8x64xf32>
    %623 = vector.extract_strided_slice %622 {offsets = [0, 0], sizes = [8, 32], strides = [1, 1]} : vector<8x64xf32> to vector<8x32xf32>
    %624 = arith.index_cast %c1_i32_255 : i32 to index
    %c0_266 = arith.constant 0 : index
    %c0_267 = arith.constant 0 : index
    %625 = vector.load %arg22[%624, %c0_266, %c0_267] : memref<8x8x32xf32, #tpu.memory_space<vmem>>, vector<1x8x32xf32>
    %626 = vector.shape_cast %625 : vector<1x8x32xf32> to vector<8x32xf32>
    %627 = vector.shape_cast %623 : vector<8x32xf32> to vector<1x8x32xf32>
    tpu.vector_store %arg22[%624, %c0_266, %c0_267], %627 {strides = array<i32>} : memref<8x8x32xf32, #tpu.memory_space<vmem>>, vector<1x8x32xf32>,
    %628 = vector.extract_strided_slice %622 {offsets = [0, 32], sizes = [8, 32], strides = [1, 1]} : vector<8x64xf32> to vector<8x32xf32>
    %c7_i32_268 = arith.constant 7 : i32
    %629 = arith.subi %c7_i32_268, %c1_i32_255 : i32
    %630 = arith.index_cast %629 : i32 to index
    %c0_269 = arith.constant 0 : index
    %c0_270 = arith.constant 0 : index
    %631 = vector.load %arg23[%630, %c0_269, %c0_270] : memref<8x8x32xf32, #tpu.memory_space<vmem>>, vector<1x8x32xf32>
    %632 = vector.shape_cast %631 : vector<1x8x32xf32> to vector<8x32xf32>
    %633 = vector.shape_cast %628 : vector<8x32xf32> to vector<1x8x32xf32>
    tpu.vector_store %arg23[%630, %c0_269, %c0_270], %633 {strides = array<i32>} : memref<8x8x32xf32, #tpu.memory_space<vmem>>, vector<1x8x32xf32>,
    %634 = arith.select %620, %615, %584 : vector<8x64xi1>, vector<8x64xf32>
    %635 = arith.select %620, %613, %585 : vector<8x64xi1>, vector<8x64xf32>
    %c2_i32_271 = arith.constant 2 : i32
    %636 = arith.index_cast %c2_i32_271 : i32 to index
    %c0_272 = arith.constant 0 : index
    %c0_273 = arith.constant 0 : index
    %637 = vector.load %arg24[%636, %c0_272, %c0_273] : memref<8x8x256xf32, #tpu.memory_space<vmem>>, vector<1x8x256xf32>
    %638 = vector.shape_cast %637 : vector<1x8x256xf32> to vector<8x256xf32>
    %cst_274 = arith.constant dense<0.000000e+00> : vector<8x256xf32>
    %639 = tpu.matmul %634, %534, %cst_274 {dimension_numbers = #tpu.dot_dimension_numbers<[1], [0], [0], [1], [0, 0, 1, 1], [], []>} : vector<8x64xf32>, vector<64x256xf32>, vector<8x256xf32> -> vector<8x256xf32>
    %640 = arith.addf %638, %639 : vector<8x256xf32>
    %641 = vector.extract_strided_slice %640 {offsets = [0, 0], sizes = [8, 64], strides = [1, 1]} : vector<8x256xf32> to vector<8x64xf32>
    %642 = arith.negf %641 : vector<8x64xf32>
    %643 = math.exp %642 : vector<8x64xf32>
    %cst_275 = arith.constant 1.000000e+00 : f32
    %644 = vector.broadcast %cst_275 : f32 to vector<8x64xf32>
    %645 = arith.addf %644, %643 : vector<8x64xf32>
    %646 = arith.divf %644, %645 : vector<8x64xf32>
    %647 = vector.extract_strided_slice %640 {offsets = [0, 64], sizes = [8, 64], strides = [1, 1]} : vector<8x256xf32> to vector<8x64xf32>
    %648 = arith.negf %647 : vector<8x64xf32>
    %649 = math.exp %648 : vector<8x64xf32>
    %cst_276 = arith.constant 1.000000e+00 : f32
    %650 = vector.broadcast %cst_276 : f32 to vector<8x64xf32>
    %651 = arith.addf %650, %649 : vector<8x64xf32>
    %652 = arith.divf %650, %651 : vector<8x64xf32>
    %653 = vector.extract_strided_slice %640 {offsets = [0, 128], sizes = [8, 64], strides = [1, 1]} : vector<8x256xf32> to vector<8x64xf32>
    %654 = math.tanh %653 : vector<8x64xf32>
    %655 = vector.extract_strided_slice %640 {offsets = [0, 192], sizes = [8, 64], strides = [1, 1]} : vector<8x256xf32> to vector<8x64xf32>
    %656 = arith.negf %655 : vector<8x64xf32>
    %657 = math.exp %656 : vector<8x64xf32>
    %cst_277 = arith.constant 1.000000e+00 : f32
    %658 = vector.broadcast %cst_277 : f32 to vector<8x64xf32>
    %659 = arith.addf %658, %657 : vector<8x64xf32>
    %660 = arith.divf %658, %659 : vector<8x64xf32>
    %661 = arith.mulf %652, %635 : vector<8x64xf32>
    %662 = arith.mulf %646, %654 : vector<8x64xf32>
    %663 = arith.addf %661, %662 : vector<8x64xf32>
    %664 = math.tanh %663 : vector<8x64xf32>
    %665 = arith.mulf %660, %664 : vector<8x64xf32>
    %666 = arith.index_cast %c2_i32_271 : i32 to index
    %c0_278 = arith.constant 0 : index
    %c0_279 = arith.constant 0 : index
    %667 = vector.load %arg3[%666, %c0_278, %c0_279] : memref<8x8x64xf32, #tpu.memory_space<vmem>>, vector<1x8x64xf32>
    %668 = vector.shape_cast %667 : vector<1x8x64xf32> to vector<8x64xf32>
    %cst_280 = arith.constant 5.000000e-01 : f32
    %669 = vector.broadcast %cst_280 : f32 to vector<8x64xf32>
    %670 = arith.cmpf ogt, %668, %669 : vector<8x64xf32>
    %cst_281 = arith.constant 0.000000e+00 : f32
    %671 = vector.broadcast %cst_281 : f32 to vector<8x64xf32>
    %672 = arith.select %670, %665, %671 : vector<8x64xi1>, vector<8x64xf32>
    %673 = vector.extract_strided_slice %672 {offsets = [0, 0], sizes = [8, 32], strides = [1, 1]} : vector<8x64xf32> to vector<8x32xf32>
    %674 = arith.index_cast %c2_i32_271 : i32 to index
    %c0_282 = arith.constant 0 : index
    %c0_283 = arith.constant 0 : index
    %675 = vector.load %arg22[%674, %c0_282, %c0_283] : memref<8x8x32xf32, #tpu.memory_space<vmem>>, vector<1x8x32xf32>
    %676 = vector.shape_cast %675 : vector<1x8x32xf32> to vector<8x32xf32>
    %677 = vector.shape_cast %673 : vector<8x32xf32> to vector<1x8x32xf32>
    tpu.vector_store %arg22[%674, %c0_282, %c0_283], %677 {strides = array<i32>} : memref<8x8x32xf32, #tpu.memory_space<vmem>>, vector<1x8x32xf32>,
    %678 = vector.extract_strided_slice %672 {offsets = [0, 32], sizes = [8, 32], strides = [1, 1]} : vector<8x64xf32> to vector<8x32xf32>
    %c7_i32_284 = arith.constant 7 : i32
    %679 = arith.subi %c7_i32_284, %c2_i32_271 : i32
    %680 = arith.index_cast %679 : i32 to index
    %c0_285 = arith.constant 0 : index
    %c0_286 = arith.constant 0 : index
    %681 = vector.load %arg23[%680, %c0_285, %c0_286] : memref<8x8x32xf32, #tpu.memory_space<vmem>>, vector<1x8x32xf32>
    %682 = vector.shape_cast %681 : vector<1x8x32xf32> to vector<8x32xf32>
    %683 = vector.shape_cast %678 : vector<8x32xf32> to vector<1x8x32xf32>
    tpu.vector_store %arg23[%680, %c0_285, %c0_286], %683 {strides = array<i32>} : memref<8x8x32xf32, #tpu.memory_space<vmem>>, vector<1x8x32xf32>,
    %684 = arith.select %670, %665, %634 : vector<8x64xi1>, vector<8x64xf32>
    %685 = arith.select %670, %663, %635 : vector<8x64xi1>, vector<8x64xf32>
    %c3_i32_287 = arith.constant 3 : i32
    %686 = arith.index_cast %c3_i32_287 : i32 to index
    %c0_288 = arith.constant 0 : index
    %c0_289 = arith.constant 0 : index
    %687 = vector.load %arg24[%686, %c0_288, %c0_289] : memref<8x8x256xf32, #tpu.memory_space<vmem>>, vector<1x8x256xf32>
    %688 = vector.shape_cast %687 : vector<1x8x256xf32> to vector<8x256xf32>
    %cst_290 = arith.constant dense<0.000000e+00> : vector<8x256xf32>
    %689 = tpu.matmul %684, %534, %cst_290 {dimension_numbers = #tpu.dot_dimension_numbers<[1], [0], [0], [1], [0, 0, 1, 1], [], []>} : vector<8x64xf32>, vector<64x256xf32>, vector<8x256xf32> -> vector<8x256xf32>
    %690 = arith.addf %688, %689 : vector<8x256xf32>
    %691 = vector.extract_strided_slice %690 {offsets = [0, 0], sizes = [8, 64], strides = [1, 1]} : vector<8x256xf32> to vector<8x64xf32>
    %692 = arith.negf %691 : vector<8x64xf32>
    %693 = math.exp %692 : vector<8x64xf32>
    %cst_291 = arith.constant 1.000000e+00 : f32
    %694 = vector.broadcast %cst_291 : f32 to vector<8x64xf32>
    %695 = arith.addf %694, %693 : vector<8x64xf32>
    %696 = arith.divf %694, %695 : vector<8x64xf32>
    %697 = vector.extract_strided_slice %690 {offsets = [0, 64], sizes = [8, 64], strides = [1, 1]} : vector<8x256xf32> to vector<8x64xf32>
    %698 = arith.negf %697 : vector<8x64xf32>
    %699 = math.exp %698 : vector<8x64xf32>
    %cst_292 = arith.constant 1.000000e+00 : f32
    %700 = vector.broadcast %cst_292 : f32 to vector<8x64xf32>
    %701 = arith.addf %700, %699 : vector<8x64xf32>
    %702 = arith.divf %700, %701 : vector<8x64xf32>
    %703 = vector.extract_strided_slice %690 {offsets = [0, 128], sizes = [8, 64], strides = [1, 1]} : vector<8x256xf32> to vector<8x64xf32>
    %704 = math.tanh %703 : vector<8x64xf32>
    %705 = vector.extract_strided_slice %690 {offsets = [0, 192], sizes = [8, 64], strides = [1, 1]} : vector<8x256xf32> to vector<8x64xf32>
    %706 = arith.negf %705 : vector<8x64xf32>
    %707 = math.exp %706 : vector<8x64xf32>
    %cst_293 = arith.constant 1.000000e+00 : f32
    %708 = vector.broadcast %cst_293 : f32 to vector<8x64xf32>
    %709 = arith.addf %708, %707 : vector<8x64xf32>
    %710 = arith.divf %708, %709 : vector<8x64xf32>
    %711 = arith.mulf %702, %685 : vector<8x64xf32>
    %712 = arith.mulf %696, %704 : vector<8x64xf32>
    %713 = arith.addf %711, %712 : vector<8x64xf32>
    %714 = math.tanh %713 : vector<8x64xf32>
    %715 = arith.mulf %710, %714 : vector<8x64xf32>
    %716 = arith.index_cast %c3_i32_287 : i32 to index
    %c0_294 = arith.constant 0 : index
    %c0_295 = arith.constant 0 : index
    %717 = vector.load %arg3[%716, %c0_294, %c0_295] : memref<8x8x64xf32, #tpu.memory_space<vmem>>, vector<1x8x64xf32>
    %718 = vector.shape_cast %717 : vector<1x8x64xf32> to vector<8x64xf32>
    %cst_296 = arith.constant 5.000000e-01 : f32
    %719 = vector.broadcast %cst_296 : f32 to vector<8x64xf32>
    %720 = arith.cmpf ogt, %718, %719 : vector<8x64xf32>
    %cst_297 = arith.constant 0.000000e+00 : f32
    %721 = vector.broadcast %cst_297 : f32 to vector<8x64xf32>
    %722 = arith.select %720, %715, %721 : vector<8x64xi1>, vector<8x64xf32>
    %723 = vector.extract_strided_slice %722 {offsets = [0, 0], sizes = [8, 32], strides = [1, 1]} : vector<8x64xf32> to vector<8x32xf32>
    %724 = arith.index_cast %c3_i32_287 : i32 to index
    %c0_298 = arith.constant 0 : index
    %c0_299 = arith.constant 0 : index
    %725 = vector.load %arg22[%724, %c0_298, %c0_299] : memref<8x8x32xf32, #tpu.memory_space<vmem>>, vector<1x8x32xf32>
    %726 = vector.shape_cast %725 : vector<1x8x32xf32> to vector<8x32xf32>
    %727 = vector.shape_cast %723 : vector<8x32xf32> to vector<1x8x32xf32>
    tpu.vector_store %arg22[%724, %c0_298, %c0_299], %727 {strides = array<i32>} : memref<8x8x32xf32, #tpu.memory_space<vmem>>, vector<1x8x32xf32>,
    %728 = vector.extract_strided_slice %722 {offsets = [0, 32], sizes = [8, 32], strides = [1, 1]} : vector<8x64xf32> to vector<8x32xf32>
    %c7_i32_300 = arith.constant 7 : i32
    %729 = arith.subi %c7_i32_300, %c3_i32_287 : i32
    %730 = arith.index_cast %729 : i32 to index
    %c0_301 = arith.constant 0 : index
    %c0_302 = arith.constant 0 : index
    %731 = vector.load %arg23[%730, %c0_301, %c0_302] : memref<8x8x32xf32, #tpu.memory_space<vmem>>, vector<1x8x32xf32>
    %732 = vector.shape_cast %731 : vector<1x8x32xf32> to vector<8x32xf32>
    %733 = vector.shape_cast %728 : vector<8x32xf32> to vector<1x8x32xf32>
    tpu.vector_store %arg23[%730, %c0_301, %c0_302], %733 {strides = array<i32>} : memref<8x8x32xf32, #tpu.memory_space<vmem>>, vector<1x8x32xf32>,
    %734 = arith.select %720, %715, %684 : vector<8x64xi1>, vector<8x64xf32>
    %735 = arith.select %720, %713, %685 : vector<8x64xi1>, vector<8x64xf32>
    %c4_i32_303 = arith.constant 4 : i32
    %736 = arith.index_cast %c4_i32_303 : i32 to index
    %c0_304 = arith.constant 0 : index
    %c0_305 = arith.constant 0 : index
    %737 = vector.load %arg24[%736, %c0_304, %c0_305] : memref<8x8x256xf32, #tpu.memory_space<vmem>>, vector<1x8x256xf32>
    %738 = vector.shape_cast %737 : vector<1x8x256xf32> to vector<8x256xf32>
    %cst_306 = arith.constant dense<0.000000e+00> : vector<8x256xf32>
    %739 = tpu.matmul %734, %534, %cst_306 {dimension_numbers = #tpu.dot_dimension_numbers<[1], [0], [0], [1], [0, 0, 1, 1], [], []>} : vector<8x64xf32>, vector<64x256xf32>, vector<8x256xf32> -> vector<8x256xf32>
    %740 = arith.addf %738, %739 : vector<8x256xf32>
    %741 = vector.extract_strided_slice %740 {offsets = [0, 0], sizes = [8, 64], strides = [1, 1]} : vector<8x256xf32> to vector<8x64xf32>
    %742 = arith.negf %741 : vector<8x64xf32>
    %743 = math.exp %742 : vector<8x64xf32>
    %cst_307 = arith.constant 1.000000e+00 : f32
    %744 = vector.broadcast %cst_307 : f32 to vector<8x64xf32>
    %745 = arith.addf %744, %743 : vector<8x64xf32>
    %746 = arith.divf %744, %745 : vector<8x64xf32>
    %747 = vector.extract_strided_slice %740 {offsets = [0, 64], sizes = [8, 64], strides = [1, 1]} : vector<8x256xf32> to vector<8x64xf32>
    %748 = arith.negf %747 : vector<8x64xf32>
    %749 = math.exp %748 : vector<8x64xf32>
    %cst_308 = arith.constant 1.000000e+00 : f32
    %750 = vector.broadcast %cst_308 : f32 to vector<8x64xf32>
    %751 = arith.addf %750, %749 : vector<8x64xf32>
    %752 = arith.divf %750, %751 : vector<8x64xf32>
    %753 = vector.extract_strided_slice %740 {offsets = [0, 128], sizes = [8, 64], strides = [1, 1]} : vector<8x256xf32> to vector<8x64xf32>
    %754 = math.tanh %753 : vector<8x64xf32>
    %755 = vector.extract_strided_slice %740 {offsets = [0, 192], sizes = [8, 64], strides = [1, 1]} : vector<8x256xf32> to vector<8x64xf32>
    %756 = arith.negf %755 : vector<8x64xf32>
    %757 = math.exp %756 : vector<8x64xf32>
    %cst_309 = arith.constant 1.000000e+00 : f32
    %758 = vector.broadcast %cst_309 : f32 to vector<8x64xf32>
    %759 = arith.addf %758, %757 : vector<8x64xf32>
    %760 = arith.divf %758, %759 : vector<8x64xf32>
    %761 = arith.mulf %752, %735 : vector<8x64xf32>
    %762 = arith.mulf %746, %754 : vector<8x64xf32>
    %763 = arith.addf %761, %762 : vector<8x64xf32>
    %764 = math.tanh %763 : vector<8x64xf32>
    %765 = arith.mulf %760, %764 : vector<8x64xf32>
    %766 = arith.index_cast %c4_i32_303 : i32 to index
    %c0_310 = arith.constant 0 : index
    %c0_311 = arith.constant 0 : index
    %767 = vector.load %arg3[%766, %c0_310, %c0_311] : memref<8x8x64xf32, #tpu.memory_space<vmem>>, vector<1x8x64xf32>
    %768 = vector.shape_cast %767 : vector<1x8x64xf32> to vector<8x64xf32>
    %cst_312 = arith.constant 5.000000e-01 : f32
    %769 = vector.broadcast %cst_312 : f32 to vector<8x64xf32>
    %770 = arith.cmpf ogt, %768, %769 : vector<8x64xf32>
    %cst_313 = arith.constant 0.000000e+00 : f32
    %771 = vector.broadcast %cst_313 : f32 to vector<8x64xf32>
    %772 = arith.select %770, %765, %771 : vector<8x64xi1>, vector<8x64xf32>
    %773 = vector.extract_strided_slice %772 {offsets = [0, 0], sizes = [8, 32], strides = [1, 1]} : vector<8x64xf32> to vector<8x32xf32>
    %774 = arith.index_cast %c4_i32_303 : i32 to index
    %c0_314 = arith.constant 0 : index
    %c0_315 = arith.constant 0 : index
    %775 = vector.load %arg22[%774, %c0_314, %c0_315] : memref<8x8x32xf32, #tpu.memory_space<vmem>>, vector<1x8x32xf32>
    %776 = vector.shape_cast %775 : vector<1x8x32xf32> to vector<8x32xf32>
    %777 = vector.shape_cast %773 : vector<8x32xf32> to vector<1x8x32xf32>
    tpu.vector_store %arg22[%774, %c0_314, %c0_315], %777 {strides = array<i32>} : memref<8x8x32xf32, #tpu.memory_space<vmem>>, vector<1x8x32xf32>,
    %778 = vector.extract_strided_slice %772 {offsets = [0, 32], sizes = [8, 32], strides = [1, 1]} : vector<8x64xf32> to vector<8x32xf32>
    %c7_i32_316 = arith.constant 7 : i32
    %779 = arith.subi %c7_i32_316, %c4_i32_303 : i32
    %780 = arith.index_cast %779 : i32 to index
    %c0_317 = arith.constant 0 : index
    %c0_318 = arith.constant 0 : index
    %781 = vector.load %arg23[%780, %c0_317, %c0_318] : memref<8x8x32xf32, #tpu.memory_space<vmem>>, vector<1x8x32xf32>
    %782 = vector.shape_cast %781 : vector<1x8x32xf32> to vector<8x32xf32>
    %783 = vector.shape_cast %778 : vector<8x32xf32> to vector<1x8x32xf32>
    tpu.vector_store %arg23[%780, %c0_317, %c0_318], %783 {strides = array<i32>} : memref<8x8x32xf32, #tpu.memory_space<vmem>>, vector<1x8x32xf32>,
    %784 = arith.select %770, %765, %734 : vector<8x64xi1>, vector<8x64xf32>
    %785 = arith.select %770, %763, %735 : vector<8x64xi1>, vector<8x64xf32>
    %c5_i32_319 = arith.constant 5 : i32
    %786 = arith.index_cast %c5_i32_319 : i32 to index
    %c0_320 = arith.constant 0 : index
    %c0_321 = arith.constant 0 : index
    %787 = vector.load %arg24[%786, %c0_320, %c0_321] : memref<8x8x256xf32, #tpu.memory_space<vmem>>, vector<1x8x256xf32>
    %788 = vector.shape_cast %787 : vector<1x8x256xf32> to vector<8x256xf32>
    %cst_322 = arith.constant dense<0.000000e+00> : vector<8x256xf32>
    %789 = tpu.matmul %784, %534, %cst_322 {dimension_numbers = #tpu.dot_dimension_numbers<[1], [0], [0], [1], [0, 0, 1, 1], [], []>} : vector<8x64xf32>, vector<64x256xf32>, vector<8x256xf32> -> vector<8x256xf32>
    %790 = arith.addf %788, %789 : vector<8x256xf32>
    %791 = vector.extract_strided_slice %790 {offsets = [0, 0], sizes = [8, 64], strides = [1, 1]} : vector<8x256xf32> to vector<8x64xf32>
    %792 = arith.negf %791 : vector<8x64xf32>
    %793 = math.exp %792 : vector<8x64xf32>
    %cst_323 = arith.constant 1.000000e+00 : f32
    %794 = vector.broadcast %cst_323 : f32 to vector<8x64xf32>
    %795 = arith.addf %794, %793 : vector<8x64xf32>
    %796 = arith.divf %794, %795 : vector<8x64xf32>
    %797 = vector.extract_strided_slice %790 {offsets = [0, 64], sizes = [8, 64], strides = [1, 1]} : vector<8x256xf32> to vector<8x64xf32>
    %798 = arith.negf %797 : vector<8x64xf32>
    %799 = math.exp %798 : vector<8x64xf32>
    %cst_324 = arith.constant 1.000000e+00 : f32
    %800 = vector.broadcast %cst_324 : f32 to vector<8x64xf32>
    %801 = arith.addf %800, %799 : vector<8x64xf32>
    %802 = arith.divf %800, %801 : vector<8x64xf32>
    %803 = vector.extract_strided_slice %790 {offsets = [0, 128], sizes = [8, 64], strides = [1, 1]} : vector<8x256xf32> to vector<8x64xf32>
    %804 = math.tanh %803 : vector<8x64xf32>
    %805 = vector.extract_strided_slice %790 {offsets = [0, 192], sizes = [8, 64], strides = [1, 1]} : vector<8x256xf32> to vector<8x64xf32>
    %806 = arith.negf %805 : vector<8x64xf32>
    %807 = math.exp %806 : vector<8x64xf32>
    %cst_325 = arith.constant 1.000000e+00 : f32
    %808 = vector.broadcast %cst_325 : f32 to vector<8x64xf32>
    %809 = arith.addf %808, %807 : vector<8x64xf32>
    %810 = arith.divf %808, %809 : vector<8x64xf32>
    %811 = arith.mulf %802, %785 : vector<8x64xf32>
    %812 = arith.mulf %796, %804 : vector<8x64xf32>
    %813 = arith.addf %811, %812 : vector<8x64xf32>
    %814 = math.tanh %813 : vector<8x64xf32>
    %815 = arith.mulf %810, %814 : vector<8x64xf32>
    %816 = arith.index_cast %c5_i32_319 : i32 to index
    %c0_326 = arith.constant 0 : index
    %c0_327 = arith.constant 0 : index
    %817 = vector.load %arg3[%816, %c0_326, %c0_327] : memref<8x8x64xf32, #tpu.memory_space<vmem>>, vector<1x8x64xf32>
    %818 = vector.shape_cast %817 : vector<1x8x64xf32> to vector<8x64xf32>
    %cst_328 = arith.constant 5.000000e-01 : f32
    %819 = vector.broadcast %cst_328 : f32 to vector<8x64xf32>
    %820 = arith.cmpf ogt, %818, %819 : vector<8x64xf32>
    %cst_329 = arith.constant 0.000000e+00 : f32
    %821 = vector.broadcast %cst_329 : f32 to vector<8x64xf32>
    %822 = arith.select %820, %815, %821 : vector<8x64xi1>, vector<8x64xf32>
    %823 = vector.extract_strided_slice %822 {offsets = [0, 0], sizes = [8, 32], strides = [1, 1]} : vector<8x64xf32> to vector<8x32xf32>
    %824 = arith.index_cast %c5_i32_319 : i32 to index
    %c0_330 = arith.constant 0 : index
    %c0_331 = arith.constant 0 : index
    %825 = vector.load %arg22[%824, %c0_330, %c0_331] : memref<8x8x32xf32, #tpu.memory_space<vmem>>, vector<1x8x32xf32>
    %826 = vector.shape_cast %825 : vector<1x8x32xf32> to vector<8x32xf32>
    %827 = vector.shape_cast %823 : vector<8x32xf32> to vector<1x8x32xf32>
    tpu.vector_store %arg22[%824, %c0_330, %c0_331], %827 {strides = array<i32>} : memref<8x8x32xf32, #tpu.memory_space<vmem>>, vector<1x8x32xf32>,
    %828 = vector.extract_strided_slice %822 {offsets = [0, 32], sizes = [8, 32], strides = [1, 1]} : vector<8x64xf32> to vector<8x32xf32>
    %c7_i32_332 = arith.constant 7 : i32
    %829 = arith.subi %c7_i32_332, %c5_i32_319 : i32
    %830 = arith.index_cast %829 : i32 to index
    %c0_333 = arith.constant 0 : index
    %c0_334 = arith.constant 0 : index
    %831 = vector.load %arg23[%830, %c0_333, %c0_334] : memref<8x8x32xf32, #tpu.memory_space<vmem>>, vector<1x8x32xf32>
    %832 = vector.shape_cast %831 : vector<1x8x32xf32> to vector<8x32xf32>
    %833 = vector.shape_cast %828 : vector<8x32xf32> to vector<1x8x32xf32>
    tpu.vector_store %arg23[%830, %c0_333, %c0_334], %833 {strides = array<i32>} : memref<8x8x32xf32, #tpu.memory_space<vmem>>, vector<1x8x32xf32>,
    %834 = arith.select %820, %815, %784 : vector<8x64xi1>, vector<8x64xf32>
    %835 = arith.select %820, %813, %785 : vector<8x64xi1>, vector<8x64xf32>
    %c6_i32_335 = arith.constant 6 : i32
    %836 = arith.index_cast %c6_i32_335 : i32 to index
    %c0_336 = arith.constant 0 : index
    %c0_337 = arith.constant 0 : index
    %837 = vector.load %arg24[%836, %c0_336, %c0_337] : memref<8x8x256xf32, #tpu.memory_space<vmem>>, vector<1x8x256xf32>
    %838 = vector.shape_cast %837 : vector<1x8x256xf32> to vector<8x256xf32>
    %cst_338 = arith.constant dense<0.000000e+00> : vector<8x256xf32>
    %839 = tpu.matmul %834, %534, %cst_338 {dimension_numbers = #tpu.dot_dimension_numbers<[1], [0], [0], [1], [0, 0, 1, 1], [], []>} : vector<8x64xf32>, vector<64x256xf32>, vector<8x256xf32> -> vector<8x256xf32>
    %840 = arith.addf %838, %839 : vector<8x256xf32>
    %841 = vector.extract_strided_slice %840 {offsets = [0, 0], sizes = [8, 64], strides = [1, 1]} : vector<8x256xf32> to vector<8x64xf32>
    %842 = arith.negf %841 : vector<8x64xf32>
    %843 = math.exp %842 : vector<8x64xf32>
    %cst_339 = arith.constant 1.000000e+00 : f32
    %844 = vector.broadcast %cst_339 : f32 to vector<8x64xf32>
    %845 = arith.addf %844, %843 : vector<8x64xf32>
    %846 = arith.divf %844, %845 : vector<8x64xf32>
    %847 = vector.extract_strided_slice %840 {offsets = [0, 64], sizes = [8, 64], strides = [1, 1]} : vector<8x256xf32> to vector<8x64xf32>
    %848 = arith.negf %847 : vector<8x64xf32>
    %849 = math.exp %848 : vector<8x64xf32>
    %cst_340 = arith.constant 1.000000e+00 : f32
    %850 = vector.broadcast %cst_340 : f32 to vector<8x64xf32>
    %851 = arith.addf %850, %849 : vector<8x64xf32>
    %852 = arith.divf %850, %851 : vector<8x64xf32>
    %853 = vector.extract_strided_slice %840 {offsets = [0, 128], sizes = [8, 64], strides = [1, 1]} : vector<8x256xf32> to vector<8x64xf32>
    %854 = math.tanh %853 : vector<8x64xf32>
    %855 = vector.extract_strided_slice %840 {offsets = [0, 192], sizes = [8, 64], strides = [1, 1]} : vector<8x256xf32> to vector<8x64xf32>
    %856 = arith.negf %855 : vector<8x64xf32>
    %857 = math.exp %856 : vector<8x64xf32>
    %cst_341 = arith.constant 1.000000e+00 : f32
    %858 = vector.broadcast %cst_341 : f32 to vector<8x64xf32>
    %859 = arith.addf %858, %857 : vector<8x64xf32>
    %860 = arith.divf %858, %859 : vector<8x64xf32>
    %861 = arith.mulf %852, %835 : vector<8x64xf32>
    %862 = arith.mulf %846, %854 : vector<8x64xf32>
    %863 = arith.addf %861, %862 : vector<8x64xf32>
    %864 = math.tanh %863 : vector<8x64xf32>
    %865 = arith.mulf %860, %864 : vector<8x64xf32>
    %866 = arith.index_cast %c6_i32_335 : i32 to index
    %c0_342 = arith.constant 0 : index
    %c0_343 = arith.constant 0 : index
    %867 = vector.load %arg3[%866, %c0_342, %c0_343] : memref<8x8x64xf32, #tpu.memory_space<vmem>>, vector<1x8x64xf32>
    %868 = vector.shape_cast %867 : vector<1x8x64xf32> to vector<8x64xf32>
    %cst_344 = arith.constant 5.000000e-01 : f32
    %869 = vector.broadcast %cst_344 : f32 to vector<8x64xf32>
    %870 = arith.cmpf ogt, %868, %869 : vector<8x64xf32>
    %cst_345 = arith.constant 0.000000e+00 : f32
    %871 = vector.broadcast %cst_345 : f32 to vector<8x64xf32>
    %872 = arith.select %870, %865, %871 : vector<8x64xi1>, vector<8x64xf32>
    %873 = vector.extract_strided_slice %872 {offsets = [0, 0], sizes = [8, 32], strides = [1, 1]} : vector<8x64xf32> to vector<8x32xf32>
    %874 = arith.index_cast %c6_i32_335 : i32 to index
    %c0_346 = arith.constant 0 : index
    %c0_347 = arith.constant 0 : index
    %875 = vector.load %arg22[%874, %c0_346, %c0_347] : memref<8x8x32xf32, #tpu.memory_space<vmem>>, vector<1x8x32xf32>
    %876 = vector.shape_cast %875 : vector<1x8x32xf32> to vector<8x32xf32>
    %877 = vector.shape_cast %873 : vector<8x32xf32> to vector<1x8x32xf32>
    tpu.vector_store %arg22[%874, %c0_346, %c0_347], %877 {strides = array<i32>} : memref<8x8x32xf32, #tpu.memory_space<vmem>>, vector<1x8x32xf32>,
    %878 = vector.extract_strided_slice %872 {offsets = [0, 32], sizes = [8, 32], strides = [1, 1]} : vector<8x64xf32> to vector<8x32xf32>
    %c7_i32_348 = arith.constant 7 : i32
    %879 = arith.subi %c7_i32_348, %c6_i32_335 : i32
    %880 = arith.index_cast %879 : i32 to index
    %c0_349 = arith.constant 0 : index
    %c0_350 = arith.constant 0 : index
    %881 = vector.load %arg23[%880, %c0_349, %c0_350] : memref<8x8x32xf32, #tpu.memory_space<vmem>>, vector<1x8x32xf32>
    %882 = vector.shape_cast %881 : vector<1x8x32xf32> to vector<8x32xf32>
    %883 = vector.shape_cast %878 : vector<8x32xf32> to vector<1x8x32xf32>
    tpu.vector_store %arg23[%880, %c0_349, %c0_350], %883 {strides = array<i32>} : memref<8x8x32xf32, #tpu.memory_space<vmem>>, vector<1x8x32xf32>,
    %884 = arith.select %870, %865, %834 : vector<8x64xi1>, vector<8x64xf32>
    %885 = arith.select %870, %863, %835 : vector<8x64xi1>, vector<8x64xf32>
    %c7_i32_351 = arith.constant 7 : i32
    %886 = arith.index_cast %c7_i32_351 : i32 to index
    %c0_352 = arith.constant 0 : index
    %c0_353 = arith.constant 0 : index
    %887 = vector.load %arg24[%886, %c0_352, %c0_353] : memref<8x8x256xf32, #tpu.memory_space<vmem>>, vector<1x8x256xf32>
    %888 = vector.shape_cast %887 : vector<1x8x256xf32> to vector<8x256xf32>
    %cst_354 = arith.constant dense<0.000000e+00> : vector<8x256xf32>
    %889 = tpu.matmul %884, %534, %cst_354 {dimension_numbers = #tpu.dot_dimension_numbers<[1], [0], [0], [1], [0, 0, 1, 1], [], []>} : vector<8x64xf32>, vector<64x256xf32>, vector<8x256xf32> -> vector<8x256xf32>
    %890 = arith.addf %888, %889 : vector<8x256xf32>
    %891 = vector.extract_strided_slice %890 {offsets = [0, 0], sizes = [8, 64], strides = [1, 1]} : vector<8x256xf32> to vector<8x64xf32>
    %892 = arith.negf %891 : vector<8x64xf32>
    %893 = math.exp %892 : vector<8x64xf32>
    %cst_355 = arith.constant 1.000000e+00 : f32
    %894 = vector.broadcast %cst_355 : f32 to vector<8x64xf32>
    %895 = arith.addf %894, %893 : vector<8x64xf32>
    %896 = arith.divf %894, %895 : vector<8x64xf32>
    %897 = vector.extract_strided_slice %890 {offsets = [0, 64], sizes = [8, 64], strides = [1, 1]} : vector<8x256xf32> to vector<8x64xf32>
    %898 = arith.negf %897 : vector<8x64xf32>
    %899 = math.exp %898 : vector<8x64xf32>
    %cst_356 = arith.constant 1.000000e+00 : f32
    %900 = vector.broadcast %cst_356 : f32 to vector<8x64xf32>
    %901 = arith.addf %900, %899 : vector<8x64xf32>
    %902 = arith.divf %900, %901 : vector<8x64xf32>
    %903 = vector.extract_strided_slice %890 {offsets = [0, 128], sizes = [8, 64], strides = [1, 1]} : vector<8x256xf32> to vector<8x64xf32>
    %904 = math.tanh %903 : vector<8x64xf32>
    %905 = vector.extract_strided_slice %890 {offsets = [0, 192], sizes = [8, 64], strides = [1, 1]} : vector<8x256xf32> to vector<8x64xf32>
    %906 = arith.negf %905 : vector<8x64xf32>
    %907 = math.exp %906 : vector<8x64xf32>
    %cst_357 = arith.constant 1.000000e+00 : f32
    %908 = vector.broadcast %cst_357 : f32 to vector<8x64xf32>
    %909 = arith.addf %908, %907 : vector<8x64xf32>
    %910 = arith.divf %908, %909 : vector<8x64xf32>
    %911 = arith.mulf %902, %885 : vector<8x64xf32>
    %912 = arith.mulf %896, %904 : vector<8x64xf32>
    %913 = arith.addf %911, %912 : vector<8x64xf32>
    %914 = math.tanh %913 : vector<8x64xf32>
    %915 = arith.mulf %910, %914 : vector<8x64xf32>
    %916 = arith.index_cast %c7_i32_351 : i32 to index
    %c0_358 = arith.constant 0 : index
    %c0_359 = arith.constant 0 : index
    %917 = vector.load %arg3[%916, %c0_358, %c0_359] : memref<8x8x64xf32, #tpu.memory_space<vmem>>, vector<1x8x64xf32>
    %918 = vector.shape_cast %917 : vector<1x8x64xf32> to vector<8x64xf32>
    %cst_360 = arith.constant 5.000000e-01 : f32
    %919 = vector.broadcast %cst_360 : f32 to vector<8x64xf32>
    %920 = arith.cmpf ogt, %918, %919 : vector<8x64xf32>
    %cst_361 = arith.constant 0.000000e+00 : f32
    %921 = vector.broadcast %cst_361 : f32 to vector<8x64xf32>
    %922 = arith.select %920, %915, %921 : vector<8x64xi1>, vector<8x64xf32>
    %923 = vector.extract_strided_slice %922 {offsets = [0, 0], sizes = [8, 32], strides = [1, 1]} : vector<8x64xf32> to vector<8x32xf32>
    %924 = arith.index_cast %c7_i32_351 : i32 to index
    %c0_362 = arith.constant 0 : index
    %c0_363 = arith.constant 0 : index
    %925 = vector.load %arg22[%924, %c0_362, %c0_363] : memref<8x8x32xf32, #tpu.memory_space<vmem>>, vector<1x8x32xf32>
    %926 = vector.shape_cast %925 : vector<1x8x32xf32> to vector<8x32xf32>
    %927 = vector.shape_cast %923 : vector<8x32xf32> to vector<1x8x32xf32>
    tpu.vector_store %arg22[%924, %c0_362, %c0_363], %927 {strides = array<i32>} : memref<8x8x32xf32, #tpu.memory_space<vmem>>, vector<1x8x32xf32>,
    %928 = vector.extract_strided_slice %922 {offsets = [0, 32], sizes = [8, 32], strides = [1, 1]} : vector<8x64xf32> to vector<8x32xf32>
    %c7_i32_364 = arith.constant 7 : i32
    %929 = arith.subi %c7_i32_364, %c7_i32_351 : i32
    %930 = arith.index_cast %929 : i32 to index
    %c0_365 = arith.constant 0 : index
    %c0_366 = arith.constant 0 : index
    %931 = vector.load %arg23[%930, %c0_365, %c0_366] : memref<8x8x32xf32, #tpu.memory_space<vmem>>, vector<1x8x32xf32>
    %932 = vector.shape_cast %931 : vector<1x8x32xf32> to vector<8x32xf32>
    %933 = vector.shape_cast %928 : vector<8x32xf32> to vector<1x8x32xf32>
    tpu.vector_store %arg23[%930, %c0_365, %c0_366], %933 {strides = array<i32>} : memref<8x8x32xf32, #tpu.memory_space<vmem>>, vector<1x8x32xf32>,
    %934 = arith.select %920, %915, %884 : vector<8x64xi1>, vector<8x64xf32>
    %935 = arith.select %920, %913, %885 : vector<8x64xi1>, vector<8x64xf32>
    %c8_i32_367 = arith.constant 8 : i32
    %c0_368 = arith.constant 0 : index
    %c0_369 = arith.constant 0 : index
    %c0_370 = arith.constant 0 : index
    %936 = vector.load %arg22[%c0_368, %c0_369, %c0_370] : memref<8x8x32xf32, #tpu.memory_space<vmem>>, vector<8x8x32xf32>
    %937 = vector.shape_cast %936 : vector<8x8x32xf32> to vector<64x32xf32>
    %c0_371 = arith.constant 0 : index
    %c0_372 = arith.constant 0 : index
    %c0_373 = arith.constant 0 : index
    %938 = vector.load %arg23[%c0_371, %c0_372, %c0_373] : memref<8x8x32xf32, #tpu.memory_space<vmem>>, vector<8x8x32xf32>
    %939 = vector.shape_cast %938 : vector<8x8x32xf32> to vector<64x32xf32>
    %c0_374 = arith.constant 0 : index
    %c0_375 = arith.constant 0 : index
    %940 = vector.load %arg11[%c0_374, %c0_375] : memref<64x2xf32, #tpu.memory_space<vmem>>, vector<32x2xf32>
    %cst_376 = arith.constant dense<0.000000e+00> : vector<64x2xf32>
    %941 = tpu.matmul %937, %940, %cst_376 {dimension_numbers = #tpu.dot_dimension_numbers<[1], [0], [0], [1], [0, 0, 1, 1], [], []>} : vector<64x32xf32>, vector<32x2xf32>, vector<64x2xf32> -> vector<64x2xf32>
    %c32 = arith.constant 32 : index
    %c0_377 = arith.constant 0 : index
    %942 = vector.load %arg11[%c32, %c0_377] : memref<64x2xf32, #tpu.memory_space<vmem>>, vector<32x2xf32>
    %cst_378 = arith.constant dense<0.000000e+00> : vector<64x2xf32>
    %943 = tpu.matmul %939, %942, %cst_378 {dimension_numbers = #tpu.dot_dimension_numbers<[1], [0], [0], [1], [0, 0, 1, 1], [], []>} : vector<64x32xf32>, vector<32x2xf32>, vector<64x2xf32> -> vector<64x2xf32>
    %944 = arith.addf %941, %943 : vector<64x2xf32>
    %c0_379 = arith.constant 0 : index
    %c0_380 = arith.constant 0 : index
    %945 = vector.load %arg12[%c0_379, %c0_380] : memref<1x2xf32, #tpu.memory_space<vmem>>, vector<1x2xf32>
    %946 = vector.broadcast %945 : vector<1x2xf32> to vector<64x2xf32>
    %947 = arith.addf %944, %946 : vector<64x2xf32>
    %c0_381 = arith.constant 0 : index
    %c0_382 = arith.constant 0 : index
    %948 = vector.load %arg13[%c0_381, %c0_382] : memref<64x32xf32, #tpu.memory_space<vmem>>, vector<32x32xf32>
    %cst_383 = arith.constant dense<0.000000e+00> : vector<64x32xf32>
    %949 = tpu.matmul %937, %948, %cst_383 {dimension_numbers = #tpu.dot_dimension_numbers<[1], [0], [0], [1], [0, 0, 1, 1], [], []>} : vector<64x32xf32>, vector<32x32xf32>, vector<64x32xf32> -> vector<64x32xf32>
    %c32_384 = arith.constant 32 : index
    %c0_385 = arith.constant 0 : index
    %950 = vector.load %arg13[%c32_384, %c0_385] : memref<64x32xf32, #tpu.memory_space<vmem>>, vector<32x32xf32>
    %cst_386 = arith.constant dense<0.000000e+00> : vector<64x32xf32>
    %951 = tpu.matmul %939, %950, %cst_386 {dimension_numbers = #tpu.dot_dimension_numbers<[1], [0], [0], [1], [0, 0, 1, 1], [], []>} : vector<64x32xf32>, vector<32x32xf32>, vector<64x32xf32> -> vector<64x32xf32>
    %952 = arith.addf %949, %951 : vector<64x32xf32>
    %c0_387 = arith.constant 0 : index
    %c0_388 = arith.constant 0 : index
    %953 = vector.load %arg14[%c0_387, %c0_388] : memref<1x32xf32, #tpu.memory_space<vmem>>, vector<1x32xf32>
    %954 = vector.broadcast %953 : vector<1x32xf32> to vector<64x32xf32>
    %955 = arith.addf %952, %954 : vector<64x32xf32>
    %956 = vector.shape_cast %947 : vector<64x2xf32> to vector<8x8x2xf32>
    %957 = vector.shape_cast %955 : vector<64x32xf32> to vector<8x8x32xf32>
    %c0_389 = arith.constant 0 : index
    %c0_390 = arith.constant 0 : index
    %c0_391 = arith.constant 0 : index
    %958 = vector.load %arg5[%c0_389, %c0_390, %c0_391] : memref<8x8x1xf32, #tpu.memory_space<vmem>>, vector<8x8x1xf32>
    %cst_392 = arith.constant 5.000000e-01 : f32
    %959 = vector.broadcast %cst_392 : f32 to vector<8x8x1xf32>
    %960 = arith.cmpf ogt, %958, %959 : vector<8x8x1xf32>
    %cst_393 = arith.constant -1.000000e+09 : f32
    %961 = vector.shape_cast %960 : vector<8x8x1xi1> to vector<8x8x1xi1>
    %962 = vector.broadcast %961 : vector<8x8x1xi1> to vector<8x8x2xi1>
    %963 = vector.broadcast %cst_393 : f32 to vector<8x8x2xf32>
    %964 = arith.select %962, %956, %963 : vector<8x8x2xi1>, vector<8x8x2xf32>
    %cst_394 = arith.constant dense<0xFF800000> : vector<8x2xf32>
    %965 = vector.multi_reduction <maximumf>, %964, %cst_394 [0] : vector<8x8x2xf32> to vector<8x2xf32>
    %966 = vector.shape_cast %965 : vector<8x2xf32> to vector<1x8x2xf32>
    %967 = vector.broadcast %966 : vector<1x8x2xf32> to vector<8x8x2xf32>
    %968 = arith.subf %964, %967 : vector<8x8x2xf32>
    %969 = math.exp %968 : vector<8x8x2xf32>
    %cst_395 = arith.constant dense<0.000000e+00> : vector<8x2xf32>
    %970 = vector.multi_reduction <add>, %969, %cst_395 [0] : vector<8x8x2xf32> to vector<8x2xf32>
    %971 = vector.shape_cast %970 : vector<8x2xf32> to vector<1x8x2xf32>
    %972 = vector.broadcast %971 : vector<1x8x2xf32> to vector<8x8x2xf32>
    %973 = arith.divf %969, %972 : vector<8x8x2xf32>
    %974 = vector.extract_strided_slice %973 {offsets = [0, 0, 0], sizes = [8, 8, 1], strides = [1, 1, 1]} : vector<8x8x2xf32> to vector<8x8x1xf32>
    %975 = vector.broadcast %974 : vector<8x8x1xf32> to vector<8x8x32xf32>
    %976 = arith.mulf %975, %957 : vector<8x8x32xf32>
    %cst_396 = arith.constant dense<0.000000e+00> : vector<8x32xf32>
    %977 = vector.multi_reduction <add>, %976, %cst_396 [0] : vector<8x8x32xf32> to vector<8x32xf32>
    %978 = vector.extract_strided_slice %973 {offsets = [0, 0, 1], sizes = [8, 8, 1], strides = [1, 1, 1]} : vector<8x8x2xf32> to vector<8x8x1xf32>
    %979 = vector.broadcast %978 : vector<8x8x1xf32> to vector<8x8x32xf32>
    %980 = arith.mulf %979, %957 : vector<8x8x32xf32>
    %cst_397 = arith.constant dense<0.000000e+00> : vector<8x32xf32>
    %981 = vector.multi_reduction <add>, %980, %cst_397 [0] : vector<8x8x32xf32> to vector<8x32xf32>
    %c0_398 = arith.constant 0 : index
    %c0_399 = arith.constant 0 : index
    %982 = vector.load %arg2[%c0_398, %c0_399] : memref<56x32xf32, #tpu.memory_space<vmem>>, vector<56x32xf32>
    %c0_400 = arith.constant 0 : index
    %c0_401 = arith.constant 0 : index
    %983 = vector.load %arg15[%c0_400, %c0_401] : memref<32x128xf32, #tpu.memory_space<vmem>>, vector<32x128xf32>
    %cst_402 = arith.constant dense<0.000000e+00> : vector<56x128xf32>
    %984 = tpu.matmul %982, %983, %cst_402 {dimension_numbers = #tpu.dot_dimension_numbers<[1], [0], [0], [1], [0, 0, 1, 1], [], []>} : vector<56x32xf32>, vector<32x128xf32>, vector<56x128xf32> -> vector<56x128xf32>
    %c0_403 = arith.constant 0 : index
    %c0_404 = arith.constant 0 : index
    %985 = vector.load %arg17[%c0_403, %c0_404] : memref<1x128xf32, #tpu.memory_space<vmem>>, vector<1x128xf32>
    %986 = vector.broadcast %985 : vector<1x128xf32> to vector<56x128xf32>
    %987 = arith.addf %984, %986 : vector<56x128xf32>
    %988 = vector.shape_cast %987 : vector<56x128xf32> to vector<7x8x128xf32>
    %c0_405 = arith.constant 0 : index
    %c0_406 = arith.constant 0 : index
    %c0_407 = arith.constant 0 : index
    %989 = vector.load %arg25[%c0_405, %c0_406, %c0_407] : memref<7x8x128xf32, #tpu.memory_space<vmem>>, vector<7x8x128xf32>
    tpu.vector_store %arg25[%c0_405, %c0_406, %c0_407], %988 {strides = array<i32>} : memref<7x8x128xf32, #tpu.memory_space<vmem>>, vector<7x8x128xf32>,
    %c0_408 = arith.constant 0 : index
    %c0_409 = arith.constant 0 : index
    %990 = vector.load %arg16[%c0_408, %c0_409] : memref<32x128xf32, #tpu.memory_space<vmem>>, vector<32x128xf32>
    %c0_i32_410 = arith.constant 0 : i32
    %991 = arith.index_cast %c0_i32_410 : i32 to index
    %c0_411 = arith.constant 0 : index
    %c0_412 = arith.constant 0 : index
    %992 = vector.load %arg25[%991, %c0_411, %c0_412] : memref<7x8x128xf32, #tpu.memory_space<vmem>>, vector<1x8x128xf32>
    %993 = vector.shape_cast %992 : vector<1x8x128xf32> to vector<8x128xf32>
    %cst_413 = arith.constant dense<0.000000e+00> : vector<8x128xf32>
    %994 = tpu.matmul %977, %990, %cst_413 {dimension_numbers = #tpu.dot_dimension_numbers<[1], [0], [0], [1], [0, 0, 1, 1], [], []>} : vector<8x32xf32>, vector<32x128xf32>, vector<8x128xf32> -> vector<8x128xf32>
    %995 = arith.addf %993, %994 : vector<8x128xf32>
    %996 = vector.extract_strided_slice %995 {offsets = [0, 0], sizes = [8, 32], strides = [1, 1]} : vector<8x128xf32> to vector<8x32xf32>
    %997 = arith.negf %996 : vector<8x32xf32>
    %998 = math.exp %997 : vector<8x32xf32>
    %cst_414 = arith.constant 1.000000e+00 : f32
    %999 = vector.broadcast %cst_414 : f32 to vector<8x32xf32>
    %1000 = arith.addf %999, %998 : vector<8x32xf32>
    %1001 = arith.divf %999, %1000 : vector<8x32xf32>
    %1002 = vector.extract_strided_slice %995 {offsets = [0, 32], sizes = [8, 32], strides = [1, 1]} : vector<8x128xf32> to vector<8x32xf32>
    %1003 = arith.negf %1002 : vector<8x32xf32>
    %1004 = math.exp %1003 : vector<8x32xf32>
    %cst_415 = arith.constant 1.000000e+00 : f32
    %1005 = vector.broadcast %cst_415 : f32 to vector<8x32xf32>
    %1006 = arith.addf %1005, %1004 : vector<8x32xf32>
    %1007 = arith.divf %1005, %1006 : vector<8x32xf32>
    %1008 = vector.extract_strided_slice %995 {offsets = [0, 64], sizes = [8, 32], strides = [1, 1]} : vector<8x128xf32> to vector<8x32xf32>
    %1009 = math.tanh %1008 : vector<8x32xf32>
    %1010 = vector.extract_strided_slice %995 {offsets = [0, 96], sizes = [8, 32], strides = [1, 1]} : vector<8x128xf32> to vector<8x32xf32>
    %1011 = arith.negf %1010 : vector<8x32xf32>
    %1012 = math.exp %1011 : vector<8x32xf32>
    %cst_416 = arith.constant 1.000000e+00 : f32
    %1013 = vector.broadcast %cst_416 : f32 to vector<8x32xf32>
    %1014 = arith.addf %1013, %1012 : vector<8x32xf32>
    %1015 = arith.divf %1013, %1014 : vector<8x32xf32>
    %1016 = arith.mulf %1007, %981 : vector<8x32xf32>
    %1017 = arith.mulf %1001, %1009 : vector<8x32xf32>
    %1018 = arith.addf %1016, %1017 : vector<8x32xf32>
    %1019 = math.tanh %1018 : vector<8x32xf32>
    %1020 = arith.mulf %1015, %1019 : vector<8x32xf32>
    %1021 = arith.index_cast %c0_i32_410 : i32 to index
    %c0_417 = arith.constant 0 : index
    %c0_418 = arith.constant 0 : index
    %1022 = vector.load %arg4[%1021, %c0_417, %c0_418] : memref<7x8x32xf32, #tpu.memory_space<vmem>>, vector<1x8x32xf32>
    %1023 = vector.shape_cast %1022 : vector<1x8x32xf32> to vector<8x32xf32>
    %cst_419 = arith.constant 5.000000e-01 : f32
    %1024 = vector.broadcast %cst_419 : f32 to vector<8x32xf32>
    %1025 = arith.cmpf ogt, %1023, %1024 : vector<8x32xf32>
    %cst_420 = arith.constant 0.000000e+00 : f32
    %1026 = vector.broadcast %cst_420 : f32 to vector<8x32xf32>
    %1027 = arith.select %1025, %1020, %1026 : vector<8x32xi1>, vector<8x32xf32>
    %1028 = arith.index_cast %c0_i32_410 : i32 to index
    %c0_421 = arith.constant 0 : index
    %c0_422 = arith.constant 0 : index
    %1029 = vector.load %arg26[%1028, %c0_421, %c0_422] : memref<7x8x32xf32, #tpu.memory_space<vmem>>, vector<1x8x32xf32>
    %1030 = vector.shape_cast %1029 : vector<1x8x32xf32> to vector<8x32xf32>
    %1031 = vector.shape_cast %1027 : vector<8x32xf32> to vector<1x8x32xf32>
    tpu.vector_store %arg26[%1028, %c0_421, %c0_422], %1031 {strides = array<i32>} : memref<7x8x32xf32, #tpu.memory_space<vmem>>, vector<1x8x32xf32>,
    %1032 = arith.select %1025, %1020, %977 : vector<8x32xi1>, vector<8x32xf32>
    %1033 = arith.select %1025, %1018, %981 : vector<8x32xi1>, vector<8x32xf32>
    %c1_i32_423 = arith.constant 1 : i32
    %1034 = arith.index_cast %c1_i32_423 : i32 to index
    %c0_424 = arith.constant 0 : index
    %c0_425 = arith.constant 0 : index
    %1035 = vector.load %arg25[%1034, %c0_424, %c0_425] : memref<7x8x128xf32, #tpu.memory_space<vmem>>, vector<1x8x128xf32>
    %1036 = vector.shape_cast %1035 : vector<1x8x128xf32> to vector<8x128xf32>
    %cst_426 = arith.constant dense<0.000000e+00> : vector<8x128xf32>
    %1037 = tpu.matmul %1032, %990, %cst_426 {dimension_numbers = #tpu.dot_dimension_numbers<[1], [0], [0], [1], [0, 0, 1, 1], [], []>} : vector<8x32xf32>, vector<32x128xf32>, vector<8x128xf32> -> vector<8x128xf32>
    %1038 = arith.addf %1036, %1037 : vector<8x128xf32>
    %1039 = vector.extract_strided_slice %1038 {offsets = [0, 0], sizes = [8, 32], strides = [1, 1]} : vector<8x128xf32> to vector<8x32xf32>
    %1040 = arith.negf %1039 : vector<8x32xf32>
    %1041 = math.exp %1040 : vector<8x32xf32>
    %cst_427 = arith.constant 1.000000e+00 : f32
    %1042 = vector.broadcast %cst_427 : f32 to vector<8x32xf32>
    %1043 = arith.addf %1042, %1041 : vector<8x32xf32>
    %1044 = arith.divf %1042, %1043 : vector<8x32xf32>
    %1045 = vector.extract_strided_slice %1038 {offsets = [0, 32], sizes = [8, 32], strides = [1, 1]} : vector<8x128xf32> to vector<8x32xf32>
    %1046 = arith.negf %1045 : vector<8x32xf32>
    %1047 = math.exp %1046 : vector<8x32xf32>
    %cst_428 = arith.constant 1.000000e+00 : f32
    %1048 = vector.broadcast %cst_428 : f32 to vector<8x32xf32>
    %1049 = arith.addf %1048, %1047 : vector<8x32xf32>
    %1050 = arith.divf %1048, %1049 : vector<8x32xf32>
    %1051 = vector.extract_strided_slice %1038 {offsets = [0, 64], sizes = [8, 32], strides = [1, 1]} : vector<8x128xf32> to vector<8x32xf32>
    %1052 = math.tanh %1051 : vector<8x32xf32>
    %1053 = vector.extract_strided_slice %1038 {offsets = [0, 96], sizes = [8, 32], strides = [1, 1]} : vector<8x128xf32> to vector<8x32xf32>
    %1054 = arith.negf %1053 : vector<8x32xf32>
    %1055 = math.exp %1054 : vector<8x32xf32>
    %cst_429 = arith.constant 1.000000e+00 : f32
    %1056 = vector.broadcast %cst_429 : f32 to vector<8x32xf32>
    %1057 = arith.addf %1056, %1055 : vector<8x32xf32>
    %1058 = arith.divf %1056, %1057 : vector<8x32xf32>
    %1059 = arith.mulf %1050, %1033 : vector<8x32xf32>
    %1060 = arith.mulf %1044, %1052 : vector<8x32xf32>
    %1061 = arith.addf %1059, %1060 : vector<8x32xf32>
    %1062 = math.tanh %1061 : vector<8x32xf32>
    %1063 = arith.mulf %1058, %1062 : vector<8x32xf32>
    %1064 = arith.index_cast %c1_i32_423 : i32 to index
    %c0_430 = arith.constant 0 : index
    %c0_431 = arith.constant 0 : index
    %1065 = vector.load %arg4[%1064, %c0_430, %c0_431] : memref<7x8x32xf32, #tpu.memory_space<vmem>>, vector<1x8x32xf32>
    %1066 = vector.shape_cast %1065 : vector<1x8x32xf32> to vector<8x32xf32>
    %cst_432 = arith.constant 5.000000e-01 : f32
    %1067 = vector.broadcast %cst_432 : f32 to vector<8x32xf32>
    %1068 = arith.cmpf ogt, %1066, %1067 : vector<8x32xf32>
    %cst_433 = arith.constant 0.000000e+00 : f32
    %1069 = vector.broadcast %cst_433 : f32 to vector<8x32xf32>
    %1070 = arith.select %1068, %1063, %1069 : vector<8x32xi1>, vector<8x32xf32>
    %1071 = arith.index_cast %c1_i32_423 : i32 to index
    %c0_434 = arith.constant 0 : index
    %c0_435 = arith.constant 0 : index
    %1072 = vector.load %arg26[%1071, %c0_434, %c0_435] : memref<7x8x32xf32, #tpu.memory_space<vmem>>, vector<1x8x32xf32>
    %1073 = vector.shape_cast %1072 : vector<1x8x32xf32> to vector<8x32xf32>
    %1074 = vector.shape_cast %1070 : vector<8x32xf32> to vector<1x8x32xf32>
    tpu.vector_store %arg26[%1071, %c0_434, %c0_435], %1074 {strides = array<i32>} : memref<7x8x32xf32, #tpu.memory_space<vmem>>, vector<1x8x32xf32>,
    %1075 = arith.select %1068, %1063, %1032 : vector<8x32xi1>, vector<8x32xf32>
    %1076 = arith.select %1068, %1061, %1033 : vector<8x32xi1>, vector<8x32xf32>
    %c2_i32_436 = arith.constant 2 : i32
    %1077 = arith.index_cast %c2_i32_436 : i32 to index
    %c0_437 = arith.constant 0 : index
    %c0_438 = arith.constant 0 : index
    %1078 = vector.load %arg25[%1077, %c0_437, %c0_438] : memref<7x8x128xf32, #tpu.memory_space<vmem>>, vector<1x8x128xf32>
    %1079 = vector.shape_cast %1078 : vector<1x8x128xf32> to vector<8x128xf32>
    %cst_439 = arith.constant dense<0.000000e+00> : vector<8x128xf32>
    %1080 = tpu.matmul %1075, %990, %cst_439 {dimension_numbers = #tpu.dot_dimension_numbers<[1], [0], [0], [1], [0, 0, 1, 1], [], []>} : vector<8x32xf32>, vector<32x128xf32>, vector<8x128xf32> -> vector<8x128xf32>
    %1081 = arith.addf %1079, %1080 : vector<8x128xf32>
    %1082 = vector.extract_strided_slice %1081 {offsets = [0, 0], sizes = [8, 32], strides = [1, 1]} : vector<8x128xf32> to vector<8x32xf32>
    %1083 = arith.negf %1082 : vector<8x32xf32>
    %1084 = math.exp %1083 : vector<8x32xf32>
    %cst_440 = arith.constant 1.000000e+00 : f32
    %1085 = vector.broadcast %cst_440 : f32 to vector<8x32xf32>
    %1086 = arith.addf %1085, %1084 : vector<8x32xf32>
    %1087 = arith.divf %1085, %1086 : vector<8x32xf32>
    %1088 = vector.extract_strided_slice %1081 {offsets = [0, 32], sizes = [8, 32], strides = [1, 1]} : vector<8x128xf32> to vector<8x32xf32>
    %1089 = arith.negf %1088 : vector<8x32xf32>
    %1090 = math.exp %1089 : vector<8x32xf32>
    %cst_441 = arith.constant 1.000000e+00 : f32
    %1091 = vector.broadcast %cst_441 : f32 to vector<8x32xf32>
    %1092 = arith.addf %1091, %1090 : vector<8x32xf32>
    %1093 = arith.divf %1091, %1092 : vector<8x32xf32>
    %1094 = vector.extract_strided_slice %1081 {offsets = [0, 64], sizes = [8, 32], strides = [1, 1]} : vector<8x128xf32> to vector<8x32xf32>
    %1095 = math.tanh %1094 : vector<8x32xf32>
    %1096 = vector.extract_strided_slice %1081 {offsets = [0, 96], sizes = [8, 32], strides = [1, 1]} : vector<8x128xf32> to vector<8x32xf32>
    %1097 = arith.negf %1096 : vector<8x32xf32>
    %1098 = math.exp %1097 : vector<8x32xf32>
    %cst_442 = arith.constant 1.000000e+00 : f32
    %1099 = vector.broadcast %cst_442 : f32 to vector<8x32xf32>
    %1100 = arith.addf %1099, %1098 : vector<8x32xf32>
    %1101 = arith.divf %1099, %1100 : vector<8x32xf32>
    %1102 = arith.mulf %1093, %1076 : vector<8x32xf32>
    %1103 = arith.mulf %1087, %1095 : vector<8x32xf32>
    %1104 = arith.addf %1102, %1103 : vector<8x32xf32>
    %1105 = math.tanh %1104 : vector<8x32xf32>
    %1106 = arith.mulf %1101, %1105 : vector<8x32xf32>
    %1107 = arith.index_cast %c2_i32_436 : i32 to index
    %c0_443 = arith.constant 0 : index
    %c0_444 = arith.constant 0 : index
    %1108 = vector.load %arg4[%1107, %c0_443, %c0_444] : memref<7x8x32xf32, #tpu.memory_space<vmem>>, vector<1x8x32xf32>
    %1109 = vector.shape_cast %1108 : vector<1x8x32xf32> to vector<8x32xf32>
    %cst_445 = arith.constant 5.000000e-01 : f32
    %1110 = vector.broadcast %cst_445 : f32 to vector<8x32xf32>
    %1111 = arith.cmpf ogt, %1109, %1110 : vector<8x32xf32>
    %cst_446 = arith.constant 0.000000e+00 : f32
    %1112 = vector.broadcast %cst_446 : f32 to vector<8x32xf32>
    %1113 = arith.select %1111, %1106, %1112 : vector<8x32xi1>, vector<8x32xf32>
    %1114 = arith.index_cast %c2_i32_436 : i32 to index
    %c0_447 = arith.constant 0 : index
    %c0_448 = arith.constant 0 : index
    %1115 = vector.load %arg26[%1114, %c0_447, %c0_448] : memref<7x8x32xf32, #tpu.memory_space<vmem>>, vector<1x8x32xf32>
    %1116 = vector.shape_cast %1115 : vector<1x8x32xf32> to vector<8x32xf32>
    %1117 = vector.shape_cast %1113 : vector<8x32xf32> to vector<1x8x32xf32>
    tpu.vector_store %arg26[%1114, %c0_447, %c0_448], %1117 {strides = array<i32>} : memref<7x8x32xf32, #tpu.memory_space<vmem>>, vector<1x8x32xf32>,
    %1118 = arith.select %1111, %1106, %1075 : vector<8x32xi1>, vector<8x32xf32>
    %1119 = arith.select %1111, %1104, %1076 : vector<8x32xi1>, vector<8x32xf32>
    %c3_i32_449 = arith.constant 3 : i32
    %1120 = arith.index_cast %c3_i32_449 : i32 to index
    %c0_450 = arith.constant 0 : index
    %c0_451 = arith.constant 0 : index
    %1121 = vector.load %arg25[%1120, %c0_450, %c0_451] : memref<7x8x128xf32, #tpu.memory_space<vmem>>, vector<1x8x128xf32>
    %1122 = vector.shape_cast %1121 : vector<1x8x128xf32> to vector<8x128xf32>
    %cst_452 = arith.constant dense<0.000000e+00> : vector<8x128xf32>
    %1123 = tpu.matmul %1118, %990, %cst_452 {dimension_numbers = #tpu.dot_dimension_numbers<[1], [0], [0], [1], [0, 0, 1, 1], [], []>} : vector<8x32xf32>, vector<32x128xf32>, vector<8x128xf32> -> vector<8x128xf32>
    %1124 = arith.addf %1122, %1123 : vector<8x128xf32>
    %1125 = vector.extract_strided_slice %1124 {offsets = [0, 0], sizes = [8, 32], strides = [1, 1]} : vector<8x128xf32> to vector<8x32xf32>
    %1126 = arith.negf %1125 : vector<8x32xf32>
    %1127 = math.exp %1126 : vector<8x32xf32>
    %cst_453 = arith.constant 1.000000e+00 : f32
    %1128 = vector.broadcast %cst_453 : f32 to vector<8x32xf32>
    %1129 = arith.addf %1128, %1127 : vector<8x32xf32>
    %1130 = arith.divf %1128, %1129 : vector<8x32xf32>
    %1131 = vector.extract_strided_slice %1124 {offsets = [0, 32], sizes = [8, 32], strides = [1, 1]} : vector<8x128xf32> to vector<8x32xf32>
    %1132 = arith.negf %1131 : vector<8x32xf32>
    %1133 = math.exp %1132 : vector<8x32xf32>
    %cst_454 = arith.constant 1.000000e+00 : f32
    %1134 = vector.broadcast %cst_454 : f32 to vector<8x32xf32>
    %1135 = arith.addf %1134, %1133 : vector<8x32xf32>
    %1136 = arith.divf %1134, %1135 : vector<8x32xf32>
    %1137 = vector.extract_strided_slice %1124 {offsets = [0, 64], sizes = [8, 32], strides = [1, 1]} : vector<8x128xf32> to vector<8x32xf32>
    %1138 = math.tanh %1137 : vector<8x32xf32>
    %1139 = vector.extract_strided_slice %1124 {offsets = [0, 96], sizes = [8, 32], strides = [1, 1]} : vector<8x128xf32> to vector<8x32xf32>
    %1140 = arith.negf %1139 : vector<8x32xf32>
    %1141 = math.exp %1140 : vector<8x32xf32>
    %cst_455 = arith.constant 1.000000e+00 : f32
    %1142 = vector.broadcast %cst_455 : f32 to vector<8x32xf32>
    %1143 = arith.addf %1142, %1141 : vector<8x32xf32>
    %1144 = arith.divf %1142, %1143 : vector<8x32xf32>
    %1145 = arith.mulf %1136, %1119 : vector<8x32xf32>
    %1146 = arith.mulf %1130, %1138 : vector<8x32xf32>
    %1147 = arith.addf %1145, %1146 : vector<8x32xf32>
    %1148 = math.tanh %1147 : vector<8x32xf32>
    %1149 = arith.mulf %1144, %1148 : vector<8x32xf32>
    %1150 = arith.index_cast %c3_i32_449 : i32 to index
    %c0_456 = arith.constant 0 : index
    %c0_457 = arith.constant 0 : index
    %1151 = vector.load %arg4[%1150, %c0_456, %c0_457] : memref<7x8x32xf32, #tpu.memory_space<vmem>>, vector<1x8x32xf32>
    %1152 = vector.shape_cast %1151 : vector<1x8x32xf32> to vector<8x32xf32>
    %cst_458 = arith.constant 5.000000e-01 : f32
    %1153 = vector.broadcast %cst_458 : f32 to vector<8x32xf32>
    %1154 = arith.cmpf ogt, %1152, %1153 : vector<8x32xf32>
    %cst_459 = arith.constant 0.000000e+00 : f32
    %1155 = vector.broadcast %cst_459 : f32 to vector<8x32xf32>
    %1156 = arith.select %1154, %1149, %1155 : vector<8x32xi1>, vector<8x32xf32>
    %1157 = arith.index_cast %c3_i32_449 : i32 to index
    %c0_460 = arith.constant 0 : index
    %c0_461 = arith.constant 0 : index
    %1158 = vector.load %arg26[%1157, %c0_460, %c0_461] : memref<7x8x32xf32, #tpu.memory_space<vmem>>, vector<1x8x32xf32>
    %1159 = vector.shape_cast %1158 : vector<1x8x32xf32> to vector<8x32xf32>
    %1160 = vector.shape_cast %1156 : vector<8x32xf32> to vector<1x8x32xf32>
    tpu.vector_store %arg26[%1157, %c0_460, %c0_461], %1160 {strides = array<i32>} : memref<7x8x32xf32, #tpu.memory_space<vmem>>, vector<1x8x32xf32>,
    %1161 = arith.select %1154, %1149, %1118 : vector<8x32xi1>, vector<8x32xf32>
    %1162 = arith.select %1154, %1147, %1119 : vector<8x32xi1>, vector<8x32xf32>
    %c4_i32_462 = arith.constant 4 : i32
    %1163 = arith.index_cast %c4_i32_462 : i32 to index
    %c0_463 = arith.constant 0 : index
    %c0_464 = arith.constant 0 : index
    %1164 = vector.load %arg25[%1163, %c0_463, %c0_464] : memref<7x8x128xf32, #tpu.memory_space<vmem>>, vector<1x8x128xf32>
    %1165 = vector.shape_cast %1164 : vector<1x8x128xf32> to vector<8x128xf32>
    %cst_465 = arith.constant dense<0.000000e+00> : vector<8x128xf32>
    %1166 = tpu.matmul %1161, %990, %cst_465 {dimension_numbers = #tpu.dot_dimension_numbers<[1], [0], [0], [1], [0, 0, 1, 1], [], []>} : vector<8x32xf32>, vector<32x128xf32>, vector<8x128xf32> -> vector<8x128xf32>
    %1167 = arith.addf %1165, %1166 : vector<8x128xf32>
    %1168 = vector.extract_strided_slice %1167 {offsets = [0, 0], sizes = [8, 32], strides = [1, 1]} : vector<8x128xf32> to vector<8x32xf32>
    %1169 = arith.negf %1168 : vector<8x32xf32>
    %1170 = math.exp %1169 : vector<8x32xf32>
    %cst_466 = arith.constant 1.000000e+00 : f32
    %1171 = vector.broadcast %cst_466 : f32 to vector<8x32xf32>
    %1172 = arith.addf %1171, %1170 : vector<8x32xf32>
    %1173 = arith.divf %1171, %1172 : vector<8x32xf32>
    %1174 = vector.extract_strided_slice %1167 {offsets = [0, 32], sizes = [8, 32], strides = [1, 1]} : vector<8x128xf32> to vector<8x32xf32>
    %1175 = arith.negf %1174 : vector<8x32xf32>
    %1176 = math.exp %1175 : vector<8x32xf32>
    %cst_467 = arith.constant 1.000000e+00 : f32
    %1177 = vector.broadcast %cst_467 : f32 to vector<8x32xf32>
    %1178 = arith.addf %1177, %1176 : vector<8x32xf32>
    %1179 = arith.divf %1177, %1178 : vector<8x32xf32>
    %1180 = vector.extract_strided_slice %1167 {offsets = [0, 64], sizes = [8, 32], strides = [1, 1]} : vector<8x128xf32> to vector<8x32xf32>
    %1181 = math.tanh %1180 : vector<8x32xf32>
    %1182 = vector.extract_strided_slice %1167 {offsets = [0, 96], sizes = [8, 32], strides = [1, 1]} : vector<8x128xf32> to vector<8x32xf32>
    %1183 = arith.negf %1182 : vector<8x32xf32>
    %1184 = math.exp %1183 : vector<8x32xf32>
    %cst_468 = arith.constant 1.000000e+00 : f32
    %1185 = vector.broadcast %cst_468 : f32 to vector<8x32xf32>
    %1186 = arith.addf %1185, %1184 : vector<8x32xf32>
    %1187 = arith.divf %1185, %1186 : vector<8x32xf32>
    %1188 = arith.mulf %1179, %1162 : vector<8x32xf32>
    %1189 = arith.mulf %1173, %1181 : vector<8x32xf32>
    %1190 = arith.addf %1188, %1189 : vector<8x32xf32>
    %1191 = math.tanh %1190 : vector<8x32xf32>
    %1192 = arith.mulf %1187, %1191 : vector<8x32xf32>
    %1193 = arith.index_cast %c4_i32_462 : i32 to index
    %c0_469 = arith.constant 0 : index
    %c0_470 = arith.constant 0 : index
    %1194 = vector.load %arg4[%1193, %c0_469, %c0_470] : memref<7x8x32xf32, #tpu.memory_space<vmem>>, vector<1x8x32xf32>
    %1195 = vector.shape_cast %1194 : vector<1x8x32xf32> to vector<8x32xf32>
    %cst_471 = arith.constant 5.000000e-01 : f32
    %1196 = vector.broadcast %cst_471 : f32 to vector<8x32xf32>
    %1197 = arith.cmpf ogt, %1195, %1196 : vector<8x32xf32>
    %cst_472 = arith.constant 0.000000e+00 : f32
    %1198 = vector.broadcast %cst_472 : f32 to vector<8x32xf32>
    %1199 = arith.select %1197, %1192, %1198 : vector<8x32xi1>, vector<8x32xf32>
    %1200 = arith.index_cast %c4_i32_462 : i32 to index
    %c0_473 = arith.constant 0 : index
    %c0_474 = arith.constant 0 : index
    %1201 = vector.load %arg26[%1200, %c0_473, %c0_474] : memref<7x8x32xf32, #tpu.memory_space<vmem>>, vector<1x8x32xf32>
    %1202 = vector.shape_cast %1201 : vector<1x8x32xf32> to vector<8x32xf32>
    %1203 = vector.shape_cast %1199 : vector<8x32xf32> to vector<1x8x32xf32>
    tpu.vector_store %arg26[%1200, %c0_473, %c0_474], %1203 {strides = array<i32>} : memref<7x8x32xf32, #tpu.memory_space<vmem>>, vector<1x8x32xf32>,
    %1204 = arith.select %1197, %1192, %1161 : vector<8x32xi1>, vector<8x32xf32>
    %1205 = arith.select %1197, %1190, %1162 : vector<8x32xi1>, vector<8x32xf32>
    %c5_i32_475 = arith.constant 5 : i32
    %1206 = arith.index_cast %c5_i32_475 : i32 to index
    %c0_476 = arith.constant 0 : index
    %c0_477 = arith.constant 0 : index
    %1207 = vector.load %arg25[%1206, %c0_476, %c0_477] : memref<7x8x128xf32, #tpu.memory_space<vmem>>, vector<1x8x128xf32>
    %1208 = vector.shape_cast %1207 : vector<1x8x128xf32> to vector<8x128xf32>
    %cst_478 = arith.constant dense<0.000000e+00> : vector<8x128xf32>
    %1209 = tpu.matmul %1204, %990, %cst_478 {dimension_numbers = #tpu.dot_dimension_numbers<[1], [0], [0], [1], [0, 0, 1, 1], [], []>} : vector<8x32xf32>, vector<32x128xf32>, vector<8x128xf32> -> vector<8x128xf32>
    %1210 = arith.addf %1208, %1209 : vector<8x128xf32>
    %1211 = vector.extract_strided_slice %1210 {offsets = [0, 0], sizes = [8, 32], strides = [1, 1]} : vector<8x128xf32> to vector<8x32xf32>
    %1212 = arith.negf %1211 : vector<8x32xf32>
    %1213 = math.exp %1212 : vector<8x32xf32>
    %cst_479 = arith.constant 1.000000e+00 : f32
    %1214 = vector.broadcast %cst_479 : f32 to vector<8x32xf32>
    %1215 = arith.addf %1214, %1213 : vector<8x32xf32>
    %1216 = arith.divf %1214, %1215 : vector<8x32xf32>
    %1217 = vector.extract_strided_slice %1210 {offsets = [0, 32], sizes = [8, 32], strides = [1, 1]} : vector<8x128xf32> to vector<8x32xf32>
    %1218 = arith.negf %1217 : vector<8x32xf32>
    %1219 = math.exp %1218 : vector<8x32xf32>
    %cst_480 = arith.constant 1.000000e+00 : f32
    %1220 = vector.broadcast %cst_480 : f32 to vector<8x32xf32>
    %1221 = arith.addf %1220, %1219 : vector<8x32xf32>
    %1222 = arith.divf %1220, %1221 : vector<8x32xf32>
    %1223 = vector.extract_strided_slice %1210 {offsets = [0, 64], sizes = [8, 32], strides = [1, 1]} : vector<8x128xf32> to vector<8x32xf32>
    %1224 = math.tanh %1223 : vector<8x32xf32>
    %1225 = vector.extract_strided_slice %1210 {offsets = [0, 96], sizes = [8, 32], strides = [1, 1]} : vector<8x128xf32> to vector<8x32xf32>
    %1226 = arith.negf %1225 : vector<8x32xf32>
    %1227 = math.exp %1226 : vector<8x32xf32>
    %cst_481 = arith.constant 1.000000e+00 : f32
    %1228 = vector.broadcast %cst_481 : f32 to vector<8x32xf32>
    %1229 = arith.addf %1228, %1227 : vector<8x32xf32>
    %1230 = arith.divf %1228, %1229 : vector<8x32xf32>
    %1231 = arith.mulf %1222, %1205 : vector<8x32xf32>
    %1232 = arith.mulf %1216, %1224 : vector<8x32xf32>
    %1233 = arith.addf %1231, %1232 : vector<8x32xf32>
    %1234 = math.tanh %1233 : vector<8x32xf32>
    %1235 = arith.mulf %1230, %1234 : vector<8x32xf32>
    %1236 = arith.index_cast %c5_i32_475 : i32 to index
    %c0_482 = arith.constant 0 : index
    %c0_483 = arith.constant 0 : index
    %1237 = vector.load %arg4[%1236, %c0_482, %c0_483] : memref<7x8x32xf32, #tpu.memory_space<vmem>>, vector<1x8x32xf32>
    %1238 = vector.shape_cast %1237 : vector<1x8x32xf32> to vector<8x32xf32>
    %cst_484 = arith.constant 5.000000e-01 : f32
    %1239 = vector.broadcast %cst_484 : f32 to vector<8x32xf32>
    %1240 = arith.cmpf ogt, %1238, %1239 : vector<8x32xf32>
    %cst_485 = arith.constant 0.000000e+00 : f32
    %1241 = vector.broadcast %cst_485 : f32 to vector<8x32xf32>
    %1242 = arith.select %1240, %1235, %1241 : vector<8x32xi1>, vector<8x32xf32>
    %1243 = arith.index_cast %c5_i32_475 : i32 to index
    %c0_486 = arith.constant 0 : index
    %c0_487 = arith.constant 0 : index
    %1244 = vector.load %arg26[%1243, %c0_486, %c0_487] : memref<7x8x32xf32, #tpu.memory_space<vmem>>, vector<1x8x32xf32>
    %1245 = vector.shape_cast %1244 : vector<1x8x32xf32> to vector<8x32xf32>
    %1246 = vector.shape_cast %1242 : vector<8x32xf32> to vector<1x8x32xf32>
    tpu.vector_store %arg26[%1243, %c0_486, %c0_487], %1246 {strides = array<i32>} : memref<7x8x32xf32, #tpu.memory_space<vmem>>, vector<1x8x32xf32>,
    %1247 = arith.select %1240, %1235, %1204 : vector<8x32xi1>, vector<8x32xf32>
    %1248 = arith.select %1240, %1233, %1205 : vector<8x32xi1>, vector<8x32xf32>
    %c6_i32_488 = arith.constant 6 : i32
    %1249 = arith.index_cast %c6_i32_488 : i32 to index
    %c0_489 = arith.constant 0 : index
    %c0_490 = arith.constant 0 : index
    %1250 = vector.load %arg25[%1249, %c0_489, %c0_490] : memref<7x8x128xf32, #tpu.memory_space<vmem>>, vector<1x8x128xf32>
    %1251 = vector.shape_cast %1250 : vector<1x8x128xf32> to vector<8x128xf32>
    %cst_491 = arith.constant dense<0.000000e+00> : vector<8x128xf32>
    %1252 = tpu.matmul %1247, %990, %cst_491 {dimension_numbers = #tpu.dot_dimension_numbers<[1], [0], [0], [1], [0, 0, 1, 1], [], []>} : vector<8x32xf32>, vector<32x128xf32>, vector<8x128xf32> -> vector<8x128xf32>
    %1253 = arith.addf %1251, %1252 : vector<8x128xf32>
    %1254 = vector.extract_strided_slice %1253 {offsets = [0, 0], sizes = [8, 32], strides = [1, 1]} : vector<8x128xf32> to vector<8x32xf32>
    %1255 = arith.negf %1254 : vector<8x32xf32>
    %1256 = math.exp %1255 : vector<8x32xf32>
    %cst_492 = arith.constant 1.000000e+00 : f32
    %1257 = vector.broadcast %cst_492 : f32 to vector<8x32xf32>
    %1258 = arith.addf %1257, %1256 : vector<8x32xf32>
    %1259 = arith.divf %1257, %1258 : vector<8x32xf32>
    %1260 = vector.extract_strided_slice %1253 {offsets = [0, 32], sizes = [8, 32], strides = [1, 1]} : vector<8x128xf32> to vector<8x32xf32>
    %1261 = arith.negf %1260 : vector<8x32xf32>
    %1262 = math.exp %1261 : vector<8x32xf32>
    %cst_493 = arith.constant 1.000000e+00 : f32
    %1263 = vector.broadcast %cst_493 : f32 to vector<8x32xf32>
    %1264 = arith.addf %1263, %1262 : vector<8x32xf32>
    %1265 = arith.divf %1263, %1264 : vector<8x32xf32>
    %1266 = vector.extract_strided_slice %1253 {offsets = [0, 64], sizes = [8, 32], strides = [1, 1]} : vector<8x128xf32> to vector<8x32xf32>
    %1267 = math.tanh %1266 : vector<8x32xf32>
    %1268 = vector.extract_strided_slice %1253 {offsets = [0, 96], sizes = [8, 32], strides = [1, 1]} : vector<8x128xf32> to vector<8x32xf32>
    %1269 = arith.negf %1268 : vector<8x32xf32>
    %1270 = math.exp %1269 : vector<8x32xf32>
    %cst_494 = arith.constant 1.000000e+00 : f32
    %1271 = vector.broadcast %cst_494 : f32 to vector<8x32xf32>
    %1272 = arith.addf %1271, %1270 : vector<8x32xf32>
    %1273 = arith.divf %1271, %1272 : vector<8x32xf32>
    %1274 = arith.mulf %1265, %1248 : vector<8x32xf32>
    %1275 = arith.mulf %1259, %1267 : vector<8x32xf32>
    %1276 = arith.addf %1274, %1275 : vector<8x32xf32>
    %1277 = math.tanh %1276 : vector<8x32xf32>
    %1278 = arith.mulf %1273, %1277 : vector<8x32xf32>
    %1279 = arith.index_cast %c6_i32_488 : i32 to index
    %c0_495 = arith.constant 0 : index
    %c0_496 = arith.constant 0 : index
    %1280 = vector.load %arg4[%1279, %c0_495, %c0_496] : memref<7x8x32xf32, #tpu.memory_space<vmem>>, vector<1x8x32xf32>
    %1281 = vector.shape_cast %1280 : vector<1x8x32xf32> to vector<8x32xf32>
    %cst_497 = arith.constant 5.000000e-01 : f32
    %1282 = vector.broadcast %cst_497 : f32 to vector<8x32xf32>
    %1283 = arith.cmpf ogt, %1281, %1282 : vector<8x32xf32>
    %cst_498 = arith.constant 0.000000e+00 : f32
    %1284 = vector.broadcast %cst_498 : f32 to vector<8x32xf32>
    %1285 = arith.select %1283, %1278, %1284 : vector<8x32xi1>, vector<8x32xf32>
    %1286 = arith.index_cast %c6_i32_488 : i32 to index
    %c0_499 = arith.constant 0 : index
    %c0_500 = arith.constant 0 : index
    %1287 = vector.load %arg26[%1286, %c0_499, %c0_500] : memref<7x8x32xf32, #tpu.memory_space<vmem>>, vector<1x8x32xf32>
    %1288 = vector.shape_cast %1287 : vector<1x8x32xf32> to vector<8x32xf32>
    %1289 = vector.shape_cast %1285 : vector<8x32xf32> to vector<1x8x32xf32>
    tpu.vector_store %arg26[%1286, %c0_499, %c0_500], %1289 {strides = array<i32>} : memref<7x8x32xf32, #tpu.memory_space<vmem>>, vector<1x8x32xf32>,
    %1290 = arith.select %1283, %1278, %1247 : vector<8x32xi1>, vector<8x32xf32>
    %1291 = arith.select %1283, %1276, %1248 : vector<8x32xi1>, vector<8x32xf32>
    %c7_i32_501 = arith.constant 7 : i32
    %c0_502 = arith.constant 0 : index
    %c0_503 = arith.constant 0 : index
    %c0_504 = arith.constant 0 : index
    %1292 = vector.load %arg26[%c0_502, %c0_503, %c0_504] : memref<7x8x32xf32, #tpu.memory_space<vmem>>, vector<7x8x32xf32>
    %1293 = vector.shape_cast %1292 : vector<7x8x32xf32> to vector<56x32xf32>
    %c0_505 = arith.constant 0 : index
    %c0_506 = arith.constant 0 : index
    %1294 = vector.load %arg18[%c0_505, %c0_506] : memref<32x12xf32, #tpu.memory_space<vmem>>, vector<32x12xf32>
    %cst_507 = arith.constant dense<0.000000e+00> : vector<56x12xf32>
    %1295 = tpu.matmul %1293, %1294, %cst_507 {dimension_numbers = #tpu.dot_dimension_numbers<[1], [0], [0], [1], [0, 0, 1, 1], [], []>} : vector<56x32xf32>, vector<32x12xf32>, vector<56x12xf32> -> vector<56x12xf32>
    %c0_508 = arith.constant 0 : index
    %c0_509 = arith.constant 0 : index
    %1296 = vector.load %arg19[%c0_508, %c0_509] : memref<1x12xf32, #tpu.memory_space<vmem>>, vector<1x12xf32>
    %1297 = vector.broadcast %1296 : vector<1x12xf32> to vector<56x12xf32>
    %1298 = arith.addf %1295, %1297 : vector<56x12xf32>
    %c0_510 = arith.constant 0 : index
    %c0_511 = arith.constant 0 : index
    %1299 = vector.load %arg6[%c0_510, %c0_511] : memref<56x1xi32, #tpu.memory_space<vmem>>, vector<56x1xi32>
    %c-1_i32 = arith.constant -1 : i32
    %1300 = vector.broadcast %c-1_i32 : i32 to vector<56x1xi32>
    %1301 = arith.cmpi ne, %1299, %1300 : vector<56x1xi32>
    %cst_512 = arith.constant dense<0xFF800000> : vector<56xf32>
    %1302 = vector.multi_reduction <maximumf>, %1298, %cst_512 [1] : vector<56x12xf32> to vector<56xf32>
    %1303 = vector.shape_cast %1302 : vector<56xf32> to vector<56x1xf32>
    %1304 = vector.broadcast %1303 : vector<56x1xf32> to vector<56x12xf32>
    %1305 = arith.subf %1298, %1304 : vector<56x12xf32>
    %1306 = math.exp %1305 : vector<56x12xf32>
    %cst_513 = arith.constant dense<0.000000e+00> : vector<56xf32>
    %1307 = vector.multi_reduction <add>, %1306, %cst_513 [1] : vector<56x12xf32> to vector<56xf32>
    %1308 = vector.shape_cast %1307 : vector<56xf32> to vector<56x1xf32>
    %1309 = math.log %1308 : vector<56x1xf32>
    %1310 = vector.broadcast %1309 : vector<56x1xf32> to vector<56x12xf32>
    %1311 = arith.subf %1305, %1310 : vector<56x12xf32>
    %1312 = tpu.iota {dimensions = array<i32: 1>} : vector<56x12xi32>
    %c0_i32_514 = arith.constant 0 : i32
    %1313 = vector.broadcast %c0_i32_514 : i32 to vector<56x1xi32>
    %1314 = arith.select %1301, %1299, %1313 : vector<56x1xi1>, vector<56x1xi32>
    %1315 = vector.broadcast %1314 : vector<56x1xi32> to vector<56x12xi32>
    %1316 = arith.cmpi eq, %1312, %1315 : vector<56x12xi32>
    %cst_515 = arith.constant -0.105360515 : f32
    %1317 = vector.broadcast %cst_515 : f32 to vector<56x12xf32>
    %1318 = arith.subf %1317, %1311 : vector<56x12xf32>
    %cst_516 = arith.constant 0.899999976 : f32
    %1319 = vector.broadcast %cst_516 : f32 to vector<56x12xf32>
    %1320 = arith.mulf %1319, %1318 : vector<56x12xf32>
    %cst_517 = arith.constant -4.70048046 : f32
    %1321 = vector.broadcast %cst_517 : f32 to vector<56x12xf32>
    %1322 = arith.subf %1321, %1311 : vector<56x12xf32>
    %cst_518 = arith.constant 0.0090909088 : f32
    %1323 = vector.broadcast %cst_518 : f32 to vector<56x12xf32>
    %1324 = arith.mulf %1323, %1322 : vector<56x12xf32>
    %1325 = arith.select %1316, %1320, %1324 : vector<56x12xi1>, vector<56x12xf32>
    %cst_519 = arith.constant dense<0.000000e+00> : vector<56xf32>
    %1326 = vector.multi_reduction <add>, %1325, %cst_519 [1] : vector<56x12xf32> to vector<56xf32>
    %1327 = vector.shape_cast %1326 : vector<56xf32> to vector<56x1xf32>
    %cst_520 = arith.constant 0.000000e+00 : f32
    %1328 = vector.broadcast %cst_520 : f32 to vector<56x1xf32>
    %1329 = arith.select %1301, %1327, %1328 : vector<56x1xi1>, vector<56x1xf32>
    %cst_521 = arith.constant dense<0.000000e+00> : vector<1xf32>
    %1330 = vector.multi_reduction <add>, %1329, %cst_521 [0] : vector<56x1xf32> to vector<1xf32>
    %1331 = vector.shape_cast %1330 : vector<1xf32> to vector<1x1xf32>
    %cst_522 = arith.constant 5.000000e-01 : f32
    %1332 = vector.broadcast %cst_522 : f32 to vector<1x1xf32>
    %1333 = arith.mulf %1331, %1332 : vector<1x1xf32>
    %c0_523 = arith.constant 0 : index
    %c0_524 = arith.constant 0 : index
    %1334 = vector.load %arg20[%c0_523, %c0_524] : memref<1x1xf32, #tpu.memory_space<vmem>>, vector<1x1xf32>
    tpu.vector_store %arg20[%c0_523, %c0_524], %1333 {strides = array<i32>} : memref<1x1xf32, #tpu.memory_space<vmem>>, vector<1x1xf32>,
    %1335 = vector.broadcast %1303 : vector<56x1xf32> to vector<56x12xf32>
    %1336 = arith.cmpf oeq, %1298, %1335 : vector<56x12xf32>
    %1337 = arith.sitofp %1312 : vector<56x12xi32> to vector<56x12xf32>
    %cst_525 = arith.constant 1.200000e+01 : f32
    %1338 = vector.broadcast %cst_525 : f32 to vector<56x12xf32>
    %1339 = arith.select %1336, %1337, %1338 : vector<56x12xi1>, vector<56x12xf32>
    %cst_526 = arith.constant dense<0x7F800000> : vector<56xf32>
    %1340 = vector.multi_reduction <minimumf>, %1339, %cst_526 [1] : vector<56x12xf32> to vector<56xf32>
    %1341 = vector.shape_cast %1340 : vector<56xf32> to vector<56x1xf32>
    %1342 = arith.sitofp %1299 : vector<56x1xi32> to vector<56x1xf32>
    %1343 = arith.cmpf oeq, %1341, %1342 : vector<56x1xf32>
    %1344 = arith.andi %1343, %1301 : vector<56x1xi1>
    %1345 = arith.extui %1344 : vector<56x1xi1> to vector<56x1xi32>
    %1346 = arith.sitofp %1345 : vector<56x1xi32> to vector<56x1xf32>
    %cst_527 = arith.constant dense<0.000000e+00> : vector<1xf32>
    %1347 = vector.multi_reduction <add>, %1346, %cst_527 [0] : vector<56x1xf32> to vector<1xf32>
    %1348 = vector.shape_cast %1347 : vector<1xf32> to vector<1x1xf32>
    %1349 = arith.extui %1301 : vector<56x1xi1> to vector<56x1xi32>
    %1350 = arith.sitofp %1349 : vector<56x1xi32> to vector<56x1xf32>
    %cst_528 = arith.constant dense<0.000000e+00> : vector<1xf32>
    %1351 = vector.multi_reduction <add>, %1350, %cst_528 [0] : vector<56x1xf32> to vector<1xf32>
    %1352 = vector.shape_cast %1351 : vector<1xf32> to vector<1x1xf32>
    %cst_529 = arith.constant 1.000000e+00 : f32
    %1353 = vector.broadcast %cst_529 : f32 to vector<1x1xf32>
    %1354 = arith.maximumf %1352, %1353 : vector<1x1xf32>
    %1355 = arith.divf %1348, %1354 : vector<1x1xf32>
    %c0_530 = arith.constant 0 : index
    %c0_531 = arith.constant 0 : index
    %1356 = vector.load %arg21[%c0_530, %c0_531] : memref<1x1xf32, #tpu.memory_space<vmem>>, vector<1x1xf32>
    tpu.vector_store %arg21[%c0_530, %c0_531], %1355 {strides = array<i32>} : memref<1x1xf32, #tpu.memory_space<vmem>>, vector<1x1xf32>,
    return
  }
  func.func @transform_0(%arg0: i32) -> (i32, i32) {
    %c0_i32 = arith.constant 0 : i32
    %c0_i32_0 = arith.constant 0 : i32
    %c0_i32_1 = arith.constant 0 : i32
    return %c0_i32, %c0_i32_0 : i32, i32
  }
  func.func @transform_1(%arg0: i32) -> (i32, i32) {
    %c0_i32 = arith.constant 0 : i32
    %c0_i32_0 = arith.constant 0 : i32
    %c0_i32_1 = arith.constant 0 : i32
    return %c0_i32, %c0_i32_0 : i32, i32
  }
  func.func @transform_2(%arg0: i32) -> (i32, i32, i32) {
    %c0_i32 = arith.constant 0 : i32
    %c0_i32_0 = arith.constant 0 : i32
    %c0_i32_1 = arith.constant 0 : i32
    %c0_i32_2 = arith.constant 0 : i32
    return %c0_i32, %c0_i32_0, %c0_i32_1 : i32, i32, i32
  }
  func.func @transform_3(%arg0: i32) -> (i32, i32, i32) {
    %c0_i32 = arith.constant 0 : i32
    %c0_i32_0 = arith.constant 0 : i32
    %c0_i32_1 = arith.constant 0 : i32
    %c0_i32_2 = arith.constant 0 : i32
    return %c0_i32, %c0_i32_0, %c0_i32_1 : i32, i32, i32
  }
  func.func @transform_4(%arg0: i32) -> (i32, i32, i32) {
    %c0_i32 = arith.constant 0 : i32
    %c0_i32_0 = arith.constant 0 : i32
    %c0_i32_1 = arith.constant 0 : i32
    %c0_i32_2 = arith.constant 0 : i32
    return %c0_i32, %c0_i32_0, %c0_i32_1 : i32, i32, i32
  }
  func.func @transform_5(%arg0: i32) -> (i32, i32) {
    %c0_i32 = arith.constant 0 : i32
    %c0_i32_0 = arith.constant 0 : i32
    %c0_i32_1 = arith.constant 0 : i32
    return %c0_i32, %c0_i32_0 : i32, i32
  }
  func.func @transform_6(%arg0: i32) -> (i32, i32) {
    %c0_i32 = arith.constant 0 : i32
    %c0_i32_0 = arith.constant 0 : i32
    %c0_i32_1 = arith.constant 0 : i32
    return %c0_i32, %c0_i32_0 : i32, i32
  }
  func.func @transform_7(%arg0: i32) -> (i32, i32) {
    %c0_i32 = arith.constant 0 : i32
    %c0_i32_0 = arith.constant 0 : i32
    %c0_i32_1 = arith.constant 0 : i32
    return %c0_i32, %c0_i32_0 : i32, i32
  }
  func.func @transform_8(%arg0: i32) -> (i32, i32) {
    %c0_i32 = arith.constant 0 : i32
    %c0_i32_0 = arith.constant 0 : i32
    %c0_i32_1 = arith.constant 0 : i32
    return %c0_i32, %c0_i32_0 : i32, i32
  }
  func.func @transform_9(%arg0: i32) -> (i32, i32) {
    %c0_i32 = arith.constant 0 : i32
    %c0_i32_0 = arith.constant 0 : i32
    %c0_i32_1 = arith.constant 0 : i32
    return %c0_i32, %c0_i32_0 : i32, i32
  }
  func.func @transform_10(%arg0: i32) -> (i32, i32) {
    %c0_i32 = arith.constant 0 : i32
    %c0_i32_0 = arith.constant 0 : i32
    %c0_i32_1 = arith.constant 0 : i32
    return %c0_i32, %c0_i32_0 : i32, i32
  }
  func.func @transform_11(%arg0: i32) -> (i32, i32) {
    %c0_i32 = arith.constant 0 : i32
    %c0_i32_0 = arith.constant 0 : i32
    %c0_i32_1 = arith.constant 0 : i32
    return %c0_i32, %c0_i32_0 : i32, i32
  }
  func.func @transform_12(%arg0: i32) -> (i32, i32) {
    %c0_i32 = arith.constant 0 : i32
    %c0_i32_0 = arith.constant 0 : i32
    %c0_i32_1 = arith.constant 0 : i32
    return %c0_i32, %c0_i32_0 : i32, i32
  }
  func.func @transform_13(%arg0: i32) -> (i32, i32) {
    %c0_i32 = arith.constant 0 : i32
    %c0_i32_0 = arith.constant 0 : i32
    %c0_i32_1 = arith.constant 0 : i32
    return %c0_i32, %c0_i32_0 : i32, i32
  }
  func.func @transform_14(%arg0: i32) -> (i32, i32) {
    %c0_i32 = arith.constant 0 : i32
    %c0_i32_0 = arith.constant 0 : i32
    %c0_i32_1 = arith.constant 0 : i32
    return %c0_i32, %c0_i32_0 : i32, i32
  }
  func.func @transform_15(%arg0: i32) -> (i32, i32) {
    %c0_i32 = arith.constant 0 : i32
    %c0_i32_0 = arith.constant 0 : i32
    %c0_i32_1 = arith.constant 0 : i32
    return %c0_i32, %c0_i32_0 : i32, i32
  }
  func.func @transform_16(%arg0: i32) -> (i32, i32) {
    %c0_i32 = arith.constant 0 : i32
    %c0_i32_0 = arith.constant 0 : i32
    %c0_i32_1 = arith.constant 0 : i32
    return %c0_i32, %c0_i32_0 : i32, i32
  }
  func.func @transform_17(%arg0: i32) -> (i32, i32) {
    %c0_i32 = arith.constant 0 : i32
    %c0_i32_0 = arith.constant 0 : i32
    %c0_i32_1 = arith.constant 0 : i32
    return %c0_i32, %c0_i32_0 : i32, i32
  }
  func.func @transform_18(%arg0: i32) -> (i32, i32) {
    %c0_i32 = arith.constant 0 : i32
    %c0_i32_0 = arith.constant 0 : i32
    %c0_i32_1 = arith.constant 0 : i32
    return %c0_i32, %c0_i32_0 : i32, i32
  }
  func.func @transform_19(%arg0: i32) -> (i32, i32) {
    %c0_i32 = arith.constant 0 : i32
    %c0_i32_0 = arith.constant 0 : i32
    %c0_i32_1 = arith.constant 0 : i32
    return %c0_i32, %c0_i32_0 : i32, i32
  }
  func.func @transform_20(%arg0: i32) -> (i32, i32) {
    %c0_i32 = arith.constant 0 : i32
    %c0_i32_0 = arith.constant 0 : i32
    %c0_i32_1 = arith.constant 0 : i32
    return %c0_i32, %c0_i32_0 : i32, i32
  }
}

</mosaic_0001>

<bundles_post_ra>
// kernel: model_forward.1
= control target key start
LH: loop header
LB: loop body
LE: loop exit
PB: predicated region body
PF: predicated region fallthrough
CT: control target
= control target key end

     0   :  { %s6721_s0 = inlined_call_operand.vmem [shape: f32[64,32], index: 0, kind: input, shape index: {}]   ;;  %s6722_s1 = inlined_call_operand.vmem [shape: f32[56,32], index: 1, kind: input, shape index: {}]   ;;  %s6723_s2 = inlined_call_operand.vmem [shape: f32[8,8,64], index: 2, kind: input, shape index: {}]   ;;  %s6724_s3 = inlined_call_operand.vmem [shape: f32[7,8,32], index: 3, kind: input, shape index: {}]   ;;  %s6725_s4 = inlined_call_operand.vmem [shape: f32[8,8,1], index: 4, kind: input, shape index: {}]   ;;  %s6726_s5 = inlined_call_operand.vmem [shape: s32[56,1], index: 5, kind: input, shape index: {}]   ;;  %s6727_s6 = inlined_call_operand.vmem [shape: f32[32,256], index: 6, kind: input, shape index: {}]   ;;  %s6728_s7 = inlined_call_operand.vmem [shape: f32[64,256], index: 7, kind: input, shape index: {}]   ;;  %s6729_s8 = inlined_call_operand.vmem [shape: f32[64,256], index: 8, kind: input, shape index: {}]   ;;  %s6730_s9 = inlined_call_operand.vmem [shape: f32[64,256], index: 9, kind: input, shape index: {}]   ;;  %s6731_s10 = inlined_call_operand.vmem [shape: f32[64,2], index: 10, kind: input, shape index: {}]   ;;  %s6732_s11 = inlined_call_operand.vmem [shape: f32[1,2], index: 11, kind: input, shape index: {}]   ;;  %s6733_s12 = inlined_call_operand.vmem [shape: f32[64,32], index: 12, kind: input, shape index: {}]   ;;  %s6734_s13 = inlined_call_operand.vmem [shape: f32[1,32], index: 13, kind: input, shape index: {}]   ;;  %s6735_s14 = inlined_call_operand.vmem [shape: f32[32,128], index: 14, kind: input, shape index: {}]   ;;  %s6736_s15 = inlined_call_operand.vmem [shape: f32[32,128], index: 15, kind: input, shape index: {}]   ;;  %s6737_s16 = inlined_call_operand.vmem [shape: f32[1,128], index: 16, kind: input, shape index: {}]   ;;  %s6738_s17 = inlined_call_operand.vmem [shape: f32[32,12], index: 17, kind: input, shape index: {}]   ;;  %s6739_s18 = inlined_call_operand.vmem [shape: f32[1,12], index: 18, kind: input, shape index: {}]   ;;  %s6740_s19 = inlined_call_operand.hbm [shape: f32[1,1], index: 19, kind: output, shape index: {0}]   ;;  %s6741_s20 = inlined_call_operand.hbm [shape: f32[1,1], index: 20, kind: output, shape index: {1}]  }
   0x1   :  { %6749 = sst [smem:[#allocation13_spill]] %s6721_s0 }
   0x2   :  { %6750 = sst [smem:[#allocation14_spill]] %s6722_s1 }
   0x3   :  { %6751 = sst [smem:[#allocation15_spill]] %s6723_s2 }
   0x4   :  { %6752 = sst [smem:[#allocation16_spill]] %s6724_s3 }
   0x5   :  { %6753 = sst [smem:[#allocation17_spill]] %s6725_s4 }
   0x6   :  { %26 = vsyncpa [#allocation8], 0  ;;  %v109_v0 = vld [vmem:[%s6727_s6 + $0x30] sm:$0xff]  ;;  %v110_v1 = vld [vmem:[%s6727_s6 + $0x38] sm:$0xff]  ;;  %s6754_s25 = sld [smem:[#allocation13_spill]]  ;;  %vm111_vm0 = vcmask 261120  }
   0x7   :  { %v107_v2 = vld [vmem:[%s6727_s6 + $0x20] sm:$0xff]  ;;  %148 = vmatpush.msra.mxu0 %v109_v0  ;;  %189 = vmatpush.msra.mxu1 %v110_v1  ;;  %v108_v3 = vld [vmem:[%s6727_s6 + $0x28] sm:$0xff]  ;;  %v105_v4 = vld [vmem:[%s6727_s6 + $0x10] sm:$0xff] }
   0x8   :  { %v106_v5 = vld [vmem:[%s6727_s6 + $0x18] sm:$0xff]  ;;  %4364 = vmatpush.msra.mxu2 %v110_v1  ;;  %v103_v6 = vld [vmem:[%s6727_s6] sm:$0xff]  ;;  %v104_v7 = vld [vmem:[%s6727_s6 + $0x8] sm:$0xff] }
   0x9   :  { %149 = vmatpush.msra.mxu0 %v107_v2  ;;  %190 = vmatpush.msra.mxu1 %v108_v3  ;;  %v4877_v8 = vld [vmem:[%s6728_s7 + $0x78] sm:$0xff]  ;;  %v4886_v10 = vld [vmem:[%s6728_s7 + $0x68] sm:$0xff]  ;;  %v4898_v12 = vld [vmem:[%s6728_s7 + $0x70] sm:$0xff] }
   0xa   :  { %4365 = vmatpush.msra.mxu2 %v108_v3  ;;  %339 = vmatpush.msra.mxu3 %v4877_v8  ;;  %v4903_v13 = vld [vmem:[%s6728_s7 + $0x58] sm:$0xff]  ;;  %v4909_v14 = vld [vmem:[%s6728_s7 + $0x48] sm:$0xff]  ;;  %v4914_v15 = vld [vmem:[%s6728_s7 + $0x60] sm:$0xff] }
   0xb   :  { %150 = vmatpush.msra.mxu0 %v105_v4  ;;  %191 = vmatpush.msra.mxu1 %v106_v5 }
   0xc   :  { %v95_v9 = vld [vmem:[%s6754_s25] sm:$0xff]  ;;  %4366 = vmatpush.msra.mxu2 %v106_v5  ;;  %340 = vmatpush.msra.mxu3 %v4886_v10 }
   0xd   :  { %151 = vmatpush.msra.mxu0 %v103_v6  ;;  %192 = vmatpush.msra.mxu1 %v104_v7  ;;  %v4891_v11 = vld [vmem:[%s6754_s25 + $0x20] sm:$0xff] }
   0xe   :  { %4162 = vmatmul.msk.f32.vlgmr.msra.gmra.mxu0 %vm111_vm0, %v95_v9  ;;  %4170 = vmatmul.msk.f32.vlgmr.msra.gmra.mxu1 %vm111_vm0, %v95_v9 }
   0xf   :  { %4367 = vmatpush.msra.mxu2 %v104_v7  ;;  %815 = vmatpush.msrb.mxu1 %v4877_v8 }
  0x10   :  { %4174 = vmatmul.msk.f32.vlgmr.msra.gmra.mxu2 %vm111_vm0, %v4891_v11  ;;  %341 = vmatpush.msra.mxu3 %v4903_v13 }
  0x11   :  { %319 = vmatpush.msrb.mxu2 %v4898_v12 }
  0x12   :  { %27 = vsyncpa [#allocation10], 0  ;;  %v4924_v16 = vld [vmem:[%s6728_s7 + $0x38] sm:$0xff]  ;;  %v4929_v17 = vld [vmem:[%s6728_s7 + $0x50] sm:$0xff]  ;;  %816 = vmatpush.msrb.mxu1 %v4886_v10  ;;  %1037 = vmatpush.msrb.mxu0 %v4898_v12  ;;  %v6747_v28 = vmov 0.0   ;;  %v66_v42 = vlaneseq  ;;  %s6759_s3 = sld [smem:[#allocation15_spill]] }
  0x13   :  { %v96_v18 = vld [vmem:[%s6754_s25 + $0x8] sm:$0xff]  ;;  %342 = vmatpush.msra.mxu3 %v4909_v14  ;;  %320 = vmatpush.msrb.mxu2 %v4914_v15  ;;  %v4946_v20 = vld [vmem:[%s6728_s7 + $0x40] sm:$0xff]  ;;  %v4962_v22 = vld [vmem:[%s6728_s7 + $0x18] sm:$0xff]  ;;  %vm307_vm12 = vcmask 523264   ;;  %s4739_s24 = smov 96   ;;  %s6765_s26 = sld [smem:[#allocation14_spill]] }
  0x14   :  { %v4941_v19 = vld [vmem:[%s6728_s7 + $0x28] sm:$0xff]  ;;  %817 = vmatpush.msrb.mxu1 %v4903_v13  ;;  %1038 = vmatpush.msrb.mxu0 %v4914_v15  ;;  %v4967_v23 = vld [vmem:[%s6728_s7 + $0x30] sm:$0xff]  ;;  %v4981_v25 = vld [vmem:[%s6728_s7 + $0x20] sm:$0xff]  ;;  %v5098_v45 = vand.u32 127, %v66_v42 }
  0x15   :  { %v4953_v21 = vld [vmem:[%s6754_s25 + $0x28] sm:$0xff]  ;;  %343 = vmatpush.msra.mxu3 %v4924_v16  ;;  %321 = vmatpush.msrb.mxu2 %v4929_v17  ;;  %v4989_v26 = vld [vmem:[%s6728_s7 + $0x10] sm:$0xff]  ;;  %v5002_v29 = vld [vmem:[%s6728_s7] sm:$0xff] }
  0x16   :  { %4163 = vmatmul.msk.f32.gmra.mxu0 %vm111_vm0, %v96_v18  ;;  %4171 = vmatmul.msk.f32.gmra.mxu1 %vm111_vm0, %v96_v18  ;;  %v4976_v24 = vld [vmem:[%s6728_s7 + $0x8] sm:$0xff]  ;;  %v97_v27 = vld [vmem:[%s6754_s25 + $0x10] sm:$0xff]  ;;  %v98_v31 = vld [vmem:[%s6754_s25 + $0x18] sm:$0xff]  ;;  %v73_v46 = vand.u32 63, %v5098_v45  ;;  %v68_v53 = vadd.s32 128, %v5098_v45 }
  0x17   :  { %344 = vmatpush.msra.mxu3 %v4941_v19  ;;  %322 = vmatpush.msrb.mxu2 %v4946_v20  ;;  %v101_v30 = vld [vmem:[%s6754_s25 + $0x30] sm:$0xff]  ;;  %v102_v32 = vld [vmem:[%s6754_s25 + $0x38] sm:$0xff]  ;;  %s4738_s25 = smov 64  }
  0x18   :  { %4175 = vmatmul.msk.f32.gmra.mxu2 %vm111_vm0, %v4953_v21  ;;  %818 = vmatpush.msrb.mxu1 %v4909_v14  ;;  %vm5103_vm1 = vcmp.lt.s32.totalorder %v73_v46, 32  ;;  %v80_v56 = vand.u32 63, %v68_v53 }
  0x19   :  { %345 = vmatpush.msra.mxu3 %v4962_v22  ;;  %323 = vmatpush.msrb.mxu2 %v4967_v23 }
  0x1a   :  { %819 = vmatpush.msrb.mxu1 %v4924_v16  ;;  %1039 = vmatpush.msrb.mxu0 %v4929_v17  ;;  %vm5114_vm2 = vcmp.lt.s32.totalorder %v80_v56, 32 }
  0x1b   :  { %346 = vmatpush.msra.mxu3 %v4976_v24  ;;  %324 = vmatpush.msrb.mxu2 %v4981_v25 }
  0x1c   :  { %347 = vmatmul.f32.vlgmr.msra.gmra.mxu3 %v6747_v28  ;;  %820 = vmatpush.msrb.mxu1 %v4941_v19 }
  0x1d   :  { %325 = vmatpush.msrb.mxu2 %v4989_v26  ;;  %452 = vmatpush.msrb.mxu3 %v4877_v8 }
  0x1e   :  { %4164 = vmatmul.msk.f32.gmra.mxu0 %vm111_vm0, %v97_v27  ;;  %4172 = vmatmul.msk.f32.gmra.mxu1 %vm111_vm0, %v97_v27 }
  0x1f   :  { %326 = vmatpush.msrb.mxu2 %v5002_v29  ;;  %453 = vmatpush.msrb.mxu3 %v4886_v10 }
  0x20   :  { %4176 = vmatmul.msk.f32.gmra.mxu2 %vm111_vm0, %v101_v30  ;;  %821 = vmatpush.msrb.mxu1 %v4962_v22 }
  0x21   :  { %432 = vmatpush.msra.mxu2 %v4898_v12  ;;  %454 = vmatpush.msrb.mxu3 %v4903_v13 }
  0x22   :  { %822 = vmatpush.msrb.mxu1 %v4976_v24  ;;  %1040 = vmatpush.msrb.mxu0 %v4946_v20 }
  0x23   :  { %433 = vmatpush.msra.mxu2 %v4914_v15  ;;  %455 = vmatpush.msrb.mxu3 %v4909_v14 }
  0x24   :  { %1041 = vmatpush.msrb.mxu0 %v4967_v23  ;;  %1057 = vmatpush.msra.mxu1 %v4877_v8 }
  0x25   :  { %434 = vmatpush.msra.mxu2 %v4929_v17  ;;  %456 = vmatpush.msrb.mxu3 %v4924_v16 }
  0x26   :  { %4165 = vmatmul.msk.f32.gmra.mxu0 %vm111_vm0, %v98_v31  ;;  %4173 = vmatmul.msk.f32.gmra.mxu1 %vm111_vm0, %v98_v31 }
  0x27   :  { %435 = vmatpush.msra.mxu2 %v4946_v20  ;;  %457 = vmatpush.msrb.mxu3 %v4941_v19 }
  0x28   :  { %4177 = vmatmul.msk.f32.gmra.mxu2 %vm111_vm0, %v102_v32  ;;  %1042 = vmatpush.msrb.mxu0 %v4981_v25 }
  0x29   :  { %436 = vmatpush.msra.mxu2 %v4967_v23  ;;  %458 = vmatpush.msrb.mxu3 %v4962_v22 }
  0x2a   :  { %1043 = vmatpush.msrb.mxu0 %v4989_v26  ;;  %1058 = vmatpush.msra.mxu1 %v4886_v10 }
  0x2b   :  { %437 = vmatpush.msra.mxu2 %v4981_v25  ;;  %459 = vmatpush.msrb.mxu3 %v4976_v24 }
  0x2c   :  { %1059 = vmatpush.msra.mxu1 %v4903_v13  ;;  %1044 = vmatpush.msrb.mxu0 %v5002_v29 }
  0x2d   :  { %573 = vmatpush.msra.mxu3 %v4877_v8  ;;  %438 = vmatpush.msra.mxu2 %v4989_v26 }
  0x2e   :  { %4166 = vmatmul.msk.f32.gmra.mxu0 %vm111_vm0, %v4891_v11  ;;  %1060 = vmatpush.msra.mxu1 %v4909_v14 }
  0x2f   :  { %574 = vmatpush.msra.mxu3 %v4886_v10  ;;  %439 = vmatpush.msra.mxu2 %v5002_v29 }
  0x30   :  { %327 = vmatmul.f32.vlgmr.msrb.gmra.mxu2 %v6747_v28  ;;  %1061 = vmatpush.msra.mxu1 %v4924_v16 }
  0x31   :  { %575 = vmatpush.msra.mxu3 %v4903_v13  ;;  %553 = vmatpush.msrb.mxu2 %v4898_v12 }
  0x32   :  { %1062 = vmatpush.msra.mxu1 %v4941_v19 }
  0x33   :  { %576 = vmatpush.msra.mxu3 %v4909_v14  ;;  %554 = vmatpush.msrb.mxu2 %v4914_v15 }
  0x34   :  { %1063 = vmatpush.msra.mxu1 %v4962_v22 }
  0x35   :  { %577 = vmatpush.msra.mxu3 %v4924_v16  ;;  %555 = vmatpush.msrb.mxu2 %v4929_v17 }
  0x36   :  { %4167 = vmatmul.msk.f32.gmra.mxu0 %vm111_vm0, %v4953_v21  ;;  %1064 = vmatpush.msra.mxu1 %v4976_v24 }
  0x37   :  { %578 = vmatpush.msra.mxu3 %v4941_v19  ;;  %556 = vmatpush.msrb.mxu2 %v4946_v20 }
  0x39   :  { %579 = vmatpush.msra.mxu3 %v4962_v22  ;;  %557 = vmatpush.msrb.mxu2 %v4967_v23 }
  0x3b   :  { %580 = vmatpush.msra.mxu3 %v4976_v24  ;;  %558 = vmatpush.msrb.mxu2 %v4981_v25 }
  0x3d   :  { %559 = vmatpush.msrb.mxu2 %v4989_v26 }
  0x3e   :  { %4168 = vmatmul.msk.f32.gmra.mxu0 %vm111_vm0, %v101_v30 }
  0x3f   :  { %560 = vmatpush.msrb.mxu2 %v5002_v29 }
  0x46   :  { %4169 = vmatmul.msk.f32.gmra.mxu0 %vm111_vm0, %v102_v32 }
  0x8b   :  { %v5076_v33 = vpop.f32.mrf.mxu0  ;;  %v5112_v57 = vpop.f32.mrf.mxu1 }
  0x93   :  { %v5078_v34 = vpop.f32.mrf.mxu0  ;;  %v5082_v36 = vpop.f32.mrf.mxu2 }
  0x9b   :  { %v5080_v35 = vpop.f32.mrf.mxu0  ;;  %v5086_v38 = vpop.f32.mrf.mxu2 }
  0x9f   :  { %v348_v60 = vpop.f32.mrf.mxu3 }
  0xa3   :  { %v5084_v37 = vpop.f32.mrf.mxu0  ;;  %v5090_v40 = vpop.f32.mrf.mxu2 }
  0xab   :  { %v5088_v39 = vpop.f32.mrf.mxu0  ;;  %v5094_v43 = vpop.f32.mrf.mxu2 }
  0xac   :  { %v240_v59 = vsel %vm5114_vm2, %v5112_v57, %v5094_v43 }
  0xad   :  { %v352_v63 = vadd.f32 %v348_v60, %v240_v59 }
  0xaf   :  { %v4179_v18 = vmul.f32 -1.442695, %v352_v63 }
  0xb3   :  { %v5092_v41 = vpop.f32.mrf.mxu0  ;;  %v328_v47 = vpop.f32.mrf.mxu2 }
  0xbb   :  { %v5096_v44 = vpop.f32.mrf.mxu0 }
  0xc3   :  { %v5101_v48 = vpop.f32.mrf.mxu0 }
  0xc4   :  { %v239_v50 = vsel %vm5103_vm1, %v5076_v33, %v5101_v48 }
  0xc5   :  { %v351_v51 = vadd.f32 %v328_v47, %v239_v50 }
  0xc7   :  { %v4178_v52 = vmul.f32 -1.442695, %v351_v51 }
  0xc9   :  { %4389 = vpow2.f32 %v4178_v52 }
  0xcf   :  { %v4390_v54 = vpop.eup %4389 }
  0xd0   :  { %v356_v55 = vadd.f32 1.0, %v4390_v54 }
  0xd2   :  { %4391 = vrcp.f32 %v356_v55  ;;  %v368_v1 = vand.u32 2147483648, %v356_v55  ;;  %v366_v3 = vand.u32 2147483647, %v356_v55  ;;  %vm362_vm4 = vweird.f32 %v356_v55 }
  0xd3   :  { %4393 = vtanh.f32 %v352_v63 }
  0xd4   :  { %v369_v5 = vor.u32 1.1754944e-38, %v368_v1  ;;  %vm367_vm6 = vcmp.eq.f32.partialorder %v366_v3, 8.507059e+37  ;;  %4395 = vpow2.f32 %v4179_v18 }
  0xd8   :  { %v4392_v61 = vpop.eup %4391 }
  0xd9   :  { %v358_v62 = vmul.f32 %v4392_v61, %v356_v55  ;;  %vm363_vm3 = vweird.f32 %v4392_v61  ;;  %v4394_v7 = vpop.eup %4393 }
  0xda   :  { %vm364_vm5 = vmor %vm362_vm4, %vm363_vm3  ;;  %v4396_v21 = vpop.eup %4395 }
  0xdb   :  { %v359_v0 = vsub.f32 1.0, %v358_v62  ;;  %v376_v27 = vadd.f32 1.0, %v4396_v21 }
  0xdd   :  { %v360_v2 = vmul.f32 %v4392_v61, %v359_v0  ;;  %4397 = vrcp.f32 %v376_v27  ;;  %vm382_vm7 = vweird.f32 %v376_v27  ;;  %v388_v51 = vand.u32 2147483648, %v376_v27 }
  0xde   :  { %v386_v53 = vand.u32 2147483647, %v376_v27 }
  0xdf   :  { %v361_v4 = vadd.f32 %v4392_v61, %v360_v2  ;;  %v389_v54 = vor.u32 1.1754944e-38, %v388_v51  ;;  %v253_v2 = vsel %vm5103_vm1, %v5078_v34, %v5096_v44 }
  0xe0   :  { %vm387_vm10 = vcmp.eq.f32.partialorder %v386_v53, 8.507059e+37 }
  0xe1   :  { %v365_v6 = vsel %vm364_vm5, %v4392_v61, %v361_v4  ;;  %v401_v61 = vld [vmem:[%s6759_s3] sm:$0xff] }
  0xe2   :  { %v370_v9 = vsel %vm367_vm6, %v369_v5, %v365_v6  ;;  %vm402_vm11 = vcmp.gt.f32.partialorder %v401_v61, 0.5 }
  0xe3   :  { %v393_v11 = vmul.f32 %v4394_v7, %v370_v9  ;;  %v4398_v30 = vpop.eup %4397  ;;  %v392_v46 = vmul.f32 0.0, %v370_v9 }
  0xe4   :  { %v378_v31 = vmul.f32 %v4398_v30, %v376_v27  ;;  %vm383_vm8 = vweird.f32 %v4398_v30 }
  0xe5   :  { %395 = vrot.lane.b32.xlu0 %v393_v11, %s4738_s25  ;;  %vm384_vm9 = vmor %vm382_vm7, %vm383_vm8  ;;  %v5160_v11 = vpop.f32.mrf.mxu1 }
  0xe6   :  { %v379_v32 = vsub.f32 1.0, %v378_v31  ;;  %v254_v18 = vsel %vm5114_vm2, %v5160_v11, %v5090_v40 }
  0xe8   :  { %v380_v42 = vmul.f32 %v4398_v30, %v379_v32 }
  0xea   :  { %v381_v52 = vadd.f32 %v4398_v30, %v380_v42 }
  0xec   :  { %v385_v55 = vsel %vm384_vm9, %v4398_v30, %v381_v52 }
  0xed   :  { %v390_v59 = vsel %vm387_vm10, %v389_v54, %v385_v55 }
 0x157   :  { %v396_v47 = vpop.permute.xlu0 %395 }
 0x158   :  { %v398_v50 = vadd.f32 %v396_v47, %v392_v46 }
 0x15a   :  { %416 = vrot.lane.b32.xlu1 %v398_v50, %s4738_s25  ;;  %4399 = vtanh.f32 %v398_v50 }
 0x160   :  { %v4400_v56 = vpop.eup %4399 }
 0x161   :  { %v400_v60 = vmul.f32 %v4400_v56, %v390_v59 }
 0x163   :  { %404 = vrot.lane.b32.xlu0 %v400_v60, %s4738_s25 }
 0x1cc   :  { %v417_v62 = vpop.permute.xlu1 %416 }
 0x1cd   :  { %v5128_v63 = vsel %vm402_vm11, %v417_v62, 0.0 }
 0x1ce   :  { %506 = vrot.lane.b32.xlu1 %v5128_v63, %s4738_s25 }
 0x1d5   :  { %v405_v0 = vpop.permute.xlu0 %404 }
 0x1d6   :  { %v5132_v1 = vsel %vm402_vm11, %v405_v0, 0.0 }
 0x1d7   :  { %408 = vst.msk [vmem:[#allocation2] sm:$0xff] %vm111_vm0, %v5132_v1  ;;  %4180 = vmatmul.msk.f32.vlgmr.msra.gmra.mxu2 %vm307_vm12, %v5132_v1  ;;  %4181 = vmatmul.msk.f32.vlgmr.msrb.gmra.mxu3 %vm307_vm12, %v5132_v1 }
 0x1d8   :  { %674 = vmatpush.msra.mxu2 %v4898_v12  ;;  %694 = vmatpush.msrb.mxu3 %v4877_v8 }
 0x1da   :  { %675 = vmatpush.msra.mxu2 %v4914_v15  ;;  %695 = vmatpush.msrb.mxu3 %v4886_v10 }
 0x1dc   :  { %676 = vmatpush.msra.mxu2 %v4929_v17  ;;  %696 = vmatpush.msrb.mxu3 %v4903_v13 }
 0x1de   :  { %677 = vmatpush.msra.mxu2 %v4946_v20  ;;  %697 = vmatpush.msrb.mxu3 %v4909_v14 }
 0x1e0   :  { %678 = vmatpush.msra.mxu2 %v4967_v23  ;;  %698 = vmatpush.msrb.mxu3 %v4924_v16 }
 0x1e2   :  { %679 = vmatpush.msra.mxu2 %v4981_v25  ;;  %699 = vmatpush.msrb.mxu3 %v4941_v19 }
 0x1e4   :  { %680 = vmatpush.msra.mxu2 %v4989_v26  ;;  %700 = vmatpush.msrb.mxu3 %v4962_v22 }
 0x1e6   :  { %681 = vmatpush.msra.mxu2 %v5002_v29  ;;  %701 = vmatpush.msrb.mxu3 %v4976_v24 }
 0x240   :  { %v507_v0 = vpop.permute.xlu1 %506 }
 0x25a   :  { %v441_v3 = vpop.f32.mrf.mxu2  ;;  %v461_v9 = vpop.f32.mrf.mxu3 }
 0x25b   :  { %v464_v4 = vadd.f32 %v441_v3, %v253_v2  ;;  %v465_v27 = vadd.f32 %v461_v9, %v254_v18 }
 0x25d   :  { %v4182_v5 = vmul.f32 -1.442695, %v464_v4  ;;  %v4183_v55 = vmul.f32 -1.442695, %v465_v27 }
 0x25f   :  { %4401 = vpow2.f32 %v4182_v5 }
 0x265   :  { %v4402_v6 = vpop.eup %4401 }
 0x266   :  { %v469_v7 = vadd.f32 1.0, %v4402_v6 }
 0x268   :  { %4403 = vrcp.f32 %v469_v7  ;;  %v481_v32 = vand.u32 2147483648, %v469_v7  ;;  %v479_v46 = vand.u32 2147483647, %v469_v7  ;;  %vm475_vm14 = vweird.f32 %v469_v7 }
 0x269   :  { %4405 = vtanh.f32 %v465_v27 }
 0x26a   :  { %v482_v50 = vor.u32 1.1754944e-38, %v481_v32  ;;  %vm480_vm3 = vcmp.eq.f32.partialorder %v479_v46, 8.507059e+37  ;;  %4407 = vpow2.f32 %v4183_v55  ;;  %v4184_v32 = vld [vmem:[%s6759_s3 + $0x8] sm:$0xff] }
 0x26b   :  { %vm520_vm8 = vcmp.gt.f32.partialorder %v4184_v32, 0.5 }
 0x26e   :  { %v4404_v21 = vpop.eup %4403 }
 0x26f   :  { %v471_v30 = vmul.f32 %v4404_v21, %v469_v7  ;;  %vm476_vm13 = vweird.f32 %v4404_v21  ;;  %v4406_v52 = vpop.eup %4405 }
 0x270   :  { %vm477_vm15 = vmor %vm475_vm14, %vm476_vm13  ;;  %v4408_v56 = vpop.eup %4407 }
 0x271   :  { %v472_v31 = vsub.f32 1.0, %v471_v30  ;;  %v489_v59 = vadd.f32 1.0, %v4408_v56 }
 0x273   :  { %v473_v42 = vmul.f32 %v4404_v21, %v472_v31  ;;  %4409 = vrcp.f32 %v489_v59  ;;  %v501_v7 = vand.u32 2147483648, %v489_v59  ;;  %vm495_vm5 = vweird.f32 %v489_v59 }
 0x274   :  { %v499_v9 = vand.u32 2147483647, %v489_v59 }
 0x275   :  { %v474_v47 = vadd.f32 %v4404_v21, %v473_v42 }
 0x276   :  { %vm500_vm7 = vcmp.eq.f32.partialorder %v499_v9, 8.507059e+37 }
 0x277   :  { %v478_v51 = vsel %vm477_vm15, %v4404_v21, %v474_v47  ;;  %v502_v21 = vor.u32 1.1754944e-38, %v501_v7 }
 0x278   :  { %v483_v53 = vsel %vm480_vm3, %v482_v50, %v478_v51 }
 0x279   :  { %v510_v54 = vmul.f32 %v4406_v52, %v483_v53  ;;  %v4410_v60 = vpop.eup %4409  ;;  %v509_v3 = vmul.f32 %v507_v0, %v483_v53  ;;  %v267_v52 = vsel %vm5103_vm1, %v5080_v35, %v5092_v41 }
 0x27a   :  { %v491_v61 = vmul.f32 %v4410_v60, %v489_v59  ;;  %vm496_vm4 = vweird.f32 %v4410_v60 }
 0x27b   :  { %512 = vrot.lane.b32.xlu2 %v510_v54, %s4738_s25  ;;  %vm497_vm6 = vmor %vm495_vm5, %vm496_vm4 }
 0x27c   :  { %v492_v62 = vsub.f32 1.0, %v491_v61 }
 0x27e   :  { %v493_v2 = vmul.f32 %v4410_v60, %v492_v62 }
 0x280   :  { %v494_v6 = vadd.f32 %v4410_v60, %v493_v2 }
 0x282   :  { %v498_v18 = vsel %vm497_vm6, %v4410_v60, %v494_v6  ;;  %v5211_v60 = vpop.f32.mrf.mxu1 }
 0x283   :  { %v503_v30 = vsel %vm500_vm7, %v502_v21, %v498_v18  ;;  %v268_v61 = vsel %vm5114_vm2, %v5211_v60, %v5086_v38 }
 0x2d5   :  { %v513_v4 = vpop.permute.xlu2 %512 }
 0x2d6   :  { %v515_v5 = vadd.f32 %v513_v4, %v509_v3 }
 0x2d8   :  { %4411 = vtanh.f32 %v515_v5  ;;  %536 = vrot.lane.b32.xlu0 %v515_v5, %s4738_s25 }
 0x2de   :  { %v4412_v27 = vpop.eup %4411 }
 0x2df   :  { %v517_v31 = vmul.f32 %v4412_v27, %v503_v30 }
 0x2e1   :  { %522 = vrot.lane.b32.xlu2 %v517_v31, %s4738_s25 }
 0x33b   :  { %v523_v42 = vpop.permute.xlu2 %522 }
 0x33c   :  { %v5173_v46 = vsel %vm520_vm8, %v523_v42, 0.0  ;;  %v5177_v47 = vsel %vm520_vm8, %v523_v42, %v5132_v1 }
 0x33d   :  { %527 = vst.msk [vmem:[#allocation2 + $0x8] sm:$0xff] %vm111_vm0, %v5173_v46  ;;  %4185 = vmatmul.msk.f32.vlgmr.msrb.gmra.mxu2 %vm307_vm12, %v5177_v47  ;;  %4186 = vmatmul.msk.f32.vlgmr.msra.gmra.mxu3 %vm307_vm12, %v5177_v47 }
 0x33e   :  { %795 = vmatpush.msra.mxu3 %v4898_v12  ;;  %916 = vmatpush.msrb.mxu2 %v4898_v12 }
 0x340   :  { %796 = vmatpush.msra.mxu3 %v4914_v15  ;;  %917 = vmatpush.msrb.mxu2 %v4914_v15 }
 0x342   :  { %797 = vmatpush.msra.mxu3 %v4929_v17  ;;  %918 = vmatpush.msrb.mxu2 %v4929_v17 }
 0x344   :  { %798 = vmatpush.msra.mxu3 %v4946_v20  ;;  %919 = vmatpush.msrb.mxu2 %v4946_v20 }
 0x346   :  { %799 = vmatpush.msra.mxu3 %v4967_v23  ;;  %920 = vmatpush.msrb.mxu2 %v4967_v23 }
 0x348   :  { %800 = vmatpush.msra.mxu3 %v4981_v25  ;;  %921 = vmatpush.msrb.mxu2 %v4981_v25 }
 0x34a   :  { %v537_v50 = vpop.permute.xlu0 %536  ;;  %801 = vmatpush.msra.mxu3 %v4989_v26  ;;  %922 = vmatpush.msrb.mxu2 %v4989_v26 }
 0x34b   :  { %v5201_v51 = vsel %vm520_vm8, %v537_v50, %v5128_v63 }
 0x34c   :  { %627 = vrot.lane.b32.xlu1 %v5201_v51, %s4738_s25  ;;  %802 = vmatpush.msra.mxu3 %v5002_v29 }
 0x34d   :  { %923 = vmatpush.msrb.mxu2 %v5002_v29 }
 0x3c0   :  { %v562_v53 = vpop.f32.mrf.mxu2  ;;  %v582_v63 = vpop.f32.mrf.mxu3 }
 0x3c1   :  { %v585_v54 = vadd.f32 %v562_v53, %v267_v52  ;;  %v586_v0 = vadd.f32 %v582_v63, %v268_v61 }
 0x3c3   :  { %v4187_v55 = vmul.f32 -1.442695, %v585_v54  ;;  %v4188_v31 = vmul.f32 -1.442695, %v586_v0  ;;  %v628_v54 = vpop.permute.xlu1 %627 }
 0x3c5   :  { %4413 = vpow2.f32 %v4187_v55 }
 0x3cb   :  { %v4414_v56 = vpop.eup %4413 }
 0x3cc   :  { %v590_v59 = vadd.f32 1.0, %v4414_v56 }
 0x3ce   :  { %4415 = vrcp.f32 %v590_v59  ;;  %v602_v4 = vand.u32 2147483648, %v590_v59  ;;  %v600_v6 = vand.u32 2147483647, %v590_v59  ;;  %vm596_vm10 = vweird.f32 %v590_v59 }
 0x3cf   :  { %4417 = vtanh.f32 %v586_v0 }
 0x3d0   :  { %v603_v9 = vor.u32 1.1754944e-38, %v602_v4  ;;  %vm601_vm13 = vcmp.eq.f32.partialorder %v600_v6, 8.507059e+37  ;;  %4419 = vpow2.f32 %v4188_v31 }
 0x3d4   :  { %v4416_v62 = vpop.eup %4415 }
 0x3d5   :  { %v592_v2 = vmul.f32 %v4416_v62, %v590_v59  ;;  %vm597_vm9 = vweird.f32 %v4416_v62  ;;  %v4418_v21 = vpop.eup %4417 }
 0x3d6   :  { %vm598_vm11 = vmor %vm596_vm10, %vm597_vm9  ;;  %v4420_v32 = vpop.eup %4419 }
 0x3d7   :  { %v593_v3 = vsub.f32 1.0, %v592_v2  ;;  %v610_v42 = vadd.f32 1.0, %v4420_v32 }
 0x3d9   :  { %v594_v5 = vmul.f32 %v4416_v62, %v593_v3  ;;  %4421 = vrcp.f32 %v610_v42  ;;  %vm616_vm15 = vweird.f32 %v610_v42  ;;  %v620_v0 = vand.u32 2147483647, %v610_v42 }
 0x3db   :  { %v595_v7 = vadd.f32 %v4416_v62, %v594_v5  ;;  %vm621_vm4 = vcmp.eq.f32.partialorder %v620_v0, 8.507059e+37 }
 0x3dd   :  { %v599_v18 = vsel %vm598_vm11, %v4416_v62, %v595_v7  ;;  %v622_v62 = vand.u32 2147483648, %v610_v42  ;;  %v4189_v7 = vld [vmem:[%s6759_s3 + $0x10] sm:$0xff] }
 0x3de   :  { %v604_v27 = vsel %vm601_vm13, %v603_v9, %v599_v18  ;;  %vm641_vm5 = vcmp.gt.f32.partialorder %v4189_v7, 0.5 }
 0x3df   :  { %v631_v30 = vmul.f32 %v4418_v21, %v604_v27  ;;  %v4422_v50 = vpop.eup %4421  ;;  %v630_v56 = vmul.f32 %v628_v54, %v604_v27  ;;  %v623_v3 = vor.u32 1.1754944e-38, %v622_v62 }
 0x3e0   :  { %v612_v52 = vmul.f32 %v4422_v50, %v610_v42  ;;  %vm617_vm14 = vweird.f32 %v4422_v50 }
 0x3e1   :  { %633 = vrot.lane.b32.xlu2 %v631_v30, %s4738_s25  ;;  %vm618_vm3 = vmor %vm616_vm15, %vm617_vm14 }
 0x3e2   :  { %v613_v53 = vsub.f32 1.0, %v612_v52 }
 0x3e4   :  { %v614_v55 = vmul.f32 %v4422_v50, %v613_v53 }
 0x3e6   :  { %v615_v61 = vadd.f32 %v4422_v50, %v614_v55 }
 0x3e8   :  { %v619_v2 = vsel %vm618_vm3, %v4422_v50, %v615_v61 }
 0x3e9   :  { %v624_v5 = vsel %vm621_vm4, %v623_v3, %v619_v2 }
 0x43b   :  { %v634_v59 = vpop.permute.xlu2 %633 }
 0x43c   :  { %v636_v63 = vadd.f32 %v634_v59, %v630_v56 }
 0x43e   :  { %4423 = vtanh.f32 %v636_v63  ;;  %657 = vrot.lane.b32.xlu1 %v636_v63, %s4738_s25 }
 0x444   :  { %v4424_v4 = vpop.eup %4423 }
 0x445   :  { %v638_v6 = vmul.f32 %v4424_v4, %v624_v5 }
 0x447   :  { %643 = vrot.lane.b32.xlu0 %v638_v6, %s4738_s25 }
 0x4b0   :  { %v658_v9 = vpop.permute.xlu1 %657 }
 0x4b1   :  { %v5224_v18 = vsel %vm641_vm5, %v658_v9, %v5201_v51 }
 0x4b2   :  { %748 = vrot.lane.b32.xlu2 %v5224_v18, %s4738_s25 }
 0x4b9   :  { %v644_v21 = vpop.permute.xlu0 %643 }
 0x4ba   :  { %v5228_v27 = vsel %vm641_vm5, %v644_v21, 0.0  ;;  %v5231_v30 = vsel %vm641_vm5, %v644_v21, %v5177_v47 }
 0x4bb   :  { %648 = vst.msk [vmem:[#allocation2 + $0x10] sm:$0xff] %vm111_vm0, %v5228_v27  ;;  %4190 = vmatmul.msk.f32.vlgmr.msra.gmra.mxu2 %vm307_vm12, %v5231_v30  ;;  %4191 = vmatmul.msk.f32.vlgmr.msrb.gmra.mxu3 %vm307_vm12, %v5231_v30 }
 0x4bc   :  { %936 = vmatpush.msrb.mxu3 %v4877_v8  ;;  %1158 = vmatpush.msra.mxu2 %v4898_v12  ;;  %v281_v12 = vsel %vm5103_vm1, %v5084_v37, %v5088_v39 }
 0x4be   :  { %937 = vmatpush.msrb.mxu3 %v4886_v10  ;;  %1159 = vmatpush.msra.mxu2 %v4914_v15 }
 0x4c0   :  { %938 = vmatpush.msrb.mxu3 %v4903_v13  ;;  %1160 = vmatpush.msra.mxu2 %v4929_v17 }
 0x4c2   :  { %939 = vmatpush.msrb.mxu3 %v4909_v14  ;;  %1161 = vmatpush.msra.mxu2 %v4946_v20 }
 0x4c4   :  { %940 = vmatpush.msrb.mxu3 %v4924_v16  ;;  %1162 = vmatpush.msra.mxu2 %v4967_v23 }
 0x4c6   :  { %941 = vmatpush.msrb.mxu3 %v4941_v19  ;;  %1163 = vmatpush.msra.mxu2 %v4981_v25  ;;  %v5259_v25 = vpop.f32.mrf.mxu1 }
 0x4c8   :  { %942 = vmatpush.msrb.mxu3 %v4962_v22  ;;  %1164 = vmatpush.msra.mxu2 %v4989_v26  ;;  %v282_v26 = vsel %vm5114_vm2, %v5259_v25, %v5082_v36 }
 0x4ca   :  { %943 = vmatpush.msrb.mxu3 %v4976_v24  ;;  %1165 = vmatpush.msra.mxu2 %v5002_v29 }
 0x50c   :  { %v749_v6 = vpop.permute.xlu2 %748 }
 0x53e   :  { %v683_v15 = vpop.f32.mrf.mxu2  ;;  %v703_v51 = vpop.f32.mrf.mxu3 }
 0x53f   :  { %v706_v17 = vadd.f32 %v683_v15, %v281_v12  ;;  %v707_v31 = vadd.f32 %v703_v51, %v282_v26 }
 0x541   :  { %v4192_v20 = vmul.f32 -1.442695, %v706_v17  ;;  %v4193_v62 = vmul.f32 -1.442695, %v707_v31 }
 0x543   :  { %4425 = vpow2.f32 %v4192_v20 }
 0x549   :  { %v4426_v23 = vpop.eup %4425 }
 0x54a   :  { %v711_v47 = vadd.f32 1.0, %v4426_v23 }
 0x54c   :  { %4427 = vrcp.f32 %v711_v47  ;;  %v723_v50 = vand.u32 2147483648, %v711_v47  ;;  %v721_v53 = vand.u32 2147483647, %v711_v47  ;;  %vm717_vm7 = vweird.f32 %v711_v47 }
 0x54d   :  { %4429 = vtanh.f32 %v707_v31  ;;  %v4194_v31 = vld [vmem:[%s6759_s3 + $0x18] sm:$0xff] }
 0x54e   :  { %v724_v55 = vor.u32 1.1754944e-38, %v723_v50  ;;  %vm722_vm9 = vcmp.eq.f32.partialorder %v721_v53, 8.507059e+37  ;;  %4431 = vpow2.f32 %v4193_v62  ;;  %vm762_vm15 = vcmp.gt.f32.partialorder %v4194_v31, 0.5 }
 0x552   :  { %v4428_v29 = vpop.eup %4427 }
 0x553   :  { %v713_v32 = vmul.f32 %v4428_v29, %v711_v47  ;;  %vm718_vm6 = vweird.f32 %v4428_v29  ;;  %v4430_v59 = vpop.eup %4429 }
 0x554   :  { %vm719_vm8 = vmor %vm717_vm7, %vm718_vm6  ;;  %v4432_v0 = vpop.eup %4431 }
 0x555   :  { %v714_v42 = vsub.f32 1.0, %v713_v32  ;;  %v731_v2 = vadd.f32 1.0, %v4432_v0 }
 0x557   :  { %v715_v52 = vmul.f32 %v4428_v29, %v714_v42  ;;  %4433 = vrcp.f32 %v731_v2  ;;  %v743_v17 = vand.u32 2147483648, %v731_v2  ;;  %vm737_vm11 = vweird.f32 %v731_v2 }
 0x558   :  { %v741_v20 = vand.u32 2147483647, %v731_v2 }
 0x559   :  { %v716_v54 = vadd.f32 %v4428_v29, %v715_v52  ;;  %v744_v47 = vor.u32 1.1754944e-38, %v743_v17 }
 0x55a   :  { %vm742_vm14 = vcmp.eq.f32.partialorder %v741_v20, 8.507059e+37 }
 0x55b   :  { %v720_v56 = vsel %vm719_vm8, %v4428_v29, %v716_v54 }
 0x55c   :  { %v725_v63 = vsel %vm722_vm9, %v724_v55, %v720_v56 }
 0x55d   :  { %v752_v61 = vmul.f32 %v4430_v59, %v725_v63  ;;  %v4434_v3 = vpop.eup %4433  ;;  %v751_v9 = vmul.f32 %v749_v6, %v725_v63 }
 0x55e   :  { %v733_v4 = vmul.f32 %v4434_v3, %v731_v2  ;;  %vm738_vm10 = vweird.f32 %v4434_v3 }
 0x55f   :  { %754 = vrot.lane.b32.xlu0 %v752_v61, %s4738_s25  ;;  %vm739_vm13 = vmor %vm737_vm11, %vm738_vm10 }
 0x560   :  { %v734_v5 = vsub.f32 1.0, %v733_v4 }
 0x562   :  { %v735_v7 = vmul.f32 %v4434_v3, %v734_v5 }
 0x564   :  { %v736_v15 = vadd.f32 %v4434_v3, %v735_v7 }
 0x566   :  { %v740_v23 = vsel %vm739_vm13, %v4434_v3, %v736_v15 }
 0x567   :  { %v745_v26 = vsel %vm742_vm14, %v744_v47, %v740_v23 }
 0x5d1   :  { %v755_v21 = vpop.permute.xlu0 %754 }
 0x5d2   :  { %v757_v12 = vadd.f32 %v755_v21, %v751_v9 }
 0x5d4   :  { %4435 = vtanh.f32 %v757_v12  ;;  %778 = vrot.lane.b32.xlu2 %v757_v12, %s4738_s25 }
 0x5da   :  { %v4436_v51 = vpop.eup %4435 }
 0x5db   :  { %v759_v29 = vmul.f32 %v4436_v51, %v745_v26 }
 0x5dd   :  { %764 = vrot.lane.b32.xlu1 %v759_v29, %s4738_s25 }
 0x62e   :  { %v779_v32 = vpop.permute.xlu2 %778 }
 0x62f   :  { %v5272_v42 = vsel %vm762_vm15, %v779_v32, %v5224_v18  ;;  %v285_v18 = vsel %vm5103_vm1, %v5088_v39, %v5084_v37  ;;  %v4199_v32 = vld [vmem:[%s6759_s3 + $0x20] sm:$0xff] }
 0x630   :  { %869 = vrot.lane.b32.xlu0 %v5272_v42, %s4738_s25  ;;  %vm883_vm11 = vcmp.gt.f32.partialorder %v4199_v32, 0.5 }
 0x64f   :  { %v765_v50 = vpop.permute.xlu1 %764 }
 0x650   :  { %v5276_v52 = vsel %vm762_vm15, %v765_v50, 0.0  ;;  %v5279_v53 = vsel %vm762_vm15, %v765_v50, %v5231_v30 }
 0x651   :  { %769 = vst.msk [vmem:[#allocation2 + $0x18] sm:$0xff] %vm111_vm0, %v5276_v52  ;;  %4195 = vmatmul.msk.f32.vlgmr.msra.gmra.mxu3 %vm307_vm12, %v5279_v53  ;;  %4196 = vmatmul.msk.f32.vlgmr.msrb.gmra.mxu1 %vm307_vm12, %v5279_v53 }
 0x652   :  { %1178 = vmatpush.msra.mxu3 %v4877_v8 }
 0x654   :  { %1179 = vmatpush.msra.mxu3 %v4886_v10 }
 0x656   :  { %1180 = vmatpush.msra.mxu3 %v4903_v13 }
 0x658   :  { %1181 = vmatpush.msra.mxu3 %v4909_v14 }
 0x65a   :  { %1182 = vmatpush.msra.mxu3 %v4924_v16  ;;  %v286_v16 = vsel %vm5114_vm2, %v5082_v36, %v5259_v25 }
 0x65c   :  { %1183 = vmatpush.msra.mxu3 %v4941_v19 }
 0x65e   :  { %1184 = vmatpush.msra.mxu3 %v4962_v22 }
 0x660   :  { %1185 = vmatpush.msra.mxu3 %v4976_v24 }
 0x6a2   :  { %v870_v7 = vpop.permute.xlu0 %869 }
 0x6ce   :  { %v824_v14 = vpop.f32.mrf.mxu1 }
 0x6cf   :  { %v828_v22 = vadd.f32 %v824_v14, %v286_v16 }
 0x6d1   :  { %v4198_v36 = vmul.f32 -1.442695, %v828_v22 }
 0x6d4   :  { %v804_v8 = vpop.f32.mrf.mxu3 }
 0x6d5   :  { %v827_v30 = vadd.f32 %v804_v8, %v285_v18 }
 0x6d7   :  { %v4197_v10 = vmul.f32 -1.442695, %v827_v30 }
 0x6d9   :  { %4437 = vpow2.f32 %v4197_v10 }
 0x6df   :  { %v4438_v13 = vpop.eup %4437 }
 0x6e0   :  { %v832_v54 = vadd.f32 1.0, %v4438_v13 }
 0x6e2   :  { %4439 = vrcp.f32 %v832_v54  ;;  %v844_v56 = vand.u32 2147483648, %v832_v54  ;;  %v842_v39 = vand.u32 2147483647, %v832_v54  ;;  %vm838_vm4 = vweird.f32 %v832_v54 }
 0x6e3   :  { %4441 = vtanh.f32 %v828_v22 }
 0x6e4   :  { %v845_v63 = vor.u32 1.1754944e-38, %v844_v56  ;;  %vm843_vm6 = vcmp.eq.f32.partialorder %v842_v39, 8.507059e+37  ;;  %4443 = vpow2.f32 %v4198_v36 }
 0x6e8   :  { %v4440_v19 = vpop.eup %4439 }
 0x6e9   :  { %v834_v24 = vmul.f32 %v4440_v19, %v832_v54  ;;  %vm839_vm3 = vweird.f32 %v4440_v19  ;;  %v4442_v62 = vpop.eup %4441 }
 0x6ea   :  { %vm840_vm5 = vmor %vm838_vm4, %vm839_vm3  ;;  %v4444_v25 = vpop.eup %4443 }
 0x6eb   :  { %v835_v55 = vsub.f32 1.0, %v834_v24  ;;  %v852_v3 = vadd.f32 1.0, %v4444_v25 }
 0x6ed   :  { %v836_v37 = vmul.f32 %v4440_v19, %v835_v55  ;;  %4445 = vrcp.f32 %v852_v3  ;;  %v864_v20 = vand.u32 2147483648, %v852_v3  ;;  %vm858_vm8 = vweird.f32 %v852_v3 }
 0x6ee   :  { %v862_v23 = vand.u32 2147483647, %v852_v3 }
 0x6ef   :  { %v837_v59 = vadd.f32 %v4440_v19, %v836_v37  ;;  %v865_v51 = vor.u32 1.1754944e-38, %v864_v20 }
 0x6f0   :  { %vm863_vm10 = vcmp.eq.f32.partialorder %v862_v23, 8.507059e+37 }
 0x6f1   :  { %v841_v61 = vsel %vm840_vm5, %v4440_v19, %v837_v59 }
 0x6f2   :  { %v846_v0 = vsel %vm843_vm6, %v845_v63, %v841_v61 }
 0x6f3   :  { %v873_v2 = vmul.f32 %v4442_v62, %v846_v0  ;;  %v4446_v4 = vpop.eup %4445  ;;  %v872_v21 = vmul.f32 %v870_v7, %v846_v0 }
 0x6f4   :  { %v854_v5 = vmul.f32 %v4446_v4, %v852_v3  ;;  %vm859_vm7 = vweird.f32 %v4446_v4 }
 0x6f5   :  { %875 = vrot.lane.b32.xlu1 %v873_v2, %s4738_s25  ;;  %vm860_vm9 = vmor %vm858_vm8, %vm859_vm7 }
 0x6f6   :  { %v855_v6 = vsub.f32 1.0, %v854_v5 }
 0x6f8   :  { %v856_v9 = vmul.f32 %v4446_v4, %v855_v6 }
 0x6fa   :  { %v857_v17 = vadd.f32 %v4446_v4, %v856_v9 }
 0x6fc   :  { %v861_v47 = vsel %vm860_vm9, %v4446_v4, %v857_v17 }
 0x6fd   :  { %v866_v29 = vsel %vm863_vm10, %v865_v51, %v861_v47 }
 0x767   :  { %v876_v12 = vpop.permute.xlu1 %875 }
 0x768   :  { %v878_v15 = vadd.f32 %v876_v12, %v872_v21 }
 0x76a   :  { %4447 = vtanh.f32 %v878_v15  ;;  %899 = vrot.lane.b32.xlu0 %v878_v15, %s4738_s25 }
 0x770   :  { %v4448_v26 = vpop.eup %4447 }
 0x771   :  { %v880_v31 = vmul.f32 %v4448_v26, %v866_v29  ;;  %v4204_v29 = vld [vmem:[%s6759_s3 + $0x28] sm:$0xff] }
 0x772   :  { %vm1004_vm8 = vcmp.gt.f32.partialorder %v4204_v29, 0.5  ;;  %v1279_v29 = vld [vmem:[%s6729_s8 + $0x20] sm:$0xff] }
 0x773   :  { %885 = vrot.lane.b32.xlu2 %v880_v31, %s4738_s25 }
 0x7cd   :  { %v886_v50 = vpop.permute.xlu2 %885 }
 0x7ce   :  { %v5309_v18 = vsel %vm883_vm11, %v886_v50, 0.0  ;;  %v5312_v8 = vsel %vm883_vm11, %v886_v50, %v5279_v53  ;;  %v271_v53 = vsel %vm5103_vm1, %v5092_v41, %v5080_v35 }
 0x7cf   :  { %890 = vst.msk [vmem:[#allocation2 + $0x20] sm:$0xff] %vm111_vm0, %v5309_v18  ;;  %4200 = vmatmul.msk.f32.vlgmr.msrb.gmra.mxu2 %vm307_vm12, %v5312_v8  ;;  %4201 = vmatmul.msk.f32.vlgmr.msrb.gmra.mxu3 %vm307_vm12, %v5312_v8 }
 0x7dc   :  { %v900_v30 = vpop.permute.xlu0 %899 }
 0x7dd   :  { %v5321_v10 = vsel %vm883_vm11, %v900_v30, %v5272_v42  ;;  %v272_v42 = vsel %vm5114_vm2, %v5086_v38, %v5211_v60 }
 0x7de   :  { %990 = vrot.lane.b32.xlu1 %v5321_v10, %s4738_s25 }
 0x850   :  { %v991_v5 = vpop.permute.xlu1 %990 }
 0x852   :  { %v925_v13 = vpop.f32.mrf.mxu2  ;;  %v945_v22 = vpop.f32.mrf.mxu3 }
 0x853   :  { %v948_v54 = vadd.f32 %v925_v13, %v271_v53  ;;  %v949_v55 = vadd.f32 %v945_v22, %v272_v42  ;;  %v258_v22 = vsel %vm5114_vm2, %v5090_v40, %v5160_v11 }
 0x855   :  { %v4202_v14 = vmul.f32 -1.442695, %v948_v54  ;;  %v4203_v38 = vmul.f32 -1.442695, %v949_v55 }
 0x857   :  { %4449 = vpow2.f32 %v4202_v14 }
 0x85d   :  { %v4450_v16 = vpop.eup %4449 }
 0x85e   :  { %v953_v19 = vadd.f32 1.0, %v4450_v16 }
 0x860   :  { %4451 = vrcp.f32 %v953_v19  ;;  %v965_v39 = vand.u32 2147483648, %v953_v19  ;;  %v963_v41 = vand.u32 2147483647, %v953_v19  ;;  %vm959_vm14 = vweird.f32 %v953_v19 }
 0x861   :  { %4453 = vtanh.f32 %v949_v55 }
 0x862   :  { %v966_v63 = vor.u32 1.1754944e-38, %v965_v39  ;;  %vm964_vm3 = vcmp.eq.f32.partialorder %v963_v41, 8.507059e+37  ;;  %4455 = vpow2.f32 %v4203_v38 }
 0x866   :  { %v4452_v24 = vpop.eup %4451 }
 0x867   :  { %v955_v56 = vmul.f32 %v4452_v24, %v953_v19  ;;  %vm960_vm13 = vweird.f32 %v4452_v24  ;;  %v4454_v62 = vpop.eup %4453 }
 0x868   :  { %vm961_vm15 = vmor %vm959_vm14, %vm960_vm13  ;;  %v4456_v60 = vpop.eup %4455 }
 0x869   :  { %v956_v37 = vsub.f32 1.0, %v955_v56  ;;  %v973_v36 = vadd.f32 1.0, %v4456_v60 }
 0x86b   :  { %v957_v35 = vmul.f32 %v4452_v24, %v956_v37  ;;  %4457 = vrcp.f32 %v973_v36  ;;  %v985_v15 = vand.u32 2147483648, %v973_v36  ;;  %vm979_vm5 = vweird.f32 %v973_v36 }
 0x86c   :  { %v983_v17 = vand.u32 2147483647, %v973_v36 }
 0x86d   :  { %v958_v59 = vadd.f32 %v4452_v24, %v957_v35  ;;  %v986_v23 = vor.u32 1.1754944e-38, %v985_v15 }
 0x86e   :  { %vm984_vm7 = vcmp.eq.f32.partialorder %v983_v17, 8.507059e+37 }
 0x86f   :  { %v962_v61 = vsel %vm961_vm15, %v4452_v24, %v958_v59 }
 0x870   :  { %v967_v0 = vsel %vm964_vm3, %v966_v63, %v962_v61 }
 0x871   :  { %v994_v2 = vmul.f32 %v4454_v62, %v967_v0  ;;  %v4458_v25 = vpop.eup %4457  ;;  %v993_v7 = vmul.f32 %v991_v5, %v967_v0 }
 0x872   :  { %v975_v3 = vmul.f32 %v4458_v25, %v973_v36  ;;  %vm980_vm4 = vweird.f32 %v4458_v25 }
 0x873   :  { %996 = vrot.lane.b32.xlu2 %v994_v2, %s4738_s25  ;;  %vm981_vm6 = vmor %vm979_vm5, %vm980_vm4 }
 0x874   :  { %v976_v4 = vsub.f32 1.0, %v975_v3 }
 0x876   :  { %v977_v6 = vmul.f32 %v4458_v25, %v976_v4 }
 0x878   :  { %v978_v12 = vadd.f32 %v4458_v25, %v977_v6 }
 0x87a   :  { %v982_v20 = vsel %vm981_vm6, %v4458_v25, %v978_v12 }
 0x87b   :  { %v987_v51 = vsel %vm984_vm7, %v986_v23, %v982_v20  ;;  %v4209_v20 = vld [vmem:[%s6759_s3 + $0x30] sm:$0xff] }
 0x87c   :  { %vm1125_vm5 = vcmp.gt.f32.partialorder %v4209_v20, 0.5 }
 0x8cd   :  { %v997_v9 = vpop.permute.xlu2 %996 }
 0x8ce   :  { %v999_v21 = vadd.f32 %v997_v9, %v993_v7 }
 0x8d0   :  { %4459 = vtanh.f32 %v999_v21  ;;  %1020 = vrot.lane.b32.xlu1 %v999_v21, %s4738_s25 }
 0x8d6   :  { %v4460_v47 = vpop.eup %4459 }
 0x8d7   :  { %v1001_v26 = vmul.f32 %v4460_v47, %v987_v51  ;;  %v1281_v51 = vld [vmem:[%s6729_s8 + $0x30] sm:$0xff] }
 0x8d8   :  { %1433 = vmatpush.msrb.mxu2 %v1281_v51 }
 0x8d9   :  { %1006 = vrot.lane.b32.xlu0 %v1001_v26, %s4738_s25  ;;  %v1282_v26 = vld [vmem:[%s6729_s8 + $0x38] sm:$0xff] }
 0x8da   :  { %1474 = vmatpush.msrb.mxu3 %v1282_v26  ;;  %1434 = vmatpush.msrb.mxu2 %v1279_v29 }
 0x942   :  { %v1021_v31 = vpop.permute.xlu1 %1020 }
 0x943   :  { %v5340_v32 = vsel %vm1004_vm8, %v1021_v31, %v5321_v10  ;;  %v257_v10 = vsel %vm5103_vm1, %v5096_v44, %v5078_v34  ;;  %v1280_v31 = vld [vmem:[%s6729_s8 + $0x28] sm:$0xff] }
 0x944   :  { %1111 = vrot.lane.b32.xlu2 %v5340_v32, %s4738_s25  ;;  %1475 = vmatpush.msrb.mxu3 %v1280_v31 }
 0x94b   :  { %v1007_v50 = vpop.permute.xlu0 %1006 }
 0x94c   :  { %v5344_v30 = vsel %vm1004_vm8, %v1007_v50, 0.0  ;;  %v5347_v53 = vsel %vm1004_vm8, %v1007_v50, %v5312_v8  ;;  %v1278_v50 = vld [vmem:[%s6729_s8 + $0x18] sm:$0xff] }
 0x94d   :  { %1011 = vst.msk [vmem:[#allocation2 + $0x28] sm:$0xff] %vm111_vm0, %v5344_v30  ;;  %4205 = vmatmul.msk.f32.vlgmr.msrb.gmra.mxu0 %vm307_vm12, %v5347_v53  ;;  %4206 = vmatmul.msk.f32.vlgmr.msra.gmra.mxu1 %vm307_vm12, %v5347_v53 }
 0x94e   :  { %1476 = vmatpush.msrb.mxu3 %v1278_v50  ;;  %v4214_v50 = vld [vmem:[%s6759_s3 + $0x38] sm:$0xff] }
 0x99e   :  { %v1112_v60 = vpop.permute.xlu2 %1111 }
 0x9ca   :  { %v1046_v13 = vpop.f32.mrf.mxu0  ;;  %v1066_v19 = vpop.f32.mrf.mxu1 }
 0x9cb   :  { %v1069_v54 = vadd.f32 %v1046_v13, %v257_v10  ;;  %v1070_v24 = vadd.f32 %v1066_v19, %v258_v22  ;;  %v1275_v10 = vld [vmem:[%s6729_s8] sm:$0xff]  ;;  %v1276_v13 = vld [vmem:[%s6729_s8 + $0x8] sm:$0xff]  ;;  %v1261_v22 = vld [vmem:[#allocation2 + $0x10] sm:$0xff] }
 0x9cc   :  { %1477 = vmatpush.msrb.mxu3 %v1276_v13  ;;  %v1260_v19 = vld [vmem:[#allocation2 + $0x8] sm:$0xff] }
 0x9cd   :  { %v4207_v14 = vmul.f32 -1.442695, %v1069_v54  ;;  %v4208_v40 = vmul.f32 -1.442695, %v1070_v24 }
 0x9cf   :  { %4461 = vpow2.f32 %v4207_v14 }
 0x9d5   :  { %v4462_v8 = vpop.eup %4461 }
 0x9d6   :  { %v1074_v16 = vadd.f32 1.0, %v4462_v8 }
 0x9d8   :  { %4463 = vrcp.f32 %v1074_v16  ;;  %v1086_v37 = vand.u32 2147483648, %v1074_v16  ;;  %v1084_v44 = vand.u32 2147483647, %v1074_v16  ;;  %vm1080_vm10 = vweird.f32 %v1074_v16 }
 0x9d9   :  { %4465 = vtanh.f32 %v1070_v24  ;;  %v1264_v24 = vld [vmem:[#allocation2 + $0x28] sm:$0xff] }
 0x9da   :  { %v1087_v35 = vor.u32 1.1754944e-38, %v1086_v37  ;;  %vm1085_vm13 = vcmp.eq.f32.partialorder %v1084_v44, 8.507059e+37  ;;  %4467 = vpow2.f32 %v4208_v40 }
 0x9de   :  { %v4464_v42 = vpop.eup %4463 }
 0x9df   :  { %v1076_v55 = vmul.f32 %v4464_v42, %v1074_v16  ;;  %vm1081_vm9 = vweird.f32 %v4464_v42  ;;  %v4466_v59 = vpop.eup %4465  ;;  %v1259_v16 = vld [vmem:[#allocation2] sm:$0xff] }
 0x9e0   :  { %vm1082_vm11 = vmor %vm1080_vm10, %vm1081_vm9  ;;  %v4468_v11 = vpop.eup %4467 }
 0x9e1   :  { %v1077_v56 = vsub.f32 1.0, %v1076_v55  ;;  %v1094_v62 = vadd.f32 1.0, %v4468_v11 }
 0x9e3   :  { %v1078_v34 = vmul.f32 %v4464_v42, %v1077_v56  ;;  %4469 = vrcp.f32 %v1094_v62  ;;  %v1106_v6 = vand.u32 2147483648, %v1094_v62  ;;  %vm1100_vm15 = vweird.f32 %v1094_v62 }
 0x9e4   :  { %v1104_v7 = vand.u32 2147483647, %v1094_v62  ;;  %v243_v56 = vsel %vm5103_vm1, %v5101_v48, %v5076_v33 }
 0x9e5   :  { %v1079_v39 = vadd.f32 %v4464_v42, %v1078_v34  ;;  %v1107_v21 = vor.u32 1.1754944e-38, %v1106_v6 }
 0x9e6   :  { %vm1105_vm4 = vcmp.eq.f32.partialorder %v1104_v7, 8.507059e+37 }
 0x9e7   :  { %v1083_v41 = vsel %vm1082_vm11, %v4464_v42, %v1079_v39  ;;  %v1263_v42 = vld [vmem:[#allocation2 + $0x20] sm:$0xff] }
 0x9e8   :  { %v1088_v63 = vsel %vm1085_vm13, %v1087_v35, %v1083_v41 }
 0x9e9   :  { %v1115_v61 = vmul.f32 %v4466_v59, %v1088_v63  ;;  %v4470_v0 = vpop.eup %4469  ;;  %v1114_v25 = vmul.f32 %v1112_v60, %v1088_v63  ;;  %v244_v59 = vsel %vm5114_vm2, %v5094_v43, %v5112_v57 }
 0x9ea   :  { %v1096_v2 = vmul.f32 %v4470_v0, %v1094_v62  ;;  %vm1101_vm14 = vweird.f32 %v4470_v0 }
 0x9eb   :  { %1117 = vrot.lane.b32.xlu0 %v1115_v61, %s4738_s25  ;;  %vm1102_vm3 = vmor %vm1100_vm15, %vm1101_vm14  ;;  %vm1246_vm15 = vcmp.gt.f32.partialorder %v4214_v50, 0.5 }
 0x9ec   :  { %v1097_v38 = vsub.f32 1.0, %v1096_v2 }
 0x9ee   :  { %v1098_v36 = vmul.f32 %v4470_v0, %v1097_v38 }
 0x9f0   :  { %v1099_v5 = vadd.f32 %v4470_v0, %v1098_v36 }
 0x9f2   :  { %v1103_v9 = vsel %vm1102_vm3, %v4470_v0, %v1099_v5 }
 0x9f3   :  { %v1108_v15 = vsel %vm1105_vm4, %v1107_v21, %v1103_v9 }
 0xa5d   :  { %v1118_v3 = vpop.permute.xlu0 %1117 }
 0xa5e   :  { %v1120_v4 = vadd.f32 %v1118_v3, %v1114_v25 }
 0xa60   :  { %4471 = vtanh.f32 %v1120_v4  ;;  %1141 = vrot.lane.b32.xlu2 %v1120_v4, %s4738_s25 }
 0xa66   :  { %v4472_v12 = vpop.eup %4471 }
 0xa67   :  { %v1122_v17 = vmul.f32 %v4472_v12, %v1108_v15 }
 0xa69   :  { %1127 = vrot.lane.b32.xlu1 %v1122_v17, %s4738_s25 }
 0xaba   :  { %v1142_v23 = vpop.permute.xlu2 %1141 }
 0xabb   :  { %v1144_v47 = vsel %vm1125_vm5, %v1142_v23, %v5340_v32  ;;  %v1277_v32 = vld [vmem:[%s6729_s8 + $0x10] sm:$0xff] }
 0xabc   :  { %1232 = vrot.lane.b32.xlu0 %v1144_v47, %s4738_s25  ;;  %1435 = vmatpush.msrb.mxu2 %v1277_v32 }
 0xabe   :  { %1436 = vmatpush.msrb.mxu2 %v1275_v10 }
 0xadb   :  { %v1128_v54 = vpop.permute.xlu1 %1127 }
 0xadc   :  { %v1130_v14 = vsel %vm1125_vm5, %v1128_v54, 0.0  ;;  %v1139_v8 = vsel %vm1125_vm5, %v1128_v54, %v5347_v53  ;;  %v1262_v53 = vld [vmem:[#allocation2 + $0x18] sm:$0xff] }
 0xadd   :  { %1132 = vst.msk [vmem:[#allocation2 + $0x30] sm:$0xff] %vm111_vm0, %v1130_v14  ;;  %4210 = vmatmul.msk.f32.vlgmr.msra.gmra.mxu2 %vm307_vm12, %v1139_v8  ;;  %4211 = vmatmul.msk.f32.vlgmr.msra.gmra.mxu3 %vm307_vm12, %v1139_v8  ;;  %v1290_v8 = vld [vmem:[%s6729_s8 + $0x78] sm:$0xff] }
 0xade   :  { %1368 = vmatpush.msrb.mxu1 %v1290_v8 }
 0xae4   :  { %v1265_v55 = vld [vmem:[#allocation2 + $0x30] sm:$0xff] }
 0xae5   :  { %4231 = vmatmul.msk.f32.vlgmr.msrb.gmra.mxu2 %vm111_vm0, %v1259_v16  ;;  %4239 = vmatmul.msk.f32.vlgmr.msrb.gmra.mxu3 %vm111_vm0, %v1259_v16  ;;  %v1288_v16 = vld [vmem:[%s6729_s8 + $0x68] sm:$0xff] }
 0xae6   :  { %1369 = vmatpush.msrb.mxu1 %v1288_v16 }
 0xaed   :  { %4232 = vmatmul.msk.f32.gmra.mxu2 %vm111_vm0, %v1260_v19  ;;  %4240 = vmatmul.msk.f32.gmra.mxu3 %vm111_vm0, %v1260_v19  ;;  %v1286_v19 = vld [vmem:[%s6729_s8 + $0x58] sm:$0xff] }
 0xaee   :  { %1370 = vmatpush.msrb.mxu1 %v1286_v19 }
 0xaf5   :  { %4233 = vmatmul.msk.f32.gmra.mxu2 %vm111_vm0, %v1261_v22  ;;  %4241 = vmatmul.msk.f32.gmra.mxu3 %vm111_vm0, %v1261_v22  ;;  %v1283_v22 = vld [vmem:[%s6729_s8 + $0x40] sm:$0xff] }
 0xafd   :  { %4234 = vmatmul.msk.f32.gmra.mxu2 %vm111_vm0, %v1262_v53  ;;  %4242 = vmatmul.msk.f32.gmra.mxu3 %vm111_vm0, %v1262_v53  ;;  %v1284_v53 = vld [vmem:[%s6729_s8 + $0x48] sm:$0xff] }
 0xafe   :  { %1371 = vmatpush.msrb.mxu1 %v1284_v53 }
 0xb05   :  { %4235 = vmatmul.msk.f32.gmra.mxu2 %vm111_vm0, %v1263_v42  ;;  %4243 = vmatmul.msk.f32.gmra.mxu3 %vm111_vm0, %v1263_v42  ;;  %v5478_v42 = vld [vmem:[%s6730_s9 + $0x70] sm:$0xff] }
 0xb06   :  { %1705 = vmatpush.msra.mxu2 %v5478_v42 }
 0xb0d   :  { %4236 = vmatmul.msk.f32.gmra.mxu2 %vm111_vm0, %v1264_v24  ;;  %4244 = vmatmul.msk.f32.gmra.mxu3 %vm111_vm0, %v1264_v24  ;;  %v5485_v24 = vld [vmem:[%s6730_s9 + $0x60] sm:$0xff] }
 0xb0e   :  { %1706 = vmatpush.msra.mxu2 %v5485_v24 }
 0xb15   :  { %4237 = vmatmul.msk.f32.gmra.mxu2 %vm111_vm0, %v1265_v55  ;;  %4245 = vmatmul.msk.f32.gmra.mxu3 %vm111_vm0, %v1265_v55  ;;  %v5492_v55 = vld [vmem:[%s6730_s9 + $0x50] sm:$0xff] }
 0xb16   :  { %1707 = vmatpush.msra.mxu2 %v5492_v55 }
 0xb2e   :  { %v1233_v7 = vpop.permute.xlu0 %1232 }
 0xb60   :  { %v1167_v37 = vpop.f32.mrf.mxu2  ;;  %v1187_v41 = vpop.f32.mrf.mxu3 }
 0xb61   :  { %v1190_v34 = vadd.f32 %v1167_v37, %v243_v56  ;;  %v1191_v61 = vadd.f32 %v1187_v41, %v244_v59  ;;  %v5497_v56 = vld [vmem:[%s6730_s9 + $0x78] sm:$0xff]  ;;  %v5524_v41 = vld [vmem:[%s6730_s9 + $0x30] sm:$0xff] }
 0xb62   :  { %1613 = vmatpush.msra.mxu1 %v5497_v56  ;;  %1725 = vmatpush.msra.mxu3 %v5497_v56  ;;  %v5529_v59 = vld [vmem:[%s6730_s9 + $0x58] sm:$0xff] }
 0xb63   :  { %v4212_v44 = vmul.f32 -1.442695, %v1190_v34  ;;  %v4213_v43 = vmul.f32 -1.442695, %v1191_v61  ;;  %v5507_v34 = vld [vmem:[%s6730_s9 + $0x40] sm:$0xff] }
 0xb64   :  { %1708 = vmatpush.msra.mxu2 %v5507_v34 }
 0xb65   :  { %4473 = vpow2.f32 %v4212_v44  ;;  %v5512_v44 = vld [vmem:[%s6730_s9 + $0x68] sm:$0xff] }
 0xb66   :  { %1614 = vmatpush.msra.mxu1 %v5512_v44  ;;  %1726 = vmatpush.msra.mxu3 %v5512_v44 }
 0xb67   :  { %1709 = vmatpush.msra.mxu2 %v5524_v41 }
 0xb68   :  { %1615 = vmatpush.msra.mxu1 %v5529_v59  ;;  %1727 = vmatpush.msra.mxu3 %v5529_v59 }
 0xb6b   :  { %v4474_v39 = vpop.eup %4473 }
 0xb6c   :  { %v1195_v35 = vadd.f32 1.0, %v4474_v39 }
 0xb6e   :  { %4475 = vrcp.f32 %v1195_v35  ;;  %v1207_v62 = vand.u32 2147483648, %v1195_v35  ;;  %v1205_v48 = vand.u32 2147483647, %v1195_v35  ;;  %vm1201_vm7 = vweird.f32 %v1195_v35 }
 0xb6f   :  { %4477 = vtanh.f32 %v1191_v61 }
 0xb70   :  { %v1208_v2 = vor.u32 1.1754944e-38, %v1207_v62  ;;  %vm1206_vm9 = vcmp.eq.f32.partialorder %v1205_v48, 8.507059e+37  ;;  %4479 = vpow2.f32 %v4213_v43  ;;  %v5562_v48 = vld [vmem:[%s6730_s9 + $0x38] sm:$0xff] }
 0xb74   :  { %v4476_v63 = vpop.eup %4475 }
 0xb75   :  { %v1197_v40 = vmul.f32 %v4476_v63, %v1195_v35  ;;  %vm1202_vm6 = vweird.f32 %v4476_v63  ;;  %v4478_v60 = vpop.eup %4477 }
 0xb76   :  { %vm1203_vm8 = vmor %vm1201_vm7, %vm1202_vm6  ;;  %v4480_v57 = vpop.eup %4479 }
 0xb77   :  { %v1198_v11 = vsub.f32 1.0, %v1197_v40  ;;  %v1215_v3 = vadd.f32 1.0, %v4480_v57  ;;  %v5541_v40 = vld [vmem:[%s6730_s9 + $0x20] sm:$0xff] }
 0xb78   :  { %1710 = vmatpush.msra.mxu2 %v5541_v40 }
 0xb79   :  { %v1199_v33 = vmul.f32 %v4476_v63, %v1198_v11  ;;  %4481 = vrcp.f32 %v1215_v3  ;;  %vm1221_vm11 = vweird.f32 %v1215_v3  ;;  %v1225_v20 = vand.u32 2147483647, %v1215_v3  ;;  %v5546_v11 = vld [vmem:[%s6730_s9 + $0x48] sm:$0xff] }
 0xb7a   :  { %1616 = vmatpush.msra.mxu1 %v5546_v11  ;;  %1728 = vmatpush.msra.mxu3 %v5546_v11 }
 0xb7b   :  { %v1200_v0 = vadd.f32 %v4476_v63, %v1199_v33  ;;  %vm1226_vm14 = vcmp.eq.f32.partialorder %v1225_v20, 8.507059e+37  ;;  %v5557_v33 = vld [vmem:[%s6730_s9 + $0x10] sm:$0xff] }
 0xb7c   :  { %1617 = vmatpush.msra.mxu1 %v5562_v48  ;;  %1711 = vmatpush.msra.mxu2 %v5557_v33 }
 0xb7d   :  { %v1204_v38 = vsel %vm1203_vm8, %v4476_v63, %v1200_v0  ;;  %1729 = vmatpush.msra.mxu3 %v5562_v48 }
 0xb7e   :  { %v1209_v36 = vsel %vm1206_vm9, %v1208_v2, %v1204_v38  ;;  %v5573_v2 = vld [vmem:[%s6730_s9] sm:$0xff]  ;;  %v5578_v38 = vld [vmem:[%s6730_s9 + $0x28] sm:$0xff] }
 0xb7f   :  { %v1236_v25 = vmul.f32 %v4478_v60, %v1209_v36  ;;  %v4482_v4 = vpop.eup %4481  ;;  %v1235_v21 = vmul.f32 %v1233_v7, %v1209_v36  ;;  %v5583_v60 = vld [vmem:[%s6730_s9 + $0x18] sm:$0xff]  ;;  %1618 = vmatpush.msra.mxu1 %v5578_v38  ;;  %v5590_v36 = vld [vmem:[%s6730_s9 + $0x8] sm:$0xff]  ;;  %1712 = vmatpush.msra.mxu2 %v5573_v2  ;;  %s6764_s9 = sld [smem:[#allocation17_spill]] }
 0xb80   :  { %v1217_v5 = vmul.f32 %v4482_v4, %v1215_v3  ;;  %vm1222_vm10 = vweird.f32 %v4482_v4  ;;  %1730 = vmatpush.msra.mxu3 %v5578_v38 }
 0xb81   :  { %1238 = vrot.lane.b32.xlu1 %v1236_v25, %s4738_s25  ;;  %vm1223_vm13 = vmor %vm1221_vm11, %vm1222_vm10  ;;  %1619 = vmatpush.msra.mxu1 %v5583_v60 }
 0xb82   :  { %v1218_v6 = vsub.f32 1.0, %v1217_v5  ;;  %1731 = vmatpush.msra.mxu3 %v5583_v60  ;;  %1941 = vmatpush.msrb.mxu2 %v5478_v42  ;;  %v1479_v5 = vpop.f32.mrf.mxu3 }
 0xb83   :  { %1620 = vmatpush.msra.mxu1 %v5590_v36 }
 0xb84   :  { %v1219_v9 = vmul.f32 %v4482_v4, %v1218_v6  ;;  %1732 = vmatpush.msra.mxu3 %v5590_v36  ;;  %1942 = vmatpush.msrb.mxu2 %v5485_v24 }
 0xb86   :  { %v1220_v17 = vadd.f32 %v4482_v4, %v1219_v9  ;;  %1961 = vmatpush.msrb.mxu3 %v5497_v56  ;;  %1943 = vmatpush.msrb.mxu2 %v5492_v55 }
 0xb88   :  { %1962 = vmatpush.msrb.mxu3 %v5512_v44  ;;  %1944 = vmatpush.msrb.mxu2 %v5507_v34 }
 0xb89   :  { %1134 = vrot.lane.b32.xlu1 %v1130_v14, %s4739_s24  ;;  %v1289_v14 = vld [vmem:[%s6729_s8 + $0x70] sm:$0xff] }
 0xb8a   :  { %1327 = vmatpush.msra.mxu0 %v1289_v14  ;;  %1963 = vmatpush.msrb.mxu3 %v5529_v59  ;;  %v1482_v7 = vpop.f32.mrf.mxu3 }
 0xb8b   :  { %1945 = vmatpush.msrb.mxu2 %v5524_v41 }
 0xb8c   :  { %1964 = vmatpush.msrb.mxu3 %v5546_v11 }
 0xb8d   :  { %1946 = vmatpush.msrb.mxu2 %v5541_v40 }
 0xb8e   :  { %1965 = vmatpush.msrb.mxu3 %v5562_v48 }
 0xb8f   :  { %1947 = vmatpush.msrb.mxu2 %v5557_v33 }
 0xb90   :  { %1966 = vmatpush.msrb.mxu3 %v5578_v38 }
 0xb91   :  { %771 = vrot.lane.b32.xlu1 %v5276_v52, %s4739_s24  ;;  %v1227_v52 = vand.u32 2147483648, %v1215_v3  ;;  %1948 = vmatpush.msrb.mxu2 %v5573_v2 }
 0xb92   :  { %1967 = vmatpush.msrb.mxu3 %v5583_v60 }
 0xb93   :  { %v1228_v23 = vor.u32 1.1754944e-38, %v1227_v52 }
 0xb94   :  { %1968 = vmatpush.msrb.mxu3 %v5590_v36 }
 0xb99   :  { %410 = vrot.lane.b32.xlu1 %v5132_v1, %s4739_s24  ;;  %v1224_v1 = vsel %vm1223_vm13, %v4482_v4, %v1220_v17  ;;  %v1438_v4 = vpop.f32.mrf.mxu2 }
 0xb9a   :  { %v1229_v26 = vsel %vm1226_vm14, %v1228_v23, %v1224_v1 }
 0xba1   :  { %v1441_v6 = vpop.f32.mrf.mxu2 }
 0xbf3   :  { %v1239_v12 = vpop.permute.xlu1 %1238 }
 0xbf4   :  { %v1241_v15 = vadd.f32 %v1239_v12, %v1235_v21  ;;  %v1444_v12 = vpop.f32.mrf.mxu2 }
 0xbf6   :  { %4483 = vtanh.f32 %v1241_v15  ;;  %v1485_v15 = vpop.f32.mrf.mxu3 }
 0xbfb   :  { %v1135_v47 = vpop.permute.xlu1 %1134 }
 0xbfc   :  { %v4484_v51 = vpop.eup %4483  ;;  %1138 = vst.msk [vmem:[#allocation3 + $0x8] sm:$0xff] %vm111_vm0, %v1135_v47  ;;  %v1447_v23 = vpop.f32.mrf.mxu2 }
 0xbfd   :  { %v1243_v29 = vmul.f32 %v4484_v51, %v1229_v26 }
 0xbfe   :  { %v1488_v47 = vpop.f32.mrf.mxu3 }
 0xbff   :  { %1248 = vrot.lane.b32.xlu2 %v1243_v29, %s4738_s25 }
 0xc03   :  { %v772_v31 = vpop.permute.xlu1 %771  ;;  %v1268_v61 = vld [vmem:[#allocation3 + $0x8] sm:$0xff] }
 0xc04   :  { %775 = vst.msk [vmem:[#allocation3 + $0x20] sm:$0xff] %vm111_vm0, %v772_v31  ;;  %v1450_v29 = vpop.f32.mrf.mxu2 }
 0xc06   :  { %v1491_v31 = vpop.f32.mrf.mxu3 }
 0xc07   :  { %1013 = vrot.lane.b32.xlu2 %v5344_v30, %s4739_s24 }
 0xc0b   :  { %v411_v32 = vpop.permute.xlu1 %410  ;;  %v1271_v25 = vld [vmem:[#allocation3 + $0x20] sm:$0xff] }
 0xc0c   :  { %414 = vst.msk [vmem:[#allocation3 + $0x38] sm:$0xff] %vm111_vm0, %v411_v32 }
 0xc0e   :  { %v1494_v16 = vpop.f32.mrf.mxu3 }
 0xc0f   :  { %650 = vrot.lane.b32.xlu2 %v5228_v27, %s4739_s24 }
 0xc13   :  { %v1274_v3 = vld [vmem:[#allocation3 + $0x38] sm:$0xff] }
 0xc59   :  { %v1249_v10 = vpop.permute.xlu2 %1248 }
 0xc5a   :  { %v1251_v13 = vsel %vm1246_vm15, %v1249_v10, 0.0 }
 0xc5b   :  { %1255 = vrot.lane.b32.xlu0 %v1251_v13, %s4739_s24  ;;  %1253 = vst.msk [vmem:[#allocation2 + $0x38] sm:$0xff] %vm111_vm0, %v1251_v13 }
 0xc61   :  { %v1014_v54 = vpop.permute.xlu2 %1013 }
 0xc62   :  { %1017 = vst.msk [vmem:[#allocation3 + $0x10] sm:$0xff] %vm111_vm0, %v1014_v54  ;;  %v1266_v30 = vld [vmem:[#allocation2 + $0x38] sm:$0xff] }
 0xc63   :  { %892 = vrot.lane.b32.xlu0 %v5309_v18, %s4739_s24  ;;  %4238 = vmatmul.msk.f32.gmra.mxu2 %vm111_vm0, %v1266_v30  ;;  %v1287_v18 = vld [vmem:[%s6729_s8 + $0x60] sm:$0xff] }
 0xc64   :  { %4246 = vmatmul.msk.f32.gmra.mxu3 %vm111_vm0, %v1266_v30  ;;  %1328 = vmatpush.msra.mxu0 %v1287_v18  ;;  %v1453_v18 = vpop.f32.mrf.mxu2 }
 0xc69   :  { %v651_v27 = vpop.permute.xlu2 %650  ;;  %v1269_v62 = vld [vmem:[#allocation3 + $0x10] sm:$0xff] }
 0xc6a   :  { %654 = vst.msk [vmem:[#allocation3 + $0x28] sm:$0xff] %vm111_vm0, %v651_v27 }
 0xc6b   :  { %529 = vrot.lane.b32.xlu0 %v5173_v46, %s4739_s24  ;;  %v1285_v46 = vld [vmem:[%s6729_s8 + $0x50] sm:$0xff]  ;;  %s4137_s8 = sshll.u32 %s6740_s19, 4  ;;  %s4138_s8 = int_to_ptr.hbm [resolvable:$true] %s4137_s8 }
 0xc6c   :  { %1329 = vmatpush.msra.mxu0 %v1285_v46 }
 0xc6e   :  { %1330 = vmatpush.msra.mxu0 %v1283_v22 }
 0xc70   :  { %1593 = vmatpush.msrb.mxu0 %v5478_v42 }
 0xc71   :  { %v1272_v43 = vld [vmem:[#allocation3 + $0x28] sm:$0xff] }
 0xc72   :  { %1594 = vmatpush.msrb.mxu0 %v5485_v24 }
 0xc74   :  { %1595 = vmatpush.msrb.mxu0 %v5492_v55 }
 0xc76   :  { %1596 = vmatpush.msrb.mxu0 %v5507_v34 }
 0xc78   :  { %1597 = vmatpush.msrb.mxu0 %v5524_v41 }
 0xc7a   :  { %1598 = vmatpush.msrb.mxu0 %v5541_v40 }
 0xc7c   :  { %1599 = vmatpush.msrb.mxu0 %v5557_v33 }
 0xc7e   :  { %1600 = vmatpush.msrb.mxu0 %v5573_v2 }
 0xccd   :  { %v1256_v37 = vpop.permute.xlu0 %1255 }
 0xcce   :  { %1258 = vst.msk [vmem:[#allocation3] sm:$0xff] %vm111_vm0, %v1256_v37 }
 0xcd5   :  { %v893_v39 = vpop.permute.xlu0 %892  ;;  %v1267_v35 = vld [vmem:[#allocation3] sm:$0xff] }
 0xcd6   :  { %896 = vst.msk [vmem:[#allocation3 + $0x18] sm:$0xff] %vm111_vm0, %v893_v39  ;;  %4215 = vmatmul.msk.f32.vlgmr.msra.gmra.mxu0 %vm111_vm0, %v1267_v35  ;;  %4223 = vmatmul.msk.f32.vlgmr.msrb.gmra.mxu1 %vm111_vm0, %v1267_v35 }
 0xcd7   :  { %1823 = vmatpush.msra.mxu0 %v5478_v42  ;;  %1843 = vmatpush.msrb.mxu1 %v5497_v56 }
 0xcd9   :  { %1824 = vmatpush.msra.mxu0 %v5485_v24  ;;  %1844 = vmatpush.msrb.mxu1 %v5512_v44 }
 0xcdb   :  { %1825 = vmatpush.msra.mxu0 %v5492_v55  ;;  %1845 = vmatpush.msrb.mxu1 %v5529_v59 }
 0xcdd   :  { %v530_v63 = vpop.permute.xlu0 %529  ;;  %v1270_v0 = vld [vmem:[#allocation3 + $0x18] sm:$0xff]  ;;  %1826 = vmatpush.msra.mxu0 %v5507_v34  ;;  %1846 = vmatpush.msrb.mxu1 %v5546_v11 }
 0xcde   :  { %533 = vst.msk [vmem:[#allocation3 + $0x30] sm:$0xff] %vm111_vm0, %v530_v63  ;;  %4216 = vmatmul.msk.f32.gmra.mxu0 %vm111_vm0, %v1268_v61  ;;  %4224 = vmatmul.msk.f32.gmra.mxu1 %vm111_vm0, %v1268_v61  ;;  %v1456_v61 = vpop.f32.mrf.mxu2 }
 0xcdf   :  { %1827 = vmatpush.msra.mxu0 %v5524_v41  ;;  %1847 = vmatpush.msrb.mxu1 %v5562_v48 }
 0xce1   :  { %1828 = vmatpush.msra.mxu0 %v5541_v40  ;;  %1848 = vmatpush.msrb.mxu1 %v5578_v38 }
 0xce3   :  { %1829 = vmatpush.msra.mxu0 %v5557_v33  ;;  %1849 = vmatpush.msrb.mxu1 %v5583_v60 }
 0xce5   :  { %1830 = vmatpush.msra.mxu0 %v5573_v2  ;;  %1850 = vmatpush.msrb.mxu1 %v5590_v36  ;;  %v1273_v57 = vld [vmem:[#allocation3 + $0x30] sm:$0xff] }
 0xce6   :  { %4217 = vmatmul.msk.f32.gmra.mxu0 %vm111_vm0, %v1269_v62  ;;  %4225 = vmatmul.msk.f32.gmra.mxu1 %vm111_vm0, %v1269_v62  ;;  %v1497_v62 = vpop.f32.mrf.mxu3 }
 0xcee   :  { %4218 = vmatmul.msk.f32.gmra.mxu0 %vm111_vm0, %v1270_v0  ;;  %4226 = vmatmul.msk.f32.gmra.mxu1 %vm111_vm0, %v1270_v0 }
 0xcf6   :  { %4219 = vmatmul.msk.f32.gmra.mxu0 %vm111_vm0, %v1271_v25  ;;  %4227 = vmatmul.msk.f32.gmra.mxu1 %vm111_vm0, %v1271_v25 }
 0xcfe   :  { %4220 = vmatmul.msk.f32.gmra.mxu0 %vm111_vm0, %v1272_v43  ;;  %4228 = vmatmul.msk.f32.gmra.mxu1 %vm111_vm0, %v1272_v43 }
 0xd06   :  { %4221 = vmatmul.msk.f32.gmra.mxu0 %vm111_vm0, %v1273_v57  ;;  %4229 = vmatmul.msk.f32.gmra.mxu1 %vm111_vm0, %v1273_v57 }
 0xd0e   :  { %4222 = vmatmul.msk.f32.gmra.mxu0 %vm111_vm0, %v1274_v3  ;;  %4230 = vmatmul.msk.f32.gmra.mxu1 %vm111_vm0, %v1274_v3 }
 0xd16   :  { %1601 = vmatmul.f32.vlgmr.msrb.gmra.mxu0 %v6747_v28  ;;  %1621 = vmatmul.f32.vlgmr.msra.gmra.mxu1 %v6747_v28 }
 0xd17   :  { %2059 = vmatpush.msrb.mxu0 %v5478_v42  ;;  %2079 = vmatpush.msra.mxu1 %v5497_v56 }
 0xd19   :  { %2060 = vmatpush.msrb.mxu0 %v5485_v24  ;;  %2080 = vmatpush.msra.mxu1 %v5512_v44 }
 0xd1b   :  { %2061 = vmatpush.msrb.mxu0 %v5492_v55  ;;  %2081 = vmatpush.msra.mxu1 %v5529_v59 }
 0xd1d   :  { %2062 = vmatpush.msrb.mxu0 %v5507_v34  ;;  %2082 = vmatpush.msra.mxu1 %v5546_v11 }
 0xd1f   :  { %2063 = vmatpush.msrb.mxu0 %v5524_v41  ;;  %2083 = vmatpush.msra.mxu1 %v5562_v48 }
 0xd21   :  { %2064 = vmatpush.msrb.mxu0 %v5541_v40  ;;  %2084 = vmatpush.msra.mxu1 %v5578_v38 }
 0xd23   :  { %2065 = vmatpush.msrb.mxu0 %v5557_v33  ;;  %2085 = vmatpush.msra.mxu1 %v5583_v60 }
 0xd25   :  { %2066 = vmatpush.msrb.mxu0 %v5573_v2  ;;  %2086 = vmatpush.msra.mxu1 %v5590_v36 }
 0xd53   :  { %v1332_v9 = vpop.f32.mrf.mxu0  ;;  %v1373_v21 = vpop.f32.mrf.mxu1 }
 0xd5b   :  { %v1335_v17 = vpop.f32.mrf.mxu0  ;;  %v1376_v52 = vpop.f32.mrf.mxu1 }
 0xd5c   :  { %v5692_v43 = vadd.f32 %v1441_v6, %v1335_v17  ;;  %v5694_v57 = vadd.f32 %v1482_v7, %v1376_v52  ;;  %v5708_v7 = vadd.f32 %v1438_v4, %v1332_v9  ;;  %v5710_v52 = vadd.f32 %v1479_v5, %v1373_v21 }
 0xd63   :  { %v1338_v20 = vpop.f32.mrf.mxu0  ;;  %v1379_v1 = vpop.f32.mrf.mxu1 }
 0xd64   :  { %v5676_v22 = vadd.f32 %v1444_v12, %v1338_v20  ;;  %v5678_v53 = vadd.f32 %v1485_v15, %v1379_v1  ;;  %v1459_v1 = vpop.f32.mrf.mxu2 }
 0xd6b   :  { %v1341_v51 = vpop.f32.mrf.mxu0  ;;  %v1382_v26 = vpop.f32.mrf.mxu1 }
 0xd6c   :  { %v5656_v10 = vadd.f32 %v1447_v23, %v1341_v51  ;;  %v5658_v13 = vadd.f32 %v1488_v47, %v1382_v26  ;;  %v1500_v23 = vpop.f32.mrf.mxu3 }
 0xd73   :  { %v1344_v32 = vpop.f32.mrf.mxu0  ;;  %v1385_v50 = vpop.f32.mrf.mxu1 }
 0xd74   :  { %v5660_v54 = vadd.f32 %v1450_v29, %v1344_v32  ;;  %v5662_v30 = vadd.f32 %v1491_v31, %v1385_v50 }
 0xd76   :  { %v1559_v27 = vsel %vm5103_vm1, %v5656_v10, %v5660_v54  ;;  %v1563_v14 = vsel %vm5103_vm1, %v5660_v54, %v5656_v10  ;;  %v1564_v8 = vsel %vm5114_vm2, %v5662_v30, %v5658_v13 }
 0xd7b   :  { %v1347_v46 = vpop.f32.mrf.mxu0  ;;  %v1388_v19 = vpop.f32.mrf.mxu1 }
 0xd7c   :  { %v5680_v37 = vadd.f32 %v1453_v18, %v1347_v46  ;;  %v5682_v39 = vadd.f32 %v1494_v16, %v1388_v19 }
 0xd7e   :  { %v1551_v35 = vsel %vm5103_vm1, %v5680_v37, %v5676_v22  ;;  %v1552_v63 = vsel %vm5114_vm2, %v5682_v39, %v5678_v53 }
 0xd83   :  { %v1350_v0 = vpop.f32.mrf.mxu0  ;;  %v1391_v25 = vpop.f32.mrf.mxu1 }
 0xd84   :  { %v5696_v3 = vadd.f32 %v1456_v61, %v1350_v0  ;;  %v5698_v12 = vadd.f32 %v1497_v62, %v1391_v25 }
 0xd8b   :  { %v1353_v6 = vpop.f32.mrf.mxu0  ;;  %v1394_v17 = vpop.f32.mrf.mxu1 }
 0xd8c   :  { %v5712_v47 = vadd.f32 %v1459_v1, %v1353_v6  ;;  %v5714_v51 = vadd.f32 %v1500_v23, %v1394_v17 }
 0xd8e   :  { %v1523_v4 = vsel %vm5103_vm1, %v5708_v7, %v5712_v47  ;;  %v1524_v18 = vsel %vm5114_vm2, %v5710_v52, %v5714_v51 }
 0xd93   :  { %v1602_v5 = vpop.f32.mrf.mxu0  ;;  %v1622_v50 = vpop.f32.mrf.mxu1 }
 0xd94   :  { %v1625_v9 = vadd.f32 %v1602_v5, %v1523_v4  ;;  %v1626_v46 = vadd.f32 %v1622_v50, %v1524_v18 }
 0xd96   :  { %v4247_v21 = vmul.f32 -1.442695, %v1625_v9  ;;  %v4248_v9 = vmul.f32 -1.442695, %v1626_v46 }
 0xd98   :  { %4485 = vpow2.f32 %v4247_v21 }
 0xd9e   :  { %v4486_v31 = vpop.eup %4485 }
 0xd9f   :  { %v1630_v32 = vadd.f32 1.0, %v4486_v31 }
 0xda1   :  { %4487 = vrcp.f32 %v1630_v32  ;;  %v1642_v62 = vand.u32 2147483648, %v1630_v32  ;;  %v1640_v25 = vand.u32 2147483647, %v1630_v32  ;;  %vm1636_vm4 = vweird.f32 %v1630_v32 }
 0xda2   :  { %4489 = vtanh.f32 %v1626_v46 }
 0xda3   :  { %v1643_v23 = vor.u32 1.1754944e-38, %v1642_v62  ;;  %vm1641_vm6 = vcmp.eq.f32.partialorder %v1640_v25, 8.507059e+37  ;;  %4491 = vpow2.f32 %v4248_v9 }
 0xda7   :  { %v4488_v16 = vpop.eup %4487 }
 0xda8   :  { %v1632_v19 = vmul.f32 %v4488_v16, %v1630_v32  ;;  %vm1637_vm3 = vweird.f32 %v4488_v16  ;;  %v4490_v17 = vpop.eup %4489 }
 0xda9   :  { %vm1638_vm5 = vmor %vm1636_vm4, %vm1637_vm3  ;;  %v4492_v21 = vpop.eup %4491 }
 0xdaa   :  { %v1633_v61 = vsub.f32 1.0, %v1632_v19  ;;  %v1650_v31 = vadd.f32 1.0, %v4492_v21 }
 0xdac   :  { %v1634_v0 = vmul.f32 %v4488_v16, %v1633_v61  ;;  %4493 = vrcp.f32 %v1650_v31  ;;  %vm1656_vm8 = vweird.f32 %v1650_v31  ;;  %v1660_v25 = vand.u32 2147483647, %v1650_v31 }
 0xdae   :  { %v1635_v1 = vadd.f32 %v4488_v16, %v1634_v0  ;;  %vm1661_vm10 = vcmp.eq.f32.partialorder %v1660_v25, 8.507059e+37 }
 0xdb0   :  { %v1639_v6 = vsel %vm1638_vm5, %v4488_v16, %v1635_v1  ;;  %v1662_v16 = vand.u32 2147483648, %v1650_v31 }
 0xdb1   :  { %v1644_v4 = vsel %vm1641_vm6, %v1643_v23, %v1639_v6 }
 0xdb2   :  { %v1667_v5 = vmul.f32 %v4490_v17, %v1644_v4  ;;  %v4494_v50 = vpop.eup %4493  ;;  %v1666_v0 = vmul.f32 0.0, %v1644_v4  ;;  %v1663_v1 = vor.u32 1.1754944e-38, %v1662_v16  ;;  %v1675_v4 = vld [vmem:[%s6759_s3] sm:$0xff] }
 0xdb3   :  { %v1652_v18 = vmul.f32 %v4494_v50, %v1650_v31  ;;  %vm1657_vm7 = vweird.f32 %v4494_v50  ;;  %vm1676_vm11 = vcmp.gt.f32.partialorder %v1675_v4, 0.5  ;;  %v1535_v31 = vsel %vm5103_vm1, %v5692_v43, %v5696_v3 }
 0xdb4   :  { %1669 = vrot.lane.b32.xlu2 %v1667_v5, %s4738_s25  ;;  %vm1658_vm9 = vmor %vm1656_vm8, %vm1657_vm7 }
 0xdb5   :  { %v1653_v19 = vsub.f32 1.0, %v1652_v18 }
 0xdb7   :  { %v1654_v61 = vmul.f32 %v4494_v50, %v1653_v19 }
 0xdb9   :  { %v1655_v62 = vadd.f32 %v4494_v50, %v1654_v61 }
 0xdbb   :  { %v1659_v46 = vsel %vm1658_vm9, %v4494_v50, %v1655_v62  ;;  %v1536_v62 = vsel %vm5114_vm2, %v5694_v57, %v5698_v12 }
 0xdbc   :  { %v1664_v6 = vsel %vm1661_vm10, %v1663_v1, %v1659_v46 }
 0xe0e   :  { %v1670_v32 = vpop.permute.xlu2 %1669 }
 0xe0f   :  { %v1672_v28 = vadd.f32 %v1670_v32, %v1666_v0 }
 0xe11   :  { %4495 = vtanh.f32 %v1672_v28  ;;  %1689 = vrot.lane.b32.xlu1 %v1672_v28, %s4738_s25 }
 0xe17   :  { %v4496_v23 = vpop.eup %4495 }
 0xe18   :  { %v1674_v17 = vmul.f32 %v4496_v23, %v1664_v6 }
 0xe1a   :  { %1678 = vrot.lane.b32.xlu0 %v1674_v17, %s4738_s25 }
 0xe83   :  { %v1690_v5 = vpop.permute.xlu1 %1689 }
 0xe84   :  { %v5738_v9 = vsel %vm1676_vm11, %v1690_v5, 0.0 }
 0xe85   :  { %1779 = vrot.lane.b32.xlu2 %v5738_v9, %s4738_s25 }
 0xe8c   :  { %v1679_v28 = vpop.permute.xlu0 %1678 }
 0xe8d   :  { %v5742_v21 = vsel %vm1676_vm11, %v1679_v28, 0.0 }
 0xe8e   :  { %1682 = vst.msk [vmem:[#allocation2] sm:$0xff] %vm111_vm0, %v5742_v21  ;;  %4249 = vmatmul.msk.f32.vlgmr.msra.gmra.mxu2 %vm307_vm12, %v5742_v21  ;;  %4250 = vmatmul.msk.f32.vlgmr.msra.gmra.mxu3 %vm307_vm12, %v5742_v21 }
 0xe8f   :  { %2177 = vmatpush.msra.mxu2 %v5478_v42  ;;  %2197 = vmatpush.msra.mxu3 %v5497_v56 }
 0xe91   :  { %2178 = vmatpush.msra.mxu2 %v5485_v24  ;;  %2198 = vmatpush.msra.mxu3 %v5512_v44 }
 0xe93   :  { %2179 = vmatpush.msra.mxu2 %v5492_v55  ;;  %2199 = vmatpush.msra.mxu3 %v5529_v59 }
 0xe95   :  { %2180 = vmatpush.msra.mxu2 %v5507_v34  ;;  %2200 = vmatpush.msra.mxu3 %v5546_v11 }
 0xe97   :  { %2181 = vmatpush.msra.mxu2 %v5524_v41  ;;  %2201 = vmatpush.msra.mxu3 %v5562_v48 }
 0xe99   :  { %2182 = vmatpush.msra.mxu2 %v5541_v40  ;;  %2202 = vmatpush.msra.mxu3 %v5578_v38 }
 0xe9b   :  { %2183 = vmatpush.msra.mxu2 %v5557_v33  ;;  %2203 = vmatpush.msra.mxu3 %v5583_v60 }
 0xe9d   :  { %2184 = vmatpush.msra.mxu2 %v5573_v2  ;;  %2204 = vmatpush.msra.mxu3 %v5590_v36 }
 0xedf   :  { %v1780_v29 = vpop.permute.xlu2 %1779 }
 0xf11   :  { %v1714_v50 = vpop.f32.mrf.mxu2  ;;  %v1734_v32 = vpop.f32.mrf.mxu3 }
 0xf12   :  { %v1737_v18 = vadd.f32 %v1714_v50, %v1535_v31  ;;  %v1738_v25 = vadd.f32 %v1734_v32, %v1536_v62 }
 0xf14   :  { %v4251_v19 = vmul.f32 -1.442695, %v1737_v18 }
 0xf16   :  { %4497 = vpow2.f32 %v4251_v19  ;;  %v4252_v19 = vmul.f32 -1.442695, %v1738_v25 }
 0xf1c   :  { %v4498_v61 = vpop.eup %4497 }
 0xf1d   :  { %v1742_v0 = vadd.f32 1.0, %v4498_v61 }
 0xf1f   :  { %4499 = vrcp.f32 %v1742_v0  ;;  %v1754_v23 = vand.u32 2147483648, %v1742_v0  ;;  %v1752_v17 = vand.u32 2147483647, %v1742_v0  ;;  %vm1748_vm14 = vweird.f32 %v1742_v0 }
 0xf20   :  { %4501 = vtanh.f32 %v1738_v25 }
 0xf21   :  { %v1755_v5 = vor.u32 1.1754944e-38, %v1754_v23  ;;  %vm1753_vm3 = vcmp.eq.f32.partialorder %v1752_v17, 8.507059e+37  ;;  %4503 = vpow2.f32 %v4252_v19 }
 0xf25   :  { %v4500_v16 = vpop.eup %4499 }
 0xf26   :  { %v1744_v46 = vmul.f32 %v4500_v16, %v1742_v0  ;;  %vm1749_vm13 = vweird.f32 %v4500_v16  ;;  %v4502_v31 = vpop.eup %4501 }
 0xf27   :  { %vm1750_vm15 = vmor %vm1748_vm14, %vm1749_vm13  ;;  %v4504_v61 = vpop.eup %4503 }
 0xf28   :  { %v1745_v1 = vsub.f32 1.0, %v1744_v46  ;;  %v1762_v32 = vadd.f32 1.0, %v4504_v61 }
 0xf2a   :  { %v1746_v6 = vmul.f32 %v4500_v16, %v1745_v1  ;;  %4505 = vrcp.f32 %v1762_v32  ;;  %v1774_v17 = vand.u32 2147483648, %v1762_v32  ;;  %vm1768_vm5 = vweird.f32 %v1762_v32 }
 0xf2b   :  { %v1772_v25 = vand.u32 2147483647, %v1762_v32 }
 0xf2c   :  { %v1747_v4 = vadd.f32 %v4500_v16, %v1746_v6 }
 0xf2d   :  { %vm1773_vm7 = vcmp.eq.f32.partialorder %v1772_v25, 8.507059e+37 }
 0xf2e   :  { %v1751_v28 = vsel %vm1750_vm15, %v4500_v16, %v1747_v4 }
 0xf2f   :  { %v1756_v50 = vsel %vm1753_vm3, %v1755_v5, %v1751_v28  ;;  %v1775_v5 = vor.u32 1.1754944e-38, %v1774_v17 }
 0xf30   :  { %v1783_v18 = vmul.f32 %v4502_v31, %v1756_v50  ;;  %v4506_v62 = vpop.eup %4505  ;;  %v1782_v0 = vmul.f32 %v1780_v29, %v1756_v50 }
 0xf31   :  { %v1764_v46 = vmul.f32 %v4506_v62, %v1762_v32  ;;  %vm1769_vm4 = vweird.f32 %v4506_v62 }
 0xf32   :  { %1785 = vrot.lane.b32.xlu0 %v1783_v18, %s4738_s25  ;;  %vm1770_vm6 = vmor %vm1768_vm5, %vm1769_vm4 }
 0xf33   :  { %v1765_v1 = vsub.f32 1.0, %v1764_v46 }
 0xf35   :  { %v1766_v6 = vmul.f32 %v4506_v62, %v1765_v1 }
 0xf37   :  { %v1767_v16 = vadd.f32 %v4506_v62, %v1766_v6 }
 0xf39   :  { %v1771_v4 = vsel %vm1770_vm6, %v4506_v62, %v1767_v16  ;;  %v1548_v16 = vsel %vm5114_vm2, %v5678_v53, %v5682_v39 }
 0xf3a   :  { %v1776_v31 = vsel %vm1773_vm7, %v1775_v5, %v1771_v4 }
 0xfa4   :  { %v1786_v26 = vpop.permute.xlu0 %1785 }
 0xfa5   :  { %v1788_v23 = vadd.f32 %v1786_v26, %v1782_v0  ;;  %v4253_v26 = vld [vmem:[%s6759_s3 + $0x8] sm:$0xff] }
 0xfa6   :  { %vm1792_vm8 = vcmp.gt.f32.partialorder %v4253_v26, 0.5 }
 0xfa7   :  { %4507 = vtanh.f32 %v1788_v23  ;;  %1806 = vrot.lane.b32.xlu2 %v1788_v23, %s4738_s25 }
 0xfad   :  { %v4508_v28 = vpop.eup %4507 }
 0xfae   :  { %v1790_v18 = vmul.f32 %v4508_v28, %v1776_v31 }
 0xfb0   :  { %1794 = vrot.lane.b32.xlu1 %v1790_v18, %s4738_s25 }
0x1001   :  { %v1807_v29 = vpop.permute.xlu2 %1806 }
0x1002   :  { %v5781_v50 = vsel %vm1792_vm8, %v1807_v29, %v5738_v9  ;;  %v1547_v9 = vsel %vm5103_vm1, %v5676_v22, %v5680_v37 }
0x1003   :  { %1897 = vrot.lane.b32.xlu0 %v5781_v50, %s4738_s25 }
0x1022   :  { %v1795_v19 = vpop.permute.xlu1 %1794 }
0x1023   :  { %v5785_v61 = vsel %vm1792_vm8, %v1795_v19, 0.0  ;;  %v5788_v32 = vsel %vm1792_vm8, %v1795_v19, %v5742_v21 }
0x1024   :  { %1798 = vst.msk [vmem:[#allocation2 + $0x8] sm:$0xff] %vm111_vm0, %v5785_v61  ;;  %4254 = vmatmul.msk.f32.vlgmr.msra.gmra.mxu0 %vm307_vm12, %v5788_v32  ;;  %4255 = vmatmul.msk.f32.vlgmr.msrb.gmra.mxu1 %vm307_vm12, %v5788_v32 }
0x1025   :  { %2295 = vmatpush.msra.mxu0 %v5478_v42  ;;  %2315 = vmatpush.msrb.mxu1 %v5497_v56 }
0x1027   :  { %2296 = vmatpush.msra.mxu0 %v5485_v24  ;;  %2316 = vmatpush.msrb.mxu1 %v5512_v44 }
0x1029   :  { %2297 = vmatpush.msra.mxu0 %v5492_v55  ;;  %2317 = vmatpush.msrb.mxu1 %v5529_v59 }
0x102b   :  { %2298 = vmatpush.msra.mxu0 %v5507_v34  ;;  %2318 = vmatpush.msrb.mxu1 %v5546_v11 }
0x102d   :  { %2299 = vmatpush.msra.mxu0 %v5524_v41  ;;  %2319 = vmatpush.msrb.mxu1 %v5562_v48 }
0x102f   :  { %2300 = vmatpush.msra.mxu0 %v5541_v40  ;;  %2320 = vmatpush.msrb.mxu1 %v5578_v38 }
0x1031   :  { %2301 = vmatpush.msra.mxu0 %v5557_v33  ;;  %2321 = vmatpush.msrb.mxu1 %v5583_v60 }
0x1033   :  { %2302 = vmatpush.msra.mxu0 %v5573_v2  ;;  %2322 = vmatpush.msrb.mxu1 %v5590_v36 }
0x1075   :  { %v1898_v20 = vpop.permute.xlu0 %1897 }
0x10a1   :  { %v1832_v62 = vpop.f32.mrf.mxu0  ;;  %v1852_v23 = vpop.f32.mrf.mxu1 }
0x10a2   :  { %v1855_v46 = vadd.f32 %v1832_v62, %v1547_v9  ;;  %v1856_v25 = vadd.f32 %v1852_v23, %v1548_v16 }
0x10a4   :  { %v4256_v1 = vmul.f32 -1.442695, %v1855_v46 }
0x10a6   :  { %4509 = vpow2.f32 %v4256_v1  ;;  %v4257_v1 = vmul.f32 -1.442695, %v1856_v25 }
0x10ac   :  { %v4510_v6 = vpop.eup %4509 }
0x10ad   :  { %v1860_v0 = vadd.f32 1.0, %v4510_v6 }
0x10af   :  { %4511 = vrcp.f32 %v1860_v0  ;;  %v1872_v28 = vand.u32 2147483648, %v1860_v0  ;;  %v1870_v18 = vand.u32 2147483647, %v1860_v0  ;;  %vm1866_vm10 = vweird.f32 %v1860_v0 }
0x10b0   :  { %4513 = vtanh.f32 %v1856_v25 }
0x10b1   :  { %v1873_v29 = vor.u32 1.1754944e-38, %v1872_v28  ;;  %vm1871_vm13 = vcmp.eq.f32.partialorder %v1870_v18, 8.507059e+37  ;;  %4515 = vpow2.f32 %v4257_v1 }
0x10b5   :  { %v4512_v17 = vpop.eup %4511 }
0x10b6   :  { %v1862_v4 = vmul.f32 %v4512_v17, %v1860_v0  ;;  %vm1867_vm9 = vweird.f32 %v4512_v17  ;;  %v4514_v9 = vpop.eup %4513 }
0x10b7   :  { %vm1868_vm11 = vmor %vm1866_vm10, %vm1867_vm9  ;;  %v4516_v6 = vpop.eup %4515 }
0x10b8   :  { %v1863_v5 = vsub.f32 1.0, %v1862_v4  ;;  %v1880_v23 = vadd.f32 1.0, %v4516_v6 }
0x10ba   :  { %v1864_v31 = vmul.f32 %v4512_v17, %v1863_v5  ;;  %4517 = vrcp.f32 %v1880_v23  ;;  %v1892_v18 = vand.u32 2147483648, %v1880_v23  ;;  %vm1886_vm15 = vweird.f32 %v1880_v23 }
0x10bb   :  { %v1890_v25 = vand.u32 2147483647, %v1880_v23 }
0x10bc   :  { %v1865_v26 = vadd.f32 %v4512_v17, %v1864_v31 }
0x10bd   :  { %vm1891_vm4 = vcmp.eq.f32.partialorder %v1890_v25, 8.507059e+37 }
0x10be   :  { %v1869_v19 = vsel %vm1868_vm11, %v4512_v17, %v1865_v26 }
0x10bf   :  { %v1874_v62 = vsel %vm1871_vm13, %v1873_v29, %v1869_v19  ;;  %v1893_v29 = vor.u32 1.1754944e-38, %v1892_v18 }
0x10c0   :  { %v1901_v46 = vmul.f32 %v4514_v9, %v1874_v62  ;;  %v4518_v16 = vpop.eup %4517  ;;  %v1900_v0 = vmul.f32 %v1898_v20, %v1874_v62 }
0x10c1   :  { %v1882_v4 = vmul.f32 %v4518_v16, %v1880_v23  ;;  %vm1887_vm14 = vweird.f32 %v4518_v16 }
0x10c2   :  { %1903 = vrot.lane.b32.xlu1 %v1901_v46, %s4738_s25  ;;  %vm1888_vm3 = vmor %vm1886_vm15, %vm1887_vm14 }
0x10c3   :  { %v1883_v5 = vsub.f32 1.0, %v1882_v4 }
0x10c5   :  { %v1884_v31 = vmul.f32 %v4518_v16, %v1883_v5 }
0x10c7   :  { %v1885_v17 = vadd.f32 %v4518_v16, %v1884_v31 }
0x10c9   :  { %v1889_v26 = vsel %vm1888_vm3, %v4518_v16, %v1885_v17 }
0x10ca   :  { %v1894_v9 = vsel %vm1891_vm4, %v1893_v29, %v1889_v26 }
0x1134   :  { %v1904_v15 = vpop.permute.xlu1 %1903 }
0x1135   :  { %v1906_v28 = vadd.f32 %v1904_v15, %v1900_v0  ;;  %v4258_v15 = vld [vmem:[%s6759_s3 + $0x10] sm:$0xff] }
0x1136   :  { %vm1910_vm5 = vcmp.gt.f32.partialorder %v4258_v15, 0.5 }
0x1137   :  { %4519 = vtanh.f32 %v1906_v28  ;;  %1924 = vrot.lane.b32.xlu0 %v1906_v28, %s4738_s25 }
0x113d   :  { %v4520_v19 = vpop.eup %4519 }
0x113e   :  { %v1908_v46 = vmul.f32 %v4520_v19, %v1894_v9 }
0x1140   :  { %1912 = vrot.lane.b32.xlu2 %v1908_v46, %s4738_s25 }
0x119a   :  { %v1913_v20 = vpop.permute.xlu2 %1912 }
0x119b   :  { %v5827_v62 = vsel %vm1910_vm5, %v1913_v20, 0.0  ;;  %v5831_v1 = vsel %vm1910_vm5, %v1913_v20, %v5788_v32 }
0x119c   :  { %1916 = vst.msk [vmem:[#allocation2 + $0x10] sm:$0xff] %vm111_vm0, %v5827_v62  ;;  %4259 = vmatmul.msk.f32.vlgmr.msrb.gmra.mxu2 %vm307_vm12, %v5831_v1  ;;  %4260 = vmatmul.msk.f32.vlgmr.msrb.gmra.mxu3 %vm307_vm12, %v5831_v1 }
0x119d   :  { %2413 = vmatpush.msrb.mxu2 %v5478_v42  ;;  %2433 = vmatpush.msrb.mxu3 %v5497_v56 }
0x119f   :  { %2414 = vmatpush.msrb.mxu2 %v5485_v24  ;;  %2434 = vmatpush.msrb.mxu3 %v5512_v44 }
0x11a1   :  { %2415 = vmatpush.msrb.mxu2 %v5492_v55  ;;  %2435 = vmatpush.msrb.mxu3 %v5529_v59 }
0x11a3   :  { %2416 = vmatpush.msrb.mxu2 %v5507_v34  ;;  %2436 = vmatpush.msrb.mxu3 %v5546_v11 }
0x11a5   :  { %2417 = vmatpush.msrb.mxu2 %v5524_v41  ;;  %2437 = vmatpush.msrb.mxu3 %v5562_v48 }
0x11a7   :  { %2418 = vmatpush.msrb.mxu2 %v5541_v40  ;;  %2438 = vmatpush.msrb.mxu3 %v5578_v38  ;;  %v1560_v40 = vsel %vm5114_vm2, %v5658_v13, %v5662_v30 }
0x11a9   :  { %v1925_v42 = vpop.permute.xlu0 %1924  ;;  %2419 = vmatpush.msrb.mxu2 %v5557_v33  ;;  %2439 = vmatpush.msrb.mxu3 %v5583_v60 }
0x11aa   :  { %v5855_v24 = vsel %vm1910_vm5, %v1925_v42, %v5781_v50 }
0x11ab   :  { %2015 = vrot.lane.b32.xlu1 %v5855_v24, %s4738_s25  ;;  %2420 = vmatpush.msrb.mxu2 %v5573_v2 }
0x11ac   :  { %2440 = vmatpush.msrb.mxu3 %v5590_v36 }
0x121d   :  { %v2016_v18 = vpop.permute.xlu1 %2015 }
0x121f   :  { %v1950_v55 = vpop.f32.mrf.mxu2  ;;  %v1970_v59 = vpop.f32.mrf.mxu3 }
0x1220   :  { %v1973_v56 = vadd.f32 %v1950_v55, %v1559_v27  ;;  %v1974_v33 = vadd.f32 %v1970_v59, %v1560_v40 }
0x1222   :  { %v4261_v34 = vmul.f32 -1.442695, %v1973_v56  ;;  %v4262_v4 = vmul.f32 -1.442695, %v1974_v33 }
0x1224   :  { %4521 = vpow2.f32 %v4261_v34 }
0x122a   :  { %v4522_v44 = vpop.eup %4521 }
0x122b   :  { %v1978_v41 = vadd.f32 1.0, %v4522_v44  ;;  %v4263_v44 = vld [vmem:[%s6759_s3 + $0x18] sm:$0xff] }
0x122c   :  { %vm2028_vm15 = vcmp.gt.f32.partialorder %v4263_v44, 0.5  ;;  %v4268_v44 = vld [vmem:[%s6759_s3 + $0x20] sm:$0xff] }
0x122d   :  { %4523 = vrcp.f32 %v1978_v41  ;;  %v1990_v38 = vand.u32 2147483648, %v1978_v41  ;;  %v1988_v36 = vand.u32 2147483647, %v1978_v41  ;;  %vm1984_vm7 = vweird.f32 %v1978_v41 }
0x122e   :  { %4525 = vtanh.f32 %v1974_v33 }
0x122f   :  { %v1991_v50 = vor.u32 1.1754944e-38, %v1990_v38  ;;  %vm1989_vm9 = vcmp.eq.f32.partialorder %v1988_v36, 8.507059e+37  ;;  %4527 = vpow2.f32 %v4262_v4 }
0x1233   :  { %v4524_v11 = vpop.eup %4523 }
0x1234   :  { %v1980_v48 = vmul.f32 %v4524_v11, %v1978_v41  ;;  %vm1985_vm6 = vweird.f32 %v4524_v11  ;;  %v4526_v6 = vpop.eup %4525 }
0x1235   :  { %vm1986_vm8 = vmor %vm1984_vm7, %vm1985_vm6  ;;  %v4528_v5 = vpop.eup %4527 }
0x1236   :  { %v1981_v2 = vsub.f32 1.0, %v1980_v48  ;;  %v1998_v31 = vadd.f32 1.0, %v4528_v5 }
0x1238   :  { %v1982_v60 = vmul.f32 %v4524_v11, %v1981_v2  ;;  %4529 = vrcp.f32 %v1998_v31  ;;  %v2010_v46 = vand.u32 2147483648, %v1998_v31  ;;  %vm2004_vm11 = vweird.f32 %v1998_v31 }
0x1239   :  { %v2008_v15 = vand.u32 2147483647, %v1998_v31 }
0x123a   :  { %v1983_v27 = vadd.f32 %v4524_v11, %v1982_v60  ;;  %v2011_v42 = vor.u32 1.1754944e-38, %v2010_v46 }
0x123b   :  { %vm2009_vm14 = vcmp.eq.f32.partialorder %v2008_v15, 8.507059e+37 }
0x123c   :  { %v1987_v32 = vsel %vm1986_vm8, %v4524_v11, %v1983_v27 }
0x123d   :  { %v1992_v23 = vsel %vm1989_vm9, %v1991_v50, %v1987_v32 }
0x123e   :  { %v2019_v16 = vmul.f32 %v4526_v6, %v1992_v23  ;;  %v4530_v0 = vpop.eup %4529  ;;  %v2018_v26 = vmul.f32 %v2016_v18, %v1992_v23 }
0x123f   :  { %v2000_v28 = vmul.f32 %v4530_v0, %v1998_v31  ;;  %vm2005_vm10 = vweird.f32 %v4530_v0 }
0x1240   :  { %2021 = vrot.lane.b32.xlu2 %v2019_v16, %s4738_s25  ;;  %vm2006_vm13 = vmor %vm2004_vm11, %vm2005_vm10  ;;  %vm2146_vm11 = vcmp.gt.f32.partialorder %v4268_v44, 0.5 }
0x1241   :  { %v2001_v17 = vsub.f32 1.0, %v2000_v28 }
0x1243   :  { %v2002_v25 = vmul.f32 %v4530_v0, %v2001_v17 }
0x1245   :  { %v2003_v9 = vadd.f32 %v4530_v0, %v2002_v25 }
0x1247   :  { %v2007_v20 = vsel %vm2006_vm13, %v4530_v0, %v2003_v9 }
0x1248   :  { %v2012_v56 = vsel %vm2009_vm14, %v2011_v42, %v2007_v20 }
0x129a   :  { %v2022_v29 = vpop.permute.xlu2 %2021 }
0x129b   :  { %v2024_v19 = vadd.f32 %v2022_v29, %v2018_v26 }
0x129d   :  { %4531 = vtanh.f32 %v2024_v19  ;;  %2042 = vrot.lane.b32.xlu1 %v2024_v19, %s4738_s25 }
0x12a3   :  { %v4532_v55 = vpop.eup %4531 }
0x12a4   :  { %v2026_v34 = vmul.f32 %v4532_v55, %v2012_v56 }
0x12a6   :  { %2030 = vrot.lane.b32.xlu0 %v2026_v34, %s4738_s25 }
0x130f   :  { %v2043_v41 = vpop.permute.xlu1 %2042 }
0x1310   :  { %v5877_v59 = vsel %vm2028_vm15, %v2043_v41, %v5855_v24 }
0x1311   :  { %2133 = vrot.lane.b32.xlu2 %v5877_v59, %s4738_s25 }
0x1318   :  { %v2031_v40 = vpop.permute.xlu0 %2030 }
0x1319   :  { %v5881_v11 = vsel %vm2028_vm15, %v2031_v40, 0.0  ;;  %v5884_v33 = vsel %vm2028_vm15, %v2031_v40, %v5831_v1 }
0x131a   :  { %2034 = vst.msk [vmem:[#allocation2 + $0x18] sm:$0xff] %vm111_vm0, %v5881_v11  ;;  %4264 = vmatmul.msk.f32.vlgmr.msrb.gmra.mxu0 %vm307_vm12, %v5884_v33  ;;  %4265 = vmatmul.msk.f32.vlgmr.msra.gmra.mxu1 %vm307_vm12, %v5884_v33 }
0x136b   :  { %v2134_v18 = vpop.permute.xlu2 %2133 }
0x1397   :  { %v2068_v24 = vpop.f32.mrf.mxu0  ;;  %v2088_v60 = vpop.f32.mrf.mxu1 }
0x1398   :  { %v2091_v48 = vadd.f32 %v2068_v24, %v1563_v14  ;;  %v2092_v27 = vadd.f32 %v2088_v60, %v1564_v8 }
0x139a   :  { %v4266_v2 = vmul.f32 -1.442695, %v2091_v48  ;;  %v4267_v13 = vmul.f32 -1.442695, %v2092_v27 }
0x139c   :  { %4533 = vpow2.f32 %v4266_v2 }
0x13a2   :  { %v4534_v1 = vpop.eup %4533 }
0x13a3   :  { %v2096_v38 = vadd.f32 1.0, %v4534_v1 }
0x13a5   :  { %4535 = vrcp.f32 %v2096_v38  ;;  %v2108_v6 = vand.u32 2147483648, %v2096_v38  ;;  %v2106_v10 = vand.u32 2147483647, %v2096_v38  ;;  %vm2102_vm4 = vweird.f32 %v2096_v38 }
0x13a6   :  { %4537 = vtanh.f32 %v2092_v27 }
0x13a7   :  { %v2109_v14 = vor.u32 1.1754944e-38, %v2108_v6  ;;  %vm2107_vm6 = vcmp.eq.f32.partialorder %v2106_v10, 8.507059e+37  ;;  %4539 = vpow2.f32 %v4267_v13 }
0x13ab   :  { %v4536_v36 = vpop.eup %4535 }
0x13ac   :  { %v2098_v50 = vmul.f32 %v4536_v36, %v2096_v38  ;;  %vm2103_vm3 = vweird.f32 %v4536_v36  ;;  %v4538_v4 = vpop.eup %4537 }
0x13ad   :  { %vm2104_vm5 = vmor %vm2102_vm4, %vm2103_vm3  ;;  %v4540_v30 = vpop.eup %4539 }
0x13ae   :  { %v2099_v32 = vsub.f32 1.0, %v2098_v50  ;;  %v2116_v8 = vadd.f32 1.0, %v4540_v30 }
0x13b0   :  { %v2100_v23 = vmul.f32 %v4536_v36, %v2099_v32  ;;  %4541 = vrcp.f32 %v2116_v8  ;;  %v2128_v46 = vand.u32 2147483648, %v2116_v8  ;;  %vm2122_vm8 = vweird.f32 %v2116_v8 }
0x13b1   :  { %v2126_v15 = vand.u32 2147483647, %v2116_v8 }
0x13b2   :  { %v2101_v54 = vadd.f32 %v4536_v36, %v2100_v23  ;;  %v2129_v42 = vor.u32 1.1754944e-38, %v2128_v46 }
0x13b3   :  { %vm2127_vm10 = vcmp.eq.f32.partialorder %v2126_v15, 8.507059e+37 }
0x13b4   :  { %v2105_v16 = vsel %vm2104_vm5, %v4536_v36, %v2101_v54 }
0x13b5   :  { %v2110_v5 = vsel %vm2107_vm6, %v2109_v14, %v2105_v16 }
0x13b6   :  { %v2137_v31 = vmul.f32 %v4538_v4, %v2110_v5  ;;  %v4542_v0 = vpop.eup %4541  ;;  %v2136_v26 = vmul.f32 %v2134_v18, %v2110_v5 }
0x13b7   :  { %v2118_v28 = vmul.f32 %v4542_v0, %v2116_v8  ;;  %vm2123_vm7 = vweird.f32 %v4542_v0 }
0x13b8   :  { %2139 = vrot.lane.b32.xlu0 %v2137_v31, %s4738_s25  ;;  %vm2124_vm9 = vmor %vm2122_vm8, %vm2123_vm7 }
0x13b9   :  { %v2119_v17 = vsub.f32 1.0, %v2118_v28 }
0x13bb   :  { %v2120_v25 = vmul.f32 %v4542_v0, %v2119_v17 }
0x13bd   :  { %v2121_v9 = vadd.f32 %v4542_v0, %v2120_v25 }
0x13bf   :  { %v2125_v20 = vsel %vm2124_vm9, %v4542_v0, %v2121_v9 }
0x13c0   :  { %v2130_v56 = vsel %vm2127_vm10, %v2129_v42, %v2125_v20  ;;  %v2531_v20 = vld [vmem:[%s6731_s10 + $0x18] sm:$0xff]  ;;  %v2530_v42 = vld [vmem:[%s6731_s10 + $0x10] sm:$0xff] }
0x13c1   :  { %2637 = vmatpush.msra.mxu1 %v2531_v20 }
0x13c3   :  { %2638 = vmatpush.msra.mxu1 %v2530_v42 }
0x142a   :  { %v2140_v29 = vpop.permute.xlu0 %2139 }
0x142b   :  { %v2142_v19 = vadd.f32 %v2140_v29, %v2136_v26 }
0x142d   :  { %4543 = vtanh.f32 %v2142_v19  ;;  %2160 = vrot.lane.b32.xlu2 %v2142_v19, %s4738_s25 }
0x1433   :  { %v4544_v55 = vpop.eup %4543 }
0x1434   :  { %v2144_v34 = vmul.f32 %v4544_v55, %v2130_v56  ;;  %v2529_v55 = vld [vmem:[%s6731_s10 + $0x8] sm:$0xff]  ;;  %v2528_v56 = vld [vmem:[%s6731_s10] sm:$0xff] }
0x1435   :  { %2639 = vmatpush.msra.mxu1 %v2529_v55 }
0x1436   :  { %2148 = vrot.lane.b32.xlu1 %v2144_v34, %s4738_s25  ;;  %v4273_v34 = vld [vmem:[%s6759_s3 + $0x28] sm:$0xff] }
0x1437   :  { %2640 = vmatpush.msra.mxu1 %v2528_v56  ;;  %vm2264_vm8 = vcmp.gt.f32.partialorder %v4273_v34, 0.5  ;;  %v2681_v34 = vld [vmem:[%s6733_s12 + $0x18] sm:$0xff] }
0x1487   :  { %v2161_v41 = vpop.permute.xlu2 %2160 }
0x1488   :  { %v5909_v40 = vsel %vm2146_vm11, %v2161_v41, %v5877_v59 }
0x1489   :  { %2251 = vrot.lane.b32.xlu0 %v5909_v40, %s4738_s25 }
0x14a8   :  { %v2149_v24 = vpop.permute.xlu1 %2148 }
0x14a9   :  { %v5913_v48 = vsel %vm2146_vm11, %v2149_v24, 0.0  ;;  %v5916_v2 = vsel %vm2146_vm11, %v2149_v24, %v5884_v33 }
0x14aa   :  { %2152 = vst.msk [vmem:[#allocation2 + $0x20] sm:$0xff] %vm111_vm0, %v5913_v48  ;;  %4269 = vmatmul.msk.f32.vlgmr.msra.gmra.mxu2 %vm307_vm12, %v5916_v2  ;;  %4270 = vmatmul.msk.f32.vlgmr.msra.gmra.mxu3 %vm307_vm12, %v5916_v2 }
0x14ab   :  { %2739 = vmatpush.msra.mxu3 %v2681_v34  ;;  %v2685_v34 = vld [vmem:[%s6733_s12 + $0x38] sm:$0xff] }
0x14ac   :  { %2698 = vmatpush.msra.mxu2 %v2685_v34 }
0x14fb   :  { %v2252_v30 = vpop.permute.xlu0 %2251 }
0x152d   :  { %v2186_v59 = vpop.f32.mrf.mxu2  ;;  %v2206_v36 = vpop.f32.mrf.mxu3 }
0x152e   :  { %v2209_v1 = vadd.f32 %v2186_v59, %v1551_v35  ;;  %v2210_v50 = vadd.f32 %v2206_v36, %v1552_v63  ;;  %v5963_v59 = vld [vmem:[#allocation2] sm:$0xff] }
0x1530   :  { %v4271_v38 = vmul.f32 -1.442695, %v2209_v1  ;;  %v4272_v53 = vmul.f32 -1.442695, %v2210_v50 }
0x1532   :  { %4545 = vpow2.f32 %v4271_v38 }
0x1538   :  { %v4546_v33 = vpop.eup %4545 }
0x1539   :  { %v2214_v60 = vadd.f32 1.0, %v4546_v33  ;;  %v5976_v33 = vld [vmem:[#allocation2 + $0x10] sm:$0xff] }
0x153b   :  { %4547 = vrcp.f32 %v2214_v60  ;;  %v2226_v23 = vand.u32 2147483648, %v2214_v60  ;;  %v2224_v22 = vand.u32 2147483647, %v2214_v60  ;;  %vm2220_vm14 = vweird.f32 %v2214_v60 }
0x153c   :  { %4549 = vtanh.f32 %v2210_v50  ;;  %v6760_v50 = vsel %vm5103_vm1, %v5696_v3, %v5692_v43 }
0x153d   :  { %v2227_v35 = vor.u32 1.1754944e-38, %v2226_v23  ;;  %vm2225_vm3 = vcmp.eq.f32.partialorder %v2224_v22, 8.507059e+37  ;;  %4551 = vpow2.f32 %v4272_v53 }
0x1541   :  { %v4548_v27 = vpop.eup %4547 }
0x1542   :  { %v2216_v32 = vmul.f32 %v4548_v27, %v2214_v60  ;;  %vm2221_vm13 = vweird.f32 %v4548_v27  ;;  %v4550_v14 = vpop.eup %4549  ;;  %v5980_v60 = vld [vmem:[#allocation2 + $0x18] sm:$0xff] }
0x1543   :  { %vm2222_vm15 = vmor %vm2220_vm14, %vm2221_vm13  ;;  %v4552_v39 = vpop.eup %4551 }
0x1544   :  { %v2217_v6 = vsub.f32 1.0, %v2216_v32  ;;  %v2234_v63 = vadd.f32 1.0, %v4552_v39 }
0x1546   :  { %v2218_v10 = vmul.f32 %v4548_v27, %v2217_v6  ;;  %4553 = vrcp.f32 %v2234_v63  ;;  %v2246_v25 = vand.u32 2147483648, %v2234_v63  ;;  %vm2240_vm5 = vweird.f32 %v2234_v63 }
0x1547   :  { %v2244_v26 = vand.u32 2147483647, %v2234_v63 }
0x1548   :  { %v2219_v37 = vadd.f32 %v4548_v27, %v2218_v10  ;;  %v2247_v19 = vor.u32 1.1754944e-38, %v2246_v25 }
0x1549   :  { %vm2245_vm7 = vcmp.eq.f32.partialorder %v2244_v26, 8.507059e+37 }
0x154a   :  { %v2223_v54 = vsel %vm2222_vm15, %v4548_v27, %v2219_v37 }
0x154b   :  { %v2228_v16 = vsel %vm2225_vm3, %v2227_v35, %v2223_v54  ;;  %v6761_v35 = vsel %vm5114_vm2, %v5698_v12, %v5694_v57 }
0x154c   :  { %v2255_v4 = vmul.f32 %v4550_v14, %v2228_v16  ;;  %v4554_v5 = vpop.eup %4553  ;;  %v2254_v0 = vmul.f32 %v2252_v30, %v2228_v16 }
0x154d   :  { %v2236_v31 = vmul.f32 %v4554_v5, %v2234_v63  ;;  %vm2241_vm4 = vweird.f32 %v4554_v5 }
0x154e   :  { %2257 = vrot.lane.b32.xlu1 %v2255_v4, %s4738_s25  ;;  %vm2242_vm6 = vmor %vm2240_vm5, %vm2241_vm4 }
0x154f   :  { %v2237_v13 = vsub.f32 1.0, %v2236_v31 }
0x1551   :  { %v2238_v8 = vmul.f32 %v4554_v5, %v2237_v13 }
0x1553   :  { %v2239_v18 = vadd.f32 %v4554_v5, %v2238_v8 }
0x1555   :  { %v2243_v29 = vsel %vm2242_vm6, %v4554_v5, %v2239_v18 }
0x1556   :  { %v2248_v46 = vsel %vm2245_vm7, %v2247_v19, %v2243_v29 }
0x15c0   :  { %v2258_v28 = vpop.permute.xlu1 %2257 }
0x15c1   :  { %v2260_v17 = vadd.f32 %v2258_v28, %v2254_v0 }
0x15c3   :  { %4555 = vtanh.f32 %v2260_v17  ;;  %2278 = vrot.lane.b32.xlu0 %v2260_v17, %s4738_s25 }
0x15c9   :  { %v4556_v9 = vpop.eup %4555 }
0x15ca   :  { %v2262_v15 = vmul.f32 %v4556_v9, %v2248_v46 }
0x15cc   :  { %2266 = vrot.lane.b32.xlu2 %v2262_v15, %s4738_s25 }
0x1626   :  { %v2267_v44 = vpop.permute.xlu2 %2266 }
0x1627   :  { %v5952_v41 = vsel %vm2264_vm8, %v2267_v44, 0.0  ;;  %v5955_v24 = vsel %vm2264_vm8, %v2267_v44, %v5916_v2  ;;  %v5972_v2 = vld [vmem:[#allocation2 + $0x8] sm:$0xff]  ;;  %v2680_v44 = vld [vmem:[%s6733_s12 + $0x10] sm:$0xff] }
0x1628   :  { %2270 = vst.msk [vmem:[#allocation2 + $0x28] sm:$0xff] %vm111_vm0, %v5952_v41  ;;  %4274 = vmatmul.msk.f32.vlgmr.msra.gmra.mxu0 %vm307_vm12, %v5955_v24  ;;  %4275 = vmatmul.msk.f32.vlgmr.msrb.gmra.mxu1 %vm307_vm12, %v5955_v24 }
0x1629   :  { %2740 = vmatpush.msra.mxu3 %v2680_v44  ;;  %v2684_v44 = vld [vmem:[%s6733_s12 + $0x30] sm:$0xff] }
0x162a   :  { %2699 = vmatpush.msra.mxu2 %v2684_v44 }
0x162f   :  { %v5988_v36 = vld [vmem:[#allocation2 + $0x28] sm:$0xff] }
0x1630   :  { %4292 = vmatmul.msk.f32.vlgmr.msra.gmra.mxu1 %vm111_vm0, %v5963_v59 }
0x1635   :  { %v2279_v1 = vpop.permute.xlu0 %2278 }
0x1636   :  { %v5968_v38 = vsel %vm2264_vm8, %v2279_v1, %v5909_v40  ;;  %v5984_v40 = vld [vmem:[#allocation2 + $0x20] sm:$0xff]  ;;  %v2679_v1 = vld [vmem:[%s6733_s12 + $0x8] sm:$0xff] }
0x1637   :  { %2369 = vrot.lane.b32.xlu1 %v5968_v38, %s4738_s25  ;;  %2741 = vmatpush.msra.mxu3 %v2679_v1  ;;  %v2683_v1 = vld [vmem:[%s6733_s12 + $0x28] sm:$0xff] }
0x1638   :  { %4293 = vmatmul.msk.f32.gmra.mxu1 %vm111_vm0, %v5972_v2  ;;  %2700 = vmatpush.msra.mxu2 %v2683_v1 }
0x1640   :  { %4294 = vmatmul.msk.f32.gmra.mxu1 %vm111_vm0, %v5976_v33 }
0x1648   :  { %4295 = vmatmul.msk.f32.gmra.mxu1 %vm111_vm0, %v5980_v60 }
0x1650   :  { %4296 = vmatmul.msk.f32.gmra.mxu1 %vm111_vm0, %v5984_v40 }
0x1658   :  { %4297 = vmatmul.msk.f32.gmra.mxu1 %vm111_vm0, %v5988_v36 }
0x16a5   :  { %v2304_v27 = vpop.f32.mrf.mxu0  ;;  %v2324_v22 = vpop.f32.mrf.mxu1 }
0x16a6   :  { %v2327_v32 = vadd.f32 %v2304_v27, %v6760_v50  ;;  %v2328_v54 = vadd.f32 %v2324_v22, %v6761_v35  ;;  %v2678_v27 = vld [vmem:[%s6733_s12] sm:$0xff]  ;;  %v4278_v50 = vld [vmem:[%s6759_s3 + $0x30] sm:$0xff] }
0x16a7   :  { %2742 = vmatpush.msra.mxu3 %v2678_v27  ;;  %vm2382_vm5 = vcmp.gt.f32.partialorder %v4278_v50, 0.5  ;;  %v2532_v27 = vld [vmem:[%s6731_s10 + $0x20] sm:$0xff] }
0x16a8   :  { %v4276_v6 = vmul.f32 -1.442695, %v2327_v32  ;;  %v4277_v57 = vmul.f32 -1.442695, %v2328_v54  ;;  %v2682_v50 = vld [vmem:[%s6733_s12 + $0x20] sm:$0xff] }
0x16a9   :  { %v2370_v17 = vpop.permute.xlu1 %2369  ;;  %2701 = vmatpush.msra.mxu2 %v2682_v50 }
0x16aa   :  { %4557 = vpow2.f32 %v4276_v6 }
0x16b0   :  { %v4558_v23 = vpop.eup %4557 }
0x16b1   :  { %v2332_v10 = vadd.f32 1.0, %v4558_v23 }
0x16b3   :  { %4559 = vrcp.f32 %v2332_v10  ;;  %v2344_v4 = vand.u32 2147483648, %v2332_v10  ;;  %v2342_v43 = vand.u32 2147483647, %v2332_v10  ;;  %vm2338_vm10 = vweird.f32 %v2332_v10 }
0x16b4   :  { %4561 = vtanh.f32 %v2328_v54 }
0x16b5   :  { %v2345_v39 = vor.u32 1.1754944e-38, %v2344_v4  ;;  %vm2343_vm13 = vcmp.eq.f32.partialorder %v2342_v43, 8.507059e+37  ;;  %4563 = vpow2.f32 %v4277_v57 }
0x16b9   :  { %v4560_v37 = vpop.eup %4559 }
0x16ba   :  { %v2334_v14 = vmul.f32 %v4560_v37, %v2332_v10  ;;  %vm2339_vm9 = vweird.f32 %v4560_v37  ;;  %v4562_v5 = vpop.eup %4561 }
0x16bb   :  { %vm2340_vm11 = vmor %vm2338_vm10, %vm2339_vm9  ;;  %v4564_v12 = vpop.eup %4563 }
0x16bc   :  { %v2335_v16 = vsub.f32 1.0, %v2334_v14  ;;  %v2352_v30 = vadd.f32 1.0, %v4564_v12 }
0x16be   :  { %v2336_v53 = vmul.f32 %v4560_v37, %v2335_v16  ;;  %4565 = vrcp.f32 %v2352_v30  ;;  %v2364_v9 = vand.u32 2147483648, %v2352_v30  ;;  %vm2358_vm15 = vweird.f32 %v2352_v30 }
0x16bf   :  { %v2362_v46 = vand.u32 2147483647, %v2352_v30 }
0x16c0   :  { %v2337_v3 = vadd.f32 %v4560_v37, %v2336_v53  ;;  %v2365_v20 = vor.u32 1.1754944e-38, %v2364_v9 }
0x16c1   :  { %vm2363_vm4 = vcmp.eq.f32.partialorder %v2362_v46, 8.507059e+37 }
0x16c2   :  { %v2341_v63 = vsel %vm2340_vm11, %v4560_v37, %v2337_v3 }
0x16c3   :  { %v2346_v31 = vsel %vm2343_vm13, %v2345_v39, %v2341_v63 }
0x16c4   :  { %v2373_v13 = vmul.f32 %v4562_v5, %v2346_v31  ;;  %v4566_v8 = vpop.eup %4565  ;;  %v2372_v25 = vmul.f32 %v2370_v17, %v2346_v31 }
0x16c5   :  { %v2354_v0 = vmul.f32 %v4566_v8, %v2352_v30  ;;  %vm2359_vm14 = vweird.f32 %v4566_v8 }
0x16c6   :  { %2375 = vrot.lane.b32.xlu2 %v2373_v13, %s4738_s25  ;;  %vm2360_vm3 = vmor %vm2358_vm15, %vm2359_vm14 }
0x16c7   :  { %v2355_v28 = vsub.f32 1.0, %v2354_v0 }
0x16c9   :  { %v2356_v18 = vmul.f32 %v4566_v8, %v2355_v28 }
0x16cb   :  { %v2357_v19 = vadd.f32 %v4566_v8, %v2356_v18 }
0x16cd   :  { %v2361_v15 = vsel %vm2360_vm3, %v4566_v8, %v2357_v19 }
0x16ce   :  { %v2366_v55 = vsel %vm2363_vm4, %v2365_v20, %v2361_v15  ;;  %v4283_v15 = vld [vmem:[%s6759_s3 + $0x38] sm:$0xff] }
0x16cf   :  { %vm2500_vm11 = vcmp.gt.f32.partialorder %v4283_v15, 0.5 }
0x1720   :  { %v2376_v26 = vpop.permute.xlu2 %2375 }
0x1721   :  { %v2378_v29 = vadd.f32 %v2376_v26, %v2372_v25 }
0x1723   :  { %4567 = vtanh.f32 %v2378_v29  ;;  %2396 = vrot.lane.b32.xlu1 %v2378_v29, %s4738_s25 }
0x1729   :  { %v4568_v42 = vpop.eup %4567 }
0x172a   :  { %v2380_v56 = vmul.f32 %v4568_v42, %v2366_v55 }
0x172c   :  { %2384 = vrot.lane.b32.xlu0 %v2380_v56, %s4738_s25  ;;  %v2535_v56 = vld [vmem:[%s6731_s10 + $0x38] sm:$0xff] }
0x172d   :  { %2572 = vmatpush.msrb.mxu0 %v2535_v56 }
0x1795   :  { %v2397_v32 = vpop.permute.xlu1 %2396 }
0x1796   :  { %v2399_v6 = vsel %vm2382_vm5, %v2397_v32, %v5968_v38  ;;  %v2780_v32 = vld [vmem:[%s6764_s9] sm:$0xff] }
0x1797   :  { %2487 = vrot.lane.b32.xlu2 %v2399_v6, %s4738_s25  ;;  %v4740_v6 = vmov 0   ;;  %vm2788_vm13 = vcmp.gt.f32.partialorder %v2780_v32, 0.5 }
0x1798   :  { %4376 = vset.pattern.permute.xlu1 %v4740_v6  ;;  %4378 = vset.pattern.permute.xlu0 %v4740_v6 }
0x1799   :  { %4377 = vset.pattern.permute.xlu2 %v4740_v6 }
0x179e   :  { %v2385_v23 = vpop.permute.xlu0 %2384 }
0x179f   :  { %v2387_v10 = vsel %vm2382_vm5, %v2385_v23, 0.0  ;;  %v2394_v22 = vsel %vm2382_vm5, %v2385_v23, %v5955_v24  ;;  %v2796_v23 = vsel %vm2788_vm13, 1, %v4740_v6 }
0x17a0   :  { %2388 = vst.msk [vmem:[#allocation2 + $0x30] sm:$0xff] %vm111_vm0, %v2387_v10  ;;  %4279 = vmatmul.msk.f32.vlgmr.msrb.gmra.mxu2 %vm307_vm12, %v2394_v22  ;;  %4280 = vmatmul.msk.f32.vlgmr.msrb.gmra.mxu3 %vm307_vm12, %v2394_v22  ;;  %v2782_v22 = vld [vmem:[%s6764_s9 + $0x10] sm:$0xff] }
0x17a1   :  { %vm2790_vm14 = vcmp.gt.f32.partialorder %v2782_v22, 0.5 }
0x17a7   :  { %v2518_v37 = vld [vmem:[#allocation2 + $0x30] sm:$0xff] }
0x17a8   :  { %4298 = vmatmul.msk.f32.gmra.mxu1 %vm111_vm0, %v2518_v37  ;;  %4308 = vmatmul.msk.f32.vlgmr.msra.gmra.mxu3 %vm111_vm0, %v5963_v59  ;;  %v6762_v59 = vsel %vm5103_vm1, %v5712_v47, %v5708_v7 }
0x17b0   :  { %4309 = vmatmul.msk.f32.gmra.mxu3 %vm111_vm0, %v5972_v2 }
0x17b8   :  { %4310 = vmatmul.msk.f32.gmra.mxu3 %vm111_vm0, %v5976_v33 }
0x17c0   :  { %4311 = vmatmul.msk.f32.gmra.mxu3 %vm111_vm0, %v5980_v60 }
0x17c8   :  { %4312 = vmatmul.msk.f32.gmra.mxu3 %vm111_vm0, %v5984_v40  ;;  %v6763_v40 = vsel %vm5114_vm2, %v5714_v51, %v5710_v52 }
0x17d0   :  { %4313 = vmatmul.msk.f32.gmra.mxu3 %vm111_vm0, %v5988_v36 }
0x17d8   :  { %4314 = vmatmul.msk.f32.gmra.mxu3 %vm111_vm0, %v2518_v37  ;;  %v2798_v37 = vsel %vm2790_vm14, 1, %v4740_v6 }
0x17f1   :  { %v2488_v57 = vpop.permute.xlu2 %2487 }
0x1823   :  { %v2422_v24 = vpop.f32.mrf.mxu2  ;;  %v2442_v60 = vpop.f32.mrf.mxu3 }
0x1824   :  { %v2445_v38 = vadd.f32 %v2422_v24, %v6762_v59  ;;  %v2446_v36 = vadd.f32 %v2442_v60, %v6763_v40  ;;  %v2781_v60 = vld [vmem:[%s6764_s9 + $0x8] sm:$0xff] }
0x1825   :  { %vm2789_vm3 = vcmp.gt.f32.partialorder %v2781_v60, 0.5 }
0x1826   :  { %v4281_v2 = vmul.f32 -1.442695, %v2445_v38  ;;  %v4282_v52 = vmul.f32 -1.442695, %v2446_v36  ;;  %v2783_v38 = vld [vmem:[%s6764_s9 + $0x18] sm:$0xff] }
0x1827   :  { %vm2791_vm15 = vcmp.gt.f32.partialorder %v2783_v38, 0.5 }
0x1828   :  { %4569 = vpow2.f32 %v4281_v2  ;;  %v2799_v2 = vsel %vm2791_vm15, 1, %v4740_v6 }
0x182e   :  { %v4570_v33 = vpop.eup %4569 }
0x182f   :  { %v2450_v35 = vadd.f32 1.0, %v4570_v33 }
0x1831   :  { %4571 = vrcp.f32 %v2450_v35  ;;  %v2462_v49 = vand.u32 2147483648, %v2450_v35  ;;  %v2460_v7 = vand.u32 2147483647, %v2450_v35  ;;  %vm2456_vm12 = vweird.f32 %v2450_v35 }
0x1832   :  { %4573 = vtanh.f32 %v2446_v36  ;;  %v2785_v36 = vld [vmem:[%s6764_s9 + $0x28] sm:$0xff] }
0x1833   :  { %v2463_v53 = vor.u32 1.1754944e-38, %v2462_v49  ;;  %vm2461_vm7 = vcmp.eq.f32.partialorder %v2460_v7, 8.507059e+37  ;;  %4575 = vpow2.f32 %v4282_v52  ;;  %vm2793_vm4 = vcmp.gt.f32.partialorder %v2785_v36, 0.5  ;;  %v2787_v49 = vld [vmem:[%s6764_s9 + $0x38] sm:$0xff] }
0x1834   :  { %vm2795_vm5 = vcmp.gt.f32.partialorder %v2787_v49, 0.5 }
0x1835   :  { %v2803_v7 = vsel %vm2795_vm5, 1, %v4740_v6 }
0x1837   :  { %v4572_v54 = vpop.eup %4571 }
0x1838   :  { %v2452_v14 = vmul.f32 %v4572_v54, %v2450_v35  ;;  %vm2457_vm1 = vweird.f32 %v4572_v54  ;;  %v4574_v3 = vpop.eup %4573 }
0x1839   :  { %vm2458_vm6 = vmor %vm2456_vm12, %vm2457_vm1  ;;  %v4576_v51 = vpop.eup %4575 }
0x183a   :  { %v2453_v16 = vsub.f32 1.0, %v2452_v14  ;;  %v2470_v63 = vadd.f32 1.0, %v4576_v51  ;;  %v2801_v14 = vsel %vm2793_vm4, 1, %v4740_v6  ;;  %v2642_v51 = vpop.f32.mrf.mxu1 }
0x183c   :  { %v2454_v4 = vmul.f32 %v4572_v54, %v2453_v16  ;;  %4577 = vrcp.f32 %v2470_v63  ;;  %vm2476_vm8 = vweird.f32 %v2470_v63  ;;  %v2480_v17 = vand.u32 2147483647, %v2470_v63 }
0x183e   :  { %v2455_v47 = vadd.f32 %v4572_v54, %v2454_v4  ;;  %vm2481_vm10 = vcmp.eq.f32.partialorder %v2480_v17, 8.507059e+37  ;;  %v2784_v4 = vld [vmem:[%s6764_s9 + $0x20] sm:$0xff] }
0x183f   :  { %vm2792_vm1 = vcmp.gt.f32.partialorder %v2784_v4, 0.5 }
0x1840   :  { %v2459_v43 = vsel %vm2458_vm6, %v4572_v54, %v2455_v47  ;;  %v2797_v54 = vsel %vm2789_vm3, 1, %v4740_v6  ;;  %v2800_v47 = vsel %vm2792_vm1, 1, %v4740_v6 }
0x1841   :  { %v2464_v39 = vsel %vm2461_vm7, %v2463_v53, %v2459_v43  ;;  %v2786_v53 = vld [vmem:[%s6764_s9 + $0x30] sm:$0xff]  ;;  %vm2844_vm7 = vcmask 15360   ;;  %s4148_s9 = sshll.u32 %s6741_s20, 4  ;;  %s4744_s20 = smov [#allocation7]   ;;  %s4149_s9 = int_to_ptr.hbm [resolvable:$true] %s4148_s9 }
0x1842   :  { %v2491_v58 = vmul.f32 %v4574_v3, %v2464_v39  ;;  %v4578_v5 = vpop.eup %4577  ;;  %v2490_v30 = vmul.f32 %v2488_v57, %v2464_v39  ;;  %vm2794_vm12 = vcmp.gt.f32.partialorder %v2786_v53, 0.5  ;;  %s4135_s12 = sshll.u32 %s4744_s20, 4  ;;  %s4136_s12 = int_to_ptr.vmem [resolvable:$true] %s4135_s12 }
0x1843   :  { %v2472_v31 = vmul.f32 %v4578_v5, %v2470_v63  ;;  %vm2477_vm2 = vweird.f32 %v4578_v5  ;;  %v2802_v3 = vsel %vm2794_vm12, 1, %v4740_v6 }
0x1844   :  { %2493 = vrot.lane.b32.xlu0 %v2491_v58, %s4738_s25  ;;  %vm2478_vm9 = vmor %vm2476_vm8, %vm2477_vm2 }
0x1845   :  { %v2473_v13 = vsub.f32 1.0, %v2472_v31 }
0x1847   :  { %v2474_v12 = vmul.f32 %v4578_v5, %v2473_v13 }
0x1849   :  { %v2475_v28 = vadd.f32 %v4578_v5, %v2474_v12 }
0x184c   :  { %2390 = vrot.lane.b32.xlu0 %v2387_v10, %s4739_s24 }
0x1854   :  { %2036 = vrot.lane.b32.xlu0 %v5881_v11, %s4739_s24  ;;  %v2482_v11 = vand.u32 2147483648, %v2470_v63  ;;  %v2645_v63 = vpop.f32.mrf.mxu1 }
0x1856   :  { %v2483_v18 = vor.u32 1.1754944e-38, %v2482_v11 }
0x185c   :  { %1684 = vrot.lane.b32.xlu0 %v5742_v21, %s4739_s24  ;;  %v2479_v21 = vsel %vm2478_vm9, %v4578_v5, %v2475_v28  ;;  %v2648_v13 = vpop.f32.mrf.mxu1 }
0x185d   :  { %v2484_v29 = vsel %vm2481_vm10, %v2483_v18, %v2479_v21 }
0x1864   :  { %2811 = vperm.xlu0 %4378, %v2798_v37   ;;  %v2651_v12 = vpop.f32.mrf.mxu1 }
0x186c   :  { %2826 = vperm.xlu0 %4378, %v2803_v7  }
0x18b6   :  { %v2494_v8 = vpop.permute.xlu0 %2493 }
0x18b7   :  { %v2496_v0 = vadd.f32 %v2494_v8, %v2490_v30  ;;  %v2654_v8 = vpop.f32.mrf.mxu1 }
0x18b9   :  { %4579 = vtanh.f32 %v2496_v0 }
0x18be   :  { %v2391_v25 = vpop.permute.xlu0 %2390 }
0x18bf   :  { %v4580_v26 = vpop.eup %4579  ;;  %2393 = vst.msk [vmem:[#allocation3 + $0x8] sm:$0xff] %vm111_vm0, %v2391_v25  ;;  %v2657_v17 = vpop.f32.mrf.mxu1 }
0x18c0   :  { %v2498_v19 = vmul.f32 %v4580_v26, %v2484_v29 }
0x18c2   :  { %2502 = vrot.lane.b32.xlu1 %v2498_v19, %s4738_s25 }
0x18c6   :  { %v2037_v9 = vpop.permute.xlu0 %2036  ;;  %v2521_v35 = vld [vmem:[#allocation3 + $0x8] sm:$0xff] }
0x18c7   :  { %2039 = vst.msk [vmem:[#allocation3 + $0x20] sm:$0xff] %vm111_vm0, %v2037_v9  ;;  %v2660_v29 = vpop.f32.mrf.mxu1  ;;  %v4385_v9 = vld [vmem:[%s6732_s11] ss:$0 sm:$0xff] }
0x18ca   :  { %2272 = vrot.lane.b32.xlu1 %v5952_v41, %s4739_s24 }
0x18ce   :  { %v1685_v46 = vpop.permute.xlu0 %1684  ;;  %v2524_v43 = vld [vmem:[#allocation3 + $0x20] sm:$0xff] }
0x18cf   :  { %1687 = vst.msk [vmem:[#allocation3 + $0x38] sm:$0xff] %vm111_vm0, %v1685_v46 }
0x18d2   :  { %1918 = vrot.lane.b32.xlu1 %v5827_v62, %s4739_s24 }
0x18d6   :  { %v2527_v52 = vld [vmem:[#allocation3 + $0x38] sm:$0xff]  ;;  %v2812_v15 = vpop.permute.xlu0 %2811 }
0x18d7   :  { %vm2830_vm10 = vcmp.eq.s32.totalorder %v2812_v15, 1 }
0x18da   :  { %2805 = vperm.xlu1 %4376, %v2796_v23  }
0x18de   :  { %v2827_v38 = vpop.permute.xlu0 %2826 }
0x18df   :  { %vm2835_vm14 = vcmp.eq.s32.totalorder %v2827_v38, 1 }
0x18e2   :  { %2814 = vperm.xlu1 %4376, %v2799_v2  }
0x18ea   :  { %2820 = vperm.xlu1 %4376, %v2801_v14  }
0x1934   :  { %v2503_v20 = vpop.permute.xlu1 %2502 }
0x1935   :  { %v2505_v42 = vsel %vm2500_vm11, %v2503_v20, 0.0 }
0x1936   :  { %2506 = vst.msk [vmem:[#allocation2 + $0x38] sm:$0xff] %vm111_vm0, %v2505_v42  ;;  %2508 = vrot.lane.b32.xlu2 %v2505_v42, %s4739_s24 }
0x193c   :  { %v2273_v55 = vpop.permute.xlu1 %2272 }
0x193d   :  { %2275 = vst.msk [vmem:[#allocation3 + $0x10] sm:$0xff] %vm111_vm0, %v2273_v55  ;;  %v2519_v41 = vld [vmem:[#allocation2 + $0x38] sm:$0xff] }
0x193e   :  { %2154 = vrot.lane.b32.xlu2 %v5913_v48, %s4739_s24  ;;  %4299 = vmatmul.msk.f32.gmra.mxu1 %vm111_vm0, %v2519_v41  ;;  %v2534_v48 = vld [vmem:[%s6731_s10 + $0x30] sm:$0xff] }
0x193f   :  { %4315 = vmatmul.msk.f32.gmra.mxu3 %vm111_vm0, %v2519_v41  ;;  %2573 = vmatpush.msrb.mxu0 %v2534_v48 }
0x1944   :  { %v1919_v62 = vpop.permute.xlu1 %1918  ;;  %v2522_v40 = vld [vmem:[#allocation3 + $0x10] sm:$0xff] }
0x1945   :  { %1921 = vst.msk [vmem:[#allocation3 + $0x28] sm:$0xff] %vm111_vm0, %v1919_v62 }
0x1946   :  { %1800 = vrot.lane.b32.xlu2 %v5785_v61, %s4739_s24  ;;  %v2533_v61 = vld [vmem:[%s6731_s10 + $0x28] sm:$0xff]  ;;  %s6766_s10 = sld [smem:[#allocation16_spill]] }
0x1947   :  { %2574 = vmatpush.msrb.mxu0 %v2533_v61 }
0x1949   :  { %2575 = vmatpush.msrb.mxu0 %v2532_v27 }
0x194c   :  { %v2525_v39 = vld [vmem:[#allocation3 + $0x28] sm:$0xff]  ;;  %v2806_v28 = vpop.permute.xlu1 %2805 }
0x194d   :  { %vm2828_vm9 = vcmp.eq.s32.totalorder %v2806_v28, 1 }
0x194e   :  { %2808 = vperm.xlu2 %4377, %v2797_v54  }
0x1954   :  { %v2815_v18 = vpop.permute.xlu1 %2814 }
0x1955   :  { %vm2831_vm11 = vcmp.eq.s32.totalorder %v2815_v18, 1 }
0x1956   :  { %2817 = vperm.xlu2 %4377, %v2800_v47  }
0x195c   :  { %v2821_v42 = vpop.permute.xlu1 %2820 }
0x195d   :  { %vm2833_vm6 = vcmp.eq.s32.totalorder %v2821_v42, 1 }
0x195e   :  { %2823 = vperm.xlu2 %4377, %v2802_v3  }
0x1990   :  { %v2509_v10 = vpop.permute.xlu2 %2508 }
0x1991   :  { %2511 = vst.msk [vmem:[#allocation3] sm:$0xff] %vm111_vm0, %v2509_v10 }
0x1998   :  { %v2155_v24 = vpop.permute.xlu2 %2154  ;;  %v2520_v59 = vld [vmem:[#allocation3] sm:$0xff] }
0x1999   :  { %2157 = vst.msk [vmem:[#allocation3 + $0x18] sm:$0xff] %vm111_vm0, %v2155_v24  ;;  %4284 = vmatmul.msk.f32.vlgmr.msrb.gmra.mxu0 %vm111_vm0, %v2520_v59  ;;  %4300 = vmatmul.msk.f32.vlgmr.msra.gmra.mxu2 %vm111_vm0, %v2520_v59 }
0x19a0   :  { %v1801_v33 = vpop.permute.xlu2 %1800  ;;  %v2523_v16 = vld [vmem:[#allocation3 + $0x18] sm:$0xff] }
0x19a1   :  { %1803 = vst.msk [vmem:[#allocation3 + $0x30] sm:$0xff] %vm111_vm0, %v1801_v33  ;;  %4285 = vmatmul.msk.f32.gmra.mxu0 %vm111_vm0, %v2521_v35  ;;  %4301 = vmatmul.msk.f32.gmra.mxu2 %vm111_vm0, %v2521_v35 }
0x19a8   :  { %v2526_v58 = vld [vmem:[#allocation3 + $0x30] sm:$0xff]  ;;  %v2809_v11 = vpop.permute.xlu2 %2808 }
0x19a9   :  { %4286 = vmatmul.msk.f32.gmra.mxu0 %vm111_vm0, %v2522_v40  ;;  %4302 = vmatmul.msk.f32.gmra.mxu2 %vm111_vm0, %v2522_v40  ;;  %vm2829_vm2 = vcmp.eq.s32.totalorder %v2809_v11, 1 }
0x19b0   :  { %v2818_v25 = vpop.permute.xlu2 %2817 }
0x19b1   :  { %4287 = vmatmul.msk.f32.gmra.mxu0 %vm111_vm0, %v2523_v16  ;;  %4303 = vmatmul.msk.f32.gmra.mxu2 %vm111_vm0, %v2523_v16  ;;  %vm2832_vm8 = vcmp.eq.s32.totalorder %v2818_v25, 1 }
0x19b8   :  { %v2824_v61 = vpop.permute.xlu2 %2823 }
0x19b9   :  { %4288 = vmatmul.msk.f32.gmra.mxu0 %vm111_vm0, %v2524_v43  ;;  %4304 = vmatmul.msk.f32.gmra.mxu2 %vm111_vm0, %v2524_v43  ;;  %vm2834_vm13 = vcmp.eq.s32.totalorder %v2824_v61, 1 }
0x19bb   :  { %v2663_v10 = vpop.f32.mrf.mxu1 }
0x19c1   :  { %4289 = vmatmul.msk.f32.gmra.mxu0 %vm111_vm0, %v2525_v39  ;;  %4305 = vmatmul.msk.f32.gmra.mxu2 %vm111_vm0, %v2525_v39 }
0x19c9   :  { %4290 = vmatmul.msk.f32.gmra.mxu0 %vm111_vm0, %v2526_v58  ;;  %4306 = vmatmul.msk.f32.gmra.mxu2 %vm111_vm0, %v2526_v58 }
0x19d1   :  { %4291 = vmatmul.msk.f32.gmra.mxu0 %vm111_vm0, %v2527_v52  ;;  %4307 = vmatmul.msk.f32.gmra.mxu2 %vm111_vm0, %v2527_v52 }
0x1a16   :  { %v2577_v5 = vpop.f32.mrf.mxu0 }
0x1a17   :  { %v2643_v41 = vadd.f32 %v2642_v51, %v2577_v5 }
0x1a19   :  { %v2670_v27 = vadd.f32 %v4385_v9, %v2643_v41 }
0x1a1b   :  { %v2836_v35 = vsel %vm2828_vm9, %v2670_v27, -1e+09 }
0x1a1c   :  { %v2845_v7 = vsel %vm2844_vm7, %v2836_v35, -inf }
0x1a1e   :  { %v2580_v31 = vpop.f32.mrf.mxu0 }
0x1a1f   :  { %v2646_v46 = vadd.f32 %v2645_v63, %v2580_v31 }
0x1a21   :  { %v2671_v48 = vadd.f32 %v4385_v9, %v2646_v46 }
0x1a23   :  { %v2837_v37 = vsel %vm2829_vm2, %v2671_v48, -1e+09 }
0x1a24   :  { %v2846_v36 = vsel %vm2844_vm7, %v2837_v37, -inf }
0x1a26   :  { %v2583_v57 = vpop.f32.mrf.mxu0 }
0x1a27   :  { %v2649_v62 = vadd.f32 %v2648_v13, %v2583_v57 }
0x1a29   :  { %v2672_v50 = vadd.f32 %v4385_v9, %v2649_v62 }
0x1a2b   :  { %v2838_v60 = vsel %vm2830_vm10, %v2672_v50, -1e+09 }
0x1a2c   :  { %v2847_v47 = vsel %vm2844_vm7, %v2838_v60, -inf }
0x1a2e   :  { %v2586_v30 = vpop.f32.mrf.mxu0 }
0x1a2f   :  { %v2652_v56 = vadd.f32 %v2651_v12, %v2586_v30 }
0x1a31   :  { %v2673_v32 = vadd.f32 %v4385_v9, %v2652_v56 }
0x1a33   :  { %v2839_v54 = vsel %vm2831_vm11, %v2673_v32, -1e+09 }
0x1a34   :  { %v2848_v53 = vsel %vm2844_vm7, %v2839_v54, -inf }
0x1a36   :  { %v2589_v0 = vpop.f32.mrf.mxu0 }
0x1a37   :  { %v2655_v20 = vadd.f32 %v2654_v8, %v2589_v0 }
0x1a39   :  { %v2674_v44 = vadd.f32 %v4385_v9, %v2655_v20 }
0x1a3b   :  { %v2840_v24 = vsel %vm2832_vm8, %v2674_v44, -1e+09 }
0x1a3c   :  { %v2849_v14 = vsel %vm2844_vm7, %v2840_v24, -inf }
0x1a3d   :  { %v2850_v3 = vmax.f32 %v2845_v7, %v2849_v14 }
0x1a3e   :  { %v2592_v21 = vpop.f32.mrf.mxu0 }
0x1a3f   :  { %v2658_v26 = vadd.f32 %v2657_v17, %v2592_v21 }
0x1a41   :  { %v2675_v34 = vadd.f32 %v4385_v9, %v2658_v26 }
0x1a43   :  { %v2841_v23 = vsel %vm2833_vm6, %v2675_v34, -1e+09 }
0x1a44   :  { %v2851_v33 = vsel %vm2844_vm7, %v2841_v23, -inf }
0x1a45   :  { %v2852_v49 = vmax.f32 %v2846_v36, %v2851_v33 }
0x1a46   :  { %v2595_v19 = vpop.f32.mrf.mxu0 }
0x1a47   :  { %v2661_v55 = vadd.f32 %v2660_v29, %v2595_v19  ;;  %v2857_v52 = vmax.f32 %v2850_v3, %v2852_v49  ;;  %v6180_v3 = vld [vmem:[%s6736_s15 + $0x18] sm:$0xff] }
0x1a48   :  { %3140 = vmatpush.msrb.mxu1 %v6180_v3  ;;  %3304 = vmatpush.msrb.mxu2 %v6180_v3 }
0x1a49   :  { %v2676_v1 = vadd.f32 %v4385_v9, %v2661_v55  ;;  %3387 = vmatpush.msrb.mxu3 %v6180_v3 }
0x1a4b   :  { %v2842_v59 = vsel %vm2834_vm13, %v2676_v1, -1e+09 }
0x1a4c   :  { %v2853_v16 = vsel %vm2844_vm7, %v2842_v59, -inf }
0x1a4d   :  { %v2854_v39 = vmax.f32 %v2847_v47, %v2853_v16 }
0x1a4e   :  { %v2598_v22 = vpop.f32.mrf.mxu0 }
0x1a4f   :  { %v2664_v2 = vadd.f32 %v2663_v10, %v2598_v22 }
0x1a51   :  { %v2677_v40 = vadd.f32 %v4385_v9, %v2664_v2 }
0x1a53   :  { %v2843_v4 = vsel %vm2835_vm14, %v2677_v40, -1e+09 }
0x1a54   :  { %v2855_v43 = vsel %vm2844_vm7, %v2843_v4, -inf }
0x1a55   :  { %v2856_v58 = vmax.f32 %v2848_v53, %v2855_v43  ;;  %v3049_v43 = vld [vmem:[%s6735_s14 + $0x18] sm:$0xff] }
0x1a56   :  { %3087 = vmatpush.msra.mxu0 %v3049_v43 }
0x1a57   :  { %v2858_v51 = vmax.f32 %v2854_v39, %v2856_v58  ;;  %v3048_v39 = vld [vmem:[%s6735_s14 + $0x10] sm:$0xff] }
0x1a58   :  { %v6189_v58 = vld [vmem:[%s6736_s15 + $0x10] sm:$0xff]  ;;  %3088 = vmatpush.msra.mxu0 %v3048_v39 }
0x1a59   :  { %v2859_v63 = vmax.f32 %v2857_v52, %v2858_v51  ;;  %3141 = vmatpush.msrb.mxu1 %v6189_v58  ;;  %3305 = vmatpush.msrb.mxu2 %v6189_v58 }
0x1a5a   :  { %3388 = vmatpush.msrb.mxu3 %v6189_v58 }
0x1a5b   :  { %v2860_v5 = vsub.f32 %v2836_v35, %v2859_v63  ;;  %v2861_v31 = vsub.f32 %v2837_v37, %v2859_v63  ;;  %v2862_v13 = vsub.f32 %v2838_v60, %v2859_v63  ;;  %v2863_v57 = vsub.f32 %v2839_v54, %v2859_v63 }
0x1a5c   :  { %v2864_v12 = vsub.f32 %v2840_v24, %v2859_v63  ;;  %v2865_v28 = vsub.f32 %v2841_v23, %v2859_v63  ;;  %v2866_v17 = vsub.f32 %v2842_v59, %v2859_v63  ;;  %v2867_v18 = vsub.f32 %v2843_v4, %v2859_v63 }
0x1a5d   :  { %v2868_v30 = vmul.f32 1.442695, %v2860_v5  ;;  %v2870_v8 = vmul.f32 1.442695, %v2861_v31  ;;  %v2872_v0 = vmul.f32 1.442695, %v2862_v13  ;;  %v2703_v5 = vpop.f32.mrf.mxu2  ;;  %v2744_v31 = vpop.f32.mrf.mxu3 }
0x1a5e   :  { %v2874_v11 = vmul.f32 1.442695, %v2863_v57  ;;  %v2876_v21 = vmul.f32 1.442695, %v2864_v12  ;;  %v2878_v25 = vmul.f32 1.442695, %v2865_v28 }
0x1a5f   :  { %4581 = vpow2.f32 %v2868_v30  ;;  %v2880_v26 = vmul.f32 1.442695, %v2866_v17  ;;  %v2882_v9 = vmul.f32 1.442695, %v2867_v18  ;;  %v4741_v63 = vmov 1   ;;  %v3047_v12 = vld [vmem:[%s6735_s14 + $0x8] sm:$0xff] }
0x1a60   :  { %4583 = vpow2.f32 %v2870_v8  ;;  %v6205_v30 = vld [vmem:[%s6736_s15 + $0x8] sm:$0xff]  ;;  %3089 = vmatpush.msra.mxu0 %v3047_v12  ;;  %v6216_v17 = vld [vmem:[%s6736_s15] sm:$0xff] }
0x1a61   :  { %4585 = vpow2.f32 %v2872_v0  ;;  %3142 = vmatpush.msrb.mxu1 %v6205_v30  ;;  %3306 = vmatpush.msrb.mxu2 %v6205_v30 }
0x1a62   :  { %4587 = vpow2.f32 %v2874_v11  ;;  %3389 = vmatpush.msrb.mxu3 %v6205_v30  ;;  %v3046_v11 = vld [vmem:[%s6735_s14] sm:$0xff] }
0x1a63   :  { %4589 = vpow2.f32 %v2876_v21  ;;  %3090 = vmatpush.msra.mxu0 %v3046_v11  ;;  %3143 = vmatpush.msrb.mxu1 %v6216_v17 }
0x1a64   :  { %4591 = vpow2.f32 %v2878_v25  ;;  %3307 = vmatpush.msrb.mxu2 %v6216_v17  ;;  %3390 = vmatpush.msrb.mxu3 %v6216_v17 }
0x1a65   :  { %v4582_v29 = vpop.eup %4581  ;;  %4593 = vpow2.f32 %v2880_v26  ;;  %v2706_v13 = vpop.f32.mrf.mxu2  ;;  %3221 = vmatpush.msra.mxu1 %v6180_v3 }
0x1a66   :  { %v4584_v19 = vpop.eup %4583  ;;  %v2884_v46 = vsel %vm2844_vm7, %v4582_v29, 0.0  ;;  %4595 = vpow2.f32 %v2882_v9  ;;  %v2747_v57 = vpop.f32.mrf.mxu3  ;;  %3553 = vmatpush.msra.mxu2 %v6180_v3  ;;  %3636 = vmatpush.msra.mxu3 %v6180_v3  ;;  %v2745_v9 = vadd.f32 %v2744_v31, %v2703_v5 }
0x1a67   :  { %v4586_v15 = vpop.eup %4585  ;;  %v2885_v20 = vsel %vm2844_vm7, %v4584_v19, 0.0  ;;  %3222 = vmatpush.msra.mxu1 %v6189_v58 }
0x1a68   :  { %v4588_v42 = vpop.eup %4587  ;;  %v2886_v55 = vadd.f32 %v2885_v20, %v2884_v46  ;;  %v2887_v41 = vsel %vm2844_vm7, %v4586_v15, 0.0  ;;  %3554 = vmatpush.msra.mxu2 %v6189_v58  ;;  %3637 = vmatpush.msra.mxu3 %v6189_v58  ;;  %v2748_v46 = vadd.f32 %v2747_v57, %v2706_v13 }
0x1a69   :  { %v4590_v62 = vpop.eup %4589  ;;  %v2889_v34 = vsel %vm2844_vm7, %v4588_v42, 0.0  ;;  %3223 = vmatpush.msra.mxu1 %v6205_v30 }
0x1a6a   :  { %v2888_v56 = vadd.f32 %v2887_v41, %v2886_v55  ;;  %v4592_v48 = vpop.eup %4591  ;;  %v2891_v61 = vsel %vm2844_vm7, %v4590_v62, 0.0  ;;  %3555 = vmatpush.msra.mxu2 %v6205_v30  ;;  %3638 = vmatpush.msra.mxu3 %v6205_v30 }
0x1a6b   :  { %v4594_v1 = vpop.eup %4593  ;;  %v2893_v50 = vsel %vm2844_vm7, %v4592_v48, 0.0  ;;  %3224 = vmatpush.msra.mxu1 %v6216_v17 }
0x1a6c   :  { %v2890_v44 = vadd.f32 %v2889_v34, %v2888_v56  ;;  %v4596_v32 = vpop.eup %4595  ;;  %v2895_v10 = vsel %vm2844_vm7, %v4594_v1, 0.0  ;;  %3556 = vmatpush.msra.mxu2 %v6216_v17  ;;  %3639 = vmatpush.msra.mxu3 %v6216_v17 }
0x1a6d   :  { %v2897_v37 = vsel %vm2844_vm7, %v4596_v32, 0.0 }
0x1a6e   :  { %v2892_v27 = vadd.f32 %v2891_v61, %v2890_v44  ;;  %v2750_v8 = vpop.f32.mrf.mxu3 }
0x1a70   :  { %v2894_v23 = vadd.f32 %v2893_v50, %v2892_v27 }
0x1a72   :  { %v2896_v22 = vadd.f32 %v2895_v10, %v2894_v23 }
0x1a74   :  { %v2898_v24 = vadd.f32 %v2897_v37, %v2896_v22 }
0x1a76   :  { %4597 = vrcp.f32 %v2898_v24  ;;  %v2910_v33 = vand.u32 2147483648, %v2898_v24  ;;  %v2908_v60 = vand.u32 2147483647, %v2898_v24  ;;  %vm2904_vm3 = vweird.f32 %v2898_v24  ;;  %v2753_v28 = vpop.f32.mrf.mxu3 }
0x1a78   :  { %v2911_v40 = vor.u32 1.1754944e-38, %v2910_v33  ;;  %vm2909_vm5 = vcmp.eq.f32.partialorder %v2908_v60, 8.507059e+37 }
0x1a7c   :  { %v4598_v59 = vpop.eup %4597 }
0x1a7d   :  { %v2900_v38 = vmul.f32 %v4598_v59, %v2898_v24  ;;  %vm2905_vm15 = vweird.f32 %v4598_v59 }
0x1a7e   :  { %vm2906_vm4 = vmor %vm2904_vm3, %vm2905_vm15  ;;  %v2756_v18 = vpop.f32.mrf.mxu3 }
0x1a7f   :  { %v2901_v2 = vsub.f32 1.0, %v2900_v38 }
0x1a81   :  { %v2902_v35 = vmul.f32 %v4598_v59, %v2901_v2 }
0x1a83   :  { %v2903_v54 = vadd.f32 %v4598_v59, %v2902_v35 }
0x1a85   :  { %v2907_v36 = vsel %vm2906_vm4, %v4598_v59, %v2903_v54 }
0x1a86   :  { %v2912_v14 = vsel %vm2909_vm5, %v2911_v40, %v2907_v36 }
0x1a87   :  { %v2915_v16 = vmul.f32 %v4586_v15, %v2912_v14  ;;  %v2914_v49 = vmul.f32 %v4584_v19, %v2912_v14  ;;  %v2913_v4 = vmul.f32 %v4582_v29, %v2912_v14  ;;  %v2918_v7 = vmul.f32 %v4592_v48, %v2912_v14  ;;  %v3039_v29 = vld [vmem:[%s6765_s26] sm:$0xff]  ;;  %v2759_v19 = vpop.f32.mrf.mxu3 }
0x1a88   :  { %v2917_v47 = vmul.f32 %v4590_v62, %v2912_v14  ;;  %v2916_v53 = vmul.f32 %v4588_v42, %v2912_v14  ;;  %v2920_v52 = vmul.f32 %v4596_v32, %v2912_v14  ;;  %v2919_v51 = vmul.f32 %v4594_v1, %v2912_v14  ;;  %4316 = vmatmul.msk.f32.vlgmr.msra.gmra.mxu0 %vm111_vm0, %v3039_v29  ;;  %v4386_v15 = vld [vmem:[%s6734_s13] ss:$0 sm:$0xff]  ;;  %s4742_s13 = smov 32  }
0x1a89   :  { %2933 = vperm.xlu0 %4378, %v2915_v16   ;;  %2928 = vperm.xlu2 %4377, %v2914_v49   ;;  %v2773_v55 = vadd.f32 %v4386_v15, %v2748_v46  ;;  %v2772_v62 = vadd.f32 %v4386_v15, %v2745_v9 }
0x1a8a   :  { %2923 = vperm.xlu1 %4376, %v2913_v4  }
0x1a8f   :  { %v2762_v61 = vpop.f32.mrf.mxu3 }
0x1a91   :  { %2948 = vperm.xlu0 %4378, %v2918_v7   ;;  %2943 = vperm.xlu2 %4377, %v2917_v47  }
0x1a92   :  { %2938 = vperm.xlu1 %4376, %v2916_v53  }
0x1a97   :  { %v2765_v40 = vpop.f32.mrf.mxu3 }
0x1a99   :  { %4379 = vset.pattern.permute.xlu0 %v4741_v63  ;;  %2958 = vperm.xlu2 %4377, %v2920_v52  }
0x1a9a   :  { %2953 = vperm.xlu1 %4376, %v2919_v51   ;;  %2985 = vperm.xlu0 %4379, %v2913_v4  }
0x1aa1   :  { %4381 = vset.pattern.permute.xlu2 %v4741_v63 }
0x1aa2   :  { %4380 = vset.pattern.permute.xlu1 %v4741_v63  ;;  %2993 = vperm.xlu2 %4381, %v2915_v16  }
0x1aa3   :  { %3005 = vperm.xlu0 %4379, %v2918_v7   ;;  %2989 = vperm.xlu1 %4380, %v2914_v49  }
0x1aaa   :  { %3001 = vperm.xlu2 %4381, %v2917_v47  }
0x1aab   :  { %2997 = vperm.xlu1 %4380, %v2916_v53   ;;  %4382 = vset.pattern.permute.xlu0 %v4740_v6 }
0x1ab2   :  { %3013 = vperm.xlu2 %4381, %v2920_v52  }
0x1ab3   :  { %3009 = vperm.xlu1 %4380, %v2919_v51  }
0x1aba   :  { %4384 = vset.pattern.permute.xlu2 %v4740_v6 }
0x1abb   :  { %4383 = vset.pattern.permute.xlu1 %v4740_v6  ;;  %v2709_v6 = vpop.f32.mrf.mxu2 }
0x1abc   :  { %v2751_v42 = vadd.f32 %v2750_v8, %v2709_v6 }
0x1abe   :  { %v2774_v50 = vadd.f32 %v4386_v15, %v2751_v42 }
0x1ac3   :  { %v2712_v0 = vpop.f32.mrf.mxu2 }
0x1ac4   :  { %v2754_v1 = vadd.f32 %v2753_v28, %v2712_v0 }
0x1ac6   :  { %v2775_v59 = vadd.f32 %v4386_v15, %v2754_v1 }
0x1acb   :  { %v2715_v21 = vpop.f32.mrf.mxu2 }
0x1acc   :  { %v2757_v27 = vadd.f32 %v2756_v18, %v2715_v21 }
0x1ace   :  { %v2776_v24 = vadd.f32 %v4386_v15, %v2757_v27 }
0x1ad3   :  { %v2718_v25 = vpop.f32.mrf.mxu2 }
0x1ad4   :  { %v2760_v37 = vadd.f32 %v2759_v19, %v2718_v25 }
0x1ad6   :  { %v2777_v4 = vadd.f32 %v4386_v15, %v2760_v37 }
0x1adb   :  { %v2721_v20 = vpop.f32.mrf.mxu2 }
0x1adc   :  { %v2763_v16 = vadd.f32 %v2762_v61, %v2721_v20 }
0x1ade   :  { %v2778_v51 = vadd.f32 %v4386_v15, %v2763_v16 }
0x1ae3   :  { %v2929_v26 = vpop.permute.xlu2 %2928  ;;  %v2724_v38 = vpop.f32.mrf.mxu2 }
0x1ae4   :  { %v2962_v48 = vmul.f32 %v2929_v26, %v2773_v55  ;;  %v2766_v49 = vadd.f32 %v2765_v40, %v2724_v38 }
0x1ae6   :  { %v2970_v23 = vsel %vm111_vm0, %v2962_v48, 0.0  ;;  %v2779_v52 = vadd.f32 %v4386_v15, %v2766_v49 }
0x1aeb   :  { %v2944_v41 = vpop.permute.xlu2 %2943 }
0x1aec   :  { %v2965_v33 = vmul.f32 %v2944_v41, %v2776_v24 }
0x1aee   :  { %v2976_v53 = vsel %vm111_vm0, %v2965_v33, 0.0 }
0x1af3   :  { %v2959_v35 = vpop.permute.xlu2 %2958 }
0x1af4   :  { %v2968_v5 = vmul.f32 %v2959_v35, %v2779_v52 }
0x1af6   :  { %v2982_v0 = vsel %vm111_vm0, %v2968_v5, 0.0 }
0x1afb   :  { %v2934_v56 = vpop.permute.xlu0 %2933 }
0x1afc   :  { %v2924_v34 = vpop.permute.xlu1 %2923  ;;  %v2963_v10 = vmul.f32 %v2934_v56, %v2774_v50  ;;  %v2994_v12 = vpop.permute.xlu2 %2993 }
0x1afd   :  { %v2961_v44 = vmul.f32 %v2924_v34, %v2772_v62  ;;  %v3018_v19 = vmul.f32 %v2994_v12, %v2774_v50 }
0x1afe   :  { %v2972_v60 = vsel %vm111_vm0, %v2963_v10, 0.0 }
0x1aff   :  { %v2969_v32 = vsel %vm111_vm0, %v2961_v44, 0.0  ;;  %v3027_v20 = vsel %vm111_vm0, %v3018_v19, 0.0 }
0x1b00   :  { %v2971_v22 = vadd.f32 %v2970_v23, %v2969_v32 }
0x1b02   :  { %v2973_v14 = vadd.f32 %v2972_v60, %v2971_v22  ;;  %v6268_v22 = vld [vmem:[%s6737_s16] ss:$0 sm:$0xff] }
0x1b03   :  { %v2949_v36 = vpop.permute.xlu0 %2948 }
0x1b04   :  { %v2939_v2 = vpop.permute.xlu1 %2938  ;;  %v2966_v43 = vmul.f32 %v2949_v36, %v2777_v4  ;;  %v3002_v29 = vpop.permute.xlu2 %3001 }
0x1b05   :  { %v2964_v54 = vmul.f32 %v2939_v2, %v2775_v59  ;;  %v3020_v42 = vmul.f32 %v3002_v29, %v2776_v24  ;;  %v3092_v37 = vpop.f32.mrf.mxu0 }
0x1b06   :  { %v2978_v31 = vsel %vm111_vm0, %v2966_v43, 0.0  ;;  %v3093_v24 = vadd.f32 %v6268_v22, %v3092_v37 }
0x1b07   :  { %v2974_v7 = vsel %vm111_vm0, %v2964_v54, 0.0  ;;  %v3031_v56 = vsel %vm111_vm0, %v3020_v42, 0.0 }
0x1b08   :  { %v2975_v47 = vadd.f32 %v2974_v7, %v2973_v14 }
0x1b0a   :  { %v2977_v39 = vadd.f32 %v2976_v53, %v2975_v47 }
0x1b0c   :  { %v2954_v63 = vpop.permute.xlu1 %2953  ;;  %v2979_v57 = vadd.f32 %v2978_v31, %v2977_v39  ;;  %v2986_v11 = vpop.permute.xlu0 %2985 }
0x1b0d   :  { %v2967_v13 = vmul.f32 %v2954_v63, %v2778_v51  ;;  %v3016_v18 = vmul.f32 %v2986_v11, %v2772_v62 }
0x1b0f   :  { %v2980_v6 = vsel %vm111_vm0, %v2967_v13, 0.0  ;;  %v3024_v9 = vsel %vm111_vm0, %v3016_v18, 0.0  ;;  %v3040_v13 = vld [vmem:[%s6765_s26 + $0x8] sm:$0xff] }
0x1b10   :  { %v2981_v8 = vadd.f32 %v2980_v6, %v2979_v57  ;;  %4317 = vmatmul.msk.f32.gmra.mxu0 %vm111_vm0, %v3040_v13  ;;  %v3190_v6 = vld [vmem:[%s6766_s10] sm:$0xff] }
0x1b11   :  { %vm3191_vm2 = vcmp.gt.f32.partialorder %v3190_v6, 0.5 }
0x1b12   :  { %v6248_v28 = vadd.f32 %v2982_v0, %v2981_v8 }
0x1b14   :  { %4323 = vmatmul.msk.f32.vlgmr.msrb.gmra.mxu1 %vm111_vm0, %v6248_v28 }
0x1b15   :  { %v2990_v21 = vpop.permute.xlu1 %2989  ;;  %3470 = vmatpush.msrb.mxu1 %v6180_v3  ;;  %v3006_v41 = vpop.permute.xlu0 %3005 }
0x1b16   :  { %v3017_v25 = vmul.f32 %v2990_v21, %v2773_v55  ;;  %v3021_v34 = vmul.f32 %v3006_v41, %v2777_v4 }
0x1b17   :  { %3471 = vmatpush.msrb.mxu1 %v6189_v58 }
0x1b18   :  { %v3025_v26 = vsel %vm111_vm0, %v3017_v25, 0.0  ;;  %v3033_v1 = vsel %vm111_vm0, %v3021_v34, 0.0 }
0x1b19   :  { %3472 = vmatpush.msrb.mxu1 %v6205_v30  ;;  %v3026_v46 = vadd.f32 %v3025_v26, %v3024_v9  ;;  %v3014_v30 = vpop.permute.xlu2 %3013 }
0x1b1a   :  { %v3023_v61 = vmul.f32 %v3014_v30, %v2779_v52 }
0x1b1b   :  { %3473 = vmatpush.msrb.mxu1 %v6216_v17  ;;  %v3028_v55 = vadd.f32 %v3027_v20, %v3026_v46 }
0x1b1c   :  { %v3037_v23 = vsel %vm111_vm0, %v3023_v61, 0.0 }
0x1b1d   :  { %v2998_v15 = vpop.permute.xlu1 %2997 }
0x1b1e   :  { %v3019_v3 = vmul.f32 %v2998_v15, %v2775_v59 }
0x1b20   :  { %v3029_v58 = vsel %vm111_vm0, %v3019_v3, 0.0 }
0x1b21   :  { %v3030_v62 = vadd.f32 %v3029_v58, %v3028_v55 }
0x1b23   :  { %v3032_v48 = vadd.f32 %v3031_v56, %v3030_v62 }
0x1b25   :  { %v3010_v44 = vpop.permute.xlu1 %3009  ;;  %v3034_v27 = vadd.f32 %v3033_v1, %v3032_v48 }
0x1b26   :  { %v3022_v17 = vmul.f32 %v3010_v44, %v2778_v51 }
0x1b28   :  { %v3035_v50 = vsel %vm111_vm0, %v3022_v17, 0.0 }
0x1b29   :  { %v3036_v32 = vadd.f32 %v3035_v50, %v3034_v27 }
0x1b2b   :  { %v3038_v10 = vadd.f32 %v3037_v23, %v3036_v32 }
0x1b2d   :  { %3170 = vrot.lane.b32.xlu1 %v3038_v10, %s4742_s13 }
0x1b8d   :  { %v3095_v25 = vpop.f32.mrf.mxu0 }
0x1b8e   :  { %v3096_v26 = vadd.f32 %v6268_v22, %v3095_v25 }
0x1b91   :  { %v3145_v59 = vpop.f32.mrf.mxu1 }
0x1b92   :  { %v3148_v38 = vadd.f32 %v3145_v59, %v3093_v24  ;;  %v3041_v59 = vld [vmem:[%s6765_s26 + $0x10] sm:$0xff] }
0x1b93   :  { %4318 = vmatmul.msk.f32.gmra.mxu0 %vm111_vm0, %v3041_v59 }
0x1b94   :  { %4599 = vtanh.f32 %v3148_v38  ;;  %v4324_v33 = vmul.f32 -1.442695, %v3148_v38 }
0x1b96   :  { %4601 = vpow2.f32 %v4324_v33 }
0x1b9a   :  { %v4600_v2 = vpop.eup %4599 }
0x1b9b   :  { %3175 = vrot.lane.b32.xlu0 %v4600_v2, %s4738_s25 }
0x1b9c   :  { %v4602_v35 = vpop.eup %4601 }
0x1b9d   :  { %v3152_v60 = vadd.f32 1.0, %v4602_v35 }
0x1b9f   :  { %4603 = vrcp.f32 %v3152_v60  ;;  %v3164_v49 = vand.u32 2147483648, %v3152_v60  ;;  %vm3158_vm12 = vweird.f32 %v3152_v60  ;;  %v3162_v4 = vand.u32 2147483647, %v3152_v60  ;;  %v3171_v52 = vpop.permute.xlu1 %3170 }
0x1ba1   :  { %v3165_v47 = vor.u32 1.1754944e-38, %v3164_v49  ;;  %vm3163_vm7 = vcmp.eq.f32.partialorder %v3162_v4, 8.507059e+37 }
0x1ba5   :  { %v4604_v54 = vpop.eup %4603 }
0x1ba6   :  { %v3154_v40 = vmul.f32 %v4604_v54, %v3152_v60  ;;  %vm3159_vm1 = vweird.f32 %v4604_v54 }
0x1ba7   :  { %vm3160_vm6 = vmor %vm3158_vm12, %vm3159_vm1 }
0x1ba8   :  { %v3155_v36 = vsub.f32 1.0, %v3154_v40 }
0x1baa   :  { %v3156_v14 = vmul.f32 %v4604_v54, %v3155_v36 }
0x1bac   :  { %v3157_v16 = vadd.f32 %v4604_v54, %v3156_v14 }
0x1bae   :  { %v3161_v7 = vsel %vm3160_vm6, %v4604_v54, %v3157_v16 }
0x1baf   :  { %v3166_v53 = vsel %vm3163_vm7, %v3165_v47, %v3161_v7 }
0x1bb0   :  { %v3173_v51 = vmul.f32 %v3171_v52, %v3166_v53 }
0x1c0d   :  { %v3176_v43 = vpop.permute.xlu0 %3175 }
0x1c0e   :  { %v3178_v39 = vmul.f32 %v3176_v43, %v3166_v53 }
0x1c10   :  { %3180 = vrot.lane.b32.xlu2 %v3178_v39, %s4742_s13  ;;  %v3098_v35 = vpop.f32.mrf.mxu0 }
0x1c11   :  { %v3099_v60 = vadd.f32 %v6268_v22, %v3098_v35  ;;  %v4333_v35 = vld [vmem:[%s6766_s10 + $0x18] sm:$0xff] }
0x1c6a   :  { %v3181_v63 = vpop.permute.xlu2 %3180 }
0x1c6b   :  { %v3183_v5 = vadd.f32 %v3181_v63, %v3173_v51 }
0x1c6d   :  { %4605 = vtanh.f32 %v3183_v5  ;;  %3200 = vrot.lane.b32.xlu2 %v3183_v5, %s4739_s24 }
0x1c73   :  { %v4606_v31 = vpop.eup %4605 }
0x1c74   :  { %3186 = vrot.lane.b32.xlu0 %v4606_v31, %s4738_s25 }
0x1cc7   :  { %v3201_v8 = vpop.permute.xlu2 %3200 }
0x1cc8   :  { %v3203_v0 = vsel %vm3191_vm2, %v3201_v8, %v3038_v10  ;;  %v4327_v10 = vld [vmem:[%s6766_s10 + $0x8] sm:$0xff] }
0x1cc9   :  { %vm3273_vm13 = vcmp.gt.f32.partialorder %v4327_v10, 0.5 }
0x1ce6   :  { %v3187_v57 = vpop.permute.xlu0 %3186 }
0x1ce7   :  { %v3189_v12 = vmul.f32 %v3187_v57, %v3166_v53 }
0x1ce9   :  { %3193 = vrot.lane.b32.xlu1 %v3189_v12, %s4742_s13 }
0x1cf1   :  { %3251 = vrot.lane.b32.xlu1 %v3203_v0, %s4742_s13 }
0x1d5b   :  { %v3194_v11 = vpop.permute.xlu1 %3193 }
0x1d5c   :  { %v3196_v21 = vsel %vm3191_vm2, %v3194_v11, 0.0  ;;  %v3198_v18 = vsel %vm3191_vm2, %v3194_v11, %v6248_v28  ;;  %vm3439_vm2 = vcmp.gt.f32.partialorder %v4333_v35, 0.5 }
0x1d5d   :  { %3197 = vst.msk [vmem:[#allocation6] sm:$0xff] %vm111_vm0, %v3196_v21  ;;  %4325 = vmatmul.msk.f32.vlgmr.msra.gmra.mxu1 %vm111_vm0, %v3198_v18 }
0x1d63   :  { %v3252_v61 = vpop.permute.xlu1 %3251 }
0x1dda   :  { %v3226_v29 = vpop.f32.mrf.mxu1 }
0x1ddb   :  { %v3229_v19 = vadd.f32 %v3226_v29, %v3096_v26  ;;  %v3042_v29 = vld [vmem:[%s6765_s26 + $0x18] sm:$0xff] }
0x1ddc   :  { %4319 = vmatmul.msk.f32.gmra.mxu0 %vm111_vm0, %v3042_v29 }
0x1ddd   :  { %4607 = vtanh.f32 %v3229_v19  ;;  %v4326_v46 = vmul.f32 -1.442695, %v3229_v19 }
0x1ddf   :  { %4609 = vpow2.f32 %v4326_v46 }
0x1de3   :  { %v4608_v9 = vpop.eup %4607 }
0x1de4   :  { %3256 = vrot.lane.b32.xlu0 %v4608_v9, %s4738_s25 }
0x1de5   :  { %v4610_v15 = vpop.eup %4609 }
0x1de6   :  { %v3233_v20 = vadd.f32 1.0, %v4610_v15 }
0x1de8   :  { %4611 = vrcp.f32 %v3233_v20  ;;  %v3245_v58 = vand.u32 2147483648, %v3233_v20  ;;  %vm3239_vm9 = vweird.f32 %v3233_v20  ;;  %v3243_v62 = vand.u32 2147483647, %v3233_v20 }
0x1dea   :  { %v3246_v34 = vor.u32 1.1754944e-38, %v3245_v58  ;;  %vm3244_vm11 = vcmp.eq.f32.partialorder %v3243_v62, 8.507059e+37 }
0x1dee   :  { %v4612_v42 = vpop.eup %4611 }
0x1def   :  { %v3235_v28 = vmul.f32 %v4612_v42, %v3233_v20  ;;  %vm3240_vm8 = vweird.f32 %v4612_v42 }
0x1df0   :  { %vm3241_vm10 = vmor %vm3239_vm9, %vm3240_vm8 }
0x1df1   :  { %v3236_v3 = vsub.f32 1.0, %v3235_v28 }
0x1df3   :  { %v3237_v41 = vmul.f32 %v4612_v42, %v3236_v3 }
0x1df5   :  { %v3238_v55 = vadd.f32 %v4612_v42, %v3237_v41 }
0x1df7   :  { %v3242_v56 = vsel %vm3241_vm10, %v4612_v42, %v3238_v55 }
0x1df8   :  { %v3247_v48 = vsel %vm3244_vm11, %v3246_v34, %v3242_v56 }
0x1df9   :  { %v3254_v1 = vmul.f32 %v3252_v61, %v3247_v48 }
0x1e56   :  { %v3257_v30 = vpop.permute.xlu0 %3256 }
0x1e57   :  { %v3259_v44 = vmul.f32 %v3257_v30, %v3247_v48 }
0x1e59   :  { %3261 = vrot.lane.b32.xlu2 %v3259_v44, %s4742_s13  ;;  %v3101_v15 = vpop.f32.mrf.mxu0 }
0x1e5a   :  { %v3102_v20 = vadd.f32 %v6268_v22, %v3101_v15 }
0x1eb3   :  { %v3262_v17 = vpop.permute.xlu2 %3261 }
0x1eb4   :  { %v3264_v27 = vadd.f32 %v3262_v17, %v3254_v1 }
0x1eb6   :  { %4613 = vtanh.f32 %v3264_v27  ;;  %3283 = vrot.lane.b32.xlu2 %v3264_v27, %s4739_s24 }
0x1ebc   :  { %v4614_v50 = vpop.eup %4613 }
0x1ebd   :  { %3267 = vrot.lane.b32.xlu0 %v4614_v50, %s4738_s25 }
0x1f10   :  { %v3284_v37 = vpop.permute.xlu2 %3283 }
0x1f11   :  { %v3286_v24 = vsel %vm3273_vm13, %v3284_v37, %v3203_v0 }
0x1f2f   :  { %v3268_v32 = vpop.permute.xlu0 %3267 }
0x1f30   :  { %v3270_v23 = vmul.f32 %v3268_v32, %v3247_v48 }
0x1f32   :  { %3275 = vrot.lane.b32.xlu1 %v3270_v23, %s4742_s13 }
0x1f3a   :  { %3334 = vrot.lane.b32.xlu1 %v3286_v24, %s4742_s13 }
0x1fa4   :  { %v3276_v38 = vpop.permute.xlu1 %3275 }
0x1fa5   :  { %v3278_v2 = vsel %vm3273_vm13, %v3276_v38, 0.0  ;;  %v3281_v33 = vsel %vm3273_vm13, %v3276_v38, %v3198_v18  ;;  %v4330_v18 = vld [vmem:[%s6766_s10 + $0x10] sm:$0xff]  ;;  %v3043_v38 = vld [vmem:[%s6765_s26 + $0x20] sm:$0xff] }
0x1fa6   :  { %3280 = vst.msk [vmem:[#allocation6 + $0x8] sm:$0xff] %vm111_vm0, %v3278_v2  ;;  %4328 = vmatmul.msk.f32.vlgmr.msrb.gmra.mxu2 %vm111_vm0, %v3281_v33  ;;  %vm3356_vm5 = vcmp.gt.f32.partialorder %v4330_v18, 0.5  ;;  %4320 = vmatmul.msk.f32.gmra.mxu0 %vm111_vm0, %v3043_v38 }
0x1fac   :  { %v3335_v57 = vpop.permute.xlu1 %3334 }
0x2029   :  { %v3309_v54 = vpop.f32.mrf.mxu2 }
0x202a   :  { %v3312_v40 = vadd.f32 %v3309_v54, %v3099_v60 }
0x202c   :  { %4615 = vtanh.f32 %v3312_v40  ;;  %v4329_v14 = vmul.f32 -1.442695, %v3312_v40  ;;  %v3706_v40 = vld [vmem:[%s6738_s17 + $0x18] sm:$0xff] }
0x202d   :  { %3744 = vmatpush.msra.mxu1 %v3706_v40 }
0x202e   :  { %4617 = vpow2.f32 %v4329_v14  ;;  %v3704_v14 = vld [vmem:[%s6738_s17 + $0x8] sm:$0xff] }
0x2032   :  { %v4616_v36 = vpop.eup %4615 }
0x2033   :  { %3339 = vrot.lane.b32.xlu0 %v4616_v36, %s4738_s25  ;;  %v3705_v36 = vld [vmem:[%s6738_s17 + $0x10] sm:$0xff] }
0x2034   :  { %v4618_v16 = vpop.eup %4617  ;;  %3745 = vmatpush.msra.mxu1 %v3705_v36 }
0x2035   :  { %v3316_v49 = vadd.f32 1.0, %v4618_v16  ;;  %v3703_v16 = vld [vmem:[%s6738_s17] sm:$0xff] }
0x2036   :  { %3746 = vmatpush.msra.mxu1 %v3704_v14 }
0x2037   :  { %4619 = vrcp.f32 %v3316_v49  ;;  %v3328_v39 = vand.u32 2147483648, %v3316_v49  ;;  %vm3322_vm15 = vweird.f32 %v3316_v49  ;;  %v3326_v52 = vand.u32 2147483647, %v3316_v49 }
0x2038   :  { %3747 = vmatpush.msra.mxu1 %v3703_v16 }
0x2039   :  { %v3329_v63 = vor.u32 1.1754944e-38, %v3328_v39  ;;  %vm3327_vm4 = vcmp.eq.f32.partialorder %v3326_v52, 8.507059e+37  ;;  %v3104_v52 = vpop.f32.mrf.mxu0 }
0x203d   :  { %v4620_v4 = vpop.eup %4619 }
0x203e   :  { %v3318_v7 = vmul.f32 %v4620_v4, %v3316_v49  ;;  %vm3323_vm14 = vweird.f32 %v4620_v4 }
0x203f   :  { %vm3324_vm3 = vmor %vm3322_vm15, %vm3323_vm14 }
0x2040   :  { %v3319_v47 = vsub.f32 1.0, %v3318_v7 }
0x2042   :  { %v3320_v53 = vmul.f32 %v4620_v4, %v3319_v47  ;;  %v3696_v47 = vld [vmem:[#allocation6] sm:$0xff] }
0x2044   :  { %v3321_v43 = vadd.f32 %v4620_v4, %v3320_v53  ;;  %v3697_v53 = vld [vmem:[#allocation6 + $0x8] sm:$0xff] }
0x2046   :  { %v3325_v51 = vsel %vm3324_vm3, %v4620_v4, %v3321_v43 }
0x2047   :  { %v3330_v31 = vsel %vm3327_vm4, %v3329_v63, %v3325_v51  ;;  %v3105_v51 = vadd.f32 %v6268_v22, %v3104_v52  ;;  %v4339_v52 = vld [vmem:[%s6766_s10 + $0x28] sm:$0xff] }
0x2048   :  { %v3337_v12 = vmul.f32 %v3335_v57, %v3330_v31 }
0x20a5   :  { %v3340_v5 = vpop.permute.xlu0 %3339 }
0x20a6   :  { %v3342_v13 = vmul.f32 %v3340_v5, %v3330_v31 }
0x20a8   :  { %3344 = vrot.lane.b32.xlu2 %v3342_v13, %s4742_s13 }
0x2102   :  { %v3345_v6 = vpop.permute.xlu2 %3344 }
0x2103   :  { %v3347_v8 = vadd.f32 %v3345_v6, %v3337_v12 }
0x2105   :  { %4621 = vtanh.f32 %v3347_v8  ;;  %3366 = vrot.lane.b32.xlu2 %v3347_v8, %s4739_s24 }
0x210b   :  { %v4622_v0 = vpop.eup %4621 }
0x210c   :  { %3350 = vrot.lane.b32.xlu0 %v4622_v0, %s4738_s25 }
0x215f   :  { %v3367_v25 = vpop.permute.xlu2 %3366 }
0x2160   :  { %v3369_v26 = vsel %vm3356_vm5, %v3367_v25, %v3286_v24 }
0x217e   :  { %v3351_v11 = vpop.permute.xlu0 %3350 }
0x217f   :  { %v3353_v21 = vmul.f32 %v3351_v11, %v3330_v31 }
0x2181   :  { %3358 = vrot.lane.b32.xlu1 %v3353_v21, %s4742_s13 }
0x2189   :  { %3417 = vrot.lane.b32.xlu1 %v3369_v26, %s4742_s13 }
0x21f3   :  { %v3359_v19 = vpop.permute.xlu1 %3358 }
0x21f4   :  { %v3361_v9 = vsel %vm3356_vm5, %v3359_v19, 0.0  ;;  %v3364_v46 = vsel %vm3356_vm5, %v3359_v19, %v3281_v33  ;;  %vm3605_vm5 = vcmp.gt.f32.partialorder %v4339_v52, 0.5 }
0x21f5   :  { %3363 = vst.msk [vmem:[#allocation6 + $0x10] sm:$0xff] %vm111_vm0, %v3361_v9  ;;  %4331 = vmatmul.msk.f32.vlgmr.msrb.gmra.mxu3 %vm111_vm0, %v3364_v46 }
0x21fb   :  { %v3418_v23 = vpop.permute.xlu1 %3417 }
0x21fc   :  { %v3698_v43 = vld [vmem:[#allocation6 + $0x10] sm:$0xff] }
0x2278   :  { %v3392_v42 = vpop.f32.mrf.mxu3 }
0x2279   :  { %v3395_v28 = vadd.f32 %v3392_v42, %v3102_v20 }
0x227b   :  { %4623 = vtanh.f32 %v3395_v28  ;;  %v4332_v41 = vmul.f32 -1.442695, %v3395_v28 }
0x227d   :  { %4625 = vpow2.f32 %v4332_v41 }
0x2281   :  { %v4624_v3 = vpop.eup %4623 }
0x2282   :  { %3422 = vrot.lane.b32.xlu0 %v4624_v3, %s4738_s25 }
0x2283   :  { %v4626_v55 = vpop.eup %4625 }
0x2284   :  { %v3399_v58 = vadd.f32 1.0, %v4626_v55 }
0x2286   :  { %4627 = vrcp.f32 %v3399_v58  ;;  %v3411_v44 = vand.u32 2147483648, %v3399_v58  ;;  %vm3405_vm12 = vweird.f32 %v3399_v58  ;;  %v3409_v61 = vand.u32 2147483647, %v3399_v58 }
0x2288   :  { %v3412_v17 = vor.u32 1.1754944e-38, %v3411_v44  ;;  %vm3410_vm7 = vcmp.eq.f32.partialorder %v3409_v61, 8.507059e+37 }
0x228c   :  { %v4628_v62 = vpop.eup %4627 }
0x228d   :  { %v3401_v56 = vmul.f32 %v4628_v62, %v3399_v58  ;;  %vm3406_vm1 = vweird.f32 %v4628_v62  ;;  %v4336_v58 = vld [vmem:[%s6766_s10 + $0x20] sm:$0xff] }
0x228e   :  { %vm3407_vm6 = vmor %vm3405_vm12, %vm3406_vm1  ;;  %vm3522_vm13 = vcmp.gt.f32.partialorder %v4336_v58, 0.5 }
0x228f   :  { %v3402_v34 = vsub.f32 1.0, %v3401_v56 }
0x2291   :  { %v3403_v30 = vmul.f32 %v4628_v62, %v3402_v34  ;;  %v3044_v34 = vld [vmem:[%s6765_s26 + $0x28] sm:$0xff] }
0x2292   :  { %4321 = vmatmul.msk.f32.gmra.mxu0 %vm111_vm0, %v3044_v34  ;;  %v6395_v34 = vld [vmem:[%s6739_s18] ss:$0 sm:$0xff] }
0x2293   :  { %v3404_v48 = vadd.f32 %v4628_v62, %v3403_v30 }
0x2295   :  { %v3408_v1 = vsel %vm3407_vm6, %v4628_v62, %v3404_v48 }
0x2296   :  { %v3413_v50 = vsel %vm3410_vm7, %v3412_v17, %v3408_v1 }
0x2297   :  { %v3420_v10 = vmul.f32 %v3418_v23, %v3413_v50 }
0x22f4   :  { %v3423_v27 = vpop.permute.xlu0 %3422 }
0x22f5   :  { %v3425_v32 = vmul.f32 %v3423_v27, %v3413_v50 }
0x22f7   :  { %3427 = vrot.lane.b32.xlu2 %v3425_v32, %s4742_s13 }
0x230f   :  { %v3107_v1 = vpop.f32.mrf.mxu0 }
0x2310   :  { %v3108_v17 = vadd.f32 %v6268_v22, %v3107_v1 }
0x2351   :  { %v3428_v37 = vpop.permute.xlu2 %3427 }
0x2352   :  { %v3430_v24 = vadd.f32 %v3428_v37, %v3420_v10 }
0x2354   :  { %4629 = vtanh.f32 %v3430_v24  ;;  %3449 = vrot.lane.b32.xlu2 %v3430_v24, %s4739_s24 }
0x235a   :  { %v4630_v59 = vpop.eup %4629 }
0x235b   :  { %3433 = vrot.lane.b32.xlu0 %v4630_v59, %s4738_s25 }
0x23ae   :  { %v3450_v60 = vpop.permute.xlu2 %3449 }
0x23af   :  { %v6332_v54 = vsel %vm3439_vm2, %v3450_v60, %v3369_v26 }
0x23cd   :  { %v3434_v2 = vpop.permute.xlu0 %3433 }
0x23ce   :  { %v3436_v33 = vmul.f32 %v3434_v2, %v3413_v50 }
0x23d0   :  { %3441 = vrot.lane.b32.xlu1 %v3436_v33, %s4742_s13 }
0x23d8   :  { %3500 = vrot.lane.b32.xlu1 %v6332_v54, %s4742_s13 }
0x2442   :  { %v3442_v49 = vpop.permute.xlu1 %3441 }
0x2443   :  { %v3444_v4 = vsel %vm3439_vm2, %v3442_v49, 0.0  ;;  %v3447_v7 = vsel %vm3439_vm2, %v3442_v49, %v3364_v46  ;;  %vm3784_vm2 = vcmask 97280  }
0x2444   :  { %3446 = vst.msk [vmem:[#allocation6 + $0x18] sm:$0xff] %vm111_vm0, %v3444_v4  ;;  %4334 = vmatmul.msk.f32.vlgmr.msrb.gmra.mxu1 %vm111_vm0, %v3447_v7 }
0x244a   :  { %v3501_v15 = vpop.permute.xlu1 %3500 }
0x244b   :  { %v3699_v39 = vld [vmem:[#allocation6 + $0x18] sm:$0xff] }
0x244c   :  { %4343 = vmatmul.msk.f32.vlgmr.msra.gmra.mxu1 %vm111_vm0, %v3696_v47 }
0x2454   :  { %4344 = vmatmul.msk.f32.gmra.mxu1 %vm111_vm0, %v3697_v53 }
0x245c   :  { %4345 = vmatmul.msk.f32.gmra.mxu1 %vm111_vm0, %v3698_v43 }
0x2464   :  { %4346 = vmatmul.msk.f32.gmra.mxu1 %vm111_vm0, %v3699_v39 }
0x24c1   :  { %v3475_v63 = vpop.f32.mrf.mxu1 }
0x24c2   :  { %v3478_v5 = vadd.f32 %v3475_v63, %v3105_v51 }
0x24c4   :  { %4631 = vtanh.f32 %v3478_v5  ;;  %v4335_v13 = vmul.f32 -1.442695, %v3478_v5  ;;  %v3045_v5 = vld [vmem:[%s6765_s26 + $0x30] sm:$0xff] }
0x24c5   :  { %4322 = vmatmul.msk.f32.gmra.mxu0 %vm111_vm0, %v3045_v5 }
0x24c6   :  { %4633 = vpow2.f32 %v4335_v13 }
0x24c9   :  { %v3749_v58 = vpop.f32.mrf.mxu1 }
0x24ca   :  { %v4632_v31 = vpop.eup %4631 }
0x24cb   :  { %3505 = vrot.lane.b32.xlu0 %v4632_v31, %s4738_s25 }
0x24cc   :  { %v4634_v57 = vpop.eup %4633 }
0x24cd   :  { %v3482_v12 = vadd.f32 1.0, %v4634_v57 }
0x24cf   :  { %4635 = vrcp.f32 %v3482_v12  ;;  %v3494_v18 = vand.u32 2147483648, %v3482_v12  ;;  %vm3488_vm9 = vweird.f32 %v3482_v12  ;;  %v3492_v25 = vand.u32 2147483647, %v3482_v12 }
0x24d1   :  { %v3495_v29 = vor.u32 1.1754944e-38, %v3494_v18  ;;  %vm3493_vm11 = vcmp.eq.f32.partialorder %v3492_v25, 8.507059e+37 }
0x24d5   :  { %v4636_v6 = vpop.eup %4635 }
0x24d6   :  { %v3484_v8 = vmul.f32 %v4636_v6, %v3482_v12  ;;  %vm3489_vm8 = vweird.f32 %v4636_v6 }
0x24d7   :  { %vm3490_vm10 = vmor %vm3488_vm9, %vm3489_vm8 }
0x24d8   :  { %v3485_v0 = vsub.f32 1.0, %v3484_v8 }
0x24da   :  { %v3486_v11 = vmul.f32 %v4636_v6, %v3485_v0 }
0x24dc   :  { %v3487_v21 = vadd.f32 %v4636_v6, %v3486_v11 }
0x24de   :  { %v3491_v26 = vsel %vm3490_vm10, %v4636_v6, %v3487_v21 }
0x24df   :  { %v3496_v9 = vsel %vm3493_vm11, %v3495_v29, %v3491_v26 }
0x24e0   :  { %v3503_v20 = vmul.f32 %v3501_v15, %v3496_v9 }
0x253d   :  { %v3506_v19 = vpop.permute.xlu0 %3505 }
0x253e   :  { %v3508_v46 = vmul.f32 %v3506_v19, %v3496_v9 }
0x2540   :  { %3510 = vrot.lane.b32.xlu2 %v3508_v46, %s4742_s13 }
0x2542   :  { %v3110_v6 = vpop.f32.mrf.mxu0 }
0x2543   :  { %v3111_v8 = vadd.f32 %v6268_v22, %v3110_v6 }
0x259a   :  { %v3511_v42 = vpop.permute.xlu2 %3510 }
0x259b   :  { %v3513_v28 = vadd.f32 %v3511_v42, %v3503_v20 }
0x259d   :  { %4637 = vtanh.f32 %v3513_v28  ;;  %3532 = vrot.lane.b32.xlu2 %v3513_v28, %s4739_s24 }
0x25a3   :  { %v4638_v3 = vpop.eup %4637 }
0x25a4   :  { %3516 = vrot.lane.b32.xlu0 %v4638_v3, %s4738_s25 }
0x25f7   :  { %v3533_v62 = vpop.permute.xlu2 %3532 }
0x25f8   :  { %v3535_v56 = vsel %vm3522_vm13, %v3533_v62, %v6332_v54  ;;  %v3752_v62 = vpop.f32.mrf.mxu1 }
0x2616   :  { %v3517_v41 = vpop.permute.xlu0 %3516 }
0x2617   :  { %v3519_v55 = vmul.f32 %v3517_v41, %v3496_v9 }
0x2619   :  { %3524 = vrot.lane.b32.xlu1 %v3519_v55, %s4742_s13 }
0x2621   :  { %3583 = vrot.lane.b32.xlu1 %v3535_v56, %s4742_s13 }
0x268b   :  { %v3525_v30 = vpop.permute.xlu1 %3524 }
0x268c   :  { %v3527_v48 = vsel %vm3522_vm13, %v3525_v30, 0.0  ;;  %v3530_v44 = vsel %vm3522_vm13, %v3525_v30, %v3447_v7  ;;  %v6398_v30 = vadd.f32 %v6395_v34, %v3749_v58 }
0x268d   :  { %3529 = vst.msk [vmem:[#allocation6 + $0x20] sm:$0xff] %vm111_vm0, %v3527_v48  ;;  %4337 = vmatmul.msk.f32.vlgmr.msra.gmra.mxu2 %vm111_vm0, %v3530_v44 }
0x268e   :  { %v3785_v48 = vsel %vm3784_vm2, %v6398_v30, -inf }
0x2693   :  { %v3584_v49 = vpop.permute.xlu1 %3583 }
0x2694   :  { %v3700_v61 = vld [vmem:[#allocation6 + $0x20] sm:$0xff] }
0x2695   :  { %4347 = vmatmul.msk.f32.gmra.mxu1 %vm111_vm0, %v3700_v61 }
0x2710   :  { %v3558_v27 = vpop.f32.mrf.mxu2 }
0x2711   :  { %v3561_v50 = vadd.f32 %v3558_v27, %v3108_v17 }
0x2713   :  { %4639 = vtanh.f32 %v3561_v50  ;;  %v4338_v23 = vmul.f32 -1.442695, %v3561_v50 }
0x2715   :  { %4641 = vpow2.f32 %v4338_v23 }
0x2719   :  { %v4640_v32 = vpop.eup %4639 }
0x271a   :  { %3588 = vrot.lane.b32.xlu0 %v4640_v32, %s4738_s25 }
0x271b   :  { %v4642_v10 = vpop.eup %4641 }
0x271c   :  { %v3565_v37 = vadd.f32 1.0, %v4642_v10 }
0x271e   :  { %4643 = vrcp.f32 %v3565_v37  ;;  %v3577_v35 = vand.u32 2147483648, %v3565_v37  ;;  %vm3571_vm15 = vweird.f32 %v3565_v37  ;;  %v3575_v60 = vand.u32 2147483647, %v3565_v37 }
0x2720   :  { %v3578_v40 = vor.u32 1.1754944e-38, %v3577_v35  ;;  %vm3576_vm4 = vcmp.eq.f32.partialorder %v3575_v60, 8.507059e+37 }
0x2724   :  { %v4644_v24 = vpop.eup %4643 }
0x2725   :  { %v3567_v59 = vmul.f32 %v4644_v24, %v3565_v37  ;;  %vm3572_vm14 = vweird.f32 %v4644_v24 }
0x2726   :  { %vm3573_vm3 = vmor %vm3571_vm15, %vm3572_vm14 }
0x2727   :  { %v3568_v38 = vsub.f32 1.0, %v3567_v59  ;;  %v6414_v59 = vadd.f32 %v6395_v34, %v3752_v62 }
0x2729   :  { %v3569_v2 = vmul.f32 %v4644_v24, %v3568_v38  ;;  %v3788_v38 = vsel %vm3784_vm2, %v6414_v59, -inf }
0x272b   :  { %v3570_v33 = vadd.f32 %v4644_v24, %v3569_v2 }
0x272d   :  { %v3574_v54 = vsel %vm3573_vm3, %v4644_v24, %v3570_v33 }
0x272e   :  { %v3579_v14 = vsel %vm3576_vm4, %v3578_v40, %v3574_v54 }
0x272f   :  { %v3586_v4 = vmul.f32 %v3584_v49, %v3579_v14 }
0x278c   :  { %v3589_v36 = vpop.permute.xlu0 %3588 }
0x278d   :  { %v3591_v16 = vmul.f32 %v3589_v36, %v3579_v14 }
0x278f   :  { %3593 = vrot.lane.b32.xlu2 %v3591_v16, %s4742_s13 }
0x27e9   :  { %v3594_v7 = vpop.permute.xlu2 %3593 }
0x27ea   :  { %v3596_v47 = vadd.f32 %v3594_v7, %v3586_v4 }
0x27ec   :  { %4645 = vtanh.f32 %v3596_v47  ;;  %3615 = vrot.lane.b32.xlu2 %v3596_v47, %s4739_s24 }
0x27f2   :  { %v4646_v53 = vpop.eup %4645 }
0x27f3   :  { %3599 = vrot.lane.b32.xlu0 %v4646_v53, %s4738_s25 }
0x2846   :  { %v3616_v51 = vpop.permute.xlu2 %3615 }
0x2847   :  { %v3618_v63 = vsel %vm3605_vm5, %v3616_v51, %v3535_v56  ;;  %v3755_v56 = vpop.f32.mrf.mxu1 }
0x2865   :  { %v3600_v43 = vpop.permute.xlu0 %3599 }
0x2866   :  { %v3602_v39 = vmul.f32 %v3600_v43, %v3579_v14 }
0x2868   :  { %3607 = vrot.lane.b32.xlu1 %v3602_v39, %s4742_s13  ;;  %v6438_v39 = vadd.f32 %v6395_v34, %v3755_v56 }
0x286a   :  { %v3791_v5 = vsel %vm3784_vm2, %v6438_v39, -inf }
0x2870   :  { %3666 = vrot.lane.b32.xlu1 %v3618_v63, %s4742_s13 }
0x28da   :  { %v3608_v31 = vpop.permute.xlu1 %3607 }
0x28db   :  { %v3610_v13 = vsel %vm3605_vm5, %v3608_v31, 0.0  ;;  %v3613_v57 = vsel %vm3605_vm5, %v3608_v31, %v3530_v44  ;;  %v3758_v44 = vpop.f32.mrf.mxu1 }
0x28dc   :  { %3612 = vst.msk [vmem:[#allocation6 + $0x28] sm:$0xff] %vm111_vm0, %v3610_v13  ;;  %4340 = vmatmul.msk.f32.vlgmr.msra.gmra.mxu3 %vm111_vm0, %v3613_v57  ;;  %v6403_v61 = vadd.f32 %v6395_v34, %v3758_v44 }
0x28de   :  { %v3794_v1 = vsel %vm3784_vm2, %v6403_v61, -inf }
0x28e2   :  { %v3667_v32 = vpop.permute.xlu1 %3666 }
0x28e3   :  { %v3701_v12 = vld [vmem:[#allocation6 + $0x28] sm:$0xff]  ;;  %v3761_v17 = vpop.f32.mrf.mxu1 }
0x28e4   :  { %4348 = vmatmul.msk.f32.gmra.mxu1 %vm111_vm0, %v3701_v12  ;;  %v6408_v27 = vadd.f32 %v6395_v34, %v3761_v17 }
0x28e6   :  { %v3797_v50 = vsel %vm3784_vm2, %v6408_v27, -inf }
0x295f   :  { %v3641_v0 = vpop.f32.mrf.mxu3 }
0x2960   :  { %v3644_v11 = vadd.f32 %v3641_v0, %v3111_v8  ;;  %v6460_v0 = vld [vmem:[%s6726_s5 + $0x10] sm:$0xff] }
0x2961   :  { %v3764_v2 = vpop.f32.mrf.mxu1  ;;  %vm3779_vm8 = vcmp.ne.s32.totalorder %v6460_v0, 4294967295 }
0x2962   :  { %4647 = vtanh.f32 %v3644_v11  ;;  %v4341_v18 = vmul.f32 -1.442695, %v3644_v11  ;;  %v6419_v33 = vadd.f32 %v6395_v34, %v3764_v2  ;;  %v3871_v11 = vsel %vm3779_vm8, %v6460_v0, 0 }
0x2964   :  { %4649 = vpow2.f32 %v4341_v18  ;;  %v3800_v35 = vsel %vm3784_vm2, %v6419_v33, -inf }
0x2968   :  { %v4648_v21 = vpop.eup %4647 }
0x2969   :  { %3671 = vrot.lane.b32.xlu0 %v4648_v21, %s4738_s25  ;;  %v6469_v21 = vld [vmem:[%s6726_s5 + $0x20] sm:$0xff] }
0x296a   :  { %v4650_v25 = vpop.eup %4649  ;;  %vm3781_vm9 = vcmp.ne.s32.totalorder %v6469_v21, 4294967295 }
0x296b   :  { %v3648_v26 = vadd.f32 1.0, %v4650_v25  ;;  %v3873_v25 = vsel %vm3781_vm9, %v6469_v21, 0 }
0x296d   :  { %4651 = vrcp.f32 %v3648_v26  ;;  %v3660_v20 = vand.u32 2147483648, %v3648_v26  ;;  %vm3654_vm12 = vweird.f32 %v3648_v26  ;;  %v3658_v22 = vand.u32 2147483647, %v3648_v26 }
0x296f   :  { %v3661_v28 = vor.u32 1.1754944e-38, %v3660_v20  ;;  %vm3659_vm7 = vcmp.eq.f32.partialorder %v3658_v22, 8.507059e+37 }
0x2973   :  { %v4652_v29 = vpop.eup %4651 }
0x2974   :  { %v3650_v19 = vmul.f32 %v4652_v29, %v3648_v26  ;;  %vm3655_vm1 = vweird.f32 %v4652_v29  ;;  %v6479_v26 = vld [vmem:[%s6726_s5] sm:$0xff] }
0x2975   :  { %vm3656_vm6 = vmor %vm3654_vm12, %vm3655_vm1  ;;  %vm3777_vm10 = vcmp.ne.s32.totalorder %v6479_v26, 4294967295 }
0x2976   :  { %v3651_v9 = vsub.f32 1.0, %v3650_v19  ;;  %v4342_v19 = vld [vmem:[%s6766_s10 + $0x30] sm:$0xff] }
0x2977   :  { %vm3688_vm11 = vcmp.gt.f32.partialorder %v4342_v19, 0.5 }
0x2978   :  { %v3652_v46 = vmul.f32 %v4652_v29, %v3651_v9 }
0x297a   :  { %v3653_v15 = vadd.f32 %v4652_v29, %v3652_v46 }
0x297c   :  { %v3657_v42 = vsel %vm3656_vm6, %v4652_v29, %v3653_v15  ;;  %v3869_v29 = vsel %vm3777_vm10, %v6479_v26, 0  ;;  %v6489_v15 = vcvt.s32.f32 %v5098_v45 }
0x297d   :  { %v3662_v41 = vsel %vm3659_vm7, %v3661_v28, %v3657_v42 }
0x297e   :  { %v3669_v23 = vmul.f32 %v3667_v32, %v3662_v41  ;;  %v6517_v32 = vld [vmem:[%s6726_s5 + $0x8] sm:$0xff] }
0x29db   :  { %v3672_v3 = vpop.permute.xlu0 %3671 }
0x29dc   :  { %v3674_v55 = vmul.f32 %v3672_v3, %v3662_v41 }
0x29de   :  { %3676 = vrot.lane.b32.xlu2 %v3674_v55, %s4742_s13 }
0x2a07   :  { %3786 = vmax.xlane.f32.xlu2 %v3785_v48 }
0x2a0f   :  { %3795 = vmax.xlane.f32.xlu2 %v3794_v1 }
0x2a17   :  { %3798 = vmax.xlane.f32.xlu2 %v3797_v50 }
0x2a38   :  { %v3677_v10 = vpop.permute.xlu2 %3676 }
0x2a39   :  { %v3679_v37 = vadd.f32 %v3677_v10, %v3669_v23 }
0x2a3b   :  { %4653 = vtanh.f32 %v3679_v37  ;;  %v6535_v37 = vld [vmem:[%s6726_s5 + $0x28] sm:$0xff] }
0x2a3c   :  { %vm3782_vm15 = vcmp.ne.s32.totalorder %v6535_v37, 4294967295 }
0x2a41   :  { %v4654_v24 = vpop.eup %4653 }
0x2a42   :  { %3682 = vrot.lane.b32.xlu0 %v4654_v24, %s4738_s25  ;;  %v3874_v24 = vsel %vm3782_vm15, %v6535_v37, 0 }
0x2a6c   :  { %3789 = vmax.xlane.f32.xlu0 %v3788_v38 }
0x2a74   :  { %3801 = vmax.xlane.f32.xlu0 %v3800_v35 }
0x2a7a   :  { %v3787_v60 = vpop.xlane.xlu2 %3786 }
0x2a7b   :  { %v6424_v54 = vsub.f32 %v6398_v30, %v3787_v60  ;;  %vm3990_vm13 = vcmp.eq.f32.partialorder %v6398_v30, %v3787_v60 }
0x2a7c   :  { %v3998_v20 = vsel %vm3990_vm13, %v6489_v15, 12.0 }
0x2a7d   :  { %v3813_v40 = vmul.f32 1.442695, %v6424_v54  ;;  %v4005_v22 = vsel %vm3784_vm2, %v3998_v20, inf }
0x2a7f   :  { %4655 = vpow2.f32 %v3813_v40 }
0x2a82   :  { %v6427_v36 = vpop.xlane.xlu2 %3795 }
0x2a83   :  { %v6431_v14 = vsub.f32 %v6403_v61, %v6427_v36  ;;  %vm3993_vm1 = vcmp.eq.f32.partialorder %v6403_v61, %v6427_v36 }
0x2a85   :  { %v4656_v16 = vpop.eup %4655  ;;  %v3819_v49 = vmul.f32 1.442695, %v6431_v14 }
0x2a86   :  { %v3827_v4 = vsel %vm3784_vm2, %v4656_v16, 0.0 }
0x2a87   :  { %4657 = vpow2.f32 %v3819_v49  ;;  %3828 = vadd.xlane.f32.xlu2 %v3827_v4 }
0x2a8a   :  { %v6440_v52 = vpop.xlane.xlu2 %3798 }
0x2a8b   :  { %v6452_v31 = vsub.f32 %v6408_v27, %v6440_v52 }
0x2a8d   :  { %v4658_v7 = vpop.eup %4657  ;;  %v3821_v57 = vmul.f32 1.442695, %v6452_v31 }
0x2a8e   :  { %v3836_v47 = vsel %vm3784_vm2, %v4658_v7, 0.0 }
0x2a8f   :  { %3837 = vadd.xlane.f32.xlu2 %v3836_v47 }
0x2aa7   :  { %3883 = vperm.xlu2 %4384, %v3871_v11  }
0x2aaf   :  { %3889 = vperm.xlu2 %4384, %v3873_v25  }
0x2ab4   :  { %v3683_v53 = vpop.permute.xlu0 %3682 }
0x2ab5   :  { %v3685_v43 = vmul.f32 %v3683_v53, %v3662_v41 }
0x2ab7   :  { %3690 = vrot.lane.b32.xlu1 %v3685_v43, %s4742_s13 }
0x2adf   :  { %v6442_v51 = vpop.xlane.xlu0 %3789 }
0x2ae0   :  { %v6446_v63 = vsub.f32 %v6414_v59, %v6442_v51  ;;  %vm3991_vm3 = vcmp.eq.f32.partialorder %v6414_v59, %v6442_v51 }
0x2ae1   :  { %3792 = vmax.xlane.f32.xlu1 %v3791_v5  ;;  %v3999_v38 = vsel %vm3991_vm3, %v6489_v15, 12.0 }
0x2ae2   :  { %v3815_v13 = vmul.f32 1.442695, %v6446_v63  ;;  %v4008_v2 = vsel %vm3784_vm2, %v3999_v38, inf }
0x2ae4   :  { %4659 = vpow2.f32 %v3815_v13 }
0x2ae5   :  { %4661 = vpow2.f32 %v3821_v57 }
0x2ae7   :  { %v6496_v28 = vpop.xlane.xlu0 %3801 }
0x2ae8   :  { %v6503_v55 = vsub.f32 %v6419_v33, %v6496_v28  ;;  %vm3995_vm7 = vcmp.eq.f32.partialorder %v6419_v33, %v6496_v28 }
0x2ae9   :  { %v4003_v38 = vsel %vm3995_vm7, %v6489_v15, 12.0  ;;  %vm3967_vm7 = vcmask 7168  }
0x2aea   :  { %v4660_v12 = vpop.eup %4659  ;;  %v3823_v62 = vmul.f32 1.442695, %v6503_v55 }
0x2aeb   :  { %v3830_v6 = vsel %vm3784_vm2, %v4660_v12, 0.0  ;;  %v4662_v8 = vpop.eup %4661 }
0x2aec   :  { %3831 = vadd.xlane.f32.xlu0 %v3830_v6  ;;  %v3839_v18 = vsel %vm3784_vm2, %v4662_v8, 0.0 }
0x2af4   :  { %3840 = vadd.xlane.f32.xlu0 %v3839_v18 }
0x2afa   :  { %v6552_v49 = vpop.xlane.xlu2 %3828 }
0x2b02   :  { %v3838_v53 = vpop.xlane.xlu2 %3837 }
0x2b08   :  { %3877 = vperm.xlu0 %4382, %v3869_v29  }
0x2b29   :  { %v3691_v9 = vpop.permute.xlu1 %3690 }
0x2b2a   :  { %v3693_v46 = vsel %vm3688_vm11, %v3691_v9, 0.0 }
0x2b2b   :  { %3695 = vst.msk [vmem:[#allocation6 + $0x30] sm:$0xff] %vm111_vm0, %v3693_v46  ;;  %v6564_v46 = vpop.permute.xlu2 %3883 }
0x2b32   :  { %4006 = vmin.xlane.f32.xlu0 %v4005_v22  ;;  %v3702_v42 = vld [vmem:[#allocation6 + $0x30] sm:$0xff] }
0x2b33   :  { %4349 = vmatmul.msk.f32.gmra.mxu1 %vm111_vm0, %v3702_v42  ;;  %vm3778_vm0 = vcmp.ne.s32.totalorder %v6517_v32, 4294967295  ;;  %v3890_v61 = vpop.permute.xlu2 %3889 }
0x2b34   :  { %v3870_v23 = vsel %vm3778_vm0, %v6517_v32, 0  ;;  %vm3901_vm11 = vcmp.eq.s32.totalorder %v5098_v45, %v3890_v61 }
0x2b54   :  { %v3793_v3 = vpop.xlane.xlu1 %3792 }
0x2b55   :  { %v6499_v41 = vsub.f32 %v6438_v39, %v3793_v3  ;;  %vm3992_vm4 = vcmp.eq.f32.partialorder %v6438_v39, %v3793_v3 }
0x2b56   :  { %v4000_v35 = vsel %vm3992_vm4, %v6489_v15, 12.0  ;;  %vm3899_vm4 = vcmp.eq.s32.totalorder %v5098_v45, %v6564_v46 }
0x2b57   :  { %v3817_v58 = vmul.f32 1.442695, %v6499_v41  ;;  %v4011_v60 = vsel %vm3784_vm2, %v4000_v35, inf  ;;  %v4020_v35 = vsel %vm3784_vm2, %v4003_v38, inf }
0x2b59   :  { %4663 = vpow2.f32 %v3817_v58 }
0x2b5a   :  { %4665 = vpow2.f32 %v3823_v62 }
0x2b5f   :  { %v4664_v56 = vpop.eup %4663  ;;  %v3832_v4 = vpop.xlane.xlu0 %3831 }
0x2b60   :  { %v3833_v30 = vsel %vm3784_vm2, %v4664_v56, 0.0  ;;  %v4666_v48 = vpop.eup %4665  ;;  %4667 = vlog2.f32 %v3832_v4  ;;  %v4001_v56 = vsel %vm3993_vm1, %v6489_v15, 12.0 }
0x2b61   :  { %3834 = vadd.xlane.f32.xlu1 %v3833_v30  ;;  %v3842_v44 = vsel %vm3784_vm2, %v4666_v48, 0.0 }
0x2b66   :  { %v4668_v43 = vpop.eup %4667 }
0x2b67   :  { %v3851_v51 = vmul.f32 0.6931472, %v4668_v43  ;;  %v3841_v5 = vpop.xlane.xlu0 %3840 }
0x2b69   :  { %3843 = vadd.xlane.f32.xlu1 %v3842_v44  ;;  %v3863_v12 = vsub.f32 %v6446_v63, %v3851_v51 }
0x2b6b   :  { %v3905_v8 = vsub.f32 -0.105360515, %v3863_v12  ;;  %v3919_v11 = vsub.f32 -4.7004805, %v3863_v12 }
0x2b6d   :  { %v3912_v29 = vmul.f32 0.9, %v3905_v8  ;;  %v3926_v19 = vmul.f32 0.009090909, %v3919_v11 }
0x2bb0   :  { %v3767_v1 = vpop.f32.mrf.mxu1 }
0x2bb1   :  { %v6510_v17 = vadd.f32 %v6395_v34, %v3767_v1  ;;  %v6526_v34 = vld [vmem:[%s6726_s5 + $0x18] sm:$0xff] }
0x2bb2   :  { %vm3780_vm14 = vcmp.ne.s32.totalorder %v6526_v34, 4294967295 }
0x2bb3   :  { %v3803_v50 = vsel %vm3784_vm2, %v6510_v17, -inf  ;;  %v3872_v10 = vsel %vm3780_vm14, %v6526_v34, 0 }
0x2bb4   :  { %3804 = vmax.xlane.f32.xlu1 %v3803_v50 }
0x2bcd   :  { %3880 = vperm.xlu1 %4383, %v3870_v23   ;;  %v4014_v23 = vsel %vm3784_vm2, %v4001_v56, inf }
0x2bd4   :  { %v6548_v40 = vpop.xlane.xlu1 %3834 }
0x2bd5   :  { %3886 = vperm.xlu1 %4383, %v3872_v10  }
0x2bdc   :  { %v6550_v16 = vpop.xlane.xlu1 %3843 }
0x2bdd   :  { %3892 = vperm.xlu1 %4383, %v3874_v24  }
0x2c07   :  { %4009 = vmin.xlane.f32.xlu1 %v4008_v2 }
0x2c0f   :  { %4012 = vmin.xlane.f32.xlu1 %v4011_v60 }
0x2c27   :  { %v6554_v59 = vpop.xlane.xlu1 %3804 }
0x2c28   :  { %v6558_v7 = vsub.f32 %v6510_v17, %v6554_v59  ;;  %vm3996_vm13 = vcmp.eq.f32.partialorder %v6510_v17, %v6554_v59 }
0x2c29   :  { %v4004_v4 = vsel %vm3996_vm13, %v6489_v15, 12.0 }
0x2c2a   :  { %v3825_v47 = vmul.f32 1.442695, %v6558_v7  ;;  %v4023_v33 = vsel %vm3784_vm2, %v4004_v4, inf }
0x2c2c   :  { %4669 = vpow2.f32 %v3825_v47 }
0x2c2d   :  { %4671 = vlog2.f32 %v3838_v53 }
0x2c2e   :  { %4673 = vlog2.f32 %v3841_v5 }
0x2c2f   :  { %4675 = vlog2.f32 %v6552_v49 }
0x2c30   :  { %4677 = vlog2.f32 %v6548_v40 }
0x2c31   :  { %4679 = vlog2.f32 %v6550_v16 }
0x2c32   :  { %v4670_v39 = vpop.eup %4669 }
0x2c33   :  { %v3845_v13 = vsel %vm3784_vm2, %v4670_v39, 0.0  ;;  %v4672_v57 = vpop.eup %4671 }
0x2c34   :  { %3846 = vadd.xlane.f32.xlu2 %v3845_v13  ;;  %v3855_v6 = vmul.f32 0.6931472, %v4672_v57  ;;  %v4674_v18 = vpop.eup %4673  ;;  %v3878_v13 = vpop.permute.xlu0 %3877 }
0x2c35   :  { %v3857_v9 = vmul.f32 0.6931472, %v4674_v18  ;;  %v4676_v28 = vpop.eup %4675  ;;  %vm3897_vm3 = vcmp.eq.s32.totalorder %v5098_v45, %v3878_v13 }
0x2c36   :  { %v3865_v25 = vsub.f32 %v6431_v14, %v3855_v6  ;;  %v6574_v14 = vld [vmem:[%s6726_s5 + $0x30] sm:$0xff]  ;;  %v3849_v47 = vmul.f32 0.6931472, %v4676_v28  ;;  %v4678_v53 = vpop.eup %4677  ;;  %s4743_s5 = smov [#allocation9]  }
0x2c37   :  { %v3866_v58 = vsub.f32 %v6452_v31, %v3857_v9  ;;  %vm3783_vm12 = vcmp.ne.s32.totalorder %v6574_v14, 4294967295  ;;  %v3853_v39 = vmul.f32 0.6931472, %v4678_v53  ;;  %s4146_s4 = sshll.u32 %s4743_s5, 4  ;;  %s4147_s4 = int_to_ptr.vmem [resolvable:$true] %s4146_s4 }
0x2c38   :  { %v3907_v42 = vsub.f32 -0.105360515, %v3865_v25  ;;  %v3921_v63 = vsub.f32 -4.7004805, %v3865_v25  ;;  %v3875_v31 = vsel %vm3783_vm12, %v6574_v14, 0  ;;  %v3862_v43 = vsub.f32 %v6424_v54, %v3849_v47  ;;  %v4680_v54 = vpop.eup %4679 }
0x2c39   :  { %v3908_v48 = vsub.f32 -0.105360515, %v3866_v58  ;;  %v3922_v44 = vsub.f32 -4.7004805, %v3866_v58  ;;  %v3864_v17 = vsub.f32 %v6499_v41, %v3853_v39  ;;  %v3859_v41 = vmul.f32 0.6931472, %v4680_v54 }
0x2c3a   :  { %v3914_v62 = vmul.f32 0.9, %v3907_v42  ;;  %v3928_v30 = vmul.f32 0.009090909, %v3921_v63  ;;  %v3904_v51 = vsub.f32 -0.105360515, %v3862_v43  ;;  %v4026_v54 = vcvt.s32.f32 %v6479_v26 }
0x2c3b   :  { %v3915_v10 = vmul.f32 0.9, %v3908_v48  ;;  %v3929_v24 = vmul.f32 0.009090909, %v3922_v44  ;;  %v3918_v5 = vsub.f32 -4.7004805, %v3862_v43 }
0x2c3c   :  { %v3911_v59 = vmul.f32 0.9, %v3904_v51  ;;  %v3906_v57 = vsub.f32 -0.105360515, %v3864_v17  ;;  %v3920_v12 = vsub.f32 -4.7004805, %v3864_v17  ;;  %v4007_v39 = vpop.xlane.xlu0 %4006 }
0x2c3d   :  { %v3936_v2 = vsel %vm3901_vm11, %v3915_v10, %v3929_v24  ;;  %v3925_v49 = vmul.f32 0.009090909, %v3918_v5  ;;  %v6767_v44 = vmov 0.0   ;;  %vm4033_vm11 = vcmp.eq.f32.partialorder %v4007_v39, %v4026_v54 }
0x2c3e   :  { %v3951_v60 = vsel %vm3784_vm2, %v3936_v2, 0.0  ;;  %v3913_v8 = vmul.f32 0.9, %v3906_v57  ;;  %v3927_v11 = vmul.f32 0.009090909, %v3920_v12  ;;  %v4358_v61 = vsel %vm3778_vm0, 1.0, %v6767_v44 }
0x2c3f   :  { %v3881_v20 = vpop.permute.xlu1 %3880  ;;  %v3932_v6 = vsel %vm3897_vm3, %v3911_v59, %v3925_v49  ;;  %v4363_v53 = vsel %vm3783_vm12, 1.0, %v6767_v44 }
0x2c40   :  { %vm3898_vm5 = vcmp.eq.s32.totalorder %v5098_v45, %v3881_v20  ;;  %v3939_v40 = vsel %vm3784_vm2, %v3932_v6, 0.0  ;;  %v3934_v18 = vsel %vm3899_vm4, %v3913_v8, %v3927_v11  ;;  %v4105_v51 = vsel %vm3967_vm7, %v4363_v53, 0.0  ;;  %vm4040_vm4 = vmand %vm4033_vm11, %vm3777_vm10 }
0x2c41   :  { %v3933_v22 = vsel %vm3898_vm5, %v3912_v29, %v3926_v19  ;;  %v3945_v25 = vsel %vm3784_vm2, %v3934_v18, 0.0  ;;  %vm3994_vm5 = vcmp.eq.f32.partialorder %v6408_v27, %v6440_v52  ;;  %v3867_v29 = vsub.f32 %v6503_v55, %v3859_v41 }
0x2c42   :  { %v3942_v3 = vsel %vm3784_vm2, %v3933_v22, 0.0  ;;  %v4002_v16 = vsel %vm3994_vm5, %v6489_v15, 12.0  ;;  %v4027_v11 = vcvt.s32.f32 %v6517_v32 }
0x2c43   :  { %3943 = vadd.xlane.f32.xlu0 %v3942_v3  ;;  %v3909_v19 = vsub.f32 -0.105360515, %v3867_v29  ;;  %v3923_v9 = vsub.f32 -4.7004805, %v3867_v29  ;;  %v4017_v22 = vsel %vm3784_vm2, %v4002_v16, inf  ;;  %v4028_v29 = vcvt.s32.f32 %v6460_v0 }
0x2c45   :  { %v3916_v46 = vmul.f32 0.9, %v3909_v19  ;;  %v3930_v42 = vmul.f32 0.009090909, %v3923_v9  ;;  %v4029_v19 = vcvt.s32.f32 %v6526_v34 }
0x2c47   :  { %v3887_v1 = vpop.permute.xlu1 %3886 }
0x2c48   :  { %vm3900_vm6 = vcmp.eq.s32.totalorder %v5098_v45, %v3887_v1  ;;  %v4357_v1 = vsel %vm3777_vm10, 1.0, %v6767_v44 }
0x2c49   :  { %v3935_v36 = vsel %vm3900_vm6, %v3914_v62, %v3928_v30 }
0x2c4a   :  { %v3948_v50 = vsel %vm3784_vm2, %v3935_v36, 0.0 }
0x2c4b   :  { %3949 = vadd.xlane.f32.xlu1 %v3948_v50  ;;  %4015 = vmin.xlane.f32.xlu0 %v4014_v23  ;;  %v4095_v50 = vsel %vm3967_vm7, %v4358_v61, 0.0  ;;  %v4359_v23 = vsel %vm3779_vm8, 1.0, %v6767_v44 }
0x2c4c   :  { %3895 = vperm.xlu2 %4384, %v3875_v31   ;;  %v4097_v24 = vsel %vm3967_vm7, %v4359_v23, 0.0 }
0x2c4f   :  { %v3893_v20 = vpop.permute.xlu1 %3892 }
0x2c50   :  { %vm3902_vm1 = vcmp.eq.s32.totalorder %v5098_v45, %v3893_v20 }
0x2c51   :  { %v3937_v3 = vsel %vm3902_vm1, %v3916_v46, %v3930_v42  ;;  %v4031_v46 = vcvt.s32.f32 %v6535_v37 }
0x2c52   :  { %v3954_v63 = vsel %vm3784_vm2, %v3937_v3, 0.0  ;;  %v4032_v3 = vcvt.s32.f32 %v6574_v14 }
0x2c53   :  { %4021 = vmin.xlane.f32.xlu1 %v4020_v35  ;;  %3952 = vadd.xlane.f32.xlu0 %v3951_v60  ;;  %v4361_v35 = vsel %vm3781_vm9, 1.0, %v6767_v44 }
0x2c54   :  { %v4101_v4 = vsel %vm3967_vm7, %v4361_v35, 0.0 }
0x2c5b   :  { %4024 = vmin.xlane.f32.xlu0 %v4023_v33  ;;  %v4362_v33 = vsel %vm3782_vm15, 1.0, %v6767_v44 }
0x2c5c   :  { %v4103_v47 = vsel %vm3967_vm7, %v4362_v33, 0.0 }
0x2c75   :  { %3940 = vadd.xlane.f32.xlu2 %v3939_v40 }
0x2c7a   :  { %v4010_v59 = vpop.xlane.xlu1 %4009 }
0x2c7d   :  { %3946 = vadd.xlane.f32.xlu2 %v3945_v25 }
0x2c82   :  { %v4013_v40 = vpop.xlane.xlu1 %4012 }
0x2c83   :  { %vm4035_vm13 = vcmp.eq.f32.partialorder %v4013_v40, %v4028_v29 }
0x2c84   :  { %vm4042_vm1 = vmand %vm4035_vm13, %vm3779_vm8 }
0x2c85   :  { %4018 = vmin.xlane.f32.xlu2 %v4017_v22 }
0x2c8d   :  { %3955 = vadd.xlane.f32.xlu2 %v3954_v63  ;;  %v4350_v63 = vsel %vm4040_vm4, 1.0, %v6767_v44 }
0x2ca7   :  { %v3847_v58 = vpop.xlane.xlu2 %3846 }
0x2ca8   :  { %4681 = vlog2.f32 %v3847_v58  ;;  %v4352_v58 = vsel %vm4042_vm1, 1.0, %v6767_v44 }
0x2cae   :  { %v4682_v27 = vpop.eup %4681 }
0x2caf   :  { %v3861_v52 = vmul.f32 0.6931472, %v4682_v27  ;;  %v3896_v56 = vpop.permute.xlu2 %3895 }
0x2cb0   :  { %vm3903_vm6 = vcmp.eq.s32.totalorder %v5098_v45, %v3896_v56  ;;  %v4360_v45 = vsel %vm3780_vm14, 1.0, %v6767_v44  ;;  %v4061_v56 = vsel %vm3967_vm7, %v4350_v63, 0.0 }
0x2cb1   :  { %v3868_v15 = vsub.f32 %v6558_v7, %v3861_v52  ;;  %v4094_v7 = vsel %vm3967_vm7, %v4357_v1, 0.0  ;;  %v4099_v2 = vsel %vm3967_vm7, %v4360_v45, 0.0 }
0x2cb2   :  { %v4096_v10 = vadd.f32 %v4095_v50, %v4094_v7 }
0x2cb3   :  { %v3910_v55 = vsub.f32 -0.105360515, %v3868_v15  ;;  %v3924_v62 = vsub.f32 -4.7004805, %v3868_v15 }
0x2cb4   :  { %v4098_v38 = vadd.f32 %v4097_v24, %v4096_v10 }
0x2cb5   :  { %v3917_v30 = vmul.f32 0.9, %v3910_v55  ;;  %v3931_v48 = vmul.f32 0.009090909, %v3924_v62  ;;  %v4030_v55 = vcvt.s32.f32 %v6469_v21 }
0x2cb6   :  { %v4100_v60 = vadd.f32 %v4099_v2, %v4098_v38  ;;  %v6642_v17 = vpop.xlane.xlu0 %3943 }
0x2cb7   :  { %v3938_v36 = vsel %vm3903_vm6, %v3917_v30, %v3931_v48  ;;  %v4064_v30 = vsel %vm3967_vm7, %v4352_v58, 0.0  ;;  %v3961_v40 = vsel %vm3778_vm0, %v6642_v17, 0.0 }
0x2cb8   :  { %v3957_v31 = vsel %vm3784_vm2, %v3938_v36, 0.0  ;;  %v4102_v28 = vadd.f32 %v4101_v4, %v4100_v60  ;;  %vm4034_vm2 = vcmp.eq.f32.partialorder %v4010_v59, %v4027_v11  ;;  %v3969_v54 = vsel %vm3967_vm7, %v3961_v40, 0.0 }
0x2cb9   :  { %3958 = vadd.xlane.f32.xlu1 %v3957_v31  ;;  %vm4041_vm3 = vmand %vm4034_vm2, %vm3778_vm0 }
0x2cba   :  { %v4104_v43 = vadd.f32 %v4103_v47, %v4102_v28  ;;  %v4351_v22 = vsel %vm4041_vm3, 1.0, %v6767_v44 }
0x2cbb   :  { %v4062_v52 = vsel %vm3967_vm7, %v4351_v22, 0.0 }
0x2cbc   :  { %v4106_v5 = vadd.f32 %v4105_v51, %v4104_v43  ;;  %v4063_v48 = vadd.f32 %v4062_v52, %v4061_v56 }
0x2cbe   :  { %v4107_v13 = vrot.slane %v4106_v5, 4  ;;  %v4016_v12 = vpop.xlane.xlu0 %4015  ;;  %v6646_v41 = vpop.xlane.xlu1 %3949  ;;  %v4065_v36 = vadd.f32 %v4064_v30, %v4063_v48 }
0x2cbf   :  { %vm4036_vm5 = vcmp.eq.f32.partialorder %v4016_v12, %v4029_v19  ;;  %v3963_v26 = vsel %vm3780_vm14, %v6646_v41, 0.0 }
0x2cc0   :  { %v4108_v49 = vadd.f32 %v4107_v13, %v4106_v5  ;;  %vm4043_vm6 = vmand %vm4036_vm5, %vm3780_vm14  ;;  %v3973_v32 = vsel %vm3967_vm7, %v3963_v26, 0.0 }
0x2cc1   :  { %v4353_v15 = vsel %vm4043_vm6, 1.0, %v6767_v44 }
0x2cc2   :  { %v4109_v57 = vrot.slane %v4108_v49, 2  ;;  %v4066_v1 = vsel %vm3967_vm7, %v4353_v15, 0.0 }
0x2cc3   :  { %v4067_v7 = vadd.f32 %v4066_v1, %v4065_v36 }
0x2cc4   :  { %v4110_v6 = vadd.f32 %v4109_v57, %v4108_v49 }
0x2cc6   :  { %v4111_v8 = vrot.slane %v4110_v6, 1  ;;  %v6651_v16 = vpop.xlane.xlu0 %3952  ;;  %v4022_v42 = vpop.xlane.xlu1 %4021 }
0x2cc7   :  { %vm4038_vm2 = vcmp.eq.f32.partialorder %v4022_v42, %v4031_v46  ;;  %v3964_v0 = vsel %vm3781_vm9, %v6651_v16, 0.0 }
0x2cc8   :  { %v4112_v18 = vadd.f32 %v4111_v8, %v4110_v6  ;;  %vm4045_vm13 = vmand %vm4038_vm2, %vm3782_vm15 }
0x2cc9   :  { %v4355_v50 = vsel %vm4045_vm13, 1.0, %v6767_v44  ;;  %vm3988_vm13 = vcmask 0  }
0x2cca   :  { %v4113_v9 = vmax.f32 %v4112_v18, 1.0  ;;  %v4070_v2 = vsel %vm3967_vm7, %v4355_v50, 0.0 }
0x2ccc   :  { %4683 = vrcp.f32 %v4113_v9  ;;  %vm4119_vm1 = vweird.f32 %v4113_v9  ;;  %v4125_v47 = vand.u32 2147483648, %v4113_v9  ;;  %v4123_v39 = vand.u32 2147483647, %v4113_v9 }
0x2cce   :  { %v4025_v27 = vpop.xlane.xlu0 %4024  ;;  %v4126_v5 = vor.u32 1.1754944e-38, %v4125_v47 }
0x2ccf   :  { %vm4039_vm11 = vcmp.eq.f32.partialorder %v4025_v27, %v4032_v3 }
0x2cd0   :  { %vm4046_vm3 = vmand %vm4039_vm11, %vm3783_vm12  ;;  %vm4124_vm11 = vcmp.eq.f32.partialorder %v4123_v39, 8.507059e+37 }
0x2cd1   :  { %v4356_v24 = vsel %vm4046_vm3, 1.0, %v6767_v44 }
0x2cd2   :  { %v4684_v62 = vpop.eup %4683  ;;  %v4072_v60 = vsel %vm3967_vm7, %v4356_v24, 0.0 }
0x2cd3   :  { %v4115_v31 = vmul.f32 %v4684_v62, %v4113_v9  ;;  %vm4120_vm6 = vweird.f32 %v4684_v62 }
0x2cd4   :  { %vm4121_vm2 = vmor %vm4119_vm1, %vm4120_vm6 }
0x2cd5   :  { %v4116_v38 = vsub.f32 1.0, %v4115_v31 }
0x2cd7   :  { %v4117_v33 = vmul.f32 %v4684_v62, %v4116_v38 }
0x2cd9   :  { %v4118_v43 = vadd.f32 %v4684_v62, %v4117_v33 }
0x2cdb   :  { %v4122_v13 = vsel %vm4121_vm2, %v4684_v62, %v4118_v43 }
0x2cdc   :  { %v4127_v49 = vsel %vm4124_vm11, %v4126_v5, %v4122_v13 }
0x2ce8   :  { %v6648_v25 = vpop.xlane.xlu2 %3940 }
0x2ce9   :  { %v3960_v6 = vsel %vm3777_vm10, %v6648_v25, 0.0 }
0x2cea   :  { %v3968_v11 = vsel %vm3967_vm7, %v3960_v6, 0.0 }
0x2ceb   :  { %v3970_v29 = vadd.f32 %v3969_v54, %v3968_v11 }
0x2cf0   :  { %v6660_v20 = vpop.xlane.xlu2 %3946 }
0x2cf1   :  { %v3962_v8 = vsel %vm3779_vm8, %v6660_v20, 0.0  ;;  %v3975_v20 = vsel %vm3967_vm7, %v3964_v0, 0.0 }
0x2cf2   :  { %v3971_v18 = vsel %vm3967_vm7, %v3962_v8, 0.0 }
0x2cf3   :  { %v3972_v25 = vadd.f32 %v3971_v18, %v3970_v29 }
0x2cf5   :  { %v3974_v17 = vadd.f32 %v3973_v32, %v3972_v25 }
0x2cf7   :  { %v3976_v46 = vadd.f32 %v3975_v20, %v3974_v17 }
0x2cf8   :  { %v4019_v61 = vpop.xlane.xlu2 %4018 }
0x2cf9   :  { %vm4037_vm4 = vcmp.eq.f32.partialorder %v4019_v61, %v4030_v55 }
0x2cfa   :  { %vm4044_vm5 = vmand %vm4037_vm4, %vm3781_vm9 }
0x2cfb   :  { %v4354_v23 = vsel %vm4044_vm5, 1.0, %v6767_v44 }
0x2cfc   :  { %v4068_v10 = vsel %vm3967_vm7, %v4354_v23, 0.0 }
0x2cfd   :  { %v4069_v45 = vadd.f32 %v4068_v10, %v4067_v7 }
0x2cff   :  { %v4071_v35 = vadd.f32 %v4070_v2, %v4069_v45 }
0x2d00   :  { %v3956_v19 = vpop.xlane.xlu2 %3955 }
0x2d01   :  { %v4073_v4 = vadd.f32 %v4072_v60, %v4071_v35  ;;  %v3965_v9 = vsel %vm3782_vm15, %v3956_v19, 0.0 }
0x2d02   :  { %v3977_v22 = vsel %vm3967_vm7, %v3965_v9, 0.0 }
0x2d03   :  { %v4074_v28 = vrot.slane %v4073_v4, 4  ;;  %v3978_v34 = vadd.f32 %v3977_v22, %v3976_v46 }
0x2d05   :  { %v4075_v53 = vadd.f32 %v4074_v28, %v4073_v4 }
0x2d07   :  { %v4076_v51 = vrot.slane %v4075_v53, 2 }
0x2d09   :  { %v4077_v44 = vadd.f32 %v4076_v51, %v4075_v53 }
0x2d0b   :  { %v4078_v59 = vrot.slane %v4077_v44, 1 }
0x2d0d   :  { %v4079_v57 = vadd.f32 %v4078_v59, %v4077_v44 }
0x2d0f   :  { %v4128_v12 = vmul.f32 %v4127_v49, %v4079_v57 }
0x2d11   :  { %4129 = vst.msk [vmem:[#allocation9] sm:$0x1] %vm3988_vm13, %v4128_v12 }
0x2d12   :  { %4151 = dma.vmem_to_hbm [thread:$0]  %s4147_s4, 16, %s4149_s9, [#allocation10]  }
0x2d2c   :  { %v3959_v42 = vpop.xlane.xlu1 %3958 }
0x2d2d   :  { %v3966_v41 = vsel %vm3783_vm12, %v3959_v42, 0.0 }
0x2d2e   :  { %v3979_v3 = vsel %vm3967_vm7, %v3966_v41, 0.0 }
0x2d2f   :  { %v3980_v63 = vadd.f32 %v3979_v3, %v3978_v34 }
0x2d31   :  { %v3981_v58 = vrot.slane %v3980_v63, 4 }
0x2d33   :  { %v3982_v21 = vadd.f32 %v3981_v58, %v3980_v63 }
0x2d35   :  { %v3983_v16 = vrot.slane %v3982_v21, 2 }
0x2d37   :  { %v3984_v27 = vadd.f32 %v3983_v16, %v3982_v21 }
0x2d39   :  { %v3985_v52 = vrot.slane %v3984_v27, 1 }
0x2d3b   :  { %v3986_v37 = vadd.f32 %v3985_v52, %v3984_v27 }
0x2d3d   :  { %v3987_v15 = vmul.f32 0.5, %v3986_v37 }
0x2d3f   :  { %3989 = vst.msk [vmem:[#allocation7] sm:$0x1] %vm3988_vm13, %v3987_v15 }
0x2d40   :  { %4140 = dma.vmem_to_hbm [thread:$0]  %s4136_s12, 16, %s4138_s8, [#allocation8]  }
0x2d41   :  { %4733 = dma.done.wait [#allocation8], 16  }
0x2d42   :  { %4734 = vsyncadd [#allocation8], 4294967280 }
0x2d43   :  { %4735 = dma.done.wait [#allocation10], 16  }
0x2d44   :  { %4736 = vsyncadd [#allocation10], 4294967280 }
0x2d45   :  { %4160 = vsyncpa [#allocation8], 1 }
0x2d46   :  { %4161 = vsyncpa [#allocation10], 1 }

</bundles_post_ra>
